<compile_context>
chip_gen: v7x
topology: tpu7x:2x2x1
jax: 0.10.0
libtpu: 0.0.40
codegen_flags: <defaults>
</compile_context>

<pallas_src>
import functools

import jax
import jax.numpy as jnp
import numpy as np
from jax.experimental import pallas as pl
from jax.experimental.pallas import tpu as pltpu


def _ru(x, m):
    return ((x + m - 1) // m) * m


# ----------------------------------------------------------------------------
# Kernel 1: fused conv stack (Conv2d 3x3 pad=1 + ReLU, conv_layers deep),
# one node (image) per grid step.
# ----------------------------------------------------------------------------
def _conv_stack_kernel(x_ref, mask_ref, *refs, n_layers, hpwp, wp, padr, so):
    # x_ref   : (S, Cin)      one node, flattened padded NHWC rows + zero halos
    # mask_ref: (So, Ccv)     1.0 on interior pixels, 0.0 on padded-border rows
    # refs    : w_0, b_0, ..., w_{L-1}, b_{L-1}, out_ref[, scratch]
    #           w_l: (9*Cin_l, Cout) packed taps (k=ky*3+kx), b_l: (1, Cout) fp32
    out_ref = refs[2 * n_layers]
    scratch = refs[2 * n_layers + 1] if n_layers > 1 else None

    if n_layers > 1:
        # zero only the halo strips (interior is fully overwritten each layer);
        # halos just need to be finite zeros so border-row garbage stays finite.
        cc = scratch.shape[1]
        scratch[0:padr, :] = jnp.zeros((padr, cc), scratch.dtype)
        scratch[padr + hpwp:, :] = jnp.zeros(
            (scratch.shape[0] - padr - hpwp, cc), scratch.dtype)

    # interior mask, pre-broadcast in the wrapper -> loaded once, reused by
    # every layer (no per-layer broadcast_in_dim).
    mask_i = mask_ref[0:hpwp, :]

    src = x_ref
    for layer in range(n_layers):
        w_ref = refs[2 * layer]
        b_ref = refs[2 * layer + 1]

        # im2col along the flattened padded-row axis: 9 shifted row slices
        # lane-concatenated -> ONE MXU matmul with K = 9*Cin_l.
        taps = []
        for ky in range(3):
            for kx in range(3):
                off = padr + (ky - 1) * wp + (kx - 1)
                taps.append(src[off:off + hpwp, :])
        xk = jnp.concatenate(taps, axis=-1)                      # (hpwp, 9*Cin_l)

        acc = jnp.dot(xk, w_ref[...], preferred_element_type=jnp.float32)
        h = jnp.maximum(acc + b_ref[...], 0.0)                   # (hpwp, Cout) fp32
        h = h * mask_i          # zero padded-border rows (= conv zero padding)

        if layer == n_layers - 1:
            out_ref[0:hpwp, :] = h.astype(out_ref.dtype)
            if so > hpwp:
                out_ref[hpwp:so, :] = jnp.zeros((so - hpwp, h.shape[1]),
                                                out_ref.dtype)
        else:
            scratch[padr:padr + hpwp, :] = h.astype(scratch.dtype)
            src = scratch


def conv_stack_fast(conv_x, prepared):
    """conv_x: (N, Cin, H, W). Returns (N, So*Ccv) in compute_dtype, in the
    padded-NHWC flatten order the (permuted) first combined-FC weight expects."""
    g = prepared["geom"]
    cd = prepared["compute_dtype"]
    N, Cin, H, W = conv_x.shape
    Hp, Wp, hpwp = g["Hp"], g["Wp"], g["hpwp"]
    S, So, padr = g["S"], g["So"], g["padr"]
    ccv = prepared["conv"][-1][0].shape[1]

    # NCHW -> padded NHWC, flattened to (N*S, Cin) with a per-node zero halo so
    # each grid step (one node) is self-contained (parallel across TCs).
    x = jnp.transpose(conv_x, (0, 2, 3, 1))
    x = jnp.pad(x, ((0, 0), (1, 1), (1, 1), (0, 0))).reshape(N, hpwp, Cin)
    x = jnp.pad(x, ((0, 0), (padr, S - padr - hpwp), (0, 0)))
    x = x.reshape(N * S, Cin).astype(cd)

    args = [x, prepared["mask"]]
    in_specs = [pl.BlockSpec((S, Cin), lambda i: (i, 0)),
                pl.BlockSpec((So, ccv), lambda i: (0, 0))]
    for w, b in prepared["conv"]:
        args += [w, b]
        in_specs.append(pl.BlockSpec(w.shape, lambda i: (0, 0)))
        in_specs.append(pl.BlockSpec(b.shape, lambda i: (0, 0)))

    n_layers = len(prepared["conv"])
    scratch_shapes = [pltpu.VMEM((S, ccv), cd)] if n_layers > 1 else []

    out = pl.pallas_call(
        functools.partial(_conv_stack_kernel, n_layers=n_layers, hpwp=hpwp,
                          wp=Wp, padr=padr, so=So),
        out_shape=jax.ShapeDtypeStruct((N * So, ccv), cd),   # bf16 writeback
        grid=(N,),
        in_specs=in_specs,
        out_specs=pl.BlockSpec((So, ccv), lambda i: (i, 0)),
        scratch_shapes=scratch_shapes,
        compiler_params=pltpu.CompilerParams(
            dimension_semantics=("parallel",),
            vmem_limit_bytes=32 * 1024 * 1024),
    )(*args)

    # free row-major reshape (NO transpose): the first combined-FC weight rows
    # were permuted at prepare time to consume this flatten order.
    return out.reshape(N, So * ccv)


# ----------------------------------------------------------------------------
# Kernel 2: fused linear_fcs MLP + concat + combined_fcs MLP
# ----------------------------------------------------------------------------
def _tail_kernel(conv_ref, lin_ref, *refs, n_lin, n_comb, compute_dtype):
    out_ref = refs[2 * (n_lin + n_comb)]

    def dense_relu(x, w_ref, b_ref):
        y = jnp.dot(x.astype(compute_dtype), w_ref[...],
                    preferred_element_type=jnp.float32)
        return jnp.maximum(y + b_ref[...], 0.0)

    h = lin_ref[...]
    for i in range(n_lin):
        h = dense_relu(h, refs[2 * i], refs[2 * i + 1])

    h = jnp.concatenate(
        [conv_ref[...].astype(compute_dtype), h.astype(compute_dtype)], axis=-1)

    for i in range(n_comb):
        j = n_lin + i
        h = dense_relu(h, refs[2 * j], refs[2 * j + 1])

    out_ref[...] = h.astype(out_ref.dtype)


def fused_tail(conv_flat, lin_x, prepared):
    cd = prepared["compute_dtype"]
    lin_params, comb_params = prepared["lin"], prepared["comb"]
    N, Fc = conv_flat.shape
    Fl = lin_x.shape[1]
    n_lin, n_comb = len(lin_params), len(comb_params)
    out_dim, out_pad = prepared["out_dim"], prepared["out_pad"]

    args = [conv_flat.astype(cd), lin_x.astype(cd)]
    for w, b in lin_params + comb_params:
        args += [w, b]

    # node (row) tiling: single block for tiny N; otherwise >=2 grid steps so
    # "parallel" can shard across v7x's 2 TensorCores (harmless on v5e/v6e).
    # v6e/v5e with large N can afford row_block 512-1024 + a higher vmem limit.
    if N <= 16:
        row_block = N
    else:
        row_block = min(256, _ru(pl.cdiv(N, 2), 16))
    grid = (pl.cdiv(N, row_block),)

    rowmap = lambda i: (i, 0)
    fullmap = lambda i: (0, 0)
    in_specs = [pl.BlockSpec((row_block, Fc), rowmap),
                pl.BlockSpec((row_block, Fl), rowmap)]
    for w, b in lin_params + comb_params:
        in_specs.append(pl.BlockSpec(w.shape, fullmap))
        in_specs.append(pl.BlockSpec(b.shape, fullmap))

    out = pl.pallas_call(
        functools.partial(_tail_kernel, n_lin=n_lin, n_comb=n_comb,
                          compute_dtype=cd),
        out_shape=jax.ShapeDtypeStruct((N, out_pad), jnp.float32),
        grid=grid,
        in_specs=in_specs,
        out_specs=pl.BlockSpec((row_block, out_pad), rowmap),   # lane-dense store
        compiler_params=pltpu.CompilerParams(
            dimension_semantics=("parallel",),
            vmem_limit_bytes=32 * 1024 * 1024),
    )(*args)
    return out[:, :out_dim]


# ----------------------------------------------------------------------------
# Parameter init (PyTorch-style) and one-time kernel-layout preparation
# ----------------------------------------------------------------------------
def init_params(key, *, in_conv_shape, in_linear_features, conv_channels,
                conv_layers, lin_features, lin_layers, fc_features, fc_layers):
    """uniform(+-1/sqrt(fan_in)); linear weights stored (in, out); conv weights
    stored (9, Cin, Cout) with tap index k = ky*3 + kx."""
    conv_params, lin_params, comb_params = [], [], []

    in_ch = in_conv_shape[0]
    for _ in range(conv_layers):
        key, kw, kb = jax.random.split(key, 3)
        bound = 1.0 / np.sqrt(in_ch * 9)
        w = jax.random.uniform(kw, (9, in_ch, conv_channels), jnp.float32, -bound, bound)
        b = jax.random.uniform(kb, (1, conv_channels), jnp.float32, -bound, bound)
        conv_params.append((w, b))
        in_ch = conv_channels

    in_f = in_linear_features
    for _ in range(lin_layers):
        key, kw, kb = jax.random.split(key, 3)
        bound = 1.0 / np.sqrt(in_f)
        w = jax.random.uniform(kw, (in_f, lin_features), jnp.float32, -bound, bound)
        b = jax.random.uniform(kb, (1, lin_features), jnp.float32, -bound, bound)
        lin_params.append((w, b))
        in_f = lin_features

    in_f = in_ch * in_conv_shape[1] * in_conv_shape[2] + in_f
    for _ in range(fc_layers):
        key, kw, kb = jax.random.split(key, 3)
        bound = 1.0 / np.sqrt(in_f)
        w = jax.random.uniform(kw, (in_f, fc_features), jnp.float32, -bound, bound)
        b = jax.random.uniform(kb, (1, fc_features), jnp.float32, -bound, bound)
        comb_params.append((w, b))
        in_f = fc_features

    return {"conv": conv_params, "lin": lin_params, "comb": comb_params,
            "out_features": in_f}


def prepare_params(params, in_conv_shape, compute_dtype=jnp.bfloat16):
    """One-time conversion to kernel-friendly layouts: packed conv taps,
    permuted/padded first combined-FC weight, lane-padded last FC, casts."""
    Cin, H, W = in_conv_shape
    prepared = {"compute_dtype": compute_dtype, "conv": [], "lin": [], "comb": []}

    conv_raw = params["conv"]
    ccv = Cin
    if conv_raw:
        Hp, Wp = H + 2, W + 2
        hpwp = Hp * Wp
        padr = _ru(Wp + 1, 16)                  # 16-aligned (bf16 sublane packing)
        S = _ru(padr + hpwp + (Wp + 1), 16)     # per-node rows incl. both halos
        So = _ru(hpwp, 16)                      # per-node output rows
        prepared["geom"] = dict(H=H, W=W, Hp=Hp, Wp=Wp, hpwp=hpwp,
                                padr=padr, S=S, So=So)

        cin = Cin
        for w9, b in conv_raw:                  # (9, cin, cout) -> (9*cin, cout)
            cout = w9.shape[2]
            prepared["conv"].append((w9.reshape(9 * cin, cout).astype(compute_dtype),
                                     b.astype(jnp.float32)))
            cin = cout
        ccv = cin

        yy = np.arange(Hp)[:, None]
        xx = np.arange(Wp)[None, :]
        interior = ((yy >= 1) & (yy <= H) & (xx >= 1) & (xx <= W)).astype(np.float32)
        mask = np.zeros((So, ccv), np.float32)
        mask[:hpwp, :] = interior.reshape(hpwp, 1)
        prepared["mask"] = jnp.asarray(mask)

    for w, b in params["lin"]:
        prepared["lin"].append((w.astype(compute_dtype), b.astype(jnp.float32)))

    comb_ws = [np.asarray(w, np.float32) for w, _ in params["comb"]]
    comb_bs = [np.asarray(b, np.float32) for _, b in params["comb"]]

    if comb_ws and conv_raw:
        # Permute + zero-scatter the conv rows of the first combined weight so
        # it consumes the conv kernel's padded-NHWC flatten directly (no
        # transpose / interior slice of the conv features anywhere).
        g = prepared["geom"]
        F = comb_ws[0].shape[1]
        fc_old = ccv * H * W
        w_conv_old, w_lin = comb_ws[0][:fc_old], comb_ws[0][fc_old:]
        y = np.arange(1, H + 1)
        x = np.arange(1, W + 1)
        c = np.arange(ccv)
        p = y[:, None] * g["Wp"] + x[None, :]                            # (H, W)
        new_rows = (p[:, :, None] * ccv + c[None, None, :]).ravel()
        old_rows = (c[None, None, :] * H * W + (y[:, None, None] - 1) * W
                    + (x[None, :, None] - 1)).ravel()
        w_conv_new = np.zeros((g["So"] * ccv, F), np.float32)
        w_conv_new[new_rows] = w_conv_old[old_rows]
        comb_ws[0] = np.concatenate([w_conv_new, w_lin], axis=0)

    if comb_ws:
        out_dim = comb_ws[-1].shape[1]
        out_pad = _ru(out_dim, 128)             # lane-dense final store
        if out_pad != out_dim:
            comb_ws[-1] = np.pad(comb_ws[-1], ((0, 0), (0, out_pad - out_dim)))
            comb_bs[-1] = np.pad(comb_bs[-1], ((0, 0), (0, out_pad - out_dim)))
        prepared["out_dim"], prepared["out_pad"] = out_dim, out_pad
        for w, b in zip(comb_ws, comb_bs):
            prepared["comb"].append((jnp.asarray(w).astype(compute_dtype),
                                     jnp.asarray(b)))
    return prepared


# ----------------------------------------------------------------------------
# Forward pass
# ----------------------------------------------------------------------------
def input_node_model_forward(prepared, conv_x, lin_x):
    N = conv_x.shape[0]
    if prepared["conv"]:
        conv_flat = conv_stack_fast(conv_x, prepared)      # (N, So*Ccv)
    else:
        conv_flat = conv_x.reshape(N, -1)                  # plain NCHW flatten

    if prepared["comb"]:
        return fused_tail(conv_flat, lin_x, prepared)

    # TODO(synk): degenerate fc_layers == 0 config (module returns raw concat)
    # is handled by a small XLA fallback that undoes the padded-NHWC flatten.
    g = prepared.get("geom")
    if prepared["conv"]:
        ccv = prepared["conv"][-1][0].shape[1]
        cf = conv_flat.reshape(N, g["So"], ccv)[:, :g["hpwp"], :]
        cf = cf.reshape(N, g["Hp"], g["Wp"], ccv)[:, 1:g["H"] + 1, 1:g["W"] + 1, :]
        cf = jnp.transpose(cf, (0, 3, 1, 2)).reshape(N, -1)
    else:
        cf = conv_flat
    h = lin_x.astype(jnp.float32)
    for w, b in prepared["lin"]:
        h = jnp.maximum(h @ w.astype(jnp.float32) + b, 0.0)
    return jnp.concatenate([cf.astype(jnp.float32), h], axis=1)


# Pure-JAX reference (same math, high-precision XLA ops) for verification.
def reference_forward(params, conv_x, lin_x):
    hi = jax.lax.Precision.HIGHEST
    x = jnp.transpose(conv_x, (0, 2, 3, 1))
    for w9, b in params["conv"]:
        w_hwio = w9.reshape(3, 3, w9.shape[1], w9.shape[2])
        x = jax.lax.conv_general_dilated(
            x, w_hwio, window_strides=(1, 1), padding="SAME",
            dimension_numbers=("NHWC", "HWIO", "NHWC"), precision=hi)
        x = jnp.maximum(x + b.reshape(1, 1, 1, -1), 0.0)
    xf = jnp.transpose(x, (0, 3, 1, 2)).reshape(conv_x.shape[0], -1)
    h = lin_x
    for w, b in params["lin"]:
        h = jnp.maximum(jnp.dot(h, w, precision=hi) + b, 0.0)
    c = jnp.concatenate([xf, h], axis=1)
    for w, b in params["comb"]:
        c = jnp.maximum(jnp.dot(c, w, precision=hi) + b, 0.0)
    return c


# ----------------------------------------------------------------------------
if __name__ == "__main__":
    in_conv_shape = (3, 16, 16)      # (C, H, W)
    in_linear_features = 16
    conv_channels = 8
    conv_layers = 2
    lin_features = 32
    lin_layers = 2
    fc_features = 32
    fc_layers = 2
    N = 2                            # nodes (batch)

    key = jax.random.PRNGKey(0)
    k_param, k_conv, k_lin = jax.random.split(key, 3)

    params = init_params(
        k_param, in_conv_shape=in_conv_shape,
        in_linear_features=in_linear_features, conv_channels=conv_channels,
        conv_layers=conv_layers, lin_features=lin_features,
        lin_layers=lin_layers, fc_features=fc_features, fc_layers=fc_layers)

    conv_x = jax.random.normal(k_conv, (N,) + in_conv_shape, jnp.float32)
    lin_x = jax.random.normal(k_lin, (N, in_linear_features), jnp.float32)

    ref = reference_forward(params, conv_x, lin_x)

    # fp32 path: exact-ish check
    prep32 = prepare_params(params, in_conv_shape, compute_dtype=jnp.float32)
    out = input_node_model_forward(prep32, conv_x, lin_x)
    out = jax.block_until_ready(out)
    assert out.shape == (N, params["out_features"])
    np.testing.assert_allclose(np.asarray(out), np.asarray(ref),
                               rtol=1e-4, atol=2e-4)

    # bf16 MXU path (fp32 accumulation, bf16 operands + bf16 conv writeback)
    prep16 = prepare_params(params, in_conv_shape, compute_dtype=jnp.bfloat16)
    out_bf16 = input_node_model_forward(prep16, conv_x, lin_x)
    out_bf16 = jax.block_until_ready(out_bf16)
    np.testing.assert_allclose(np.asarray(out_bf16), np.asarray(ref),
                               rtol=5e-2, atol=5e-2)

    print("KERNEL_OK")
</pallas_src>

<mosaic_0001>
module attributes {stable_mosaic.version = 11 : i64} {
  func.func @_conv_stack_kernel(%arg0: i32, %arg1: memref<384x3xf32, #tpu.memory_space<vmem>>, %arg2: memref<336x8xf32, #tpu.memory_space<vmem>>, %arg3: memref<27x8xf32, #tpu.memory_space<vmem>>, %arg4: memref<1x8xf32, #tpu.memory_space<vmem>>, %arg5: memref<72x8xf32, #tpu.memory_space<vmem>>, %arg6: memref<1x8xf32, #tpu.memory_space<vmem>>, %arg7: memref<336x8xf32, #tpu.memory_space<vmem>>, %arg8: memref<384x8xf32, #tpu.memory_space<vmem>>) attributes {dimension_semantics = [#tpu.dimension_semantics<parallel>], iteration_bounds = array<i64: 2>, scalar_prefetch = 0 : i64, scratch_operands = 1 : i64, tpu.core_type = #tpu.core_type<tc>, window_params = [{transform_indices = @transform_0, window_bounds = array<i64: 384, 3>}, {pipeline_mode = #tpu.pipeline_mode<synchronous>, transform_indices = @transform_1, window_bounds = array<i64: 336, 8>}, {pipeline_mode = #tpu.pipeline_mode<synchronous>, transform_indices = @transform_2, window_bounds = array<i64: 27, 8>}, {pipeline_mode = #tpu.pipeline_mode<synchronous>, transform_indices = @transform_3, window_bounds = array<i64: 1, 8>}, {pipeline_mode = #tpu.pipeline_mode<synchronous>, transform_indices = @transform_4, window_bounds = array<i64: 72, 8>}, {pipeline_mode = #tpu.pipeline_mode<synchronous>, transform_indices = @transform_5, window_bounds = array<i64: 1, 8>}, {transform_indices = @transform_6, window_bounds = array<i64: 336, 8>}]} {
    %cst = arith.constant 0.000000e+00 : f32
    %0 = vector.broadcast %cst : f32 to vector<32x8xf32>
    %c0 = arith.constant 0 : index
    %c0_0 = arith.constant 0 : index
    %1 = vector.load %arg8[%c0, %c0_0] : memref<384x8xf32, #tpu.memory_space<vmem>>, vector<32x8xf32>
    tpu.vector_store %arg8[%c0, %c0_0], %0 {strides = array<i32>} : memref<384x8xf32, #tpu.memory_space<vmem>>, vector<32x8xf32>,
    %cst_1 = arith.constant 0.000000e+00 : f32
    %2 = vector.broadcast %cst_1 : f32 to vector<28x8xf32>
    %c356 = arith.constant 356 : index
    %c0_2 = arith.constant 0 : index
    %3 = vector.load %arg8[%c356, %c0_2] : memref<384x8xf32, #tpu.memory_space<vmem>>, vector<28x8xf32>
    tpu.vector_store %arg8[%c356, %c0_2], %2 {strides = array<i32>} : memref<384x8xf32, #tpu.memory_space<vmem>>, vector<28x8xf32>,
    %c0_3 = arith.constant 0 : index
    %c0_4 = arith.constant 0 : index
    %4 = vector.load %arg2[%c0_3, %c0_4] : memref<336x8xf32, #tpu.memory_space<vmem>>, vector<324x8xf32>
    %c13 = arith.constant 13 : index
    %c0_5 = arith.constant 0 : index
    %5 = vector.load %arg1[%c13, %c0_5] : memref<384x3xf32, #tpu.memory_space<vmem>>, vector<324x3xf32>
    %c14 = arith.constant 14 : index
    %c0_6 = arith.constant 0 : index
    %6 = vector.load %arg1[%c14, %c0_6] : memref<384x3xf32, #tpu.memory_space<vmem>>, vector<324x3xf32>
    %c15 = arith.constant 15 : index
    %c0_7 = arith.constant 0 : index
    %7 = vector.load %arg1[%c15, %c0_7] : memref<384x3xf32, #tpu.memory_space<vmem>>, vector<324x3xf32>
    %c31 = arith.constant 31 : index
    %c0_8 = arith.constant 0 : index
    %8 = vector.load %arg1[%c31, %c0_8] : memref<384x3xf32, #tpu.memory_space<vmem>>, vector<324x3xf32>
    %c32 = arith.constant 32 : index
    %c0_9 = arith.constant 0 : index
    %9 = vector.load %arg1[%c32, %c0_9] : memref<384x3xf32, #tpu.memory_space<vmem>>, vector<324x3xf32>
    %c33 = arith.constant 33 : index
    %c0_10 = arith.constant 0 : index
    %10 = vector.load %arg1[%c33, %c0_10] : memref<384x3xf32, #tpu.memory_space<vmem>>, vector<324x3xf32>
    %c49 = arith.constant 49 : index
    %c0_11 = arith.constant 0 : index
    %11 = vector.load %arg1[%c49, %c0_11] : memref<384x3xf32, #tpu.memory_space<vmem>>, vector<324x3xf32>
    %c50 = arith.constant 50 : index
    %c0_12 = arith.constant 0 : index
    %12 = vector.load %arg1[%c50, %c0_12] : memref<384x3xf32, #tpu.memory_space<vmem>>, vector<324x3xf32>
    %c51 = arith.constant 51 : index
    %c0_13 = arith.constant 0 : index
    %13 = vector.load %arg1[%c51, %c0_13] : memref<384x3xf32, #tpu.memory_space<vmem>>, vector<324x3xf32>
    %14 = tpu.concatenate %5, %6, %7, %8, %9, %10, %11, %12, %13 in 1 : vector<324x3xf32>, vector<324x3xf32>, vector<324x3xf32>, vector<324x3xf32>, vector<324x3xf32>, vector<324x3xf32>, vector<324x3xf32>, vector<324x3xf32>, vector<324x3xf32> -> vector<324x27xf32>
    %c0_14 = arith.constant 0 : index
    %c0_15 = arith.constant 0 : index
    %15 = vector.load %arg3[%c0_14, %c0_15] : memref<27x8xf32, #tpu.memory_space<vmem>>, vector<27x8xf32>
    %cst_16 = arith.constant dense<0.000000e+00> : vector<324x8xf32>
    %16 = tpu.matmul %14, %15, %cst_16 {dimension_numbers = #tpu.dot_dimension_numbers<[1], [0], [0], [1], [0, 0, 1, 1], [], []>} : vector<324x27xf32>, vector<27x8xf32>, vector<324x8xf32> -> vector<324x8xf32>
    %c0_17 = arith.constant 0 : index
    %c0_18 = arith.constant 0 : index
    %17 = vector.load %arg4[%c0_17, %c0_18] : memref<1x8xf32, #tpu.memory_space<vmem>>, vector<1x8xf32>
    %18 = vector.broadcast %17 : vector<1x8xf32> to vector<324x8xf32>
    %19 = arith.addf %16, %18 : vector<324x8xf32>
    %cst_19 = arith.constant 0.000000e+00 : f32
    %20 = vector.broadcast %cst_19 : f32 to vector<324x8xf32>
    %21 = arith.maximumf %19, %20 : vector<324x8xf32>
    %22 = arith.mulf %21, %4 : vector<324x8xf32>
    %c32_20 = arith.constant 32 : index
    %c0_21 = arith.constant 0 : index
    %23 = vector.load %arg8[%c32_20, %c0_21] : memref<384x8xf32, #tpu.memory_space<vmem>>, vector<324x8xf32>
    tpu.vector_store %arg8[%c32_20, %c0_21], %22 {strides = array<i32>} : memref<384x8xf32, #tpu.memory_space<vmem>>, vector<324x8xf32>,
    %c13_22 = arith.constant 13 : index
    %c0_23 = arith.constant 0 : index
    %24 = vector.load %arg8[%c13_22, %c0_23] : memref<384x8xf32, #tpu.memory_space<vmem>>, vector<324x8xf32>
    %c14_24 = arith.constant 14 : index
    %c0_25 = arith.constant 0 : index
    %25 = vector.load %arg8[%c14_24, %c0_25] : memref<384x8xf32, #tpu.memory_space<vmem>>, vector<324x8xf32>
    %c15_26 = arith.constant 15 : index
    %c0_27 = arith.constant 0 : index
    %26 = vector.load %arg8[%c15_26, %c0_27] : memref<384x8xf32, #tpu.memory_space<vmem>>, vector<324x8xf32>
    %c31_28 = arith.constant 31 : index
    %c0_29 = arith.constant 0 : index
    %27 = vector.load %arg8[%c31_28, %c0_29] : memref<384x8xf32, #tpu.memory_space<vmem>>, vector<324x8xf32>
    %c32_30 = arith.constant 32 : index
    %c0_31 = arith.constant 0 : index
    %28 = vector.load %arg8[%c32_30, %c0_31] : memref<384x8xf32, #tpu.memory_space<vmem>>, vector<324x8xf32>
    %c33_32 = arith.constant 33 : index
    %c0_33 = arith.constant 0 : index
    %29 = vector.load %arg8[%c33_32, %c0_33] : memref<384x8xf32, #tpu.memory_space<vmem>>, vector<324x8xf32>
    %c49_34 = arith.constant 49 : index
    %c0_35 = arith.constant 0 : index
    %30 = vector.load %arg8[%c49_34, %c0_35] : memref<384x8xf32, #tpu.memory_space<vmem>>, vector<324x8xf32>
    %c50_36 = arith.constant 50 : index
    %c0_37 = arith.constant 0 : index
    %31 = vector.load %arg8[%c50_36, %c0_37] : memref<384x8xf32, #tpu.memory_space<vmem>>, vector<324x8xf32>
    %c51_38 = arith.constant 51 : index
    %c0_39 = arith.constant 0 : index
    %32 = vector.load %arg8[%c51_38, %c0_39] : memref<384x8xf32, #tpu.memory_space<vmem>>, vector<324x8xf32>
    %33 = tpu.concatenate %24, %25, %26, %27, %28, %29, %30, %31, %32 in 1 : vector<324x8xf32>, vector<324x8xf32>, vector<324x8xf32>, vector<324x8xf32>, vector<324x8xf32>, vector<324x8xf32>, vector<324x8xf32>, vector<324x8xf32>, vector<324x8xf32> -> vector<324x72xf32>
    %c0_40 = arith.constant 0 : index
    %c0_41 = arith.constant 0 : index
    %34 = vector.load %arg5[%c0_40, %c0_41] : memref<72x8xf32, #tpu.memory_space<vmem>>, vector<72x8xf32>
    %cst_42 = arith.constant dense<0.000000e+00> : vector<324x8xf32>
    %35 = tpu.matmul %33, %34, %cst_42 {dimension_numbers = #tpu.dot_dimension_numbers<[1], [0], [0], [1], [0, 0, 1, 1], [], []>} : vector<324x72xf32>, vector<72x8xf32>, vector<324x8xf32> -> vector<324x8xf32>
    %c0_43 = arith.constant 0 : index
    %c0_44 = arith.constant 0 : index
    %36 = vector.load %arg6[%c0_43, %c0_44] : memref<1x8xf32, #tpu.memory_space<vmem>>, vector<1x8xf32>
    %37 = vector.broadcast %36 : vector<1x8xf32> to vector<324x8xf32>
    %38 = arith.addf %35, %37 : vector<324x8xf32>
    %cst_45 = arith.constant 0.000000e+00 : f32
    %39 = vector.broadcast %cst_45 : f32 to vector<324x8xf32>
    %40 = arith.maximumf %38, %39 : vector<324x8xf32>
    %41 = arith.mulf %40, %4 : vector<324x8xf32>
    %c0_46 = arith.constant 0 : index
    %c0_47 = arith.constant 0 : index
    %42 = vector.load %arg7[%c0_46, %c0_47] : memref<336x8xf32, #tpu.memory_space<vmem>>, vector<324x8xf32>
    tpu.vector_store %arg7[%c0_46, %c0_47], %41 {strides = array<i32>} : memref<336x8xf32, #tpu.memory_space<vmem>>, vector<324x8xf32>,
    %cst_48 = arith.constant 0.000000e+00 : f32
    %43 = vector.broadcast %cst_48 : f32 to vector<12x8xf32>
    %c324 = arith.constant 324 : index
    %c0_49 = arith.constant 0 : index
    %44 = vector.load %arg7[%c324, %c0_49] : memref<336x8xf32, #tpu.memory_space<vmem>>, vector<12x8xf32>
    tpu.vector_store %arg7[%c324, %c0_49], %43 {strides = array<i32>} : memref<336x8xf32, #tpu.memory_space<vmem>>, vector<12x8xf32>,
    return
  }
  func.func @transform_0(%arg0: i32) -> (i32, i32) {
    %c0_i32 = arith.constant 0 : i32
    %c0_i32_0 = arith.constant 0 : i32
    return %arg0, %c0_i32 : i32, i32
  }
  func.func @transform_1(%arg0: i32) -> (i32, i32) {
    %c0_i32 = arith.constant 0 : i32
    %c0_i32_0 = arith.constant 0 : i32
    %c0_i32_1 = arith.constant 0 : i32
    return %c0_i32, %c0_i32_0 : i32, i32
  }
  func.func @transform_2(%arg0: i32) -> (i32, i32) {
    %c0_i32 = arith.constant 0 : i32
    %c0_i32_0 = arith.constant 0 : i32
    %c0_i32_1 = arith.constant 0 : i32
    return %c0_i32, %c0_i32_0 : i32, i32
  }
  func.func @transform_3(%arg0: i32) -> (i32, i32) {
    %c0_i32 = arith.constant 0 : i32
    %c0_i32_0 = arith.constant 0 : i32
    %c0_i32_1 = arith.constant 0 : i32
    return %c0_i32, %c0_i32_0 : i32, i32
  }
  func.func @transform_4(%arg0: i32) -> (i32, i32) {
    %c0_i32 = arith.constant 0 : i32
    %c0_i32_0 = arith.constant 0 : i32
    %c0_i32_1 = arith.constant 0 : i32
    return %c0_i32, %c0_i32_0 : i32, i32
  }
  func.func @transform_5(%arg0: i32) -> (i32, i32) {
    %c0_i32 = arith.constant 0 : i32
    %c0_i32_0 = arith.constant 0 : i32
    %c0_i32_1 = arith.constant 0 : i32
    return %c0_i32, %c0_i32_0 : i32, i32
  }
  func.func @transform_6(%arg0: i32) -> (i32, i32) {
    %c0_i32 = arith.constant 0 : i32
    %c0_i32_0 = arith.constant 0 : i32
    return %arg0, %c0_i32 : i32, i32
  }
}

</mosaic_0001>

<bundles_post_ra>
// kernel: tpu_custom_call.1
= control target key start
LH: loop header
LB: loop body
LE: loop exit
PB: predicated region body
PF: predicated region fallthrough
CT: control target
= control target key end

     0   :  { %s5789_s21 = smov 0   ;;  %s9815_s0 = inlined_call_operand.vmem [shape: f32[768,3], index: 0, kind: input, shape index: {}]   ;;  %s9816_s1 = inlined_call_operand.vmem [shape: f32[336,8], index: 1, kind: input, shape index: {}]   ;;  %s9817_s2 = inlined_call_operand.vmem [shape: f32[27,8], index: 2, kind: input, shape index: {}]   ;;  %s9818_s3 = inlined_call_operand.vmem [shape: f32[1,8], index: 3, kind: input, shape index: {}]   ;;  %s9819_s4 = inlined_call_operand.vmem [shape: f32[72,8], index: 4, kind: input, shape index: {}]   ;;  %s9820_s5 = inlined_call_operand.vmem [shape: f32[1,8], index: 5, kind: input, shape index: {}]   ;;  %s9821_s6 = inlined_call_operand.vmem [shape: f32[672,8], index: 6, kind: output, shape index: {}]  }
   0x1 LB: > { %s5157_s22 = sadd.s32 4294967295, %s5733_s21   ;;  %p5161_p0 = scmp.ge.s32.totalorder %s5733_s21, 1  ;;  %s5733_s21 = sphi %s5789_s21, %s16_s21  }
   0x2   : > { %p213_p1 = scmp.lt.s32.totalorder %s5733_s21, 3 }
   0x4   : > { %p214_p2 = pnand %p5161_p0, %p213_p1 }
   0x6   : > { %217 = sbr.rel (%p214_p2) target bundleno = 1995 (0x7cb), region = 44 }
   0xd   : > { %s243_s23 = smul.u32 48, %s5157_s22  ;;  %s5735_s28 = smov 3   ;;  %vm2306_vm0 = vcmask 1042432   ;;  %vm5743_vm1 = vmmov 1   ;;  %vm5744_vm3 = vmmov 0   ;;  %vm1835_vm4 = vcmask 23552  }
   0xe   : > { %s5736_s29 = smov 6   ;;  %s5737_s30 = smov 9   ;;  %vm5623_vm2 = vmpackc.low %vm2306_vm0, %vm5743_vm1  ;;  %vm1877_vm5 = vcmask 48128   ;;  %vm1919_vm6 = vcmask 72704   ;;  %vm1961_vm7 = vcmask 97280   ;;  %vm2003_vm8 = vcmask 121856  }
   0xf   : > { %p244_p3 = scmp.lt.s32.totalorder %s243_s23, 95  ;;  %s5738_s7 = smov 12   ;;  %vm2045_vm9 = vcmask 146432   ;;  %vm2087_vm10 = vcmask 171008   ;;  %vm2129_vm11 = vcmask 195584   ;;  %vm2182_vm12 = vcmask 220160  }
  0x10   : > { %s5739_s8 = smov 15   ;;  %s5740_s9 = smov 18   ;;  %vm255_vm13 = vcmask 64512   ;;  %vm263_vm14 = vcmask 60416   ;;  %vm4273_vm15 = vcmask 130048   ;;  %vm4356_vm0 = vcmask 261120  }
  0x11   : > { %s10404_s23 = smov (!%p244_p3, %s243_s23), 95  ;;  %s5741_s10 = smov 21   ;;  %vm4398_vm1 = vcmask 326656  }
  0x12   : > { %s5162_s24 = sshll.u32 %s10404_s23, 3  ;;  %s5746_s19 = smov 24  }
  0x13   : > { %s5802_s27 = scalar_lea.vmem %s9815_s0, %s5162_s24  ;;  %s5747_s20 = smov 8  }
  0x14   : > { %v349_v0 = vld [vmem:[%s5802_s27 + $0x1e] sm:$0xff]  ;;  %v347_v1 = vld [vmem:[%s5802_s27 + $0xe] sm:$0xff]  ;;  %v350_v2 = vld [vmem:[%s5802_s27 + $0x26] sm:$0xff]  ;;  %s249_s23 = smul.u32 42, %s5157_s22 }
  0x15   : > { %644 = vrot.lane.b32.xlu1 %v349_v0, %s5735_s28  ;;  %640 = vrot.lane.b32.xlu0 %v347_v1, %s5735_s28  ;;  %v348_v3 = vld [vmem:[%s5802_s27 + $0x16] sm:$0xff]  ;;  %v351_v5 = vld [vmem:[%s5802_s27 + $0x2e] sm:$0xff] }
  0x16   : > { %v352_v4 = vld [vmem:[%s5802_s27 + $0x36] sm:$0xff]  ;;  %v354_v6 = vld [vmem:[%s5802_s27 + $0x46] sm:$0xff]  ;;  %v353_v7 = vld [vmem:[%s5802_s27 + $0x3e] sm:$0xff]  ;;  %p250_p4 = scmp.lt.s32.totalorder %s249_s23, 83 }
  0x17   : > { %v356_v8 = vld [vmem:[%s5802_s27 + $0x56] sm:$0xff]  ;;  %v355_v9 = vld [vmem:[%s5802_s27 + $0x4e] sm:$0xff]  ;;  %v358_v10 = vld [vmem:[%s5802_s27 + $0x66] sm:$0xff] }
  0x18   : > { %v357_v11 = vld [vmem:[%s5802_s27 + $0x5e] sm:$0xff]  ;;  %v360_v12 = vld [vmem:[%s5802_s27 + $0x76] sm:$0xff]  ;;  %v359_v13 = vld [vmem:[%s5802_s27 + $0x6e] sm:$0xff]  ;;  %s10406_s23 = smov (!%p250_p4, %s249_s23), 83 }
  0x19   : > { %646 = vrot.lane.b32.xlu1 %v350_v2, %s5735_s28  ;;  %642 = vrot.lane.b32.xlu0 %v348_v3, %s5735_s28  ;;  %v362_v14 = vld [vmem:[%s5802_s27 + $0x86] sm:$0xff]  ;;  %v361_v15 = vld [vmem:[%s5802_s27 + $0x7e] sm:$0xff]  ;;  %s5163_s22 = sshll.u32 %s10406_s23, 3 }
  0x1a   : > { %v364_v16 = vld [vmem:[%s5802_s27 + $0x96] sm:$0xff]  ;;  %v363_v17 = vld [vmem:[%s5802_s27 + $0x8e] sm:$0xff]  ;;  %v366_v18 = vld [vmem:[%s5802_s27 + $0xa6] sm:$0xff] }
  0x1b   : > { %v365_v19 = vld [vmem:[%s5802_s27 + $0x9e] sm:$0xff]  ;;  %v368_v20 = vld [vmem:[%s5802_s27 + $0xb6] sm:$0xff]  ;;  %v367_v21 = vld [vmem:[%s5802_s27 + $0xae] sm:$0xff] }
  0x1c   : > { %v370_v22 = vld [vmem:[%s5802_s27 + $0xc6] sm:$0xff]  ;;  %v369_v23 = vld [vmem:[%s5802_s27 + $0xbe] sm:$0xff]  ;;  %v372_v24 = vld [vmem:[%s5802_s27 + $0xd6] sm:$0xff] }
  0x1d   : > { %650 = vrot.lane.b32.xlu1 %v352_v4, %s5735_s28  ;;  %648 = vrot.lane.b32.xlu0 %v351_v5, %s5735_s28  ;;  %v371_v25 = vld [vmem:[%s5802_s27 + $0xce] sm:$0xff]  ;;  %v374_v26 = vld [vmem:[%s5802_s27 + $0xe6] sm:$0xff] }
  0x1e   : > { %v373_v27 = vld [vmem:[%s5802_s27 + $0xde] sm:$0xff]  ;;  %v376_v28 = vld [vmem:[%s5802_s27 + $0xf6] sm:$0xff]  ;;  %v375_v29 = vld [vmem:[%s5802_s27 + $0xee] sm:$0xff] }
  0x1f   : > { %v378_v30 = vld [vmem:[%s5802_s27 + $0x106] sm:$0xff]  ;;  %v377_v31 = vld [vmem:[%s5802_s27 + $0xfe] sm:$0xff]  ;;  %v380_v32 = vld [vmem:[%s5802_s27 + $0x116] sm:$0xff] }
  0x20   : > { %v379_v33 = vld [vmem:[%s5802_s27 + $0x10e] sm:$0xff]  ;;  %v382_v34 = vld [vmem:[%s5802_s27 + $0x126] sm:$0xff]  ;;  %v381_v35 = vld [vmem:[%s5802_s27 + $0x11e] sm:$0xff] }
  0x21   : > { %654 = vrot.lane.b32.xlu1 %v354_v6, %s5735_s28  ;;  %652 = vrot.lane.b32.xlu0 %v353_v7, %s5735_s28  ;;  %v384_v36 = vld [vmem:[%s5802_s27 + $0x136] sm:$0xff]  ;;  %v383_v37 = vld [vmem:[%s5802_s27 + $0x12e] sm:$0xff] }
  0x22   : > { %v386_v38 = vld [vmem:[%s5802_s27 + $0x146] sm:$0xff]  ;;  %v385_v39 = vld [vmem:[%s5802_s27 + $0x13e] sm:$0xff]  ;;  %v388_v40 = vld [vmem:[%s5802_s27 + $0xf] sm:$0xff] }
  0x23   : > { %v387_v41 = vld [vmem:[%s5802_s27 + $0x14e] sm:$0xf]  ;;  %v5889_v42 = vld [vmem:[%s5802_s27 + $0x1f] sm:$0xff]  ;;  %v389_v43 = vld [vmem:[%s5802_s27 + $0x17] sm:$0xff] }
  0x24   : > { %v5896_v44 = vld [vmem:[%s5802_s27 + $0x2f] sm:$0xff]  ;;  %v5899_v45 = vld [vmem:[%s5802_s27 + $0x27] sm:$0xff]  ;;  %v5906_v46 = vld [vmem:[%s5802_s27 + $0x3f] sm:$0xff] }
  0x25   : > { %658 = vrot.lane.b32.xlu1 %v356_v8, %s5735_s28  ;;  %656 = vrot.lane.b32.xlu0 %v355_v9, %s5735_s28  ;;  %v5909_v47 = vld [vmem:[%s5802_s27 + $0x37] sm:$0xff]  ;;  %v5916_v48 = vld [vmem:[%s5802_s27 + $0x4f] sm:$0xff] }
  0x26   : > { %v5919_v49 = vld [vmem:[%s5802_s27 + $0x47] sm:$0xff]  ;;  %v5926_v50 = vld [vmem:[%s5802_s27 + $0x5f] sm:$0xff]  ;;  %v5929_v51 = vld [vmem:[%s5802_s27 + $0x57] sm:$0xff] }
  0x27   : > { %v5936_v52 = vld [vmem:[%s5802_s27 + $0x6f] sm:$0xff]  ;;  %v5939_v53 = vld [vmem:[%s5802_s27 + $0x67] sm:$0xff]  ;;  %v5946_v54 = vld [vmem:[%s5802_s27 + $0x7f] sm:$0xff] }
  0x28   : > { %v5949_v55 = vld [vmem:[%s5802_s27 + $0x77] sm:$0xff]  ;;  %v5956_v56 = vld [vmem:[%s5802_s27 + $0x8f] sm:$0xff]  ;;  %v5959_v57 = vld [vmem:[%s5802_s27 + $0x87] sm:$0xff] }
  0x29   : > { %662 = vrot.lane.b32.xlu1 %v358_v10, %s5735_s28  ;;  %660 = vrot.lane.b32.xlu0 %v357_v11, %s5735_s28  ;;  %v5966_v58 = vld [vmem:[%s5802_s27 + $0x9f] sm:$0xff]  ;;  %v5969_v59 = vld [vmem:[%s5802_s27 + $0x97] sm:$0xff] }
  0x2a   : > { %v5980_v62 = vld [vmem:[%s5802_s27 + $0xaf] sm:$0xff]  ;;  %v5983_v63 = vld [vmem:[%s5802_s27 + $0xa7] sm:$0xff]  ;;  %v5994_v2 = vld [vmem:[%s5802_s27 + $0xbf] sm:$0xff] }
  0x2b   : > { %v5997_v3 = vld [vmem:[%s5802_s27 + $0xb7] sm:$0xff]  ;;  %v6008_v6 = vld [vmem:[%s5802_s27 + $0xcf] sm:$0xff]  ;;  %v6011_v7 = vld [vmem:[%s5802_s27 + $0xc7] sm:$0xff] }
  0x2c   : > { %v6022_v10 = vld [vmem:[%s5802_s27 + $0xdf] sm:$0xff]  ;;  %v6025_v11 = vld [vmem:[%s5802_s27 + $0xd7] sm:$0xff] }
  0x2d   : > { %666 = vrot.lane.b32.xlu1 %v360_v12, %s5735_s28  ;;  %664 = vrot.lane.b32.xlu0 %v359_v13, %s5735_s28 }
  0x31   : > { %670 = vrot.lane.b32.xlu1 %v362_v14, %s5735_s28  ;;  %668 = vrot.lane.b32.xlu0 %v361_v15, %s5735_s28  ;;  %v6036_v14 = vld [vmem:[%s5802_s27 + $0xef] sm:$0xff]  ;;  %v6039_v15 = vld [vmem:[%s5802_s27 + $0xe7] sm:$0xff] }
  0x35   : > { %674 = vrot.lane.b32.xlu1 %v364_v16, %s5735_s28  ;;  %672 = vrot.lane.b32.xlu0 %v363_v17, %s5735_s28 }
  0x39   : > { %678 = vrot.lane.b32.xlu1 %v366_v18, %s5735_s28  ;;  %676 = vrot.lane.b32.xlu0 %v365_v19, %s5735_s28  ;;  %v6050_v18 = vld [vmem:[%s5802_s27 + $0xff] sm:$0xff]  ;;  %v6053_v19 = vld [vmem:[%s5802_s27 + $0xf7] sm:$0xff] }
  0x3d   : > { %682 = vrot.lane.b32.xlu1 %v368_v20, %s5735_s28  ;;  %680 = vrot.lane.b32.xlu0 %v367_v21, %s5735_s28 }
  0x41   : > { %686 = vrot.lane.b32.xlu1 %v370_v22, %s5735_s28  ;;  %684 = vrot.lane.b32.xlu0 %v369_v23, %s5735_s28  ;;  %v6064_v22 = vld [vmem:[%s5802_s27 + $0x10f] sm:$0xff]  ;;  %v6067_v23 = vld [vmem:[%s5802_s27 + $0x107] sm:$0xff] }
  0x45   : > { %690 = vrot.lane.b32.xlu1 %v372_v24, %s5735_s28  ;;  %688 = vrot.lane.b32.xlu0 %v371_v25, %s5735_s28 }
  0x49   : > { %694 = vrot.lane.b32.xlu1 %v374_v26, %s5735_s28  ;;  %692 = vrot.lane.b32.xlu0 %v373_v27, %s5735_s28  ;;  %v6078_v26 = vld [vmem:[%s5802_s27 + $0x11f] sm:$0xff]  ;;  %v6081_v27 = vld [vmem:[%s5802_s27 + $0x117] sm:$0xff] }
  0x4d   : > { %698 = vrot.lane.b32.xlu1 %v376_v28, %s5735_s28  ;;  %696 = vrot.lane.b32.xlu0 %v375_v29, %s5735_s28 }
  0x51   : > { %702 = vrot.lane.b32.xlu1 %v378_v30, %s5735_s28  ;;  %700 = vrot.lane.b32.xlu0 %v377_v31, %s5735_s28  ;;  %v6092_v30 = vld [vmem:[%s5802_s27 + $0x12f] sm:$0xff]  ;;  %v6095_v31 = vld [vmem:[%s5802_s27 + $0x127] sm:$0xff] }
  0x55   : > { %706 = vrot.lane.b32.xlu1 %v380_v32, %s5735_s28  ;;  %704 = vrot.lane.b32.xlu0 %v379_v33, %s5735_s28 }
  0x59   : > { %710 = vrot.lane.b32.xlu1 %v382_v34, %s5735_s28  ;;  %708 = vrot.lane.b32.xlu0 %v381_v35, %s5735_s28  ;;  %v6106_v34 = vld [vmem:[%s5802_s27 + $0x13f] sm:$0xff]  ;;  %v6109_v35 = vld [vmem:[%s5802_s27 + $0x137] sm:$0xff] }
  0x5d   : > { %714 = vrot.lane.b32.xlu1 %v384_v36, %s5735_s28  ;;  %712 = vrot.lane.b32.xlu0 %v383_v37, %s5735_s28 }
  0x61   : > { %718 = vrot.lane.b32.xlu1 %v386_v38, %s5735_s28  ;;  %716 = vrot.lane.b32.xlu0 %v385_v39, %s5735_s28  ;;  %v428_v38 = vld [vmem:[%s5802_s27 + $0x14f] sm:$0xf]  ;;  %v6121_v39 = vld [vmem:[%s5802_s27 + $0x147] sm:$0xff] }
  0x65   : > { %804 = vrot.lane.b32.xlu1 %v388_v40, %s5736_s29  ;;  %720 = vrot.lane.b32.xlu0 %v387_v41, %s5735_s28  ;;  %s5749_s28 = smov 40  }
  0x69   : > { %808 = vrot.lane.b32.xlu1 %v5889_v42, %s5736_s29  ;;  %806 = vrot.lane.b32.xlu0 %v389_v43, %s5736_s29 }
  0x6d   : > { %812 = vrot.lane.b32.xlu1 %v5896_v44, %s5736_s29  ;;  %810 = vrot.lane.b32.xlu0 %v5899_v45, %s5736_s29 }
  0x71   : > { %816 = vrot.lane.b32.xlu1 %v5906_v46, %s5736_s29  ;;  %814 = vrot.lane.b32.xlu0 %v5909_v47, %s5736_s29 }
  0x75   : > { %820 = vrot.lane.b32.xlu1 %v5916_v48, %s5736_s29  ;;  %818 = vrot.lane.b32.xlu0 %v5919_v49, %s5736_s29 }
  0x79   : > { %824 = vrot.lane.b32.xlu1 %v5926_v50, %s5736_s29  ;;  %822 = vrot.lane.b32.xlu0 %v5929_v51, %s5736_s29 }
  0x7d   : > { %828 = vrot.lane.b32.xlu1 %v5936_v52, %s5736_s29  ;;  %826 = vrot.lane.b32.xlu0 %v5939_v53, %s5736_s29 }
  0x81   : > { %832 = vrot.lane.b32.xlu1 %v5946_v54, %s5736_s29  ;;  %830 = vrot.lane.b32.xlu0 %v5949_v55, %s5736_s29 }
  0x85   : > { %836 = vrot.lane.b32.xlu1 %v5956_v56, %s5736_s29  ;;  %834 = vrot.lane.b32.xlu0 %v5959_v57, %s5736_s29 }
  0x87   : > { %v5971_v60 = vpop.permute.xlu1 %644  ;;  %v5973_v61 = vpop.permute.xlu0 %640 }
  0x89   : > { %840 = vrot.lane.b32.xlu1 %v5966_v58, %s5736_s29  ;;  %838 = vrot.lane.b32.xlu0 %v5969_v59, %s5736_s29 }
  0x8b   : > { %v5985_v0 = vpop.permute.xlu1 %646  ;;  %v5987_v1 = vpop.permute.xlu0 %642 }
  0x8d   : > { %844 = vrot.lane.b32.xlu1 %v5980_v62, %s5736_s29  ;;  %842 = vrot.lane.b32.xlu0 %v5983_v63, %s5736_s29 }
  0x8f   : > { %v5999_v4 = vpop.permute.xlu1 %650  ;;  %v6001_v5 = vpop.permute.xlu0 %648 }
  0x90   : > { %9826 = vst [vmem:[#allocation3_spill] sm:$0xff] %v5999_v4 }
  0x91   : > { %848 = vrot.lane.b32.xlu1 %v5994_v2, %s5736_s29  ;;  %846 = vrot.lane.b32.xlu0 %v5997_v3, %s5736_s29 }
  0x93   : > { %v6013_v8 = vpop.permute.xlu1 %654  ;;  %v6015_v9 = vpop.permute.xlu0 %652 }
  0x94   : > { %9827 = vst [vmem:[#allocation4_spill] sm:$0xff] %v6013_v8  ;;  %9828 = vst [vmem:[#allocation5_spill] sm:$0xff] %v6015_v9 }
  0x95   : > { %852 = vrot.lane.b32.xlu1 %v6008_v6, %s5736_s29  ;;  %850 = vrot.lane.b32.xlu0 %v6011_v7, %s5736_s29 }
  0x97   : > { %v6027_v12 = vpop.permute.xlu1 %658  ;;  %v6029_v13 = vpop.permute.xlu0 %656 }
  0x98   : > { %9829 = vst [vmem:[#allocation6_spill] sm:$0xff] %v6027_v12  ;;  %9830 = vst [vmem:[#allocation7_spill] sm:$0xff] %v6029_v13 }
  0x99   : > { %856 = vrot.lane.b32.xlu1 %v6022_v10, %s5736_s29  ;;  %854 = vrot.lane.b32.xlu0 %v6025_v11, %s5736_s29 }
  0x9b   : > { %v6041_v16 = vpop.permute.xlu1 %662  ;;  %v6043_v17 = vpop.permute.xlu0 %660 }
  0x9c   : > { %9831 = vst [vmem:[#allocation8_spill] sm:$0xff] %v6041_v16  ;;  %9832 = vst [vmem:[#allocation9_spill] sm:$0xff] %v6043_v17  ;;  %v6624_v16 = vld [vmem:[%s5802_s27 + $0xe1] sm:$0xff]  ;;  %v6635_v17 = vld [vmem:[%s5802_s27 + $0xf9] sm:$0xff] }
  0x9d   : > { %860 = vrot.lane.b32.xlu1 %v6036_v14, %s5736_s29  ;;  %858 = vrot.lane.b32.xlu0 %v6039_v15, %s5736_s29 }
  0x9f   : > { %v6055_v20 = vpop.permute.xlu1 %666  ;;  %v6057_v21 = vpop.permute.xlu0 %664 }
  0xa0   : > { %9833 = vst [vmem:[#allocation10_spill] sm:$0xff] %v6055_v20  ;;  %9834 = vst [vmem:[#allocation11_spill] sm:$0xff] %v6057_v21 }
  0xa1   : > { %864 = vrot.lane.b32.xlu1 %v6050_v18, %s5736_s29  ;;  %862 = vrot.lane.b32.xlu0 %v6053_v19, %s5736_s29 }
  0xa3   : > { %v6069_v24 = vpop.permute.xlu1 %670  ;;  %v6071_v25 = vpop.permute.xlu0 %668 }
  0xa4   : > { %9835 = vst [vmem:[#allocation12_spill] sm:$0xff] %v6069_v24  ;;  %9836 = vst [vmem:[#allocation13_spill] sm:$0xff] %v6071_v25 }
  0xa5   : > { %868 = vrot.lane.b32.xlu1 %v6064_v22, %s5736_s29  ;;  %866 = vrot.lane.b32.xlu0 %v6067_v23, %s5736_s29 }
  0xa7   : > { %v6083_v28 = vpop.permute.xlu1 %674  ;;  %v6085_v29 = vpop.permute.xlu0 %672 }
  0xa8   : > { %9837 = vst [vmem:[#allocation14_spill] sm:$0xff] %v6083_v28  ;;  %9838 = vst [vmem:[#allocation15_spill] sm:$0xff] %v6085_v29 }
  0xa9   : > { %872 = vrot.lane.b32.xlu1 %v6078_v26, %s5736_s29  ;;  %870 = vrot.lane.b32.xlu0 %v6081_v27, %s5736_s29 }
  0xab   : > { %v6097_v32 = vpop.permute.xlu1 %678  ;;  %v6099_v33 = vpop.permute.xlu0 %676 }
  0xac   : > { %9839 = vst [vmem:[#allocation16_spill] sm:$0xff] %v6097_v32  ;;  %9840 = vst [vmem:[#allocation17_spill] sm:$0xff] %v6099_v33  ;;  %v469_v32 = vld [vmem:[%s5802_s27 + $0x148] sm:$0xff] }
  0xad   : > { %876 = vrot.lane.b32.xlu1 %v6092_v30, %s5736_s29  ;;  %874 = vrot.lane.b32.xlu0 %v6095_v31, %s5736_s29 }
  0xaf   : > { %v6111_v36 = vpop.permute.xlu1 %682  ;;  %v6113_v37 = vpop.permute.xlu0 %680 }
  0xb0   : > { %9841 = vst [vmem:[#allocation18_spill] sm:$0xff] %v6111_v36  ;;  %9842 = vst [vmem:[#allocation19_spill] sm:$0xff] %v6113_v37 }
  0xb1   : > { %880 = vrot.lane.b32.xlu1 %v6106_v34, %s5736_s29  ;;  %878 = vrot.lane.b32.xlu0 %v6109_v35, %s5736_s29 }
  0xb3   : > { %v6123_v40 = vpop.permute.xlu1 %686  ;;  %v6125_v41 = vpop.permute.xlu0 %684 }
  0xb4   : > { %9843 = vst [vmem:[#allocation20_spill] sm:$0xff] %v6123_v40  ;;  %9844 = vst [vmem:[#allocation21_spill] sm:$0xff] %v6125_v41  ;;  %v465_v41 = vld [vmem:[%s5802_s27 + $0x128] sm:$0xff] }
  0xb5   : > { %884 = vrot.lane.b32.xlu1 %v428_v38, %s5736_s29  ;;  %882 = vrot.lane.b32.xlu0 %v6121_v39, %s5736_s29  ;;  %s5750_s29 = smov 32  }
  0xb7   : > { %v6130_v43 = vpop.permute.xlu1 %690  ;;  %v6132_v36 = vpop.permute.xlu0 %688 }
  0xb8   : > { %9845 = vst [vmem:[#allocation22_spill] sm:$0xff] %v6130_v43  ;;  %9846 = vst [vmem:[#allocation23_spill] sm:$0xff] %v6132_v36 }
  0xb9   : > { %932 = vrot.lane.b32.xlu1 %v5899_v45, %s5737_s30  ;;  %930 = vrot.lane.b32.xlu0 %v5889_v42, %s5737_s30 }
  0xbb   : > { %v6138_v37 = vpop.permute.xlu1 %694  ;;  %v6140_v40 = vpop.permute.xlu0 %692 }
  0xbc   : > { %9847 = vst [vmem:[#allocation24_spill] sm:$0xff] %v6138_v37  ;;  %9848 = vst [vmem:[#allocation25_spill] sm:$0xff] %v6140_v40  ;;  %v457_v37 = vld [vmem:[%s5802_s27 + $0xe8] sm:$0xff]  ;;  %v459_v40 = vld [vmem:[%s5802_s27 + $0xf8] sm:$0xff] }
  0xbd   : > { %936 = vrot.lane.b32.xlu1 %v5909_v47, %s5737_s30  ;;  %934 = vrot.lane.b32.xlu0 %v5896_v44, %s5737_s30 }
  0xbf   : > { %v6146_v38 = vpop.permute.xlu1 %698  ;;  %v6148_v43 = vpop.permute.xlu0 %696 }
  0xc0   : > { %9849 = vst [vmem:[#allocation26_spill] sm:$0xff] %v6146_v38  ;;  %9850 = vst [vmem:[#allocation27_spill] sm:$0xff] %v6148_v43  ;;  %v453_v38 = vld [vmem:[%s5802_s27 + $0xc8] sm:$0xff]  ;;  %v455_v43 = vld [vmem:[%s5802_s27 + $0xd8] sm:$0xff] }
  0xc1   : > { %940 = vrot.lane.b32.xlu1 %v5919_v49, %s5737_s30  ;;  %938 = vrot.lane.b32.xlu0 %v5906_v46, %s5737_s30 }
  0xc3   : > { %v6154_v42 = vpop.permute.xlu1 %702  ;;  %v6156_v45 = vpop.permute.xlu0 %700 }
  0xc4   : > { %9851 = vst [vmem:[#allocation28_spill] sm:$0xff] %v6154_v42  ;;  %9852 = vst [vmem:[#allocation29_spill] sm:$0xff] %v6156_v45  ;;  %v439_v42 = vld [vmem:[%s5802_s27 + $0x58] sm:$0xff] }
  0xc5   : > { %944 = vrot.lane.b32.xlu1 %v5929_v51, %s5737_s30  ;;  %942 = vrot.lane.b32.xlu0 %v5916_v48, %s5737_s30 }
  0xc7   : > { %v6162_v44 = vpop.permute.xlu1 %706  ;;  %v6164_v47 = vpop.permute.xlu0 %704 }
  0xc8   : > { %9853 = vst [vmem:[#allocation30_spill] sm:$0xff] %v6162_v44  ;;  %9854 = vst [vmem:[#allocation31_spill] sm:$0xff] %v6164_v47  ;;  %v437_v44 = vld [vmem:[%s5802_s27 + $0x48] sm:$0xff] }
  0xc9   : > { %948 = vrot.lane.b32.xlu1 %v5939_v53, %s5737_s30  ;;  %946 = vrot.lane.b32.xlu0 %v5926_v50, %s5737_s30 }
  0xcb   : > { %v6170_v46 = vpop.permute.xlu1 %710  ;;  %v6172_v49 = vpop.permute.xlu0 %708 }
  0xcc   : > { %9855 = vst [vmem:[#allocation32_spill] sm:$0xff] %v6170_v46  ;;  %9856 = vst [vmem:[#allocation33_spill] sm:$0xff] %v6172_v49  ;;  %v435_v46 = vld [vmem:[%s5802_s27 + $0x38] sm:$0xff] }
  0xcd   : > { %952 = vrot.lane.b32.xlu1 %v5949_v55, %s5737_s30  ;;  %950 = vrot.lane.b32.xlu0 %v5936_v52, %s5737_s30 }
  0xcf   : > { %v6178_v48 = vpop.permute.xlu1 %714  ;;  %v6180_v51 = vpop.permute.xlu0 %712 }
  0xd0   : > { %9857 = vst [vmem:[#allocation34_spill] sm:$0xff] %v6178_v48  ;;  %9858 = vst [vmem:[#allocation35_spill] sm:$0xff] %v6180_v51  ;;  %v433_v48 = vld [vmem:[%s5802_s27 + $0x28] sm:$0xff] }
  0xd1   : > { %956 = vrot.lane.b32.xlu1 %v5959_v57, %s5737_s30  ;;  %954 = vrot.lane.b32.xlu0 %v5946_v54, %s5737_s30 }
  0xd3   : > { %v6186_v50 = vpop.permute.xlu1 %718  ;;  %v6188_v53 = vpop.permute.xlu0 %716 }
  0xd4   : > { %9859 = vst [vmem:[#allocation36_spill] sm:$0xff] %v6186_v50  ;;  %9860 = vst [vmem:[#allocation37_spill] sm:$0xff] %v6188_v53  ;;  %v431_v50 = vld [vmem:[%s5802_s27 + $0x15f] sm:$0xf] }
  0xd5   : > { %960 = vrot.lane.b32.xlu1 %v5969_v59, %s5737_s30  ;;  %958 = vrot.lane.b32.xlu0 %v5956_v56, %s5737_s30 }
  0xd7   : > { %v6194_v52 = vpop.permute.xlu1 %804  ;;  %v6196_v55 = vpop.permute.xlu0 %720 }
  0xd8   : > { %9861 = vst [vmem:[#allocation38_spill] sm:$0xff] %v6196_v55 }
  0xd9   : > { %964 = vrot.lane.b32.xlu1 %v5983_v63, %s5737_s30  ;;  %962 = vrot.lane.b32.xlu0 %v5966_v58, %s5737_s30 }
  0xdb   : > { %v6202_v54 = vpop.permute.xlu1 %808  ;;  %v6204_v57 = vpop.permute.xlu0 %806 }
  0xdd   : > { %968 = vrot.lane.b32.xlu1 %v5997_v3, %s5737_s30  ;;  %966 = vrot.lane.b32.xlu0 %v5980_v62, %s5737_s30 }
  0xdf   : > { %v6210_v56 = vpop.permute.xlu1 %812  ;;  %v6212_v59 = vpop.permute.xlu0 %810 }
  0xe1   : > { %972 = vrot.lane.b32.xlu1 %v6011_v7, %s5737_s30  ;;  %970 = vrot.lane.b32.xlu0 %v5994_v2, %s5737_s30 }
  0xe3   : > { %v6218_v58 = vpop.permute.xlu1 %816  ;;  %v6220_v63 = vpop.permute.xlu0 %814 }
  0xe4   : > { %9862 = vst [vmem:[#allocation39_spill] sm:$0xff] %v6218_v58  ;;  %9863 = vst [vmem:[#allocation40_spill] sm:$0xff] %v6220_v63 }
  0xe5   : > { %976 = vrot.lane.b32.xlu1 %v6025_v11, %s5737_s30  ;;  %974 = vrot.lane.b32.xlu0 %v6008_v6, %s5737_s30 }
  0xe7   : > { %v6226_v62 = vpop.permute.xlu1 %820  ;;  %v6228_v3 = vpop.permute.xlu0 %818 }
  0xe8   : > { %9864 = vst [vmem:[#allocation41_spill] sm:$0xff] %v6226_v62  ;;  %9865 = vst [vmem:[#allocation42_spill] sm:$0xff] %v6228_v3 }
  0xe9   : > { %980 = vrot.lane.b32.xlu1 %v6039_v15, %s5737_s30  ;;  %978 = vrot.lane.b32.xlu0 %v6022_v10, %s5737_s30 }
  0xeb   : > { %v6234_v2 = vpop.permute.xlu1 %824  ;;  %v6236_v7 = vpop.permute.xlu0 %822 }
  0xec   : > { %9866 = vst [vmem:[#allocation43_spill] sm:$0xff] %v6234_v2  ;;  %9867 = vst [vmem:[#allocation44_spill] sm:$0xff] %v6236_v7 }
  0xed   : > { %984 = vrot.lane.b32.xlu1 %v6053_v19, %s5737_s30  ;;  %982 = vrot.lane.b32.xlu0 %v6036_v14, %s5737_s30 }
  0xef   : > { %v6242_v6 = vpop.permute.xlu1 %828  ;;  %v6244_v11 = vpop.permute.xlu0 %826 }
  0xf0   : > { %9868 = vst [vmem:[#allocation45_spill] sm:$0xff] %v6242_v6  ;;  %9869 = vst [vmem:[#allocation46_spill] sm:$0xff] %v6244_v11  ;;  %v6610_v6 = vld [vmem:[%s5802_s27 + $0xd1] sm:$0xff]  ;;  %v6621_v11 = vld [vmem:[%s5802_s27 + $0xe9] sm:$0xff] }
  0xf1   : > { %988 = vrot.lane.b32.xlu1 %v6067_v23, %s5737_s30  ;;  %986 = vrot.lane.b32.xlu0 %v6050_v18, %s5737_s30 }
  0xf3   : > { %v6250_v10 = vpop.permute.xlu1 %832  ;;  %v6252_v15 = vpop.permute.xlu0 %830 }
  0xf4   : > { %9870 = vst [vmem:[#allocation47_spill] sm:$0xff] %v6250_v10  ;;  %9871 = vst [vmem:[#allocation48_spill] sm:$0xff] %v6252_v15 }
  0xf5   : > { %992 = vrot.lane.b32.xlu1 %v6081_v27, %s5737_s30  ;;  %990 = vrot.lane.b32.xlu0 %v6064_v22, %s5737_s30 }
  0xf7   : > { %v6258_v14 = vpop.permute.xlu1 %836  ;;  %v6260_v19 = vpop.permute.xlu0 %834 }
  0xf8   : > { %9872 = vst [vmem:[#allocation49_spill] sm:$0xff] %v6258_v14  ;;  %9873 = vst [vmem:[#allocation50_spill] sm:$0xff] %v6260_v19 }
  0xf9   : > { %996 = vrot.lane.b32.xlu1 %v6095_v31, %s5737_s30  ;;  %994 = vrot.lane.b32.xlu0 %v6078_v26, %s5737_s30  ;;  %v430_v26 = vld [vmem:[%s5802_s27 + $0x157] sm:$0xff]  ;;  %v429_v31 = vld [vmem:[%s5802_s27 + $0x14f] sm:$0xff] }
  0xfb   : > { %v6266_v18 = vpop.permute.xlu1 %840  ;;  %v6268_v23 = vpop.permute.xlu0 %838 }
  0xfc   : > { %9874 = vst [vmem:[#allocation51_spill] sm:$0xff] %v6266_v18  ;;  %9875 = vst [vmem:[#allocation52_spill] sm:$0xff] %v6268_v23 }
  0xfd   : > { %1000 = vrot.lane.b32.xlu1 %v6109_v35, %s5737_s30  ;;  %998 = vrot.lane.b32.xlu0 %v6092_v30, %s5737_s30  ;;  %v432_v30 = vld [vmem:[%s5802_s27 + $0x20] sm:$0xff] }
  0xff   : > { %v6274_v22 = vpop.permute.xlu1 %844  ;;  %v6276_v27 = vpop.permute.xlu0 %842 }
 0x100   : > { %9876 = vst [vmem:[#allocation53_spill] sm:$0xff] %v6274_v22  ;;  %9877 = vst [vmem:[#allocation54_spill] sm:$0xff] %v6276_v27  ;;  %v467_v22 = vld [vmem:[%s5802_s27 + $0x138] sm:$0xff] }
 0x101   : > { %1004 = vrot.lane.b32.xlu1 %v6121_v39, %s5737_s30  ;;  %1002 = vrot.lane.b32.xlu0 %v6106_v34, %s5737_s30  ;;  %v434_v34 = vld [vmem:[%s5802_s27 + $0x30] sm:$0xff] }
 0x103   : > { %v6284_v55 = vpop.permute.xlu1 %848  ;;  %v6286_v35 = vpop.permute.xlu0 %846 }
 0x104   : > { %9878 = vst [vmem:[#allocation55_spill] sm:$0xff] %v6284_v55  ;;  %9879 = vst [vmem:[#allocation56_spill] sm:$0xff] %v6286_v35 }
 0x105   : > { %1008 = vrot.lane.b32.xlu1 %v430_v26, %s5737_s30  ;;  %1006 = vrot.lane.b32.xlu0 %v429_v31, %s5737_s30  ;;  %v436_v31 = vld [vmem:[%s5802_s27 + $0x40] sm:$0xff] }
 0x107   : > { %v6292_v53 = vpop.permute.xlu1 %852  ;;  %v6294_v39 = vpop.permute.xlu0 %850 }
 0x108   : > { %9880 = vst [vmem:[#allocation57_spill] sm:$0xff] %v6292_v53  ;;  %9881 = vst [vmem:[#allocation58_spill] sm:$0xff] %v6294_v39  ;;  %v461_v53 = vld [vmem:[%s5802_s27 + $0x108] sm:$0xff]  ;;  %v463_v39 = vld [vmem:[%s5802_s27 + $0x118] sm:$0xff] }
 0x109   : > { %1094 = vrot.lane.b32.xlu1 %v432_v30, %s5738_s7  ;;  %1010 = vrot.lane.b32.xlu0 %v431_v50, %s5737_s30  ;;  %v438_v50 = vld [vmem:[%s5802_s27 + $0x50] sm:$0xff]  ;;  %s8145_s30 = scalar_lea.vmem %s9821_s6, %s5163_s22 }
 0x10b   : > { %v6300_v51 = vpop.permute.xlu1 %856  ;;  %v6302_v26 = vpop.permute.xlu0 %854 }
 0x10c   : > { %9882 = vst [vmem:[#allocation59_spill] sm:$0xff] %v6300_v51  ;;  %9883 = vst [vmem:[#allocation60_spill] sm:$0xff] %v6302_v26 }
 0x10d   : > { %1098 = vrot.lane.b32.xlu1 %v434_v34, %s5738_s7  ;;  %1096 = vrot.lane.b32.xlu0 %v433_v48, %s5738_s7  ;;  %v440_v48 = vld [vmem:[%s5802_s27 + $0x60] sm:$0xff] }
 0x10f   : > { %v6308_v49 = vpop.permute.xlu1 %860  ;;  %v6310_v30 = vpop.permute.xlu0 %858 }
 0x110   : > { %9884 = vst [vmem:[#allocation61_spill] sm:$0xff] %v6308_v49  ;;  %9885 = vst [vmem:[#allocation62_spill] sm:$0xff] %v6310_v30 }
 0x111   : > { %1102 = vrot.lane.b32.xlu1 %v436_v31, %s5738_s7  ;;  %1100 = vrot.lane.b32.xlu0 %v435_v46, %s5738_s7  ;;  %v442_v46 = vld [vmem:[%s5802_s27 + $0x70] sm:$0xff] }
 0x113   : > { %v6316_v47 = vpop.permute.xlu1 %864  ;;  %v6318_v34 = vpop.permute.xlu0 %862 }
 0x114   : > { %9886 = vst [vmem:[#allocation63_spill] sm:$0xff] %v6316_v47  ;;  %9887 = vst [vmem:[#allocation64_spill] sm:$0xff] %v6318_v34  ;;  %v441_v47 = vld [vmem:[%s5802_s27 + $0x68] sm:$0xff] }
 0x115   : > { %1106 = vrot.lane.b32.xlu1 %v438_v50, %s5738_s7  ;;  %1104 = vrot.lane.b32.xlu0 %v437_v44, %s5738_s7  ;;  %v444_v44 = vld [vmem:[%s5802_s27 + $0x80] sm:$0xff] }
 0x117   : > { %v6324_v45 = vpop.permute.xlu1 %868  ;;  %v6326_v31 = vpop.permute.xlu0 %866 }
 0x118   : > { %9888 = vst [vmem:[#allocation65_spill] sm:$0xff] %v6324_v45  ;;  %9889 = vst [vmem:[#allocation66_spill] sm:$0xff] %v6326_v31  ;;  %v443_v45 = vld [vmem:[%s5802_s27 + $0x78] sm:$0xff] }
 0x119   : > { %1110 = vrot.lane.b32.xlu1 %v440_v48, %s5738_s7  ;;  %1108 = vrot.lane.b32.xlu0 %v439_v42, %s5738_s7  ;;  %v446_v42 = vld [vmem:[%s5802_s27 + $0x90] sm:$0xff] }
 0x11b   : > { %v6332_v34 = vpop.permute.xlu1 %872  ;;  %v6334_v50 = vpop.permute.xlu0 %870 }
 0x11c   : > { %9890 = vst [vmem:[#allocation67_spill] sm:$0xff] %v6332_v34  ;;  %9891 = vst [vmem:[#allocation68_spill] sm:$0xff] %v6334_v50  ;;  %v445_v34 = vld [vmem:[%s5802_s27 + $0x88] sm:$0xff] }
 0x11d   : > { %1114 = vrot.lane.b32.xlu1 %v442_v46, %s5738_s7  ;;  %1112 = vrot.lane.b32.xlu0 %v441_v47, %s5738_s7  ;;  %v448_v47 = vld [vmem:[%s5802_s27 + $0xa0] sm:$0xff] }
 0x11f   : > { %v6340_v31 = vpop.permute.xlu1 %876  ;;  %v6342_v48 = vpop.permute.xlu0 %874 }
 0x120   : > { %9892 = vst [vmem:[#allocation69_spill] sm:$0xff] %v6340_v31  ;;  %9893 = vst [vmem:[#allocation70_spill] sm:$0xff] %v6342_v48  ;;  %v447_v31 = vld [vmem:[%s5802_s27 + $0x98] sm:$0xff] }
 0x121   : > { %1118 = vrot.lane.b32.xlu1 %v444_v44, %s5738_s7  ;;  %1116 = vrot.lane.b32.xlu0 %v443_v45, %s5738_s7  ;;  %v450_v45 = vld [vmem:[%s5802_s27 + $0xb0] sm:$0xff] }
 0x123   : > { %v6348_v50 = vpop.permute.xlu1 %880  ;;  %v6350_v46 = vpop.permute.xlu0 %878 }
 0x124   : > { %9894 = vst [vmem:[#allocation71_spill] sm:$0xff] %v6348_v50  ;;  %9895 = vst [vmem:[#allocation72_spill] sm:$0xff] %v6350_v46  ;;  %v449_v50 = vld [vmem:[%s5802_s27 + $0xa8] sm:$0xff] }
 0x125   : > { %1122 = vrot.lane.b32.xlu1 %v446_v42, %s5738_s7  ;;  %1120 = vrot.lane.b32.xlu0 %v445_v34, %s5738_s7  ;;  %v452_v34 = vld [vmem:[%s5802_s27 + $0xc0] sm:$0xff] }
 0x127   : > { %v6356_v48 = vpop.permute.xlu1 %884  ;;  %v6358_v44 = vpop.permute.xlu0 %882 }
 0x128   : > { %9896 = vst [vmem:[#allocation73_spill] sm:$0xff] %v6356_v48  ;;  %9897 = vst [vmem:[#allocation74_spill] sm:$0xff] %v6358_v44  ;;  %v451_v48 = vld [vmem:[%s5802_s27 + $0xb8] sm:$0xff] }
 0x129   : > { %1126 = vrot.lane.b32.xlu1 %v448_v47, %s5738_s7  ;;  %1124 = vrot.lane.b32.xlu0 %v447_v31, %s5738_s7  ;;  %v454_v31 = vld [vmem:[%s5802_s27 + $0xd0] sm:$0xff] }
 0x12b   : > { %v6364_v46 = vpop.permute.xlu1 %932  ;;  %v6366_v42 = vpop.permute.xlu0 %930 }
 0x12d   : > { %1130 = vrot.lane.b32.xlu1 %v450_v45, %s5738_s7  ;;  %1128 = vrot.lane.b32.xlu0 %v449_v50, %s5738_s7  ;;  %v456_v50 = vld [vmem:[%s5802_s27 + $0xe0] sm:$0xff] }
 0x12f   : > { %v6372_v44 = vpop.permute.xlu1 %936  ;;  %v6374_v47 = vpop.permute.xlu0 %934 }
 0x131   : > { %1134 = vrot.lane.b32.xlu1 %v452_v34, %s5738_s7  ;;  %1132 = vrot.lane.b32.xlu0 %v451_v48, %s5738_s7  ;;  %v458_v48 = vld [vmem:[%s5802_s27 + $0xf0] sm:$0xff] }
 0x133   : > { %v6380_v49 = vpop.permute.xlu1 %940  ;;  %v6382_v45 = vpop.permute.xlu0 %938 }
 0x134   : > { %9898 = vst [vmem:[#allocation75_spill] sm:$0xff] %v6380_v49 }
 0x135   : > { %1138 = vrot.lane.b32.xlu1 %v454_v31, %s5738_s7  ;;  %1136 = vrot.lane.b32.xlu0 %v453_v38, %s5738_s7  ;;  %v460_v38 = vld [vmem:[%s5802_s27 + $0x100] sm:$0xff] }
 0x137   : > { %v6388_v30 = vpop.permute.xlu1 %944  ;;  %v6390_v34 = vpop.permute.xlu0 %942 }
 0x138   : > { %9899 = vst [vmem:[#allocation76_spill] sm:$0xff] %v6388_v30  ;;  %9900 = vst [vmem:[#allocation77_spill] sm:$0xff] %v6390_v34 }
 0x139   : > { %1142 = vrot.lane.b32.xlu1 %v456_v50, %s5738_s7  ;;  %1140 = vrot.lane.b32.xlu0 %v455_v43, %s5738_s7  ;;  %v462_v43 = vld [vmem:[%s5802_s27 + $0x110] sm:$0xff] }
 0x13b   : > { %v6396_v51 = vpop.permute.xlu1 %948  ;;  %v6398_v31 = vpop.permute.xlu0 %946 }
 0x13c   : > { %9901 = vst [vmem:[#allocation78_spill] sm:$0xff] %v6396_v51  ;;  %9902 = vst [vmem:[#allocation79_spill] sm:$0xff] %v6398_v31  ;;  %v6638_v51 = vld [vmem:[%s5802_s27 + $0xf1] sm:$0xff]  ;;  %v6652_v31 = vld [vmem:[%s5802_s27 + $0x101] sm:$0xff] }
 0x13d   : > { %1146 = vrot.lane.b32.xlu1 %v458_v48, %s5738_s7  ;;  %1144 = vrot.lane.b32.xlu0 %v457_v37, %s5738_s7  ;;  %v464_v37 = vld [vmem:[%s5802_s27 + $0x120] sm:$0xff] }
 0x13f   : > { %v6404_v26 = vpop.permute.xlu1 %952  ;;  %v6406_v50 = vpop.permute.xlu0 %950 }
 0x140   : > { %9903 = vst [vmem:[#allocation80_spill] sm:$0xff] %v6404_v26  ;;  %9904 = vst [vmem:[#allocation81_spill] sm:$0xff] %v6406_v50 }
 0x141   : > { %1150 = vrot.lane.b32.xlu1 %v460_v38, %s5738_s7  ;;  %1148 = vrot.lane.b32.xlu0 %v459_v40, %s5738_s7  ;;  %v466_v40 = vld [vmem:[%s5802_s27 + $0x130] sm:$0xff] }
 0x143   : > { %v6412_v36 = vpop.permute.xlu1 %956  ;;  %v6414_v48 = vpop.permute.xlu0 %954 }
 0x144   : > { %9905 = vst [vmem:[#allocation82_spill] sm:$0xff] %v6412_v36  ;;  %9906 = vst [vmem:[#allocation83_spill] sm:$0xff] %v6414_v48  ;;  %v6596_v36 = vld [vmem:[%s5802_s27 + $0xc1] sm:$0xff]  ;;  %v6607_v48 = vld [vmem:[%s5802_s27 + $0xd9] sm:$0xff] }
 0x145   : > { %1154 = vrot.lane.b32.xlu1 %v462_v43, %s5738_s7  ;;  %1152 = vrot.lane.b32.xlu0 %v461_v53, %s5738_s7  ;;  %v468_v53 = vld [vmem:[%s5802_s27 + $0x140] sm:$0xff] }
 0x147   : > { %v6420_v55 = vpop.permute.xlu1 %960  ;;  %v6422_v38 = vpop.permute.xlu0 %958 }
 0x148   : > { %9907 = vst [vmem:[#allocation84_spill] sm:$0xff] %v6420_v55  ;;  %9908 = vst [vmem:[#allocation85_spill] sm:$0xff] %v6422_v38 }
 0x149   : > { %1158 = vrot.lane.b32.xlu1 %v464_v37, %s5738_s7  ;;  %1156 = vrot.lane.b32.xlu0 %v463_v39, %s5738_s7  ;;  %v470_v39 = vld [vmem:[%s5802_s27 + $0x150] sm:$0xff] }
 0x14b   : > { %v6428_v35 = vpop.permute.xlu1 %964  ;;  %v6430_v43 = vpop.permute.xlu0 %962 }
 0x14c   : > { %9909 = vst [vmem:[#allocation86_spill] sm:$0xff] %v6428_v35  ;;  %9910 = vst [vmem:[#allocation87_spill] sm:$0xff] %v6430_v43 }
 0x14d   : > { %1162 = vrot.lane.b32.xlu1 %v466_v40, %s5738_s7  ;;  %1160 = vrot.lane.b32.xlu0 %v465_v41, %s5738_s7  ;;  %v472_v41 = vld [vmem:[%s5802_s27 + $0x160] sm:$0xf]  ;;  %v471_v40 = vld [vmem:[%s5802_s27 + $0x158] sm:$0xff] }
 0x14f   : > { %v6436_v27 = vpop.permute.xlu1 %968  ;;  %v6438_v37 = vpop.permute.xlu0 %966 }
 0x150   : > { %9911 = vst [vmem:[#allocation88_spill] sm:$0xff] %v6436_v27  ;;  %9912 = vst [vmem:[#allocation89_spill] sm:$0xff] %v6438_v37 }
 0x151   : > { %1166 = vrot.lane.b32.xlu1 %v468_v53, %s5738_s7  ;;  %1164 = vrot.lane.b32.xlu0 %v467_v22, %s5738_s7  ;;  %v474_v22 = vld [vmem:[%s5802_s27 + $0x29] sm:$0xff]  ;;  %v473_v53 = vld [vmem:[%s5802_s27 + $0x21] sm:$0xff] }
 0x153   : > { %v6444_v18 = vpop.permute.xlu1 %972  ;;  %v6446_v33 = vpop.permute.xlu0 %970 }
 0x154   : > { %9913 = vst [vmem:[#allocation90_spill] sm:$0xff] %v6444_v18  ;;  %9914 = vst [vmem:[#allocation91_spill] sm:$0xff] %v6446_v33 }
 0x155   : > { %1170 = vrot.lane.b32.xlu1 %v470_v39, %s5738_s7  ;;  %1168 = vrot.lane.b32.xlu0 %v469_v32, %s5738_s7  ;;  %v6467_v32 = vld [vmem:[%s5802_s27 + $0x39] sm:$0xff] }
 0x157   : > { %v6452_v27 = vpop.permute.xlu1 %976  ;;  %v6454_v37 = vpop.permute.xlu0 %974 }
 0x158   : > { %9915 = vst [vmem:[#allocation92_spill] sm:$0xff] %v6452_v27  ;;  %9916 = vst [vmem:[#allocation93_spill] sm:$0xff] %v6454_v37  ;;  %v6470_v27 = vld [vmem:[%s5802_s27 + $0x31] sm:$0xff] }
 0x159   : > { %1174 = vrot.lane.b32.xlu1 %v472_v41, %s5738_s7  ;;  %1172 = vrot.lane.b32.xlu0 %v471_v40, %s5738_s7  ;;  %s5748_s7 = smov 16  }
 0x15b   : > { %v6460_v18 = vpop.permute.xlu1 %980  ;;  %v6462_v39 = vpop.permute.xlu0 %978 }
 0x15c   : > { %9917 = vst [vmem:[#allocation94_spill] sm:$0xff] %v6460_v18  ;;  %9918 = vst [vmem:[#allocation95_spill] sm:$0xff] %v6462_v39  ;;  %v6481_v18 = vld [vmem:[%s5802_s27 + $0x49] sm:$0xff] }
 0x15d   : > { %1260 = vrot.lane.b32.xlu1 %v474_v22, %s5739_s8  ;;  %1258 = vrot.lane.b32.xlu0 %v473_v53, %s5739_s8  ;;  %v6484_v22 = vld [vmem:[%s5802_s27 + $0x41] sm:$0xff] }
 0x15f   : > { %v6472_v41 = vpop.permute.xlu1 %984  ;;  %v6474_v40 = vpop.permute.xlu0 %982 }
 0x160   : > { %9919 = vst [vmem:[#allocation96_spill] sm:$0xff] %v6472_v41  ;;  %9920 = vst [vmem:[#allocation97_spill] sm:$0xff] %v6474_v40  ;;  %v6495_v41 = vld [vmem:[%s5802_s27 + $0x59] sm:$0xff]  ;;  %v6498_v40 = vld [vmem:[%s5802_s27 + $0x51] sm:$0xff] }
 0x161   : > { %1264 = vrot.lane.b32.xlu1 %v6467_v32, %s5739_s8  ;;  %1262 = vrot.lane.b32.xlu0 %v6470_v27, %s5739_s8 }
 0x163   : > { %v6486_v53 = vpop.permute.xlu1 %988  ;;  %v6488_v39 = vpop.permute.xlu0 %986 }
 0x164   : > { %9921 = vst [vmem:[#allocation98_spill] sm:$0xff] %v6486_v53  ;;  %9922 = vst [vmem:[#allocation99_spill] sm:$0xff] %v6488_v39  ;;  %v6509_v53 = vld [vmem:[%s5802_s27 + $0x69] sm:$0xff]  ;;  %v6512_v39 = vld [vmem:[%s5802_s27 + $0x61] sm:$0xff] }
 0x165   : > { %1268 = vrot.lane.b32.xlu1 %v6481_v18, %s5739_s8  ;;  %1266 = vrot.lane.b32.xlu0 %v6484_v22, %s5739_s8 }
 0x167   : > { %v6500_v37 = vpop.permute.xlu1 %992  ;;  %v6502_v33 = vpop.permute.xlu0 %990 }
 0x168   : > { %9923 = vst [vmem:[#allocation100_spill] sm:$0xff] %v6500_v37  ;;  %9924 = vst [vmem:[#allocation101_spill] sm:$0xff] %v6502_v33  ;;  %v6523_v37 = vld [vmem:[%s5802_s27 + $0x79] sm:$0xff]  ;;  %v6526_v33 = vld [vmem:[%s5802_s27 + $0x71] sm:$0xff] }
 0x169   : > { %1272 = vrot.lane.b32.xlu1 %v6495_v41, %s5739_s8  ;;  %1270 = vrot.lane.b32.xlu0 %v6498_v40, %s5739_s8 }
 0x16b   : > { %v6514_v35 = vpop.permute.xlu1 %996  ;;  %v6516_v23 = vpop.permute.xlu0 %994 }
 0x16c   : > { %9925 = vst [vmem:[#allocation102_spill] sm:$0xff] %v6514_v35  ;;  %9926 = vst [vmem:[#allocation103_spill] sm:$0xff] %v6516_v23  ;;  %v6537_v35 = vld [vmem:[%s5802_s27 + $0x89] sm:$0xff]  ;;  %v6540_v23 = vld [vmem:[%s5802_s27 + $0x81] sm:$0xff] }
 0x16d   : > { %1276 = vrot.lane.b32.xlu1 %v6509_v53, %s5739_s8  ;;  %1274 = vrot.lane.b32.xlu0 %v6512_v39, %s5739_s8 }
 0x16f   : > { %v6528_v28 = vpop.permute.xlu1 %1000  ;;  %v6530_v43 = vpop.permute.xlu0 %998 }
 0x170   : > { %9927 = vst [vmem:[#allocation104_spill] sm:$0xff] %v6528_v28  ;;  %9928 = vst [vmem:[#allocation105_spill] sm:$0xff] %v6530_v43  ;;  %v6551_v28 = vld [vmem:[%s5802_s27 + $0x99] sm:$0xff]  ;;  %v6554_v43 = vld [vmem:[%s5802_s27 + $0x91] sm:$0xff] }
 0x171   : > { %1280 = vrot.lane.b32.xlu1 %v6523_v37, %s5739_s8  ;;  %1278 = vrot.lane.b32.xlu0 %v6526_v33, %s5739_s8 }
 0x173   : > { %v6542_v14 = vpop.permute.xlu1 %1004  ;;  %v6544_v29 = vpop.permute.xlu0 %1002 }
 0x174   : > { %9929 = vst [vmem:[#allocation106_spill] sm:$0xff] %v6542_v14  ;;  %9930 = vst [vmem:[#allocation107_spill] sm:$0xff] %v6544_v29  ;;  %v6565_v14 = vld [vmem:[%s5802_s27 + $0xa9] sm:$0xff]  ;;  %v6568_v29 = vld [vmem:[%s5802_s27 + $0xa1] sm:$0xff] }
 0x175   : > { %1284 = vrot.lane.b32.xlu1 %v6537_v35, %s5739_s8  ;;  %1282 = vrot.lane.b32.xlu0 %v6540_v23, %s5739_s8 }
 0x177   : > { %v6556_v55 = vpop.permute.xlu1 %1008  ;;  %v6558_v19 = vpop.permute.xlu0 %1006 }
 0x178   : > { %9931 = vst [vmem:[#allocation108_spill] sm:$0xff] %v6556_v55  ;;  %9932 = vst [vmem:[#allocation109_spill] sm:$0xff] %v6558_v19  ;;  %v6579_v55 = vld [vmem:[%s5802_s27 + $0xb9] sm:$0xff]  ;;  %v6582_v19 = vld [vmem:[%s5802_s27 + $0xb1] sm:$0xff] }
 0x179   : > { %1288 = vrot.lane.b32.xlu1 %v6551_v28, %s5739_s8  ;;  %1286 = vrot.lane.b32.xlu0 %v6554_v43, %s5739_s8 }
 0x17b   : > { %v6570_v24 = vpop.permute.xlu1 %1094  ;;  %v6572_v38 = vpop.permute.xlu0 %1010 }
 0x17c   : > { %9933 = vst [vmem:[#allocation110_spill] sm:$0xff] %v6572_v38  ;;  %v6593_v38 = vld [vmem:[%s5802_s27 + $0xc9] sm:$0xff] }
 0x17d   : > { %1292 = vrot.lane.b32.xlu1 %v6565_v14, %s5739_s8  ;;  %1290 = vrot.lane.b32.xlu0 %v6568_v29, %s5739_s8 }
 0x17f   : > { %v6584_v10 = vpop.permute.xlu1 %1098  ;;  %v6586_v25 = vpop.permute.xlu0 %1096 }
 0x181   : > { %1296 = vrot.lane.b32.xlu1 %v6579_v55, %s5739_s8  ;;  %1294 = vrot.lane.b32.xlu0 %v6582_v19, %s5739_s8 }
 0x183   : > { %v6598_v15 = vpop.permute.xlu1 %1102  ;;  %v6600_v20 = vpop.permute.xlu0 %1100 }
 0x185   : > { %1300 = vrot.lane.b32.xlu1 %v6593_v38, %s5739_s8  ;;  %1298 = vrot.lane.b32.xlu0 %v6596_v36, %s5739_s8 }
 0x187   : > { %v6612_v21 = vpop.permute.xlu1 %1106  ;;  %v6614_v26 = vpop.permute.xlu0 %1104 }
 0x188   : > { %9934 = vst [vmem:[#allocation111_spill] sm:$0xff] %v6612_v21  ;;  %9935 = vst [vmem:[#allocation112_spill] sm:$0xff] %v6614_v26 }
 0x189   : > { %1304 = vrot.lane.b32.xlu1 %v6607_v48, %s5739_s8  ;;  %1302 = vrot.lane.b32.xlu0 %v6610_v6, %s5739_s8 }
 0x18b   : > { %v6626_v50 = vpop.permute.xlu1 %1110  ;;  %v6628_v2 = vpop.permute.xlu0 %1108 }
 0x18c   : > { %9936 = vst [vmem:[#allocation113_spill] sm:$0xff] %v6626_v50  ;;  %9937 = vst [vmem:[#allocation114_spill] sm:$0xff] %v6628_v2  ;;  %v6649_v50 = vld [vmem:[%s5802_s27 + $0x109] sm:$0xff] }
 0x18d   : > { %1308 = vrot.lane.b32.xlu1 %v6621_v11, %s5739_s8  ;;  %1306 = vrot.lane.b32.xlu0 %v6624_v16, %s5739_s8 }
 0x18f   : > { %v6640_v7 = vpop.permute.xlu1 %1114  ;;  %v6642_v12 = vpop.permute.xlu0 %1112 }
 0x190   : > { %9938 = vst [vmem:[#allocation115_spill] sm:$0xff] %v6640_v7  ;;  %9939 = vst [vmem:[#allocation116_spill] sm:$0xff] %v6642_v12  ;;  %v6663_v7 = vld [vmem:[%s5802_s27 + $0x119] sm:$0xff]  ;;  %v6666_v12 = vld [vmem:[%s5802_s27 + $0x111] sm:$0xff] }
 0x191   : > { %1312 = vrot.lane.b32.xlu1 %v6635_v17, %s5739_s8  ;;  %1310 = vrot.lane.b32.xlu0 %v6638_v51, %s5739_s8 }
 0x193   : > { %v6654_v62 = vpop.permute.xlu1 %1118  ;;  %v6656_v13 = vpop.permute.xlu0 %1116 }
 0x194   : > { %9940 = vst [vmem:[#allocation117_spill] sm:$0xff] %v6654_v62  ;;  %9941 = vst [vmem:[#allocation118_spill] sm:$0xff] %v6656_v13  ;;  %v6677_v62 = vld [vmem:[%s5802_s27 + $0x129] sm:$0xff]  ;;  %v6680_v13 = vld [vmem:[%s5802_s27 + $0x121] sm:$0xff] }
 0x195   : > { %1316 = vrot.lane.b32.xlu1 %v6649_v50, %s5739_s8  ;;  %1314 = vrot.lane.b32.xlu0 %v6652_v31, %s5739_s8 }
 0x197   : > { %v6668_v2 = vpop.permute.xlu1 %1122  ;;  %v6670_v30 = vpop.permute.xlu0 %1120 }
 0x198   : > { %9942 = vst [vmem:[#allocation119_spill] sm:$0xff] %v6668_v2  ;;  %9943 = vst [vmem:[#allocation120_spill] sm:$0xff] %v6670_v30  ;;  %v6691_v2 = vld [vmem:[%s5802_s27 + $0x139] sm:$0xff]  ;;  %v6694_v30 = vld [vmem:[%s5802_s27 + $0x131] sm:$0xff] }
 0x199   : > { %1320 = vrot.lane.b32.xlu1 %v6663_v7, %s5739_s8  ;;  %1318 = vrot.lane.b32.xlu0 %v6666_v12, %s5739_s8 }
 0x19b   : > { %v6682_v3 = vpop.permute.xlu1 %1126  ;;  %v6684_v8 = vpop.permute.xlu0 %1124 }
 0x19c   : > { %9944 = vst [vmem:[#allocation121_spill] sm:$0xff] %v6682_v3  ;;  %9945 = vst [vmem:[#allocation122_spill] sm:$0xff] %v6684_v8  ;;  %v6705_v3 = vld [vmem:[%s5802_s27 + $0x149] sm:$0xff]  ;;  %v6708_v8 = vld [vmem:[%s5802_s27 + $0x141] sm:$0xff] }
 0x19d   : > { %1324 = vrot.lane.b32.xlu1 %v6677_v62, %s5739_s8  ;;  %1322 = vrot.lane.b32.xlu0 %v6680_v13, %s5739_s8 }
 0x19f   : > { %v6696_v21 = vpop.permute.xlu1 %1130  ;;  %v6698_v34 = vpop.permute.xlu0 %1128 }
 0x1a0   : > { %9946 = vst [vmem:[#allocation123_spill] sm:$0xff] %v6696_v21  ;;  %9947 = vst [vmem:[#allocation124_spill] sm:$0xff] %v6698_v34  ;;  %v6719_v21 = vld [vmem:[%s5802_s27 + $0x159] sm:$0xff]  ;;  %v6722_v34 = vld [vmem:[%s5802_s27 + $0x151] sm:$0xff] }
 0x1a1   : > { %1328 = vrot.lane.b32.xlu1 %v6691_v2, %s5739_s8  ;;  %1326 = vrot.lane.b32.xlu0 %v6694_v30, %s5739_s8 }
 0x1a3   : > { %v6710_v58 = vpop.permute.xlu1 %1134  ;;  %v6712_v9 = vpop.permute.xlu0 %1132 }
 0x1a4   : > { %9948 = vst [vmem:[#allocation125_spill] sm:$0xff] %v6710_v58  ;;  %9949 = vst [vmem:[#allocation126_spill] sm:$0xff] %v6712_v9  ;;  %v513_v58 = vld [vmem:[%s5802_s27 + $0x161] sm:$0xf] }
 0x1a5   : > { %1332 = vrot.lane.b32.xlu1 %v6705_v3, %s5739_s8  ;;  %1330 = vrot.lane.b32.xlu0 %v6708_v8, %s5739_s8 }
 0x1a7   : > { %v6724_v26 = vpop.permute.xlu1 %1138  ;;  %v6726_v49 = vpop.permute.xlu0 %1136 }
 0x1a8   : > { %9950 = vst [vmem:[#allocation127_spill] sm:$0xff] %v6724_v26  ;;  %9951 = vst [vmem:[#allocation128_spill] sm:$0xff] %v6726_v49 }
 0x1a9   : > { %1336 = vrot.lane.b32.xlu1 %v6719_v21, %s5739_s8  ;;  %1334 = vrot.lane.b32.xlu0 %v6722_v34, %s5739_s8 }
 0x1ab   : > { %v6733_v9 = vpop.permute.xlu1 %1142  ;;  %v6735_v63 = vpop.permute.xlu0 %1140 }
 0x1ac   : > { %9952 = vst [vmem:[#allocation129_spill] sm:$0xff] %v6733_v9  ;;  %9953 = vst [vmem:[#allocation130_spill] sm:$0xff] %v6735_v63 }
 0x1ad   : > { %1384 = vrot.lane.b32.xlu1 %v6470_v27, %s5740_s9  ;;  %1338 = vrot.lane.b32.xlu0 %v513_v58, %s5739_s8  ;;  %s5753_s8 = smov 64  }
 0x1af   : > { %v6740_v26 = vpop.permute.xlu1 %1146  ;;  %v6742_v49 = vpop.permute.xlu0 %1144 }
 0x1b0   : > { %9954 = vst [vmem:[#allocation131_spill] sm:$0xff] %v6740_v26  ;;  %9955 = vst [vmem:[#allocation132_spill] sm:$0xff] %v6742_v49 }
 0x1b1   : > { %1388 = vrot.lane.b32.xlu1 %v6484_v22, %s5740_s9  ;;  %1386 = vrot.lane.b32.xlu0 %v6467_v32, %s5740_s9 }
 0x1b3   : > { %v6748_v4 = vpop.permute.xlu1 %1150  ;;  %v6750_v9 = vpop.permute.xlu0 %1148 }
 0x1b4   : > { %9956 = vst [vmem:[#allocation133_spill] sm:$0xff] %v6748_v4  ;;  %9957 = vst [vmem:[#allocation134_spill] sm:$0xff] %v6750_v9 }
 0x1b5   : > { %1392 = vrot.lane.b32.xlu1 %v6498_v40, %s5740_s9  ;;  %1390 = vrot.lane.b32.xlu0 %v6481_v18, %s5740_s9 }
 0x1b7   : > { %v6756_v58 = vpop.permute.xlu1 %1154  ;;  %v6758_v27 = vpop.permute.xlu0 %1152 }
 0x1b8   : > { %9958 = vst [vmem:[#allocation135_spill] sm:$0xff] %v6756_v58  ;;  %9959 = vst [vmem:[#allocation136_spill] sm:$0xff] %v6758_v27  ;;  %v525_v58 = vld [vmem:[%s5802_s27 + $0x72] sm:$0xff] }
 0x1b9   : > { %1396 = vrot.lane.b32.xlu1 %v6512_v39, %s5740_s9  ;;  %1394 = vrot.lane.b32.xlu0 %v6495_v41, %s5740_s9  ;;  %v537_v27 = vld [vmem:[%s5802_s27 + $0xd2] sm:$0xff] }
 0x1bb   : > { %v6764_v32 = vpop.permute.xlu1 %1158  ;;  %v6766_v22 = vpop.permute.xlu0 %1156 }
 0x1bc   : > { %9960 = vst [vmem:[#allocation137_spill] sm:$0xff] %v6764_v32  ;;  %9961 = vst [vmem:[#allocation138_spill] sm:$0xff] %v6766_v22  ;;  %v523_v32 = vld [vmem:[%s5802_s27 + $0x62] sm:$0xff] }
 0x1bd   : > { %1400 = vrot.lane.b32.xlu1 %v6526_v33, %s5740_s9  ;;  %1398 = vrot.lane.b32.xlu0 %v6509_v53, %s5740_s9 }
 0x1bf   : > { %v6772_v18 = vpop.permute.xlu1 %1162  ;;  %v6774_v40 = vpop.permute.xlu0 %1160 }
 0x1c0   : > { %9962 = vst [vmem:[#allocation139_spill] sm:$0xff] %v6772_v18  ;;  %9963 = vst [vmem:[#allocation140_spill] sm:$0xff] %v6774_v40  ;;  %v521_v18 = vld [vmem:[%s5802_s27 + $0x52] sm:$0xff] }
 0x1c1   : > { %1404 = vrot.lane.b32.xlu1 %v6540_v23, %s5740_s9  ;;  %1402 = vrot.lane.b32.xlu0 %v6523_v37, %s5740_s9 }
 0x1c3   : > { %v6780_v39 = vpop.permute.xlu1 %1166  ;;  %v6782_v41 = vpop.permute.xlu0 %1164 }
 0x1c4   : > { %9964 = vst [vmem:[#allocation141_spill] sm:$0xff] %v6780_v39  ;;  %9965 = vst [vmem:[#allocation142_spill] sm:$0xff] %v6782_v41  ;;  %v519_v39 = vld [vmem:[%s5802_s27 + $0x42] sm:$0xff] }
 0x1c5   : > { %1408 = vrot.lane.b32.xlu1 %v6554_v43, %s5740_s9  ;;  %1406 = vrot.lane.b32.xlu0 %v6537_v35, %s5740_s9 }
 0x1c7   : > { %v6788_v33 = vpop.permute.xlu1 %1170  ;;  %v6790_v53 = vpop.permute.xlu0 %1168 }
 0x1c8   : > { %9966 = vst [vmem:[#allocation143_spill] sm:$0xff] %v6788_v33  ;;  %9967 = vst [vmem:[#allocation144_spill] sm:$0xff] %v6790_v53  ;;  %v517_v33 = vld [vmem:[%s5802_s27 + $0x32] sm:$0xff] }
 0x1c9   : > { %1412 = vrot.lane.b32.xlu1 %v6568_v29, %s5740_s9  ;;  %1410 = vrot.lane.b32.xlu0 %v6551_v28, %s5740_s9 }
 0x1cb   : > { %v6796_v23 = vpop.permute.xlu1 %1174  ;;  %v6798_v37 = vpop.permute.xlu0 %1172 }
 0x1cc   : > { %9968 = vst [vmem:[#allocation145_spill] sm:$0xff] %v6796_v23  ;;  %9969 = vst [vmem:[#allocation146_spill] sm:$0xff] %v6798_v37 }
 0x1cd   : > { %1416 = vrot.lane.b32.xlu1 %v6582_v19, %s5740_s9  ;;  %1414 = vrot.lane.b32.xlu0 %v6565_v14, %s5740_s9 }
 0x1cf   : > { %v6804_v35 = vpop.permute.xlu1 %1260  ;;  %v6806_v43 = vpop.permute.xlu0 %1258 }
 0x1d1   : > { %1420 = vrot.lane.b32.xlu1 %v6596_v36, %s5740_s9  ;;  %1418 = vrot.lane.b32.xlu0 %v6579_v55, %s5740_s9 }
 0x1d3   : > { %v6812_v28 = vpop.permute.xlu1 %1264  ;;  %v6814_v29 = vpop.permute.xlu0 %1262 }
 0x1d5   : > { %1424 = vrot.lane.b32.xlu1 %v6610_v6, %s5740_s9  ;;  %1422 = vrot.lane.b32.xlu0 %v6593_v38, %s5740_s9 }
 0x1d7   : > { %v6820_v14 = vpop.permute.xlu1 %1268  ;;  %v6822_v19 = vpop.permute.xlu0 %1266 }
 0x1d9   : > { %1428 = vrot.lane.b32.xlu1 %v6624_v16, %s5740_s9  ;;  %1426 = vrot.lane.b32.xlu0 %v6607_v48, %s5740_s9 }
 0x1db   : > { %v6828_v36 = vpop.permute.xlu1 %1272  ;;  %v6830_v55 = vpop.permute.xlu0 %1270 }
 0x1dd   : > { %1432 = vrot.lane.b32.xlu1 %v6638_v51, %s5740_s9  ;;  %1430 = vrot.lane.b32.xlu0 %v6621_v11, %s5740_s9 }
 0x1df   : > { %v6836_v6 = vpop.permute.xlu1 %1276  ;;  %v6838_v38 = vpop.permute.xlu0 %1274 }
 0x1e1   : > { %1436 = vrot.lane.b32.xlu1 %v6652_v31, %s5740_s9  ;;  %1434 = vrot.lane.b32.xlu0 %v6635_v17, %s5740_s9 }
 0x1e3   : > { %v6844_v16 = vpop.permute.xlu1 %1280  ;;  %v6846_v48 = vpop.permute.xlu0 %1278 }
 0x1e4   : > { %9970 = vst [vmem:[#allocation147_spill] sm:$0xff] %v6844_v16 }
 0x1e5   : > { %1440 = vrot.lane.b32.xlu1 %v6666_v12, %s5740_s9  ;;  %1438 = vrot.lane.b32.xlu0 %v6649_v50, %s5740_s9 }
 0x1e7   : > { %v6852_v51 = vpop.permute.xlu1 %1284  ;;  %v6854_v11 = vpop.permute.xlu0 %1282 }
 0x1e8   : > { %9971 = vst [vmem:[#allocation148_spill] sm:$0xff] %v6852_v51  ;;  %9972 = vst [vmem:[#allocation149_spill] sm:$0xff] %v6854_v11  ;;  %v587_v51 = vld [vmem:[%s5802_s27 + $0x11b] sm:$0xff]  ;;  %v589_v11 = vld [vmem:[%s5802_s27 + $0x12b] sm:$0xff] }
 0x1e9   : > { %1444 = vrot.lane.b32.xlu1 %v6680_v13, %s5740_s9  ;;  %1442 = vrot.lane.b32.xlu0 %v6663_v7, %s5740_s9 }
 0x1eb   : > { %v6860_v17 = vpop.permute.xlu1 %1288  ;;  %v6862_v31 = vpop.permute.xlu0 %1286 }
 0x1ec   : > { %9973 = vst [vmem:[#allocation150_spill] sm:$0xff] %v6860_v17  ;;  %9974 = vst [vmem:[#allocation151_spill] sm:$0xff] %v6862_v31  ;;  %v583_v17 = vld [vmem:[%s5802_s27 + $0xfb] sm:$0xff]  ;;  %v585_v31 = vld [vmem:[%s5802_s27 + $0x10b] sm:$0xff] }
 0x1ed   : > { %1448 = vrot.lane.b32.xlu1 %v6694_v30, %s5740_s9  ;;  %1446 = vrot.lane.b32.xlu0 %v6677_v62, %s5740_s9  ;;  %v514_v62 = vld [vmem:[%s5802_s27 + $0x161] sm:$0xff] }
 0x1ef   : > { %v6868_v12 = vpop.permute.xlu1 %1292  ;;  %v6870_v50 = vpop.permute.xlu0 %1290 }
 0x1f0   : > { %9975 = vst [vmem:[#allocation152_spill] sm:$0xff] %v6868_v12  ;;  %9976 = vst [vmem:[#allocation153_spill] sm:$0xff] %v6870_v50  ;;  %v581_v50 = vld [vmem:[%s5802_s27 + $0xeb] sm:$0xff] }
 0x1f1   : > { %1452 = vrot.lane.b32.xlu1 %v6708_v8, %s5740_s9  ;;  %1450 = vrot.lane.b32.xlu0 %v6691_v2, %s5740_s9  ;;  %v516_v8 = vld [vmem:[%s5802_s27 + $0x171] sm:$0xf]  ;;  %v515_v2 = vld [vmem:[%s5802_s27 + $0x169] sm:$0xff] }
 0x1f3   : > { %v6876_v13 = vpop.permute.xlu1 %1296  ;;  %v6878_v7 = vpop.permute.xlu0 %1294 }
 0x1f4   : > { %9977 = vst [vmem:[#allocation154_spill] sm:$0xff] %v6876_v13  ;;  %9978 = vst [vmem:[#allocation155_spill] sm:$0xff] %v6878_v7 }
 0x1f5   : > { %1456 = vrot.lane.b32.xlu1 %v6722_v34, %s5740_s9  ;;  %1454 = vrot.lane.b32.xlu0 %v6705_v3, %s5740_s9  ;;  %v518_v3 = vld [vmem:[%s5802_s27 + $0x3a] sm:$0xff] }
 0x1f7   : > { %v6885_v30 = vpop.permute.xlu1 %1300  ;;  %v6887_v23 = vpop.permute.xlu0 %1298 }
 0x1f8   : > { %9979 = vst [vmem:[#allocation156_spill] sm:$0xff] %v6885_v30  ;;  %9980 = vst [vmem:[#allocation157_spill] sm:$0xff] %v6887_v23  ;;  %v9822_v30 = vmov 0.0|0.0  }
 0x1f9   : > { %1460 = vrot.lane.b32.xlu1 %v514_v62, %s5740_s9  ;;  %1458 = vrot.lane.b32.xlu0 %v6719_v21, %s5740_s9  ;;  %v520_v21 = vld [vmem:[%s5802_s27 + $0x4a] sm:$0xff] }
 0x1fa   : > { %5618 = vmatprep.subr.bf16.mxu0 %v9822_v30  ;;  %5637 = vmatprep.subr.bf16.mxu1 %v9822_v30 }
 0x1fb   : > { %v6894_v37 = vpop.permute.xlu1 %1304  ;;  %v6896_v34 = vpop.permute.xlu0 %1302 }
 0x1fc   : > { %9981 = vst [vmem:[#allocation158_spill] sm:$0xff] %v6894_v37  ;;  %9982 = vst [vmem:[#allocation159_spill] sm:$0xff] %v6896_v34 }
 0x1fd   : > { %1464 = vrot.lane.b32.xlu1 %v516_v8, %s5740_s9  ;;  %1462 = vrot.lane.b32.xlu0 %v515_v2, %s5740_s9  ;;  %v522_v2 = vld [vmem:[%s5802_s27 + $0x5a] sm:$0xff] }
 0x1ff   : > { %v6902_v53 = vpop.permute.xlu1 %1308  ;;  %v6904_v62 = vpop.permute.xlu0 %1306 }
 0x200   : > { %9983 = vst [vmem:[#allocation160_spill] sm:$0xff] %v6902_v53  ;;  %9984 = vst [vmem:[#allocation161_spill] sm:$0xff] %v6904_v62 }
 0x201   : > { %1550 = vrot.lane.b32.xlu1 %v518_v3, %s5741_s10  ;;  %1548 = vrot.lane.b32.xlu0 %v517_v33, %s5741_s10  ;;  %v524_v33 = vld [vmem:[%s5802_s27 + $0x6a] sm:$0xff] }
 0x203   : > { %v6910_v41 = vpop.permute.xlu1 %1312  ;;  %v6912_v8 = vpop.permute.xlu0 %1310 }
 0x204   : > { %9985 = vst [vmem:[#allocation162_spill] sm:$0xff] %v6910_v41  ;;  %9986 = vst [vmem:[#allocation163_spill] sm:$0xff] %v6912_v8  ;;  %v541_v41 = vld [vmem:[%s5802_s27 + $0xf2] sm:$0xff]  ;;  %v543_v8 = vld [vmem:[%s5802_s27 + $0x102] sm:$0xff] }
 0x205   : > { %1554 = vrot.lane.b32.xlu1 %v520_v21, %s5741_s10  ;;  %1552 = vrot.lane.b32.xlu0 %v519_v39, %s5741_s10  ;;  %v526_v39 = vld [vmem:[%s5802_s27 + $0x7a] sm:$0xff] }
 0x207   : > { %v6918_v40 = vpop.permute.xlu1 %1316  ;;  %v6920_v3 = vpop.permute.xlu0 %1314 }
 0x208   : > { %9987 = vst [vmem:[#allocation164_spill] sm:$0xff] %v6918_v40  ;;  %9988 = vst [vmem:[#allocation165_spill] sm:$0xff] %v6920_v3  ;;  %v539_v3 = vld [vmem:[%s5802_s27 + $0xe2] sm:$0xff] }
 0x209   : > { %1558 = vrot.lane.b32.xlu1 %v522_v2, %s5741_s10  ;;  %1556 = vrot.lane.b32.xlu0 %v521_v18, %s5741_s10  ;;  %v528_v18 = vld [vmem:[%s5802_s27 + $0x8a] sm:$0xff] }
 0x20b   : > { %v6926_v22 = vpop.permute.xlu1 %1320  ;;  %v6928_v21 = vpop.permute.xlu0 %1318 }
 0x20c   : > { %9989 = vst [vmem:[#allocation166_spill] sm:$0xff] %v6926_v22  ;;  %9990 = vst [vmem:[#allocation167_spill] sm:$0xff] %v6928_v21  ;;  %v527_v22 = vld [vmem:[%s5802_s27 + $0x82] sm:$0xff] }
 0x20d   : > { %1562 = vrot.lane.b32.xlu1 %v524_v33, %s5741_s10  ;;  %1560 = vrot.lane.b32.xlu0 %v523_v32, %s5741_s10  ;;  %v530_v32 = vld [vmem:[%s5802_s27 + $0x9a] sm:$0xff] }
 0x20f   : > { %v6934_v40 = vpop.permute.xlu1 %1324  ;;  %v6936_v2 = vpop.permute.xlu0 %1322 }
 0x210   : > { %9991 = vst [vmem:[#allocation168_spill] sm:$0xff] %v6934_v40  ;;  %9992 = vst [vmem:[#allocation169_spill] sm:$0xff] %v6936_v2  ;;  %v529_v40 = vld [vmem:[%s5802_s27 + $0x92] sm:$0xff] }
 0x211   : > { %1566 = vrot.lane.b32.xlu1 %v526_v39, %s5741_s10  ;;  %1564 = vrot.lane.b32.xlu0 %v525_v58, %s5741_s10  ;;  %v532_v58 = vld [vmem:[%s5802_s27 + $0xaa] sm:$0xff] }
 0x213   : > { %v6942_v21 = vpop.permute.xlu1 %1328  ;;  %v6944_v33 = vpop.permute.xlu0 %1326 }
 0x214   : > { %9993 = vst [vmem:[#allocation170_spill] sm:$0xff] %v6942_v21  ;;  %9994 = vst [vmem:[#allocation171_spill] sm:$0xff] %v6944_v33  ;;  %v531_v21 = vld [vmem:[%s5802_s27 + $0xa2] sm:$0xff] }
 0x215   : > { %1570 = vrot.lane.b32.xlu1 %v528_v18, %s5741_s10  ;;  %1568 = vrot.lane.b32.xlu0 %v527_v22, %s5741_s10  ;;  %v534_v22 = vld [vmem:[%s5802_s27 + $0xba] sm:$0xff] }
 0x217   : > { %v6950_v2 = vpop.permute.xlu1 %1332  ;;  %v6952_v39 = vpop.permute.xlu0 %1330 }
 0x218   : > { %9995 = vst [vmem:[#allocation172_spill] sm:$0xff] %v6950_v2  ;;  %9996 = vst [vmem:[#allocation173_spill] sm:$0xff] %v6952_v39  ;;  %v533_v2 = vld [vmem:[%s5802_s27 + $0xb2] sm:$0xff] }
 0x219   : > { %1574 = vrot.lane.b32.xlu1 %v530_v32, %s5741_s10  ;;  %1572 = vrot.lane.b32.xlu0 %v529_v40, %s5741_s10  ;;  %v536_v40 = vld [vmem:[%s5802_s27 + $0xca] sm:$0xff] }
 0x21b   : > { %v6958_v33 = vpop.permute.xlu1 %1336  ;;  %v6960_v18 = vpop.permute.xlu0 %1334 }
 0x21c   : > { %9997 = vst [vmem:[#allocation174_spill] sm:$0xff] %v6958_v33  ;;  %9998 = vst [vmem:[#allocation175_spill] sm:$0xff] %v6960_v18  ;;  %v535_v33 = vld [vmem:[%s5802_s27 + $0xc2] sm:$0xff] }
 0x21d   : > { %1578 = vrot.lane.b32.xlu1 %v532_v58, %s5741_s10  ;;  %1576 = vrot.lane.b32.xlu0 %v531_v21, %s5741_s10  ;;  %v538_v21 = vld [vmem:[%s5802_s27 + $0xda] sm:$0xff] }
 0x21f   : > { %v6966_v39 = vpop.permute.xlu1 %1384  ;;  %v6968_v32 = vpop.permute.xlu0 %1338 }
 0x220   : > { %9999 = vst [vmem:[#allocation176_spill] sm:$0xff] %v6968_v32 }
 0x221   : > { %1582 = vrot.lane.b32.xlu1 %v534_v22, %s5741_s10  ;;  %1580 = vrot.lane.b32.xlu0 %v533_v2, %s5741_s10  ;;  %v540_v2 = vld [vmem:[%s5802_s27 + $0xea] sm:$0xff] }
 0x223   : > { %v6974_v18 = vpop.permute.xlu1 %1388  ;;  %v6976_v58 = vpop.permute.xlu0 %1386 }
 0x225   : > { %1586 = vrot.lane.b32.xlu1 %v536_v40, %s5741_s10  ;;  %1584 = vrot.lane.b32.xlu0 %v535_v33, %s5741_s10  ;;  %v542_v33 = vld [vmem:[%s5802_s27 + $0xfa] sm:$0xff] }
 0x227   : > { %v6982_v32 = vpop.permute.xlu1 %1392  ;;  %v6984_v22 = vpop.permute.xlu0 %1390 }
 0x229   : > { %1590 = vrot.lane.b32.xlu1 %v538_v21, %s5741_s10  ;;  %1588 = vrot.lane.b32.xlu0 %v537_v27, %s5741_s10  ;;  %v544_v27 = vld [vmem:[%s5802_s27 + $0x10a] sm:$0xff] }
 0x22b   : > { %v6990_v4 = vpop.permute.xlu1 %1396  ;;  %v6992_v40 = vpop.permute.xlu0 %1394 }
 0x22d   : > { %1594 = vrot.lane.b32.xlu1 %v540_v2, %s5741_s10  ;;  %1592 = vrot.lane.b32.xlu0 %v539_v3, %s5741_s10  ;;  %v546_v3 = vld [vmem:[%s5802_s27 + $0x11a] sm:$0xff]  ;;  %v545_v2 = vld [vmem:[%s5802_s27 + $0x112] sm:$0xff] }
 0x22f   : > { %v6998_v9 = vpop.permute.xlu1 %1400  ;;  %v7000_v21 = vpop.permute.xlu0 %1398 }
 0x231   : > { %1598 = vrot.lane.b32.xlu1 %v542_v33, %s5741_s10  ;;  %1596 = vrot.lane.b32.xlu0 %v541_v41, %s5741_s10  ;;  %v548_v41 = vld [vmem:[%s5802_s27 + $0x12a] sm:$0xff]  ;;  %v547_v33 = vld [vmem:[%s5802_s27 + $0x122] sm:$0xff] }
 0x233   : > { %v7006_v26 = vpop.permute.xlu1 %1404  ;;  %v7008_v53 = vpop.permute.xlu0 %1402 }
 0x235   : > { %1602 = vrot.lane.b32.xlu1 %v544_v27, %s5741_s10  ;;  %1600 = vrot.lane.b32.xlu0 %v543_v8, %s5741_s10  ;;  %v2171_v8 = vld [vmem:[%s9817_s2] sm:$0xff]  ;;  %v2172_v27 = vld [vmem:[%s9817_s2 + $0x8] sm:$0xff] }
 0x236   : > { %v5619_v34 = vpack.c.bf16 %v2172_v27, %v2171_v8  ;;  %v552_v27 = vld [vmem:[%s5802_s27 + $0x14a] sm:$0xff] }
 0x237   : > { %v7014_v49 = vpop.permute.xlu1 %1408  ;;  %v7016_v62 = vpop.permute.xlu0 %1406 }
 0x238   : > { %10000 = vst [vmem:[#allocation177_spill] sm:$0xff] %v7014_v49  ;;  %10001 = vst [vmem:[#allocation178_spill] sm:$0xff] %v7016_v62  ;;  %5620 = vmatpush3.bf16.msra.mxu0 %v5619_v34  ;;  %v551_v34 = vld [vmem:[%s5802_s27 + $0x142] sm:$0xff] }
 0x239   : > { %1606 = vrot.lane.b32.xlu1 %v546_v3, %s5741_s10  ;;  %1604 = vrot.lane.b32.xlu0 %v545_v2, %s5741_s10  ;;  %v550_v3 = vld [vmem:[%s5802_s27 + $0x13a] sm:$0xff]  ;;  %v549_v2 = vld [vmem:[%s5802_s27 + $0x132] sm:$0xff] }
 0x23a   : > { %5621 = vmatprep.subr.bf16.mxu0 %v9822_v30  ;;  %v9824_v30 = vmov 0.0  }
 0x23b   : > { %v7022_v37 = vpop.permute.xlu1 %1412  ;;  %v7024_v63 = vpop.permute.xlu0 %1410  ;;  %5354 = vmatprep.mubr.msk.f32.mxu0 %vm5744_vm3, %v9824_v30  ;;  %5498 = vmatprep.mubr.msk.f32.mxu1 %vm5744_vm3, %v9824_v30  ;;  %v556_v30 = vld [vmem:[%s5802_s27 + $0x16a] sm:$0xff] }
 0x23c   : > { %10002 = vst [vmem:[#allocation179_spill] sm:$0xff] %v7022_v37  ;;  %10003 = vst [vmem:[#allocation180_spill] sm:$0xff] %v7024_v63 }
 0x23d   : > { %1610 = vrot.lane.b32.xlu1 %v548_v41, %s5741_s10  ;;  %1608 = vrot.lane.b32.xlu0 %v547_v33, %s5741_s10  ;;  %v2173_v41 = vld [vmem:[%s9817_s2 + $0x10] sm:$0xff]  ;;  %v2174_v33 = vld [vmem:[%s9817_s2 + $0x18] sm:$0x7] }
 0x23e   : > { %v5622_v8 = vpack.c.bf16 %v2174_v33, %v2173_v41  ;;  %v10008_v41 = vmov 0.0|0.0  }
 0x23f   : > { %v7038_v23 = vpop.permute.xlu1 %1416  ;;  %v7040_v13 = vpop.permute.xlu0 %1414 }
 0x240   : > { %10004 = vst [vmem:[#allocation181_spill] sm:$0xff] %v7038_v23  ;;  %10005 = vst [vmem:[#allocation182_spill] sm:$0xff] %v7040_v13  ;;  %5624 = vmatpush3.bf16.msk.msra.mxu0 %vm5623_vm2, %v5622_v8  ;;  %vm4440_vm2 = vcmask 392192  }
 0x241   : > { %1614 = vrot.lane.b32.xlu1 %v550_v3, %s5741_s10  ;;  %1612 = vrot.lane.b32.xlu0 %v549_v2, %s5741_s10  ;;  %v554_v3 = vld [vmem:[%s5802_s27 + $0x15a] sm:$0xff]  ;;  %v553_v2 = vld [vmem:[%s5802_s27 + $0x152] sm:$0xff] }
 0x242   : > { %5625 = vmatprep.subr.bf16.mxu0 %v10008_v41  ;;  %v557_v41 = vld [vmem:[%s5802_s27 + $0x172] sm:$0xf] }
 0x243   : > { %v7053_v7 = vpop.permute.xlu1 %1420  ;;  %v7055_v12 = vpop.permute.xlu0 %1418 }
 0x244   : > { %10006 = vst [vmem:[#allocation183_spill] sm:$0xff] %v7053_v7  ;;  %10007 = vst [vmem:[#allocation184_spill] sm:$0xff] %v7055_v12  ;;  %v555_v7 = vld [vmem:[%s5802_s27 + $0x162] sm:$0xff] }
 0x245   : > { %1618 = vrot.lane.b32.xlu1 %v552_v27, %s5741_s10  ;;  %1616 = vrot.lane.b32.xlu0 %v551_v34, %s5741_s10  ;;  %v558_v34 = vld [vmem:[%s5802_s27 + $0x33] sm:$0xff] }
 0x247   : > { %v7066_v33 = vpop.permute.xlu1 %1424  ;;  %v7068_v8 = vpop.permute.xlu0 %1422 }
 0x248   : > { %10009 = vst [vmem:[#allocation185_spill] sm:$0xff] %v7066_v33  ;;  %10010 = vst [vmem:[#allocation186_spill] sm:$0xff] %v7068_v8  ;;  %v579_v8 = vld [vmem:[%s5802_s27 + $0xdb] sm:$0xff] }
 0x249   : > { %1622 = vrot.lane.b32.xlu1 %v554_v3, %s5741_s10  ;;  %1620 = vrot.lane.b32.xlu0 %v553_v2, %s5741_s10  ;;  %v560_v2 = vld [vmem:[%s5802_s27 + $0x43] sm:$0xff] }
 0x24b   : > { %v7074_v27 = vpop.permute.xlu1 %1428  ;;  %v7076_v12 = vpop.permute.xlu0 %1426 }
 0x24c   : > { %10011 = vst [vmem:[#allocation187_spill] sm:$0xff] %v7074_v27  ;;  %10012 = vst [vmem:[#allocation188_spill] sm:$0xff] %v7076_v12  ;;  %v559_v27 = vld [vmem:[%s5802_s27 + $0x3b] sm:$0xff] }
 0x24d   : > { %1626 = vrot.lane.b32.xlu1 %v556_v30, %s5741_s10  ;;  %1624 = vrot.lane.b32.xlu0 %v555_v7, %s5741_s10  ;;  %v562_v7 = vld [vmem:[%s5802_s27 + $0x53] sm:$0xff] }
 0x24f   : > { %v7082_v33 = vpop.permute.xlu1 %1432  ;;  %v7084_v3 = vpop.permute.xlu0 %1430 }
 0x250   : > { %10013 = vst [vmem:[#allocation189_spill] sm:$0xff] %v7082_v33  ;;  %10014 = vst [vmem:[#allocation190_spill] sm:$0xff] %v7084_v3  ;;  %v561_v33 = vld [vmem:[%s5802_s27 + $0x4b] sm:$0xff] }
 0x251   : > { %1712 = vrot.lane.b32.xlu1 %v558_v34, %s5746_s19  ;;  %1628 = vrot.lane.b32.xlu0 %v557_v41, %s5741_s10  ;;  %v564_v41 = vld [vmem:[%s5802_s27 + $0x63] sm:$0xff] }
 0x253   : > { %v7090_v12 = vpop.permute.xlu1 %1436  ;;  %v7092_v30 = vpop.permute.xlu0 %1434 }
 0x254   : > { %10015 = vst [vmem:[#allocation191_spill] sm:$0xff] %v7090_v12  ;;  %10016 = vst [vmem:[#allocation192_spill] sm:$0xff] %v7092_v30  ;;  %v563_v12 = vld [vmem:[%s5802_s27 + $0x5b] sm:$0xff] }
 0x255   : > { %1716 = vrot.lane.b32.xlu1 %v560_v2, %s5746_s19  ;;  %1714 = vrot.lane.b32.xlu0 %v559_v27, %s5746_s19  ;;  %v566_v27 = vld [vmem:[%s5802_s27 + $0x73] sm:$0xff] }
 0x257   : > { %v7098_v3 = vpop.permute.xlu1 %1440  ;;  %v7100_v34 = vpop.permute.xlu0 %1438 }
 0x258   : > { %10017 = vst [vmem:[#allocation193_spill] sm:$0xff] %v7098_v3  ;;  %10018 = vst [vmem:[#allocation194_spill] sm:$0xff] %v7100_v34  ;;  %v565_v3 = vld [vmem:[%s5802_s27 + $0x6b] sm:$0xff] }
 0x259   : > { %1720 = vrot.lane.b32.xlu1 %v562_v7, %s5746_s19  ;;  %1718 = vrot.lane.b32.xlu0 %v561_v33, %s5746_s19  ;;  %v568_v33 = vld [vmem:[%s5802_s27 + $0x83] sm:$0xff] }
 0x25b   : > { %v7106_v30 = vpop.permute.xlu1 %1444  ;;  %v7108_v2 = vpop.permute.xlu0 %1442 }
 0x25c   : > { %10019 = vst [vmem:[#allocation195_spill] sm:$0xff] %v7106_v30  ;;  %10020 = vst [vmem:[#allocation196_spill] sm:$0xff] %v7108_v2  ;;  %v567_v30 = vld [vmem:[%s5802_s27 + $0x7b] sm:$0xff] }
 0x25d   : > { %1724 = vrot.lane.b32.xlu1 %v564_v41, %s5746_s19  ;;  %1722 = vrot.lane.b32.xlu0 %v563_v12, %s5746_s19  ;;  %v570_v12 = vld [vmem:[%s5802_s27 + $0x93] sm:$0xff] }
 0x25f   : > { %v7114_v34 = vpop.permute.xlu1 %1448  ;;  %v7116_v7 = vpop.permute.xlu0 %1446 }
 0x260   : > { %10021 = vst [vmem:[#allocation197_spill] sm:$0xff] %v7114_v34  ;;  %10022 = vst [vmem:[#allocation198_spill] sm:$0xff] %v7116_v7  ;;  %v569_v34 = vld [vmem:[%s5802_s27 + $0x8b] sm:$0xff] }
 0x261   : > { %1728 = vrot.lane.b32.xlu1 %v566_v27, %s5746_s19  ;;  %1726 = vrot.lane.b32.xlu0 %v565_v3, %s5746_s19  ;;  %v572_v3 = vld [vmem:[%s5802_s27 + $0xa3] sm:$0xff] }
 0x263   : > { %v7122_v2 = vpop.permute.xlu1 %1452  ;;  %v7124_v41 = vpop.permute.xlu0 %1450 }
 0x264   : > { %10023 = vst [vmem:[#allocation199_spill] sm:$0xff] %v7122_v2  ;;  %10024 = vst [vmem:[#allocation200_spill] sm:$0xff] %v7124_v41  ;;  %v571_v2 = vld [vmem:[%s5802_s27 + $0x9b] sm:$0xff] }
 0x265   : > { %1732 = vrot.lane.b32.xlu1 %v568_v33, %s5746_s19  ;;  %1730 = vrot.lane.b32.xlu0 %v567_v30, %s5746_s19  ;;  %v574_v30 = vld [vmem:[%s5802_s27 + $0xb3] sm:$0xff] }
 0x267   : > { %v7130_v7 = vpop.permute.xlu1 %1456  ;;  %v7132_v27 = vpop.permute.xlu0 %1454 }
 0x268   : > { %10025 = vst [vmem:[#allocation201_spill] sm:$0xff] %v7130_v7  ;;  %10026 = vst [vmem:[#allocation202_spill] sm:$0xff] %v7132_v27  ;;  %v573_v7 = vld [vmem:[%s5802_s27 + $0xab] sm:$0xff] }
 0x269   : > { %1736 = vrot.lane.b32.xlu1 %v570_v12, %s5746_s19  ;;  %1734 = vrot.lane.b32.xlu0 %v569_v34, %s5746_s19  ;;  %v576_v34 = vld [vmem:[%s5802_s27 + $0xc3] sm:$0xff] }
 0x26b   : > { %v7138_v41 = vpop.permute.xlu1 %1460  ;;  %v7140_v33 = vpop.permute.xlu0 %1458 }
 0x26c   : > { %10027 = vst [vmem:[#allocation203_spill] sm:$0xff] %v7138_v41  ;;  %10028 = vst [vmem:[#allocation204_spill] sm:$0xff] %v7140_v33  ;;  %v575_v41 = vld [vmem:[%s5802_s27 + $0xbb] sm:$0xff] }
 0x26d   : > { %1740 = vrot.lane.b32.xlu1 %v572_v3, %s5746_s19  ;;  %1738 = vrot.lane.b32.xlu0 %v571_v2, %s5746_s19  ;;  %v578_v2 = vld [vmem:[%s5802_s27 + $0xd3] sm:$0xff] }
 0x26f   : > { %v7146_v27 = vpop.permute.xlu1 %1464  ;;  %v7148_v12 = vpop.permute.xlu0 %1462 }
 0x270   : > { %10029 = vst [vmem:[#allocation205_spill] sm:$0xff] %v7146_v27  ;;  %10030 = vst [vmem:[#allocation206_spill] sm:$0xff] %v7148_v12  ;;  %v577_v27 = vld [vmem:[%s5802_s27 + $0xcb] sm:$0xff] }
 0x271   : > { %1744 = vrot.lane.b32.xlu1 %v574_v30, %s5746_s19  ;;  %1742 = vrot.lane.b32.xlu0 %v573_v7, %s5746_s19  ;;  %v580_v7 = vld [vmem:[%s5802_s27 + $0xe3] sm:$0xff] }
 0x273   : > { %v7154_v33 = vpop.permute.xlu1 %1550  ;;  %v7156_v3 = vpop.permute.xlu0 %1548 }
 0x275   : > { %1748 = vrot.lane.b32.xlu1 %v576_v34, %s5746_s19  ;;  %1746 = vrot.lane.b32.xlu0 %v575_v41, %s5746_s19  ;;  %v582_v41 = vld [vmem:[%s5802_s27 + $0xf3] sm:$0xff] }
 0x277   : > { %v7162_v12 = vpop.permute.xlu1 %1554  ;;  %v7164_v30 = vpop.permute.xlu0 %1552 }
 0x279   : > { %1752 = vrot.lane.b32.xlu1 %v578_v2, %s5746_s19  ;;  %1750 = vrot.lane.b32.xlu0 %v577_v27, %s5746_s19  ;;  %v584_v27 = vld [vmem:[%s5802_s27 + $0x103] sm:$0xff] }
 0x27b   : > { %v7170_v23 = vpop.permute.xlu1 %1558  ;;  %v7172_v34 = vpop.permute.xlu0 %1556 }
 0x27d   : > { %1756 = vrot.lane.b32.xlu1 %v580_v7, %s5746_s19  ;;  %1754 = vrot.lane.b32.xlu0 %v579_v8, %s5746_s19  ;;  %v586_v8 = vld [vmem:[%s5802_s27 + $0x113] sm:$0xff] }
 0x27f   : > { %v7178_v13 = vpop.permute.xlu1 %1562  ;;  %v7180_v2 = vpop.permute.xlu0 %1560 }
 0x281   : > { %1760 = vrot.lane.b32.xlu1 %v582_v41, %s5746_s19  ;;  %1758 = vrot.lane.b32.xlu0 %v581_v50, %s5746_s19  ;;  %v588_v50 = vld [vmem:[%s5802_s27 + $0x123] sm:$0xff] }
 0x283   : > { %v7186_v37 = vpop.permute.xlu1 %1566  ;;  %v7188_v7 = vpop.permute.xlu0 %1564 }
 0x285   : > { %1764 = vrot.lane.b32.xlu1 %v584_v27, %s5746_s19  ;;  %1762 = vrot.lane.b32.xlu0 %v583_v17, %s5746_s19  ;;  %v590_v17 = vld [vmem:[%s5802_s27 + $0x133] sm:$0xff] }
 0x287   : > { %v7194_v63 = vpop.permute.xlu1 %1570  ;;  %v7196_v41 = vpop.permute.xlu0 %1568 }
 0x288   : > { %10031 = vst [vmem:[#allocation207_spill] sm:$0xff] %v7194_v63 }
 0x289   : > { %1768 = vrot.lane.b32.xlu1 %v586_v8, %s5746_s19  ;;  %1766 = vrot.lane.b32.xlu0 %v585_v31, %s5746_s19  ;;  %v592_v31 = vld [vmem:[%s5802_s27 + $0x143] sm:$0xff] }
 0x28b   : > { %v7202_v49 = vpop.permute.xlu1 %1574  ;;  %v7204_v27 = vpop.permute.xlu0 %1572 }
 0x28c   : > { %10032 = vst [vmem:[#allocation208_spill] sm:$0xff] %v7202_v49  ;;  %10033 = vst [vmem:[#allocation209_spill] sm:$0xff] %v7204_v27  ;;  %v591_v49 = vld [vmem:[%s5802_s27 + $0x13b] sm:$0xff] }
 0x28d   : > { %1772 = vrot.lane.b32.xlu1 %v588_v50, %s5746_s19  ;;  %1770 = vrot.lane.b32.xlu0 %v587_v51, %s5746_s19  ;;  %v594_v51 = vld [vmem:[%s5802_s27 + $0x153] sm:$0xff] }
 0x28f   : > { %v7210_v63 = vpop.permute.xlu1 %1578  ;;  %v7212_v8 = vpop.permute.xlu0 %1576 }
 0x290   : > { %10034 = vst [vmem:[#allocation210_spill] sm:$0xff] %v7210_v63  ;;  %10035 = vst [vmem:[#allocation211_spill] sm:$0xff] %v7212_v8  ;;  %v593_v63 = vld [vmem:[%s5802_s27 + $0x14b] sm:$0xff] }
 0x291   : > { %1776 = vrot.lane.b32.xlu1 %v590_v17, %s5746_s19  ;;  %1774 = vrot.lane.b32.xlu0 %v589_v11, %s5746_s19  ;;  %v596_v11 = vld [vmem:[%s5802_s27 + $0x163] sm:$0xff]  ;;  %v595_v17 = vld [vmem:[%s5802_s27 + $0x15b] sm:$0xff] }
 0x293   : > { %v7218_v27 = vpop.permute.xlu1 %1582  ;;  %v7220_v50 = vpop.permute.xlu0 %1580 }
 0x294   : > { %10036 = vst [vmem:[#allocation212_spill] sm:$0xff] %v7218_v27  ;;  %10037 = vst [vmem:[#allocation213_spill] sm:$0xff] %v7220_v50 }
 0x295   : > { %1780 = vrot.lane.b32.xlu1 %v592_v31, %s5746_s19  ;;  %1778 = vrot.lane.b32.xlu0 %v591_v49, %s5746_s19  ;;  %v598_v49 = vld [vmem:[%s5802_s27 + $0x173] sm:$0xf]  ;;  %v597_v31 = vld [vmem:[%s5802_s27 + $0x16b] sm:$0xff] }
 0x297   : > { %v7226_v8 = vpop.permute.xlu1 %1586  ;;  %v7228_v62 = vpop.permute.xlu0 %1584 }
 0x298   : > { %10038 = vst [vmem:[#allocation214_spill] sm:$0xff] %v7226_v8 }
 0x299   : > { %1784 = vrot.lane.b32.xlu1 %v594_v51, %s5746_s19  ;;  %1782 = vrot.lane.b32.xlu0 %v593_v63, %s5746_s19 }
 0x29b   : > { %v7234_v27 = vpop.permute.xlu1 %1590  ;;  %v7236_v50 = vpop.permute.xlu0 %1588 }
 0x29c   : > { %10039 = vst [vmem:[#allocation215_spill] sm:$0xff] %v7234_v27  ;;  %10040 = vst [vmem:[#allocation216_spill] sm:$0xff] %v7236_v50 }
 0x29d   : > { %1788 = vrot.lane.b32.xlu1 %v596_v11, %s5746_s19  ;;  %1786 = vrot.lane.b32.xlu0 %v595_v17, %s5746_s19 }
 0x29f   : > { %v7242_v16 = vpop.permute.xlu1 %1594  ;;  %v7244_v8 = vpop.permute.xlu0 %1592 }
 0x2a0   : > { %10041 = vst [vmem:[#allocation217_spill] sm:$0xff] %v7242_v16  ;;  %10042 = vst [vmem:[#allocation218_spill] sm:$0xff] %v7244_v8 }
 0x2a1   : > { %1792 = vrot.lane.b32.xlu1 %v598_v49, %s5746_s19  ;;  %1790 = vrot.lane.b32.xlu0 %v597_v31, %s5746_s19 }
 0x2a3   : > { %v7248_v63 = vpop.permute.xlu1 %1598  ;;  %v7250_v51 = vpop.permute.xlu0 %1596 }
 0x2a4   : > { %10043 = vst [vmem:[#allocation219_spill] sm:$0xff] %v7248_v63  ;;  %10044 = vst [vmem:[#allocation220_spill] sm:$0xff] %v7250_v51 }
 0x2a7   : > { %v7252_v27 = vpop.permute.xlu1 %1602  ;;  %v7254_v11 = vpop.permute.xlu0 %1600 }
 0x2a8   : > { %10045 = vst [vmem:[#allocation221_spill] sm:$0xff] %v7252_v27  ;;  %10046 = vst [vmem:[#allocation222_spill] sm:$0xff] %v7254_v11  ;;  %v306_v27 = vld [vmem:[%s5802_s27 + $0xd] sm:$0xff] }
 0x2ab   : > { %v7256_v17 = vpop.permute.xlu1 %1606  ;;  %v7258_v50 = vpop.permute.xlu0 %1604 }
 0x2ac   : > { %10047 = vst [vmem:[#allocation223_spill] sm:$0xff] %v7256_v17 }
 0x2af   : > { %v7260_v16 = vpop.permute.xlu1 %1610  ;;  %v7262_v8 = vpop.permute.xlu0 %1608 }
 0x2b0   : > { %10048 = vst [vmem:[#allocation224_spill] sm:$0xff] %v7260_v16  ;;  %v1836_v16 = vsel %vm1835_vm4, %v306_v27, %v5973_v61 }
 0x2b3   : > { %v7264_v49 = vpop.permute.xlu1 %1614  ;;  %v7266_v31 = vpop.permute.xlu0 %1612 }
 0x2b4   : > { %10049 = vst [vmem:[#allocation225_spill] sm:$0xff] %v7264_v49  ;;  %10050 = vst [vmem:[#allocation226_spill] sm:$0xff] %v7266_v31  ;;  %v307_v49 = vld [vmem:[%s5802_s27 + $0x15] sm:$0xff]  ;;  %v1878_v31 = vsel %vm1877_vm5, %v1836_v16, %v6194_v52  ;;  %v308_v16 = vld [vmem:[%s5802_s27 + $0x1d] sm:$0xff] }
 0x2b5   : > { %v1837_v61 = vsel %vm1835_vm4, %v307_v49, %v5987_v1 }
 0x2b7   : > { %v7268_v63 = vpop.permute.xlu1 %1618  ;;  %v7270_v51 = vpop.permute.xlu0 %1616 }
 0x2b8   : > { %10051 = vst [vmem:[#allocation227_spill] sm:$0xff] %v7268_v63  ;;  %10052 = vst [vmem:[#allocation228_spill] sm:$0xff] %v7270_v51  ;;  %v1920_v63 = vsel %vm1919_vm6, %v1878_v31, %v6366_v42  ;;  %v1879_v42 = vsel %vm1877_vm5, %v1837_v61, %v6204_v57  ;;  %v1838_v57 = vsel %vm1835_vm4, %v308_v16, %v5971_v60  ;;  %v10055_v61 = vmov 0.0  }
 0x2b9   : > { %257 = vst.msk [vmem:[#allocation2 + $0x8] sm:$0xff] %vm255_vm13, %v10055_v61  ;;  %258 = vst.msk [vmem:[#allocation2 + $0x10] sm:$0xff] %vm255_vm13, %v10055_v61 }
 0x2ba   : > { %259 = vst.msk [vmem:[#allocation2 + $0x18] sm:$0xff] %vm255_vm13, %v10055_v61  ;;  %260 = vst.msk [vmem:[#allocation2 + $0x164] sm:$0xff] %vm255_vm13, %v10055_v61 }
 0x2bb   : > { %v7273_v11 = vpop.permute.xlu1 %1622  ;;  %v7275_v17 = vpop.permute.xlu0 %1620  ;;  %261 = vst.msk [vmem:[#allocation2 + $0x16c] sm:$0xff] %vm255_vm13, %v10055_v61  ;;  %262 = vst.msk [vmem:[#allocation2 + $0x174] sm:$0xff] %vm255_vm13, %v10055_v61 }
 0x2bc   : > { %10053 = vst [vmem:[#allocation229_spill] sm:$0xff] %v7273_v11  ;;  %10054 = vst [vmem:[#allocation230_spill] sm:$0xff] %v7275_v17  ;;  %v1962_v17 = vsel %vm1961_vm7, %v1920_v63, %v6570_v24  ;;  %v1921_v24 = vsel %vm1919_vm6, %v1879_v42, %v6364_v46  ;;  %v309_v46 = vld [vmem:[%s5802_s27 + $0x25] sm:$0xff] }
 0x2bd   : > { %v2004_v52 = vsel %vm2003_vm8, %v1962_v17, %v6806_v43  ;;  %v1963_v43 = vsel %vm1961_vm7, %v1921_v24, %v6586_v25  ;;  %5100 = vst.msk [vmem:[%s8145_s30 + $0x14c] sm:$0xf] %vm263_vm14, %v10055_v61 }
 0x2be   : > { %v2046_v27 = vsel %vm2045_vm9, %v2004_v52, %v6966_v39  ;;  %v2005_v39 = vsel %vm2003_vm8, %v1963_v43, %v6804_v35  ;;  %5099 = vst.msk [vmem:[%s8145_s30 + $0x144] sm:$0xff] %vm255_vm13, %v10055_v61 }
 0x2bf   : > { %v7284_v51 = vpop.permute.xlu1 %1626  ;;  %v7286_v11 = vpop.permute.xlu0 %1624  ;;  %v2088_v63 = vsel %vm2087_vm10, %v2046_v27, %v7156_v3  ;;  %v1880_v3 = vsel %vm1877_vm5, %v1838_v57, %v6202_v54  ;;  %v2047_v31 = vsel %vm2045_vm9, %v2005_v39, %v6976_v58  ;;  %v1839_v54 = vsel %vm1835_vm4, %v309_v46, %v5985_v0  ;;  %v312_v39 = vld [vmem:[%s5802_s27 + $0x3d] sm:$0xff] }
 0x2c0   : > { %v1922_v25 = vsel %vm1919_vm6, %v1880_v3, %v6374_v47  ;;  %v2089_v60 = vsel %vm2087_vm10, %v2047_v31, %v7154_v33  ;;  %v310_v47 = vld [vmem:[%s5802_s27 + $0x2d] sm:$0xff]  ;;  %v1881_v33 = vsel %vm1877_vm5, %v1839_v54, %v6212_v59  ;;  %v313_v54 = vld [vmem:[%s5802_s27 + $0x45] sm:$0xff] }
 0x2c1   : > { %v1964_v35 = vsel %vm1961_vm7, %v1922_v25, %v6584_v10  ;;  %v1923_v0 = vsel %vm1919_vm6, %v1881_v33, %v6372_v44  ;;  %v1840_v59 = vsel %vm1835_vm4, %v310_v47, %v6001_v5  ;;  %v10062_v47 = vld [vmem:[#allocation77_spill] sm:$0xff] }
 0x2c2   : > { %v2006_v58 = vsel %vm2003_vm8, %v1964_v35, %v6814_v29  ;;  %v1965_v29 = vsel %vm1961_vm7, %v1923_v0, %v6600_v20  ;;  %v1882_v44 = vsel %vm1877_vm5, %v1840_v59, %v6210_v56 }
 0x2c3   : > { %v1713_v1 = vpop.permute.xlu1 %1712  ;;  %v7303_v49 = vpop.permute.xlu0 %1628  ;;  %v2048_v27 = vsel %vm2045_vm9, %v2006_v58, %v6974_v18  ;;  %v2007_v18 = vsel %vm2003_vm8, %v1965_v29, %v6812_v28  ;;  %v1924_v5 = vsel %vm1919_vm6, %v1882_v44, %v6382_v45  ;;  %v10057_v45 = vld [vmem:[#allocation40_spill] sm:$0xff]  ;;  %v10061_v58 = vld [vmem:[#allocation39_spill] sm:$0xff] }
 0x2c4   : > { %v2130_v17 = vsel %vm2129_vm11, %v2088_v63, %v1713_v1  ;;  %v2090_v10 = vsel %vm2087_vm10, %v2048_v27, %v7164_v30  ;;  %v311_v1 = vld [vmem:[%s5802_s27 + $0x35] sm:$0xff]  ;;  %v2049_v30 = vsel %vm2045_vm9, %v2007_v18, %v6984_v22  ;;  %v1966_v28 = vsel %vm1961_vm7, %v1924_v5, %v6598_v15  ;;  %v10058_v15 = vld [vmem:[#allocation75_spill] sm:$0xff]  ;;  %v10064_v29 = vld [vmem:[#allocation4_spill] sm:$0xff] }
 0x2c5   : > { %5355 = vmatmul.mubr.msk.f32.vlgmr.msra.gmra.mrb[0].mxu0 %vm2182_vm12, %v2130_v17  ;;  %v2091_v20 = vsel %vm2087_vm10, %v2049_v30, %v7162_v12  ;;  %v10056_v17 = vld [vmem:[#allocation3_spill] sm:$0xff]  ;;  %v2008_v22 = vsel %vm2003_vm8, %v1966_v28, %v6822_v19  ;;  %v10059_v19 = vld [vmem:[#allocation112_spill] sm:$0xff] }
 0x2c6   : > { %5357 = vmatprep.mubr.msk.f32.mxu0 %vm5744_vm3, %v10055_v61  ;;  %v1841_v56 = vsel %vm1835_vm4, %v311_v1, %v10056_v17  ;;  %v2050_v12 = vsel %vm2045_vm9, %v2008_v22, %v6982_v32  ;;  %v314_v18 = vld [vmem:[%s5802_s27 + $0x4d] sm:$0xff]  ;;  %v315_v22 = vld [vmem:[%s5802_s27 + $0x55] sm:$0xff] }
 0x2c7   : > { %v1715_v52 = vpop.permute.xlu0 %1714  ;;  %v1717_v42 = vpop.permute.xlu1 %1716  ;;  %v1883_v46 = vsel %vm1877_vm5, %v1841_v56, %v10057_v45  ;;  %v2092_v31 = vsel %vm2087_vm10, %v2050_v12, %v7172_v34  ;;  %v10066_v44 = vld [vmem:[#allocation76_spill] sm:$0xff]  ;;  %v10070_v45 = vld [vmem:[#allocation79_spill] sm:$0xff] }
 0x2c8   : > { %v2131_v16 = vsel %vm2129_vm11, %v2089_v60, %v1715_v52  ;;  %v2132_v24 = vsel %vm2129_vm11, %v2090_v10, %v1717_v42  ;;  %v1925_v3 = vsel %vm1919_vm6, %v1883_v46, %v10058_v15  ;;  %v10060_v52 = vld [vmem:[#allocation5_spill] sm:$0xff] }
 0x2c9   : > { %5358 = vmatmul.mubr.msk.f32.gmra.mrb[2].mxu0 %vm2182_vm12, %v2131_v16  ;;  %v1967_v25 = vsel %vm1961_vm7, %v1925_v3, %v10059_v19  ;;  %v1842_v35 = vsel %vm1835_vm4, %v312_v39, %v10060_v52  ;;  %v10073_v52 = vld [vmem:[#allocation44_spill] sm:$0xff] }
 0x2ca   : > { %5360 = vmatprep.mubr.msk.f32.mxu0 %vm5744_vm3, %v10055_v61  ;;  %v2009_v32 = vsel %vm2003_vm8, %v1967_v25, %v6820_v14  ;;  %v1884_v42 = vsel %vm1877_vm5, %v1842_v35, %v10061_v58  ;;  %v10063_v14 = vld [vmem:[#allocation111_spill] sm:$0xff] }
 0x2cb   : > { %v1719_v63 = vpop.permute.xlu0 %1718  ;;  %v1721_v57 = vpop.permute.xlu1 %1720  ;;  %v2051_v34 = vsel %vm2045_vm9, %v2009_v32, %v6992_v40  ;;  %v1926_v33 = vsel %vm1919_vm6, %v1884_v42, %v10062_v47  ;;  %v10074_v32 = vld [vmem:[#allocation78_spill] sm:$0xff] }
 0x2cc   : > { %v2133_v43 = vsel %vm2129_vm11, %v2091_v20, %v1719_v63  ;;  %v2134_v60 = vsel %vm2129_vm11, %v2092_v31, %v1721_v57  ;;  %v2093_v27 = vsel %vm2087_vm10, %v2051_v34, %v7170_v23  ;;  %v1968_v0 = vsel %vm1961_vm7, %v1926_v33, %v10063_v14  ;;  %v10065_v63 = vld [vmem:[#allocation42_spill] sm:$0xff]  ;;  %v10069_v57 = vld [vmem:[#allocation41_spill] sm:$0xff]  ;;  %v10077_v14 = vld [vmem:[#allocation43_spill] sm:$0xff] }
 0x2cd   : > { %5361 = vmatmul.mubr.msk.f32.gmra.mrb[4].mxu0 %vm2182_vm12, %v2132_v24  ;;  %v1843_v24 = vsel %vm1835_vm4, %v313_v54, %v10064_v29  ;;  %v2010_v40 = vsel %vm2003_vm8, %v1968_v0, %v6830_v55  ;;  %v10067_v55 = vld [vmem:[#allocation114_spill] sm:$0xff]  ;;  %v10075_v54 = vld [vmem:[#allocation116_spill] sm:$0xff]  ;;  %v10076_v34 = vld [vmem:[#allocation9_spill] sm:$0xff] }
 0x2ce   : > { %5363 = vmatprep.mubr.msk.f32.mxu0 %vm5744_vm3, %v10055_v61  ;;  %v1885_v1 = vsel %vm1877_vm5, %v1843_v24, %v10065_v63  ;;  %v2052_v23 = vsel %vm2045_vm9, %v2010_v40, %v6990_v4  ;;  %v10072_v31 = vld [vmem:[#allocation6_spill] sm:$0xff]  ;;  %v10079_v29 = vld [vmem:[#allocation115_spill] sm:$0xff] }
 0x2cf   : > { %v1723_v16 = vpop.permute.xlu0 %1722  ;;  %v1725_v59 = vpop.permute.xlu1 %1724  ;;  %v1927_v30 = vsel %vm1919_vm6, %v1885_v1, %v10066_v44  ;;  %v2094_v5 = vsel %vm2087_vm10, %v2052_v23, %v7180_v2  ;;  %v1845_v19 = vsel %vm1835_vm4, %v315_v22, %v10072_v31  ;;  %v318_v23 = vld [vmem:[%s5802_s27 + $0x6d] sm:$0xff]  ;;  %v10081_v44 = vld [vmem:[#allocation46_spill] sm:$0xff] }
 0x2d0   : > { %v2135_v10 = vsel %vm2129_vm11, %v2093_v27, %v1723_v16  ;;  %v1969_v20 = vsel %vm1961_vm7, %v1927_v30, %v10067_v55  ;;  %v2136_v28 = vsel %vm2129_vm11, %v2094_v5, %v1725_v59  ;;  %v1887_v35 = vsel %vm1877_vm5, %v1845_v19, %v10073_v52  ;;  %v317_v27 = vld [vmem:[%s5802_s27 + $0x65] sm:$0xff] }
 0x2d1   : > { %5364 = vmatmul.mubr.msk.f32.gmra.mrb[6].mxu0 %vm2182_vm12, %v2133_v43  ;;  %v10068_v43 = vld [vmem:[#allocation7_spill] sm:$0xff]  ;;  %v2011_v4 = vsel %vm2003_vm8, %v1969_v20, %v6828_v36  ;;  %v10071_v36 = vld [vmem:[#allocation113_spill] sm:$0xff]  ;;  %v1929_v16 = vsel %vm1919_vm6, %v1887_v35, %v10074_v32  ;;  %v10080_v59 = vld [vmem:[#allocation8_spill] sm:$0xff] }
 0x2d2   : > { %5366 = vmatprep.mubr.msk.f32.mxu0 %vm5744_vm3, %v10055_v61  ;;  %v1844_v17 = vsel %vm1835_vm4, %v314_v18, %v10068_v43  ;;  %v2053_v2 = vsel %vm2045_vm9, %v2011_v4, %v7000_v21  ;;  %v1971_v58 = vsel %vm1961_vm7, %v1929_v16, %v10075_v54  ;;  %v1847_v18 = vsel %vm1835_vm4, %v317_v27, %v10080_v59  ;;  %v10082_v5 = vld [vmem:[#allocation80_spill] sm:$0xff] }
 0x2d3   : > { %v1727_v56 = vpop.permute.xlu0 %1726  ;;  %v1886_v39 = vsel %vm1877_vm5, %v1844_v17, %v10069_v57  ;;  %v2095_v12 = vsel %vm2087_vm10, %v2053_v2, %v7178_v13  ;;  %v1729_v25 = vpop.permute.xlu1 %1728  ;;  %v1889_v30 = vsel %vm1877_vm5, %v1847_v18, %v10081_v44  ;;  %v10084_v17 = vld [vmem:[#allocation11_spill] sm:$0xff]  ;;  %v319_v57 = vld [vmem:[%s5802_s27 + $0x75] sm:$0xff]  ;;  %v10093_v32 = vld [vmem:[#allocation48_spill] sm:$0xff] }
 0x2d4   : > { %v1928_v46 = vsel %vm1919_vm6, %v1886_v39, %v10070_v45  ;;  %v2137_v3 = vsel %vm2129_vm11, %v2095_v12, %v1727_v56  ;;  %v1931_v55 = vsel %vm1919_vm6, %v1889_v30, %v10082_v5  ;;  %v1848_v4 = vsel %vm1835_vm4, %v318_v23, %v10084_v17  ;;  %v10085_v56 = vld [vmem:[#allocation147_spill] sm:$0xff]  ;;  %v10086_v39 = vld [vmem:[#allocation45_spill] sm:$0xff]  ;;  %v10105_v5 = vld [vmem:[#allocation12_spill] sm:$0xff] }
 0x2d5   : > { %5367 = vmatmul.mubr.msk.f32.gmra.mrb[8].mxu0 %vm2182_vm12, %v2134_v60  ;;  %v1970_v15 = vsel %vm1961_vm7, %v1928_v46, %v10071_v36  ;;  %v316_v60 = vld [vmem:[%s5802_s27 + $0x5d] sm:$0xff]  ;;  %v1890_v2 = vsel %vm1877_vm5, %v1848_v4, %v10086_v39  ;;  %v10102_v18 = vld [vmem:[#allocation85_spill] sm:$0xff] }
 0x2d6   : > { %5369 = vmatprep.mubr.msk.f32.mxu0 %vm5744_vm3, %v10055_v61  ;;  %v2012_v21 = vsel %vm2003_vm8, %v1970_v15, %v6838_v38  ;;  %v1846_v47 = vsel %vm1835_vm4, %v316_v60, %v10076_v34  ;;  %v10088_v46 = vld [vmem:[#allocation83_spill] sm:$0xff]  ;;  %v10092_v60 = vld [vmem:[#allocation149_spill] sm:$0xff]  ;;  %v10107_v17 = vld [vmem:[#allocation50_spill] sm:$0xff] }
 0x2d7   : > { %v2054_v13 = vsel %vm2045_vm9, %v2012_v21, %v6998_v9  ;;  %v2013_v9 = vsel %vm2003_vm8, %v1971_v58, %v6836_v6  ;;  %v1731_v33 = vpop.permute.xlu0 %1730  ;;  %v1888_v0 = vsel %vm1877_vm5, %v1846_v47, %v10077_v14  ;;  %v1733_v1 = vpop.permute.xlu1 %1732  ;;  %v1932_v12 = vsel %vm1919_vm6, %v1890_v2, %v10088_v46  ;;  %v10089_v36 = vld [vmem:[#allocation207_spill] sm:$0xff]  ;;  %v10091_v21 = vld [vmem:[#allocation10_spill] sm:$0xff]  ;;  %v10096_v34 = vld [vmem:[#allocation209_spill] sm:$0xff] }
 0x2d8   : > { %v2096_v38 = vsel %vm2087_vm10, %v2054_v13, %v7188_v7  ;;  %v2055_v7 = vsel %vm2045_vm9, %v2013_v9, %v7008_v53  ;;  %v10078_v53 = vld [vmem:[#allocation81_spill] sm:$0xff]  ;;  %v320_v13 = vld [vmem:[%s5802_s27 + $0x7d] sm:$0xff]  ;;  %v10097_v9 = vld [vmem:[#allocation120_spill] sm:$0xff] }
 0x2d9   : > { %5370 = vmatmul.mubr.msk.f32.gmra.mrb[10].mxu0 %vm2182_vm12, %v2135_v10  ;;  %v2138_v42 = vsel %vm2129_vm11, %v2096_v38, %v1729_v25  ;;  %v1930_v6 = vsel %vm1919_vm6, %v1888_v0, %v10078_v53  ;;  %v2097_v10 = vsel %vm2087_vm10, %v2055_v7, %v7186_v37  ;;  %v1849_v25 = vsel %vm1835_vm4, %v319_v57, %v10091_v21  ;;  %v10094_v38 = vld [vmem:[#allocation177_spill] sm:$0xff]  ;;  %v10095_v58 = vld [vmem:[#allocation82_spill] sm:$0xff]  ;;  %v10099_v7 = vld [vmem:[#allocation148_spill] sm:$0xff] }
 0x2da   : > { %5372 = vmatprep.mubr.msk.f32.mxu0 %vm5744_vm3, %v10055_v61  ;;  %v1972_v24 = vsel %vm1961_vm7, %v1930_v6, %v10079_v29  ;;  %v2139_v40 = vsel %vm2129_vm11, %v2097_v10, %v1731_v33  ;;  %v1891_v16 = vsel %vm1877_vm5, %v1849_v25, %v10093_v32  ;;  %v10098_v14 = vld [vmem:[#allocation13_spill] sm:$0xff]  ;;  %v321_v10 = vld [vmem:[%s5802_s27 + $0x85] sm:$0xff]  ;;  %v10117_v32 = vld [vmem:[#allocation210_spill] sm:$0xff] }
 0x2db   : > { %v2014_v63 = vsel %vm2003_vm8, %v1972_v24, %v6846_v48  ;;  %v10083_v48 = vld [vmem:[#allocation118_spill] sm:$0xff]  ;;  %v1735_v22 = vpop.permute.xlu0 %1734  ;;  %v1737_v35 = vpop.permute.xlu1 %1736  ;;  %v1850_v0 = vsel %vm1835_vm4, %v320_v13, %v10098_v14  ;;  %v10100_v29 = vld [vmem:[#allocation47_spill] sm:$0xff]  ;;  %v10114_v21 = vld [vmem:[#allocation49_spill] sm:$0xff] }
 0x2dc   : > { %v2056_v37 = vsel %vm2045_vm9, %v2014_v63, %v7006_v26  ;;  %v1892_v24 = vsel %vm1877_vm5, %v1850_v0, %v10100_v29  ;;  %v10104_v44 = vld [vmem:[#allocation119_spill] sm:$0xff]  ;;  %v10121_v14 = vld [vmem:[#allocation52_spill] sm:$0xff]  ;;  %v10124_v29 = vld [vmem:[#allocation213_spill] sm:$0xff] }
 0x2dd   : > { %5373 = vmatmul.mubr.msk.f32.gmra.mrb[12].mxu0 %vm2182_vm12, %v2136_v28  ;;  %v2098_v20 = vsel %vm2087_vm10, %v2056_v37, %v7196_v41  ;;  %v1973_v28 = vsel %vm1961_vm7, %v1931_v55, %v10083_v48  ;;  %v10087_v41 = vld [vmem:[#allocation178_spill] sm:$0xff]  ;;  %v1934_v63 = vsel %vm1919_vm6, %v1892_v24, %v10102_v18  ;;  %v1851_v55 = vsel %vm1835_vm4, %v321_v10, %v10105_v5  ;;  %v10110_v39 = vld [vmem:[#allocation211_spill] sm:$0xff] }
 0x2de   : > { %5375 = vmatprep.mubr.msk.f32.mxu0 %vm5744_vm3, %v10055_v61  ;;  %v2140_v43 = vsel %vm2129_vm11, %v2098_v20, %v1733_v1  ;;  %v2015_v26 = vsel %vm2003_vm8, %v1973_v28, %v10085_v56  ;;  %v10103_v1 = vld [vmem:[#allocation208_spill] sm:$0xff]  ;;  %v1976_v30 = vsel %vm1961_vm7, %v1934_v63, %v10104_v44  ;;  %v10106_v20 = vld [vmem:[#allocation151_spill] sm:$0xff]  ;;  %v1893_v4 = vsel %vm1877_vm5, %v1851_v55, %v10107_v17  ;;  %v10126_v63 = vld [vmem:[#allocation17_spill] sm:$0xff] }
 0x2df   : > { %v2057_v45 = vsel %vm2045_vm9, %v2015_v26, %v10087_v41  ;;  %v1739_v6 = vpop.permute.xlu0 %1738  ;;  %v2018_v48 = vsel %vm2003_vm8, %v1976_v30, %v10106_v20  ;;  %v1741_v28 = vpop.permute.xlu1 %1740  ;;  %v10108_v56 = vld [vmem:[#allocation179_spill] sm:$0xff]  ;;  %v10111_v41 = vld [vmem:[#allocation122_spill] sm:$0xff]  ;;  %v10129_v20 = vld [vmem:[#allocation184_spill] sm:$0xff] }
 0x2e0   : > { %v2099_v15 = vsel %vm2087_vm10, %v2057_v45, %v10089_v36  ;;  %v2060_v26 = vsel %vm2045_vm9, %v2018_v48, %v10108_v56  ;;  %v10128_v5 = vld [vmem:[#allocation51_spill] sm:$0xff]  ;;  %v10131_v17 = vld [vmem:[#allocation212_spill] sm:$0xff] }
 0x2e1   : > { %5376 = vmatmul.mubr.msk.f32.gmra.mrb[14].mxu0 %vm2182_vm12, %v2137_v3  ;;  %v10090_v3 = vld [vmem:[#allocation117_spill] sm:$0xff]  ;;  %v2141_v19 = vsel %vm2129_vm11, %v2099_v15, %v1735_v22  ;;  %v10109_v22 = vld [vmem:[#allocation84_spill] sm:$0xff]  ;;  %v2102_v2 = vsel %vm2087_vm10, %v2060_v26, %v10110_v39  ;;  %v10113_v15 = vld [vmem:[#allocation150_spill] sm:$0xff] }
 0x2e2   : > { %5378 = vmatprep.mubr.msk.f32.mxu0 %vm5744_vm3, %v10055_v61  ;;  %v1974_v31 = vsel %vm1961_vm7, %v1932_v12, %v10090_v3  ;;  %v1935_v57 = vsel %vm1919_vm6, %v1893_v4, %v10109_v22  ;;  %v2144_v46 = vsel %vm2129_vm11, %v2102_v2, %v1741_v28  ;;  %v10112_v12 = vld [vmem:[#allocation15_spill] sm:$0xff]  ;;  %v10130_v28 = vld [vmem:[#allocation89_spill] sm:$0xff] }
 0x2e3   : > { %v2016_v52 = vsel %vm2003_vm8, %v1974_v31, %v10092_v60  ;;  %v1977_v45 = vsel %vm1961_vm7, %v1935_v57, %v10111_v41  ;;  %v1743_v31 = vpop.permute.xlu0 %1742  ;;  %v10115_v60 = vld [vmem:[#allocation182_spill] sm:$0xff]  ;;  %v10132_v56 = vld [vmem:[#allocation123_spill] sm:$0xff]  ;;  %v10133_v57 = vld [vmem:[#allocation16_spill] sm:$0xff] }
 0x2e4   : > { %v2058_v54 = vsel %vm2045_vm9, %v2016_v52, %v10094_v38  ;;  %v2019_v3 = vsel %vm2003_vm8, %v1977_v45, %v10113_v15  ;;  %v10118_v38 = vld [vmem:[#allocation121_spill] sm:$0xff]  ;;  %v10134_v2 = vld [vmem:[#allocation155_spill] sm:$0xff] }
 0x2e5   : > { %5379 = vmatmul.mubr.msk.f32.gmra.mrb[16].mxu0 %vm2182_vm12, %v2138_v42  ;;  %v1933_v42 = vsel %vm1919_vm6, %v1891_v16, %v10095_v58  ;;  %v2100_v47 = vsel %vm2087_vm10, %v2058_v54, %v10096_v34  ;;  %v2061_v52 = vsel %vm2045_vm9, %v2019_v3, %v10115_v60  ;;  %v10136_v15 = vld [vmem:[#allocation183_spill] sm:$0xff] }
 0x2e6   : > { %5381 = vmatprep.mubr.msk.f32.mxu0 %vm5744_vm3, %v10055_v61  ;;  %v1975_v33 = vsel %vm1961_vm7, %v1933_v42, %v10097_v9  ;;  %v2142_v27 = vsel %vm2129_vm11, %v2100_v47, %v1737_v35  ;;  %v10116_v35 = vld [vmem:[#allocation87_spill] sm:$0xff]  ;;  %v2103_v16 = vsel %vm2087_vm10, %v2061_v52, %v10117_v32  ;;  %v10119_v42 = vld [vmem:[#allocation14_spill] sm:$0xff]  ;;  %v10120_v47 = vld [vmem:[#allocation153_spill] sm:$0xff] }
 0x2e7   : > { %v2017_v53 = vsel %vm2003_vm8, %v1975_v33, %v10099_v7  ;;  %v2145_v58 = vsel %vm2129_vm11, %v2103_v16, %v1743_v31  ;;  %v1745_v33 = vpop.permute.xlu1 %1744  ;;  %v10122_v7 = vld [vmem:[#allocation181_spill] sm:$0xff]  ;;  %v1747_v30 = vpop.permute.xlu0 %1746  ;;  %v10137_v31 = vld [vmem:[#allocation88_spill] sm:$0xff]  ;;  %v10140_v32 = vld [vmem:[#allocation154_spill] sm:$0xff] }
 0x2e9   : > { %5382 = vmatmul.mubr.msk.f32.gmra.mrb[18].mxu0 %vm2182_vm12, %v2139_v40  ;;  %v10101_v40 = vld [vmem:[#allocation180_spill] sm:$0xff] }
 0x2ea   : > { %5384 = vmatprep.mubr.msk.f32.mxu0 %vm5744_vm3, %v10055_v61  ;;  %v2059_v59 = vsel %vm2045_vm9, %v2017_v53, %v10101_v40  ;;  %v10125_v40 = vld [vmem:[#allocation124_spill] sm:$0xff] }
 0x2eb   : > { %v2101_v23 = vsel %vm2087_vm10, %v2059_v59, %v10103_v1  ;;  %v1749_v45 = vpop.permute.xlu1 %1748 }
 0x2ec   : > { %v2143_v37 = vsel %vm2129_vm11, %v2101_v23, %v1739_v6  ;;  %v10123_v6 = vld [vmem:[#allocation86_spill] sm:$0xff]  ;;  %v10127_v23 = vld [vmem:[#allocation152_spill] sm:$0xff] }
 0x2ed   : > { %5385 = vmatmul.mubr.msk.f32.gmra.mrb[20].mxu0 %vm2182_vm12, %v2140_v43  ;;  %v322_v43 = vld [vmem:[%s5802_s27 + $0x8d] sm:$0xff] }
 0x2ee   : > { %5387 = vmatprep.mubr.msk.f32.mxu0 %vm5744_vm3, %v10055_v61  ;;  %v1852_v36 = vsel %vm1835_vm4, %v322_v43, %v10112_v12  ;;  %v10135_v12 = vld [vmem:[#allocation54_spill] sm:$0xff] }
 0x2ef   : > { %v1894_v25 = vsel %vm1877_vm5, %v1852_v36, %v10114_v21 }
 0x2f0   : > { %v1936_v13 = vsel %vm1919_vm6, %v1894_v25, %v10116_v35  ;;  %v10138_v25 = vld [vmem:[#allocation126_spill] sm:$0xff]  ;;  %v10139_v35 = vld [vmem:[#allocation19_spill] sm:$0xff] }
 0x2f1   : > { %5388 = vmatmul.mubr.msk.f32.gmra.mrb[22].mxu0 %vm2182_vm12, %v2141_v19  ;;  %v323_v19 = vld [vmem:[%s5802_s27 + $0x95] sm:$0xff]  ;;  %v1978_v54 = vsel %vm1961_vm7, %v1936_v13, %v10118_v38  ;;  %v1751_v38 = vpop.permute.xlu0 %1750 }
 0x2f2   : > { %5390 = vmatprep.mubr.msk.f32.mxu0 %vm5744_vm3, %v10055_v61  ;;  %v1853_v34 = vsel %vm1835_vm4, %v323_v19, %v10119_v42  ;;  %v2020_v9 = vsel %vm2003_vm8, %v1978_v54, %v10120_v47  ;;  %v327_v54 = vld [vmem:[%s5802_s27 + $0xb5] sm:$0xff]  ;;  %v10143_v47 = vld [vmem:[#allocation91_spill] sm:$0xff] }
 0x2f3   : > { %v1895_v0 = vsel %vm1877_vm5, %v1853_v34, %v10121_v14  ;;  %v2062_v53 = vsel %vm2045_vm9, %v2020_v9, %v10122_v7  ;;  %v10145_v14 = vld [vmem:[#allocation125_spill] sm:$0xff] }
 0x2f4   : > { %v1937_v10 = vsel %vm1919_vm6, %v1895_v0, %v10123_v6  ;;  %v2104_v24 = vsel %vm2087_vm10, %v2062_v53, %v10124_v29  ;;  %v10146_v53 = vld [vmem:[#allocation18_spill] sm:$0xff] }
 0x2f5   : > { %5391 = vmatmul.mubr.msk.f32.gmra.mrb[24].mxu0 %vm2182_vm12, %v2142_v27  ;;  %v324_v27 = vld [vmem:[%s5802_s27 + $0x9d] sm:$0xff]  ;;  %v1979_v59 = vsel %vm1961_vm7, %v1937_v10, %v10125_v40  ;;  %v2146_v18 = vsel %vm2129_vm11, %v2104_v24, %v1745_v33  ;;  %v1857_v6 = vsel %vm1835_vm4, %v327_v54, %v10146_v53  ;;  %v10147_v10 = vld [vmem:[#allocation157_spill] sm:$0xff]  ;;  %v1753_v24 = vpop.permute.xlu1 %1752 }
 0x2f6   : > { %5393 = vmatprep.mubr.msk.f32.mxu0 %vm5744_vm3, %v10055_v61  ;;  %v1854_v1 = vsel %vm1835_vm4, %v324_v27, %v10126_v63  ;;  %v2021_v44 = vsel %vm2003_vm8, %v1979_v59, %v10127_v23  ;;  %v10144_v33 = vld [vmem:[#allocation214_spill] sm:$0xff]  ;;  %v10148_v59 = vld [vmem:[#allocation56_spill] sm:$0xff]  ;;  %v10149_v63 = vld [vmem:[#allocation185_spill] sm:$0xff] }
 0x2f7   : > { %v1896_v55 = vsel %vm1877_vm5, %v1854_v1, %v10128_v5  ;;  %v2063_v48 = vsel %vm2045_vm9, %v2021_v44, %v10129_v20  ;;  %v328_v40 = vld [vmem:[%s5802_s27 + $0xbd] sm:$0xff]  ;;  %v10152_v5 = vld [vmem:[#allocation128_spill] sm:$0xff] }
 0x2f8   : > { %v1938_v43 = vsel %vm1919_vm6, %v1896_v55, %v10130_v28  ;;  %v2105_v4 = vsel %vm2087_vm10, %v2063_v48, %v10131_v17  ;;  %v10150_v23 = vld [vmem:[#allocation90_spill] sm:$0xff]  ;;  %v10153_v48 = vld [vmem:[#allocation21_spill] sm:$0xff] }
 0x2f9   : > { %5394 = vmatmul.mubr.msk.f32.gmra.mrb[26].mxu0 %vm2182_vm12, %v2143_v37  ;;  %v325_v37 = vld [vmem:[%s5802_s27 + $0xa5] sm:$0xff]  ;;  %v1980_v26 = vsel %vm1961_vm7, %v1938_v43, %v10132_v56  ;;  %v2147_v22 = vsel %vm2129_vm11, %v2105_v4, %v1747_v30  ;;  %v1858_v28 = vsel %vm1835_vm4, %v328_v40, %v10153_v48  ;;  %v1755_v4 = vpop.permute.xlu0 %1754  ;;  %v10165_v54 = vld [vmem:[#allocation218_spill] sm:$0xff]  ;;  %v10172_v40 = vld [vmem:[#allocation217_spill] sm:$0xff] }
 0x2fa   : > { %5396 = vmatprep.mubr.msk.f32.mxu0 %vm5744_vm3, %v10055_v61  ;;  %v1855_v39 = vsel %vm1835_vm4, %v325_v37, %v10133_v57  ;;  %v2022_v41 = vsel %vm2003_vm8, %v1980_v26, %v10134_v2  ;;  %v10151_v30 = vld [vmem:[#allocation216_spill] sm:$0xff]  ;;  %v10155_v26 = vld [vmem:[#allocation55_spill] sm:$0xff]  ;;  %v10157_v2 = vld [vmem:[#allocation93_spill] sm:$0xff] }
 0x2fb   : > { %v1897_v36 = vsel %vm1877_vm5, %v1855_v39, %v10135_v12  ;;  %v2064_v3 = vsel %vm2045_vm9, %v2022_v41, %v10136_v15  ;;  %v10154_v43 = vld [vmem:[#allocation156_spill] sm:$0xff]  ;;  %v10159_v12 = vld [vmem:[#allocation127_spill] sm:$0xff] }
 0x2fc   : > { %v1939_v19 = vsel %vm1919_vm6, %v1897_v36, %v10137_v31  ;;  %v2106_v21 = vsel %vm2087_vm10, %v2064_v3, %v7228_v62  ;;  %v10142_v62 = vld [vmem:[#allocation186_spill] sm:$0xff]  ;;  %v329_v56 = vld [vmem:[%s5802_s27 + $0xc5] sm:$0xff] }
 0x2fd   : > { %5397 = vmatmul.mubr.msk.f32.gmra.mrb[28].mxu0 %vm2182_vm12, %v2144_v46  ;;  %v326_v46 = vld [vmem:[%s5802_s27 + $0xad] sm:$0xff]  ;;  %v1981_v60 = vsel %vm1961_vm7, %v1939_v19, %v10138_v25  ;;  %v2148_v52 = vsel %vm2129_vm11, %v2106_v21, %v1749_v45  ;;  %v10158_v45 = vld [vmem:[#allocation215_spill] sm:$0xff]  ;;  %v1757_v25 = vpop.permute.xlu1 %1756 }
 0x2fe   : > { %5399 = vmatprep.mubr.msk.f32.mxu0 %vm5744_vm3, %v10055_v61  ;;  %v1856_v13 = vsel %vm1835_vm4, %v326_v46, %v10139_v35  ;;  %v2023_v16 = vsel %vm2003_vm8, %v1981_v60, %v10140_v32  ;;  %v10156_v57 = vld [vmem:[#allocation188_spill] sm:$0xff]  ;;  %v10161_v19 = vld [vmem:[#allocation159_spill] sm:$0xff] }
 0x2ff   : > { %v2065_v34 = vsel %vm2045_vm9, %v2023_v16, %v10142_v62  ;;  %v10160_v3 = vld [vmem:[#allocation20_spill] sm:$0xff] }
 0x300   : > { %v2107_v27 = vsel %vm2087_vm10, %v2065_v34, %v10144_v33  ;;  %v1859_v31 = vsel %vm1835_vm4, %v329_v56, %v10160_v3  ;;  %v330_v60 = vld [vmem:[%s5802_s27 + $0xcd] sm:$0xff]  ;;  %v10168_v33 = vld [vmem:[#allocation158_spill] sm:$0xff]  ;;  %v10183_v3 = vld [vmem:[#allocation59_spill] sm:$0xff] }
 0x301   : > { %5400 = vmatmul.mubr.msk.f32.gmra.mrb[30].mxu0 %vm2182_vm12, %v2145_v58  ;;  %v10141_v58 = vld [vmem:[#allocation53_spill] sm:$0xff]  ;;  %v2149_v7 = vsel %vm2129_vm11, %v2107_v27, %v1751_v38  ;;  %v10164_v16 = vld [vmem:[#allocation92_spill] sm:$0xff] }
 0x302   : > { %5402 = vmatprep.mubr.msk.f32.mxu0 %vm5744_vm3, %v10055_v61  ;;  %v1898_v42 = vsel %vm1877_vm5, %v1856_v13, %v10141_v58  ;;  %v10163_v13 = vld [vmem:[#allocation187_spill] sm:$0xff] }
 0x303   : > { %v1940_v9 = vsel %vm1919_vm6, %v1898_v42, %v10143_v47  ;;  %v10166_v42 = vld [vmem:[#allocation130_spill] sm:$0xff]  ;;  %v10167_v47 = vld [vmem:[#allocation23_spill] sm:$0xff] }
 0x304   : > { %v1982_v0 = vsel %vm1961_vm7, %v1940_v9, %v10145_v14  ;;  %v1860_v9 = vsel %vm1835_vm4, %v330_v60, %v10167_v47  ;;  %v1759_v14 = vpop.permute.xlu0 %1758  ;;  %v10185_v60 = vld [vmem:[#allocation97_spill] sm:$0xff] }
 0x305   : > { %5403 = vmatmul.mubr.msk.f32.gmra.mrb[32].mxu0 %vm2182_vm12, %v2146_v18  ;;  %v2024_v29 = vsel %vm2003_vm8, %v1982_v0, %v10147_v10  ;;  %v1899_v18 = vsel %vm1877_vm5, %v1857_v6, %v10148_v59  ;;  %v331_v0 = vld [vmem:[%s5802_s27 + $0xd5] sm:$0xff]  ;;  %v334_v47 = vld [vmem:[%s5802_s27 + $0xed] sm:$0xff] }
 0x306   : > { %5405 = vmatprep.mubr.msk.f32.mxu0 %vm5744_vm3, %v10055_v61  ;;  %v2066_v1 = vsel %vm2045_vm9, %v2024_v29, %v10149_v63  ;;  %v1941_v44 = vsel %vm1919_vm6, %v1899_v18, %v10150_v23  ;;  %v10170_v6 = vld [vmem:[#allocation190_spill] sm:$0xff]  ;;  %v10171_v29 = vld [vmem:[#allocation95_spill] sm:$0xff]  ;;  %v10173_v18 = vld [vmem:[#allocation129_spill] sm:$0xff] }
 0x307   : > { %v2108_v37 = vsel %vm2087_vm10, %v2066_v1, %v10151_v30  ;;  %v1983_v55 = vsel %vm1961_vm7, %v1941_v44, %v10152_v5  ;;  %v10174_v23 = vld [vmem:[#allocation22_spill] sm:$0xff]  ;;  %v10175_v30 = vld [vmem:[#allocation161_spill] sm:$0xff]  ;;  %v1761_v5 = vpop.permute.xlu1 %1760 }
 0x308   : > { %v2150_v20 = vsel %vm2129_vm11, %v2108_v37, %v1753_v24  ;;  %v2025_v17 = vsel %vm2003_vm8, %v1983_v55, %v10154_v43  ;;  %v1861_v44 = vsel %vm1835_vm4, %v331_v0, %v10174_v23  ;;  %v332_v55 = vld [vmem:[%s5802_s27 + $0xdd] sm:$0xff]  ;;  %v10192_v0 = vld [vmem:[#allocation96_spill] sm:$0xff]  ;;  %v335_v23 = vld [vmem:[%s5802_s27 + $0xf5] sm:$0xff] }
 0x309   : > { %5406 = vmatmul.mubr.msk.f32.gmra.mrb[34].mxu0 %vm2182_vm12, %v2147_v22  ;;  %v1900_v22 = vsel %vm1877_vm5, %v1858_v28, %v10155_v26  ;;  %v2067_v39 = vsel %vm2045_vm9, %v2025_v17, %v10156_v57  ;;  %v10177_v28 = vld [vmem:[#allocation189_spill] sm:$0xff]  ;;  %v10179_v26 = vld [vmem:[#allocation220_spill] sm:$0xff] }
 0x30a   : > { %5408 = vmatprep.mubr.msk.f32.mxu0 %vm5744_vm3, %v10055_v61  ;;  %v1942_v41 = vsel %vm1919_vm6, %v1900_v22, %v10157_v2  ;;  %v2109_v46 = vsel %vm2087_vm10, %v2067_v39, %v10158_v45  ;;  %v2744_v17 = vld [vmem:[#allocation2 + $0xe] sm:$0xff] }
 0x30b   : > { %v1984_v36 = vsel %vm1961_vm7, %v1942_v41, %v10159_v12  ;;  %v2151_v15 = vsel %vm2129_vm11, %v2109_v46, %v1755_v4  ;;  %v10178_v4 = vld [vmem:[#allocation94_spill] sm:$0xff]  ;;  %3037 = vrot.lane.b32.xlu0 %v2744_v17, %s5747_s20  ;;  %v10180_v57 = vld [vmem:[#allocation132_spill] sm:$0xff]  ;;  %v10181_v41 = vld [vmem:[#allocation25_spill] sm:$0xff] }
 0x30c   : > { %v2026_v21 = vsel %vm2003_vm8, %v1984_v36, %v10161_v19  ;;  %v1862_v45 = vsel %vm1835_vm4, %v332_v55, %v10181_v41  ;;  %v10182_v46 = vld [vmem:[#allocation160_spill] sm:$0xff]  ;;  %v1763_v36 = vpop.permute.xlu0 %1762  ;;  %v10199_v55 = vld [vmem:[#allocation99_spill] sm:$0xff] }
 0x30d   : > { %5409 = vmatmul.mubr.msk.f32.gmra.mrb[36].mxu0 %vm2182_vm12, %v2148_v52  ;;  %v10162_v52 = vld [vmem:[#allocation58_spill] sm:$0xff]  ;;  %v2068_v32 = vsel %vm2045_vm9, %v2026_v21, %v10163_v13  ;;  %v10184_v19 = vld [vmem:[#allocation192_spill] sm:$0xff] }
 0x30e   : > { %5411 = vmatprep.mubr.msk.f32.mxu0 %vm5744_vm3, %v10055_v61  ;;  %v1901_v35 = vsel %vm1877_vm5, %v1859_v31, %v10162_v52  ;;  %v2110_v58 = vsel %vm2087_vm10, %v2068_v32, %v10165_v54  ;;  %v1904_v31 = vsel %vm1877_vm5, %v1862_v45, %v10183_v3  ;;  %v10187_v32 = vld [vmem:[#allocation131_spill] sm:$0xff]  ;;  %v10188_v54 = vld [vmem:[#allocation24_spill] sm:$0xff] }
 0x30f   : > { %v1943_v38 = vsel %vm1919_vm6, %v1901_v35, %v10164_v16  ;;  %v2152_v34 = vsel %vm2129_vm11, %v2110_v58, %v1757_v25  ;;  %v2745_v25 = vld [vmem:[#allocation2 + $0x16] sm:$0xff]  ;;  %v1946_v52 = vsel %vm1919_vm6, %v1904_v31, %v10185_v60  ;;  %v10186_v35 = vld [vmem:[#allocation219_spill] sm:$0xff]  ;;  %v10204_v41 = vld [vmem:[#allocation64_spill] sm:$0xff] }
 0x310   : > { %v1985_v62 = vsel %vm1961_vm7, %v1943_v38, %v10166_v42  ;;  %3039 = vrot.lane.b32.xlu1 %v2745_v25, %s5747_s20  ;;  %v1988_v16 = vsel %vm1961_vm7, %v1946_v52, %v10187_v32  ;;  %v10189_v42 = vld [vmem:[#allocation163_spill] sm:$0xff]  ;;  %v10207_v31 = vld [vmem:[#allocation136_spill] sm:$0xff]  ;;  %v10208_v25 = vld [vmem:[#allocation29_spill] sm:$0xff] }
 0x311   : > { %5412 = vmatmul.mubr.msk.f32.gmra.mrb[38].mxu0 %vm2182_vm12, %v2149_v7  ;;  %v2027_v27 = vsel %vm2003_vm8, %v1985_v62, %v10168_v33  ;;  %v10169_v7 = vld [vmem:[#allocation57_spill] sm:$0xff]  ;;  %v2030_v62 = vsel %vm2003_vm8, %v1988_v16, %v10189_v42  ;;  %v10209_v52 = vld [vmem:[#allocation164_spill] sm:$0xff]  ;;  %v10210_v16 = vld [vmem:[#allocation63_spill] sm:$0xff] }
 0x312   : > { %5414 = vmatprep.mubr.msk.f32.mxu0 %vm5744_vm3, %v10055_v61  ;;  %v1902_v53 = vsel %vm1877_vm5, %v1860_v9, %v10169_v7  ;;  %v2069_v10 = vsel %vm2045_vm9, %v2027_v27, %v10170_v6  ;;  %v10190_v9 = vld [vmem:[#allocation62_spill] sm:$0xff]  ;;  %v10191_v27 = vld [vmem:[#allocation191_spill] sm:$0xff] }
 0x313   : > { %v1944_v24 = vsel %vm1919_vm6, %v1902_v53, %v10171_v29  ;;  %v2111_v59 = vsel %vm2087_vm10, %v2069_v10, %v10172_v40  ;;  %v10193_v53 = vld [vmem:[#allocation222_spill] sm:$0xff]  ;;  %v10195_v40 = vld [vmem:[#allocation27_spill] sm:$0xff] }
 0x314   : > { %v1986_v63 = vsel %vm1961_vm7, %v1944_v24, %v10173_v18  ;;  %v2153_v1 = vsel %vm2129_vm11, %v2111_v59, %v1759_v14  ;;  %v2072_v14 = vsel %vm2045_vm9, %v2030_v62, %v10191_v27  ;;  %v10194_v10 = vld [vmem:[#allocation134_spill] sm:$0xff]  ;;  %v1864_v59 = vsel %vm1835_vm4, %v334_v47, %v10195_v40  ;;  %v337_v32 = vld [vmem:[%s5802_s27 + $0x105] sm:$0xff] }
 0x315   : > { %5415 = vmatmul.mubr.msk.f32.gmra.mrb[40].mxu0 %vm2182_vm12, %v2150_v20  ;;  %v2028_v37 = vsel %vm2003_vm8, %v1986_v63, %v10175_v30  ;;  %v10176_v20 = vld [vmem:[#allocation60_spill] sm:$0xff]  ;;  %v2114_v6 = vsel %vm2087_vm10, %v2072_v14, %v10193_v53  ;;  %v10196_v18 = vld [vmem:[#allocation162_spill] sm:$0xff]  ;;  %v10213_v62 = vld [vmem:[#allocation223_spill] sm:$0xff] }
 0x316   : > { %5417 = vmatprep.mubr.msk.f32.mxu0 %vm5744_vm3, %v10055_v61  ;;  %v1903_v48 = vsel %vm1877_vm5, %v1861_v44, %v10176_v20  ;;  %v2070_v43 = vsel %vm2045_vm9, %v2028_v37, %v10177_v28  ;;  %v10197_v44 = vld [vmem:[#allocation61_spill] sm:$0xff]  ;;  %v10198_v37 = vld [vmem:[#allocation194_spill] sm:$0xff]  ;;  %v10214_v47 = vld [vmem:[#allocation135_spill] sm:$0xff] }
 0x317   : > { %v1945_v56 = vsel %vm1919_vm6, %v1903_v48, %v10178_v4  ;;  %v2112_v22 = vsel %vm2087_vm10, %v2070_v43, %v10179_v26  ;;  %v1906_v30 = vsel %vm1877_vm5, %v1864_v59, %v10197_v44  ;;  %v10200_v48 = vld [vmem:[#allocation221_spill] sm:$0xff]  ;;  %v10215_v27 = vld [vmem:[#allocation28_spill] sm:$0xff] }
 0x318   : > { %v1987_v39 = vsel %vm1961_vm7, %v1945_v56, %v10180_v57  ;;  %v2154_v2 = vsel %vm2129_vm11, %v2112_v22, %v1761_v5  ;;  %v1948_v20 = vsel %vm1919_vm6, %v1906_v30, %v10199_v55  ;;  %v10201_v43 = vld [vmem:[#allocation133_spill] sm:$0xff]  ;;  %v10202_v56 = vld [vmem:[#allocation26_spill] sm:$0xff]  ;;  %v1867_v14 = vsel %vm1835_vm4, %v337_v32, %v10215_v27  ;;  %v10219_v59 = vld [vmem:[#allocation100_spill] sm:$0xff] }
 0x319   : > { %5418 = vmatmul.mubr.msk.f32.gmra.mrb[42].mxu0 %vm2182_vm12, %v2151_v15  ;;  %v2029_v12 = vsel %vm2003_vm8, %v1987_v39, %v10182_v46  ;;  %v333_v15 = vld [vmem:[%s5802_s27 + $0xe5] sm:$0xff]  ;;  %v1990_v17 = vsel %vm1961_vm7, %v1948_v20, %v10201_v43  ;;  %v1865_v26 = vsel %vm1835_vm4, %v335_v23, %v10202_v56  ;;  %v10203_v22 = vld [vmem:[#allocation165_spill] sm:$0xff] }
 0x31a   : > { %5420 = vmatprep.mubr.msk.f32.mxu0 %vm5744_vm3, %v10055_v61  ;;  %v2071_v21 = vsel %vm2045_vm9, %v2029_v12, %v10184_v19  ;;  %v1863_v58 = vsel %vm1835_vm4, %v333_v15, %v10188_v54  ;;  %v2032_v57 = vsel %vm2003_vm8, %v1990_v17, %v10203_v22  ;;  %v1907_v45 = vsel %vm1877_vm5, %v1865_v26, %v10204_v41  ;;  %v10205_v46 = vld [vmem:[#allocation193_spill] sm:$0xff]  ;;  %v10221_v30 = vld [vmem:[#allocation31_spill] sm:$0xff]  ;;  %v10226_v26 = vld [vmem:[#allocation224_spill] sm:$0xff] }
 0x31b   : > { %v2113_v13 = vsel %vm2087_vm10, %v2071_v21, %v10186_v35  ;;  %v1905_v33 = vsel %vm1877_vm5, %v1863_v58, %v10190_v9  ;;  %v2074_v12 = vsel %vm2045_vm9, %v2032_v57, %v10205_v46  ;;  %v10212_v58 = vld [vmem:[#allocation101_spill] sm:$0xff]  ;;  %v10228_v41 = vld [vmem:[#allocation30_spill] sm:$0xff] }
 0x31c   : > { %v2155_v38 = vsel %vm2129_vm11, %v2113_v13, %v1763_v36  ;;  %v1947_v7 = vsel %vm1919_vm6, %v1905_v33, %v10192_v0  ;;  %v10206_v36 = vld [vmem:[#allocation98_spill] sm:$0xff]  ;;  %v2116_v3 = vsel %vm2087_vm10, %v2074_v12, %v7258_v50  ;;  %v10211_v50 = vld [vmem:[#allocation196_spill] sm:$0xff]  ;;  %v10216_v0 = vld [vmem:[#allocation167_spill] sm:$0xff] }
 0x31d   : > { %5421 = vmatmul.mubr.msk.f32.gmra.mrb[44].mxu0 %vm2182_vm12, %v2152_v34  ;;  %v1765_v34 = vpop.permute.xlu1 %1764  ;;  %v1989_v29 = vsel %vm1961_vm7, %v1947_v7, %v10194_v10  ;;  %v1949_v15 = vsel %vm1919_vm6, %v1907_v45, %v10206_v36  ;;  %v10217_v10 = vld [vmem:[#allocation66_spill] sm:$0xff]  ;;  %v10227_v57 = vld [vmem:[#allocation137_spill] sm:$0xff] }
 0x31e   : > { %5423 = vmatprep.mubr.msk.f32.mxu0 %vm5744_vm3, %v10055_v61  ;;  %v2156_v24 = vsel %vm2129_vm11, %v2114_v6, %v1765_v34  ;;  %v2031_v63 = vsel %vm2003_vm8, %v1989_v29, %v10196_v18  ;;  %v1991_v19 = vsel %vm1961_vm7, %v1949_v15, %v10207_v31  ;;  %v338_v6 = vld [vmem:[%s5802_s27 + $0x10d] sm:$0xff]  ;;  %v1909_v29 = vsel %vm1877_vm5, %v1867_v14, %v10217_v10  ;;  %v340_v15 = vld [vmem:[%s5802_s27 + $0x11d] sm:$0xff] }
 0x31f   : > { %v2073_v5 = vsel %vm2045_vm9, %v2031_v63, %v10198_v37  ;;  %v2033_v35 = vsel %vm2003_vm8, %v1991_v19, %v10209_v52  ;;  %v1951_v18 = vsel %vm1919_vm6, %v1909_v29, %v10219_v59  ;;  %v1868_v37 = vsel %vm1835_vm4, %v338_v6, %v10221_v30  ;;  %v10229_v46 = vld [vmem:[#allocation169_spill] sm:$0xff]  ;;  %v10233_v52 = vld [vmem:[#allocation226_spill] sm:$0xff]  ;;  %v10242_v29 = vld [vmem:[#allocation32_spill] sm:$0xff] }
 0x320   : > { %v2115_v28 = vsel %vm2087_vm10, %v2073_v5, %v10200_v48  ;;  %v2075_v54 = vsel %vm2045_vm9, %v2033_v35, %v10211_v50  ;;  %v10222_v5 = vld [vmem:[#allocation166_spill] sm:$0xff]  ;;  %v10231_v19 = vld [vmem:[#allocation197_spill] sm:$0xff] }
 0x321   : > { %5424 = vmatmul.mubr.msk.f32.gmra.mrb[46].mxu0 %vm2182_vm12, %v2153_v1  ;;  %v1767_v1 = vpop.permute.xlu0 %1766  ;;  %v1769_v39 = vpop.permute.xlu1 %1768  ;;  %v2117_v34 = vsel %vm2087_vm10, %v2075_v54, %v10213_v62  ;;  %v339_v48 = vld [vmem:[%s5802_s27 + $0x115] sm:$0xff]  ;;  %v10236_v54 = vld [vmem:[#allocation168_spill] sm:$0xff] }
 0x322   : > { %5426 = vmatprep.mubr.msk.f32.mxu0 %vm5744_vm3, %v10055_v61  ;;  %v2157_v4 = vsel %vm2129_vm11, %v2115_v28, %v1767_v1  ;;  %v2158_v21 = vsel %vm2129_vm11, %v2116_v3, %v1769_v39  ;;  %v10220_v1 = vld [vmem:[#allocation138_spill] sm:$0xff]  ;;  %v10223_v28 = vld [vmem:[#allocation65_spill] sm:$0xff]  ;;  %v1869_v45 = vsel %vm1835_vm4, %v339_v48, %v10228_v41  ;;  %v10230_v3 = vld [vmem:[#allocation68_spill] sm:$0xff] }
 0x323   : > { %v1993_v23 = vsel %vm1961_vm7, %v1951_v18, %v10220_v1  ;;  %v1910_v43 = vsel %vm1877_vm5, %v1868_v37, %v10223_v28  ;;  %v1911_v31 = vsel %vm1877_vm5, %v1869_v45, %v10230_v3  ;;  %v341_v62 = vld [vmem:[%s5802_s27 + $0x125] sm:$0xff]  ;;  %v10239_v27 = vld [vmem:[#allocation105_spill] sm:$0xff]  ;;  %v10244_v1 = vld [vmem:[#allocation70_spill] sm:$0xff] }
 0x324   : > { %v2035_v55 = vsel %vm2003_vm8, %v1993_v23, %v10222_v5  ;;  %v10246_v37 = vld [vmem:[#allocation104_spill] sm:$0xff]  ;;  %v10248_v48 = vld [vmem:[#allocation142_spill] sm:$0xff]  ;;  %v10253_v45 = vld [vmem:[#allocation107_spill] sm:$0xff] }
 0x325   : > { %5427 = vmatmul.mubr.msk.f32.gmra.mrb[48].mxu0 %vm2182_vm12, %v2154_v2  ;;  %v336_v2 = vld [vmem:[%s5802_s27 + $0xfd] sm:$0xff]  ;;  %v1771_v13 = vpop.permute.xlu0 %1770  ;;  %v1773_v53 = vpop.permute.xlu1 %1772 }
 0x326   : > { %5429 = vmatprep.mubr.msk.f32.mxu0 %vm5744_vm3, %v10055_v61  ;;  %v1866_v60 = vsel %vm1835_vm4, %v336_v2, %v10208_v25  ;;  %v2159_v33 = vsel %vm2129_vm11, %v2117_v34, %v1771_v13  ;;  %v10232_v25 = vld [vmem:[#allocation102_spill] sm:$0xff]  ;;  %v10234_v13 = vld [vmem:[#allocation140_spill] sm:$0xff]  ;;  %v10237_v34 = vld [vmem:[#allocation67_spill] sm:$0xff] }
 0x329   : > { %5430 = vmatmul.mubr.msk.f32.gmra.mrb[50].mxu0 %vm2182_vm12, %v2155_v38  ;;  %v1908_v38 = vsel %vm1877_vm5, %v1866_v60, %v10210_v16  ;;  %v1775_v20 = vpop.permute.xlu0 %1774  ;;  %v1777_v36 = vpop.permute.xlu1 %1776  ;;  %v1953_v60 = vsel %vm1919_vm6, %v1911_v31, %v10232_v25  ;;  %v10257_v25 = vld [vmem:[#allocation173_spill] sm:$0xff] }
 0x32a   : > { %5432 = vmatprep.mubr.msk.f32.mxu0 %vm5744_vm3, %v10055_v61  ;;  %v1950_v42 = vsel %vm1919_vm6, %v1908_v38, %v10212_v58  ;;  %v1995_v32 = vsel %vm1961_vm7, %v1953_v60, %v10234_v13  ;;  %v10235_v38 = vld [vmem:[#allocation33_spill] sm:$0xff]  ;;  %v10258_v13 = vld [vmem:[#allocation72_spill] sm:$0xff] }
 0x32b   : > { %v1992_v9 = vsel %vm1961_vm7, %v1950_v42, %v10214_v47  ;;  %v1870_v50 = vsel %vm1835_vm4, %v340_v15, %v10235_v38  ;;  %v2037_v58 = vsel %vm2003_vm8, %v1995_v32, %v10236_v54  ;;  %v10255_v15 = vld [vmem:[#allocation141_spill] sm:$0xff] }
 0x32c   : > { %v2034_v7 = vsel %vm2003_vm8, %v1992_v9, %v10216_v0  ;;  %v1912_v47 = vsel %vm1877_vm5, %v1870_v50, %v10237_v34  ;;  %v10238_v9 = vld [vmem:[#allocation200_spill] sm:$0xff]  ;;  %v10240_v0 = vld [vmem:[#allocation225_spill] sm:$0xff]  ;;  %v10260_v50 = vld [vmem:[#allocation106_spill] sm:$0xff] }
 0x32d   : > { %5433 = vmatmul.mubr.msk.f32.gmra.mrb[52].mxu0 %vm2182_vm12, %v2156_v24  ;;  %v10218_v24 = vld [vmem:[#allocation195_spill] sm:$0xff]  ;;  %v1779_v42 = vpop.permute.xlu0 %1778  ;;  %v1954_v14 = vsel %vm1919_vm6, %v1912_v47, %v10239_v27  ;;  %v1781_v18 = vpop.permute.xlu1 %1780  ;;  %v10264_v27 = vld [vmem:[#allocation172_spill] sm:$0xff] }
 0x32e   : > { %5435 = vmatprep.mubr.msk.f32.mxu0 %vm5744_vm3, %v10055_v61  ;;  %v2076_v40 = vsel %vm2045_vm9, %v2034_v7, %v10218_v24  ;;  %v1871_v24 = vsel %vm1835_vm4, %v341_v62, %v10242_v29  ;;  %v10262_v62 = vld [vmem:[#allocation144_spill] sm:$0xff] }
 0x32f   : > { %v2118_v63 = vsel %vm2087_vm10, %v2076_v40, %v7262_v8  ;;  %v10224_v8 = vld [vmem:[#allocation198_spill] sm:$0xff]  ;;  %v10243_v40 = vld [vmem:[#allocation171_spill] sm:$0xff]  ;;  %v1913_v23 = vsel %vm1877_vm5, %v1871_v24, %v10244_v1  ;;  %v10267_v24 = vld [vmem:[#allocation109_spill] sm:$0xff] }
 0x330   : > { %v2160_v44 = vsel %vm2129_vm11, %v2118_v63, %v1773_v53  ;;  %v2077_v17 = vsel %vm2045_vm9, %v2035_v55, %v10224_v8  ;;  %v10241_v53 = vld [vmem:[#allocation139_spill] sm:$0xff]  ;;  %v342_v63 = vld [vmem:[%s5802_s27 + $0x12d] sm:$0xff]  ;;  %v1955_v5 = vsel %vm1919_vm6, %v1913_v23, %v10246_v37 }
 0x331   : > { %5436 = vmatmul.mubr.msk.f32.gmra.mrb[54].mxu0 %vm2182_vm12, %v2157_v4  ;;  %v10225_v4 = vld [vmem:[#allocation103_spill] sm:$0xff]  ;;  %v2119_v22 = vsel %vm2087_vm10, %v2077_v17, %v10226_v26  ;;  %v1996_v6 = vsel %vm1961_vm7, %v1954_v14, %v10241_v53  ;;  %v10247_v55 = vld [vmem:[#allocation228_spill] sm:$0xff]  ;;  %v1997_v28 = vsel %vm1961_vm7, %v1955_v5, %v10248_v48  ;;  %v1783_v26 = vpop.permute.xlu0 %1782  ;;  %v10272_v48 = vld [vmem:[#allocation74_spill] sm:$0xff] }
 0x332   : > { %5438 = vmatprep.mubr.msk.f32.mxu0 %vm5744_vm3, %v10055_v61  ;;  %v1952_v56 = vsel %vm1919_vm6, %v1910_v43, %v10225_v4  ;;  %v2161_v2 = vsel %vm2129_vm11, %v2119_v22, %v1775_v20  ;;  %v2038_v59 = vsel %vm2003_vm8, %v1996_v6, %v10243_v40  ;;  %v10249_v8 = vld [vmem:[#allocation35_spill] sm:$0xff]  ;;  %v10250_v4 = vld [vmem:[#allocation170_spill] sm:$0xff] }
 0x333   : > { %v1994_v39 = vsel %vm1961_vm7, %v1952_v56, %v10227_v57  ;;  %v1872_v17 = vsel %vm1835_vm4, %v342_v63, %v10249_v8  ;;  %v2039_v56 = vsel %vm2003_vm8, %v1997_v28, %v10250_v4  ;;  %v343_v22 = vld [vmem:[%s5802_s27 + $0x135] sm:$0xff]  ;;  %v10265_v53 = vld [vmem:[#allocation71_spill] sm:$0xff] }
 0x334   : > { %v2036_v12 = vsel %vm2003_vm8, %v1994_v39, %v10229_v46  ;;  %v10251_v57 = vld [vmem:[#allocation69_spill] sm:$0xff]  ;;  %v10269_v63 = vld [vmem:[#allocation143_spill] sm:$0xff] }
 0x335   : > { %5439 = vmatmul.mubr.msk.f32.gmra.mrb[56].mxu0 %vm2182_vm12, %v2158_v21  ;;  %v2078_v21 = vsel %vm2045_vm9, %v2036_v12, %v10231_v19  ;;  %v1914_v39 = vsel %vm1877_vm5, %v1872_v17, %v10251_v57  ;;  %v10254_v12 = vld [vmem:[#allocation227_spill] sm:$0xff]  ;;  %v10256_v19 = vld [vmem:[#allocation34_spill] sm:$0xff]  ;;  %v10274_v17 = vld [vmem:[#allocation108_spill] sm:$0xff] }
 0x336   : > { %5441 = vmatprep.mubr.msk.f32.mxu0 %vm5744_vm3, %v10055_v61  ;;  %v2120_v35 = vsel %vm2087_vm10, %v2078_v21, %v10233_v52  ;;  %v1956_v46 = vsel %vm1919_vm6, %v1914_v39, %v10253_v45  ;;  %v1873_v21 = vsel %vm1835_vm4, %v343_v22, %v10256_v19  ;;  %v1785_v52 = vpop.permute.xlu1 %1784  ;;  %v10271_v37 = vld [vmem:[#allocation175_spill] sm:$0xff]  ;;  %v10276_v39 = vld [vmem:[#allocation38_spill] sm:$0xff] }
 0x337   : > { %v2162_v16 = vsel %vm2129_vm11, %v2120_v35, %v1777_v36  ;;  %v1998_v3 = vsel %vm1961_vm7, %v1956_v46, %v10255_v15  ;;  %v344_v35 = vld [vmem:[%s5802_s27 + $0x13d] sm:$0xff]  ;;  %v1915_v32 = vsel %vm1877_vm5, %v1873_v21, %v10258_v13  ;;  %v10281_v21 = vld [vmem:[#allocation145_spill] sm:$0xff] }
 0x338   : > { %v2040_v60 = vsel %vm2003_vm8, %v1998_v3, %v10257_v25  ;;  %v1957_v54 = vsel %vm1919_vm6, %v1915_v32, %v10260_v50  ;;  %v10279_v15 = vld [vmem:[#allocation206_spill] sm:$0xff]  ;;  %v10283_v32 = vld [vmem:[#allocation205_spill] sm:$0xff]  ;;  %v8078_v50 = vld [vmem:[%s9818_s3] ss:$0 sm:$0xff] }
 0x339   : > { %5442 = vmatmul.mubr.msk.f32.gmra.mrb[58].mxu0 %vm2182_vm12, %v2159_v33  ;;  %v2079_v33 = vsel %vm2045_vm9, %v2037_v58, %v10238_v9  ;;  %v10261_v58 = vld [vmem:[#allocation230_spill] sm:$0xff]  ;;  %v1999_v34 = vsel %vm1961_vm7, %v1957_v54, %v10262_v62  ;;  %v10263_v9 = vld [vmem:[#allocation37_spill] sm:$0xff] }
 0x33a   : > { %5444 = vmatprep.mubr.msk.f32.mxu0 %vm5744_vm3, %v10055_v61  ;;  %v2121_v7 = vsel %vm2087_vm10, %v2079_v33, %v10240_v0  ;;  %v1874_v33 = vsel %vm1835_vm4, %v344_v35, %v10263_v9  ;;  %v2041_v14 = vsel %vm2003_vm8, %v1999_v34, %v10264_v27  ;;  %v1787_v0 = vpop.permute.xlu0 %1786  ;;  %v10280_v3 = vld [vmem:[#allocation110_spill] sm:$0xff]  ;;  %v266_v27 = vld [vmem:[%s9816_s1 + $0x8] sm:$0xff] }
 0x33b   : > { %v2163_v10 = vsel %vm2129_vm11, %v2121_v7, %v1779_v42  ;;  %v345_v7 = vld [vmem:[%s5802_s27 + $0x145] sm:$0xff]  ;;  %v1916_v6 = vsel %vm1877_vm5, %v1874_v33, %v10265_v53 }
 0x33c   : > { %v1958_v40 = vsel %vm1919_vm6, %v1916_v6, %v10267_v24 }
 0x33d   : > { %5445 = vmatmul.mubr.msk.f32.gmra.mrb[60].mxu0 %vm2182_vm12, %v2160_v44  ;;  %v10245_v44 = vld [vmem:[#allocation199_spill] sm:$0xff]  ;;  %v2000_v1 = vsel %vm1961_vm7, %v1958_v40, %v10269_v63  ;;  %v268_v63 = vld [vmem:[%s9816_s1 + $0x18] sm:$0xff] }
 0x33e   : > { %5447 = vmatprep.mubr.msk.f32.mxu0 %vm5744_vm3, %v10055_v61  ;;  %v2080_v30 = vsel %vm2045_vm9, %v2038_v59, %v10245_v44  ;;  %v10268_v59 = vld [vmem:[#allocation229_spill] sm:$0xff]  ;;  %v10270_v44 = vld [vmem:[#allocation36_spill] sm:$0xff]  ;;  %v2042_v5 = vsel %vm2003_vm8, %v2000_v1, %v10271_v37  ;;  %v1791_v46 = vpop.permute.xlu0 %1790 }
 0x33f   : > { %v2122_v20 = vsel %vm2087_vm10, %v2080_v30, %v10247_v55  ;;  %v1875_v30 = vsel %vm1835_vm4, %v345_v7, %v10270_v44  ;;  %v1789_v55 = vpop.permute.xlu1 %1788 }
 0x340   : > { %v2164_v43 = vsel %vm2129_vm11, %v2122_v20, %v1781_v18  ;;  %v346_v20 = vld [vmem:[%s5802_s27 + $0x14d] sm:$0xf]  ;;  %v1917_v28 = vsel %vm1877_vm5, %v1875_v30, %v10272_v48 }
 0x341   : > { %5448 = vmatmul.mubr.msk.f32.gmra.mrb[62].mxu0 %vm2182_vm12, %v2161_v2  ;;  %v10252_v2 = vld [vmem:[#allocation202_spill] sm:$0xff]  ;;  %v1959_v4 = vsel %vm1919_vm6, %v1917_v28, %v10274_v17 }
 0x342   : > { %5450 = vmatprep.mubr.msk.f32.mxu0 %vm5744_vm3, %v10055_v61  ;;  %v2081_v41 = vsel %vm2045_vm9, %v2039_v56, %v10252_v2  ;;  %v1876_v2 = vsel %vm1835_vm4, %v346_v20, %v10276_v39  ;;  %vm4482_vm4 = vcmask 457728  }
 0x343   : > { %v2123_v36 = vsel %vm2087_vm10, %v2081_v41, %v10254_v12  ;;  %v10277_v41 = vld [vmem:[#allocation174_spill] sm:$0xff]  ;;  %v10278_v12 = vld [vmem:[#allocation73_spill] sm:$0xff]  ;;  %v1793_v13 = vpop.permute.xlu1 %1792 }
 0x344   : > { %v2165_v31 = vsel %vm2129_vm11, %v2123_v36, %v1783_v26  ;;  %v10275_v26 = vld [vmem:[#allocation146_spill] sm:$0xff]  ;;  %v1918_v36 = vsel %vm1877_vm5, %v1876_v2, %v10278_v12  ;;  %vm4524_vm5 = vcmask 523264  }
 0x345   : > { %5451 = vmatmul.mubr.msk.f32.gmra.mrb[64].mxu0 %vm2182_vm12, %v2162_v16  ;;  %v10259_v16 = vld [vmem:[#allocation201_spill] sm:$0xff]  ;;  %v2001_v22 = vsel %vm1961_vm7, %v1959_v4, %v10275_v26  ;;  %v270_v4 = vld [vmem:[%s9816_s1 + $0x28] sm:$0xff] }
 0x346   : > { %5453 = vmatprep.mubr.msk.f32.mxu0 %vm5744_vm3, %v10055_v61  ;;  %v2082_v38 = vsel %vm2045_vm9, %v2040_v60, %v10259_v16  ;;  %v2043_v45 = vsel %vm2003_vm8, %v2001_v22, %v10277_v41  ;;  %v271_v41 = vld [vmem:[%s9816_s1 + $0x30] sm:$0xff] }
 0x347   : > { %v2124_v42 = vsel %vm2087_vm10, %v2082_v38, %v10261_v58 }
 0x348   : > { %v2166_v47 = vsel %vm2129_vm11, %v2124_v42, %v1785_v52  ;;  %v10282_v52 = vld [vmem:[#allocation176_spill] sm:$0xff] }
 0x349   : > { %5454 = vmatmul.mubr.msk.f32.gmra.mrb[66].mxu0 %vm2182_vm12, %v2163_v10  ;;  %v10266_v10 = vld [vmem:[#allocation204_spill] sm:$0xff] }
 0x34a   : > { %5456 = vmatprep.mubr.msk.f32.mxu0 %vm5744_vm3, %v10055_v61  ;;  %v2083_v29 = vsel %vm2045_vm9, %v2041_v14, %v10266_v10  ;;  %v267_v10 = vld [vmem:[%s9816_s1 + $0x10] sm:$0xff] }
 0x34b   : > { %v2125_v18 = vsel %vm2087_vm10, %v2083_v29, %v10268_v59 }
 0x34c   : > { %v2167_v23 = vsel %vm2129_vm11, %v2125_v18, %v1787_v0 }
 0x34d   : > { %5457 = vmatmul.mubr.msk.f32.gmra.mrb[68].mxu0 %vm2182_vm12, %v2164_v43  ;;  %v10273_v43 = vld [vmem:[#allocation203_spill] sm:$0xff] }
 0x34e   : > { %5459 = vmatprep.mubr.msk.f32.mxu0 %vm5744_vm3, %v10055_v61  ;;  %v2084_v8 = vsel %vm2045_vm9, %v2042_v5, %v10273_v43 }
 0x34f   : > { %v2126_v56 = vsel %vm2087_vm10, %v2084_v8, %v7286_v11  ;;  %v2085_v11 = vsel %vm2045_vm9, %v2043_v45, %v10279_v15 }
 0x350   : > { %v2168_v57 = vsel %vm2129_vm11, %v2126_v56, %v1789_v55  ;;  %v2127_v19 = vsel %vm2087_vm10, %v2085_v11, %v7284_v51  ;;  %v269_v55 = vld [vmem:[%s9816_s1 + $0x20] sm:$0xff] }
 0x351   : > { %5460 = vmatmul.mubr.msk.f32.gmra.mrb[70].mxu0 %vm2182_vm12, %v2165_v31  ;;  %v1960_v31 = vsel %vm1919_vm6, %v1918_v36, %v10280_v3  ;;  %v2169_v60 = vsel %vm2129_vm11, %v2127_v19, %v1791_v46  ;;  %v272_v3 = vld [vmem:[%s9816_s1 + $0x38] sm:$0xff]  ;;  %vm4582_vm6 = vcmask 588800  }
 0x352   : > { %5462 = vmatprep.mubr.msk.f32.mxu0 %vm5744_vm3, %v10055_v61  ;;  %v2002_v25 = vsel %vm1961_vm7, %v1960_v31, %v10281_v21 }
 0x353   : > { %v2044_v35 = vsel %vm2003_vm8, %v2002_v25, %v10282_v52 }
 0x354   : > { %v2086_v16 = vsel %vm2045_vm9, %v2044_v35, %v10283_v32  ;;  %v273_v35 = vld [vmem:[%s9816_s1 + $0x40] sm:$0xff] }
 0x355   : > { %5463 = vmatmul.mubr.msk.f32.gmra.mrb[72].mxu0 %vm2182_vm12, %v2166_v47  ;;  %v2128_v51 = vsel %vm2087_vm10, %v2086_v16, %v7303_v49  ;;  %v265_v49 = vld [vmem:[%s9816_s1] sm:$0xff] }
 0x356   : > { %5465 = vmatprep.mubr.msk.f32.mxu0 %vm5744_vm3, %v10055_v61  ;;  %v2170_v38 = vsel %vm2129_vm11, %v2128_v51, %v1793_v13 }
 0x359   : > { %5466 = vmatmul.mubr.msk.f32.gmra.mrb[74].mxu0 %vm2182_vm12, %v2167_v23 }
 0x35a   : > { %5468 = vmatprep.mubr.msk.f32.mxu0 %vm5744_vm3, %v10055_v61 }
 0x35d   : > { %5469 = vmatmul.mubr.msk.f32.gmra.mrb[76].mxu0 %vm2182_vm12, %v2168_v57 }
 0x35e   : > { %5471 = vmatprep.mubr.msk.f32.mxu0 %vm5744_vm3, %v10055_v61 }
 0x361   : > { %5472 = vmatmul.mubr.msk.f32.gmra.mrb[78].mxu0 %vm2182_vm12, %v2169_v60 }
 0x362   : > { %5474 = vmatprep.mubr.msk.f32.mxu0 %vm5744_vm3, %v10055_v61 }
 0x365   : > { %5475 = vmatmul.mubr.msk.f32.gmra.mrb[80].mxu0 %vm2182_vm12, %v2170_v38 }
 0x366   : > { %5495 = vmatprep.mubr.msk.f32.mxu0 %vm5744_vm3, %v10055_v61 }
 0x398   : > { %v2376_v54 = vpop.f32.mrb[0].mxu0 }
 0x399   : > { %v2377_v58 = vadd.f32 %v8078_v50, %v2376_v54  ;;  %v5356_v42 = vpop.f32.mrb[1].mxu0 }
 0x39b   : > { %v2580_v62 = vmax.f32 %v2377_v58, 0.0  ;;  %v274_v58 = vld [vmem:[%s9816_s1 + $0x48] sm:$0xff] }
 0x39c   : > { %v2381_v34 = vpop.f32.mrb[2].mxu0 }
 0x39d   : > { %v2621_v47 = vmul.f32 %v2580_v62, %v265_v49  ;;  %v2382_v9 = vadd.f32 %v8078_v50, %v2381_v34  ;;  %v5359_v33 = vpop.f32.mrb[3].mxu0 }
 0x39e   : > { %v275_v33 = vld [vmem:[%s9816_s1 + $0x50] sm:$0xff] }
 0x39f   : > { %2662 = vst.msk [vmem:[#allocation2 + $0x20] sm:$0xff] %vm255_vm13, %v2621_v47  ;;  %v2581_v14 = vmax.f32 %v2382_v9, 0.0 }
 0x3a0   : > { %v2386_v0 = vpop.f32.mrb[4].mxu0 }
 0x3a1   : > { %v2622_v7 = vmul.f32 %v2581_v14, %v266_v27  ;;  %v2387_v53 = vadd.f32 %v8078_v50, %v2386_v0  ;;  %v5362_v6 = vpop.f32.mrb[5].mxu0 }
 0x3a3   : > { %2663 = vst.msk [vmem:[#allocation2 + $0x28] sm:$0xff] %vm255_vm13, %v2622_v7  ;;  %v2582_v29 = vmax.f32 %v2387_v53, 0.0 }
 0x3a4   : > { %v2391_v24 = vpop.f32.mrb[6].mxu0 }
 0x3a5   : > { %v2623_v40 = vmul.f32 %v2582_v29, %v267_v10  ;;  %v2392_v59 = vadd.f32 %v8078_v50, %v2391_v24  ;;  %v5365_v18 = vpop.f32.mrb[7].mxu0  ;;  %v276_v10 = vld [vmem:[%s9816_s1 + $0x58] sm:$0xff] }
 0x3a6   : > { %v2746_v1 = vld [vmem:[#allocation2 + $0x1e] sm:$0xff] }
 0x3a7   : > { %2664 = vst.msk [vmem:[#allocation2 + $0x30] sm:$0xff] %vm255_vm13, %v2623_v40  ;;  %v2583_v23 = vmax.f32 %v2392_v59, 0.0  ;;  %3041 = vrot.lane.b32.xlu0 %v2746_v1, %s5747_s20  ;;  %v277_v1 = vld [vmem:[%s9816_s1 + $0x60] sm:$0xff] }
 0x3a8   : > { %v2396_v44 = vpop.f32.mrb[8].mxu0 }
 0x3a9   : > { %v2624_v30 = vmul.f32 %v2583_v23, %v268_v63  ;;  %v2397_v37 = vadd.f32 %v8078_v50, %v2396_v44  ;;  %v5368_v5 = vpop.f32.mrb[9].mxu0 }
 0x3aa   : > { %v2747_v20 = vld [vmem:[#allocation2 + $0x26] sm:$0xff] }
 0x3ab   : > { %2665 = vst.msk [vmem:[#allocation2 + $0x38] sm:$0xff] %vm255_vm13, %v2624_v30  ;;  %v2584_v48 = vmax.f32 %v2397_v37, 0.0  ;;  %3043 = vrot.lane.b32.xlu1 %v2747_v20, %s5747_s20  ;;  %v278_v20 = vld [vmem:[%s9816_s1 + $0x68] sm:$0xff] }
 0x3ac   : > { %v2401_v28 = vpop.f32.mrb[10].mxu0 }
 0x3ad   : > { %v2625_v43 = vmul.f32 %v2584_v48, %v269_v55  ;;  %v2402_v8 = vadd.f32 %v8078_v50, %v2401_v28  ;;  %v5371_v17 = vpop.f32.mrb[11].mxu0 }
 0x3ae   : > { %v2748_v56 = vld [vmem:[#allocation2 + $0x2e] sm:$0xff] }
 0x3af   : > { %2666 = vst.msk [vmem:[#allocation2 + $0x40] sm:$0xff] %vm255_vm13, %v2625_v43  ;;  %v2585_v26 = vmax.f32 %v2402_v8, 0.0  ;;  %3045 = vrot.lane.b32.xlu0 %v2748_v56, %s5747_s20  ;;  %v279_v56 = vld [vmem:[%s9816_s1 + $0x70] sm:$0xff] }
 0x3b0   : > { %v2406_v22 = vpop.f32.mrb[12].mxu0 }
 0x3b1   : > { %v2626_v57 = vmul.f32 %v2585_v26, %v270_v4  ;;  %v2407_v39 = vadd.f32 %v8078_v50, %v2406_v22  ;;  %v5374_v2 = vpop.f32.mrb[13].mxu0 }
 0x3b2   : > { %v2749_v45 = vld [vmem:[#allocation2 + $0x36] sm:$0xff] }
 0x3b3   : > { %2667 = vst.msk [vmem:[#allocation2 + $0x48] sm:$0xff] %vm255_vm13, %v2626_v57  ;;  %v2586_v46 = vmax.f32 %v2407_v39, 0.0  ;;  %3047 = vrot.lane.b32.xlu1 %v2749_v45, %s5747_s20  ;;  %v280_v45 = vld [vmem:[%s9816_s1 + $0x78] sm:$0xff] }
 0x3b4   : > { %v2411_v12 = vpop.f32.mrb[14].mxu0 }
 0x3b5   : > { %v2627_v36 = vmul.f32 %v2586_v46, %v271_v41  ;;  %v2412_v15 = vadd.f32 %v8078_v50, %v2411_v12  ;;  %v5377_v11 = vpop.f32.mrb[15].mxu0 }
 0x3b6   : > { %v2750_v31 = vld [vmem:[#allocation2 + $0x3e] sm:$0xff] }
 0x3b7   : > { %2668 = vst.msk [vmem:[#allocation2 + $0x50] sm:$0xff] %vm255_vm13, %v2627_v36  ;;  %v2587_v19 = vmax.f32 %v2412_v15, 0.0  ;;  %3049 = vrot.lane.b32.xlu0 %v2750_v31, %s5747_s20  ;;  %v281_v31 = vld [vmem:[%s9816_s1 + $0x80] sm:$0xff] }
 0x3b8   : > { %v2416_v21 = vpop.f32.mrb[16].mxu0 }
 0x3b9   : > { %v2628_v25 = vmul.f32 %v2587_v19, %v272_v3  ;;  %v2417_v60 = vadd.f32 %v8078_v50, %v2416_v21  ;;  %v5380_v52 = vpop.f32.mrb[17].mxu0 }
 0x3ba   : > { %v2751_v13 = vld [vmem:[#allocation2 + $0x46] sm:$0xff] }
 0x3bb   : > { %2669 = vst.msk [vmem:[#allocation2 + $0x58] sm:$0xff] %vm255_vm13, %v2628_v25  ;;  %v2588_v32 = vmax.f32 %v2417_v60, 0.0  ;;  %3051 = vrot.lane.b32.xlu1 %v2751_v13, %s5747_s20  ;;  %v282_v13 = vld [vmem:[%s9816_s1 + $0x88] sm:$0xff] }
 0x3bc   : > { %v2421_v16 = vpop.f32.mrb[18].mxu0 }
 0x3bd   : > { %v2629_v51 = vmul.f32 %v2588_v32, %v273_v35  ;;  %v2422_v38 = vadd.f32 %v8078_v50, %v2421_v16  ;;  %v5383_v54 = vpop.f32.mrb[19].mxu0 }
 0x3be   : > { %v2752_v42 = vld [vmem:[#allocation2 + $0x4e] sm:$0xff] }
 0x3bf   : > { %2670 = vst.msk [vmem:[#allocation2 + $0x60] sm:$0xff] %vm255_vm13, %v2629_v51  ;;  %v2589_v49 = vmax.f32 %v2422_v38, 0.0  ;;  %3053 = vrot.lane.b32.xlu0 %v2752_v42, %s5747_s20  ;;  %v283_v42 = vld [vmem:[%s9816_s1 + $0x90] sm:$0xff] }
 0x3c0   : > { %v2426_v62 = vpop.f32.mrb[20].mxu0 }
 0x3c1   : > { %v2630_v34 = vmul.f32 %v2589_v49, %v274_v58  ;;  %v2427_v47 = vadd.f32 %v8078_v50, %v2426_v62  ;;  %v5386_v9 = vpop.f32.mrb[21].mxu0 }
 0x3c2   : > { %v2753_v27 = vld [vmem:[#allocation2 + $0x56] sm:$0xff] }
 0x3c3   : > { %2671 = vst.msk [vmem:[#allocation2 + $0x68] sm:$0xff] %vm255_vm13, %v2630_v34  ;;  %v2590_v14 = vmax.f32 %v2427_v47, 0.0  ;;  %3055 = vrot.lane.b32.xlu1 %v2753_v27, %s5747_s20  ;;  %v284_v27 = vld [vmem:[%s9816_s1 + $0x98] sm:$0xff] }
 0x3c4   : > { %v2431_v0 = vpop.f32.mrb[22].mxu0 }
 0x3c5   : > { %v2631_v7 = vmul.f32 %v2590_v14, %v275_v33  ;;  %v2432_v53 = vadd.f32 %v8078_v50, %v2431_v0  ;;  %v5389_v6 = vpop.f32.mrb[23].mxu0 }
 0x3c6   : > { %v2754_v29 = vld [vmem:[#allocation2 + $0x5e] sm:$0xff] }
 0x3c7   : > { %2672 = vst.msk [vmem:[#allocation2 + $0x70] sm:$0xff] %vm255_vm13, %v2631_v7  ;;  %v2591_v24 = vmax.f32 %v2432_v53, 0.0  ;;  %3057 = vrot.lane.b32.xlu0 %v2754_v29, %s5747_s20  ;;  %v285_v29 = vld [vmem:[%s9816_s1 + $0xa0] sm:$0xff] }
 0x3c8   : > { %v2436_v40 = vpop.f32.mrb[24].mxu0 }
 0x3c9   : > { %v2632_v59 = vmul.f32 %v2591_v24, %v276_v10  ;;  %v2437_v18 = vadd.f32 %v8078_v50, %v2436_v40  ;;  %v5392_v63 = vpop.f32.mrb[25].mxu0 }
 0x3ca   : > { %v2755_v23 = vld [vmem:[#allocation2 + $0x66] sm:$0xff] }
 0x3cb   : > { %2673 = vst.msk [vmem:[#allocation2 + $0x78] sm:$0xff] %vm255_vm13, %v2632_v59  ;;  %v2592_v44 = vmax.f32 %v2437_v18, 0.0  ;;  %3059 = vrot.lane.b32.xlu1 %v2755_v23, %s5747_s20  ;;  %v286_v23 = vld [vmem:[%s9816_s1 + $0xa8] sm:$0xff] }
 0x3cc   : > { %v2441_v30 = vpop.f32.mrb[26].mxu0 }
 0x3cd   : > { %v2633_v37 = vmul.f32 %v2592_v44, %v277_v1  ;;  %v2442_v5 = vadd.f32 %v8078_v50, %v2441_v30  ;;  %v5395_v55 = vpop.f32.mrb[27].mxu0 }
 0x3ce   : > { %v2756_v48 = vld [vmem:[#allocation2 + $0x6e] sm:$0xff] }
 0x3cf   : > { %2674 = vst.msk [vmem:[#allocation2 + $0x80] sm:$0xff] %vm255_vm13, %v2633_v37  ;;  %v2593_v28 = vmax.f32 %v2442_v5, 0.0  ;;  %3061 = vrot.lane.b32.xlu0 %v2756_v48, %s5747_s20  ;;  %v287_v48 = vld [vmem:[%s9816_s1 + $0xb0] sm:$0xff] }
 0x3d0   : > { %v2446_v43 = vpop.f32.mrb[28].mxu0 }
 0x3d1   : > { %v2634_v8 = vmul.f32 %v2593_v28, %v278_v20  ;;  %v2447_v17 = vadd.f32 %v8078_v50, %v2446_v43  ;;  %v5398_v4 = vpop.f32.mrb[29].mxu0 }
 0x3d2   : > { %v2757_v26 = vld [vmem:[#allocation2 + $0x76] sm:$0xff] }
 0x3d3   : > { %2675 = vst.msk [vmem:[#allocation2 + $0x88] sm:$0xff] %vm255_vm13, %v2634_v8  ;;  %v2594_v22 = vmax.f32 %v2447_v17, 0.0  ;;  %3063 = vrot.lane.b32.xlu1 %v2757_v26, %s5747_s20  ;;  %v288_v26 = vld [vmem:[%s9816_s1 + $0xb8] sm:$0xff] }
 0x3d4   : > { %v2451_v57 = vpop.f32.mrb[30].mxu0 }
 0x3d5   : > { %v2635_v39 = vmul.f32 %v2594_v22, %v279_v56  ;;  %v2452_v2 = vadd.f32 %v8078_v50, %v2451_v57  ;;  %v5401_v41 = vpop.f32.mrb[31].mxu0 }
 0x3d6   : > { %v2758_v46 = vld [vmem:[#allocation2 + $0x7e] sm:$0xff] }
 0x3d7   : > { %2676 = vst.msk [vmem:[#allocation2 + $0x90] sm:$0xff] %vm255_vm13, %v2635_v39  ;;  %v2595_v12 = vmax.f32 %v2452_v2, 0.0  ;;  %3065 = vrot.lane.b32.xlu0 %v2758_v46, %s5747_s20  ;;  %v289_v46 = vld [vmem:[%s9816_s1 + $0xc0] sm:$0xff] }
 0x3d8   : > { %v2456_v36 = vpop.f32.mrb[32].mxu0 }
 0x3d9   : > { %v2636_v15 = vmul.f32 %v2595_v12, %v280_v45  ;;  %v2457_v11 = vadd.f32 %v8078_v50, %v2456_v36  ;;  %v5404_v3 = vpop.f32.mrb[33].mxu0 }
 0x3da   : > { %v2759_v19 = vld [vmem:[#allocation2 + $0x86] sm:$0xff] }
 0x3db   : > { %2677 = vst.msk [vmem:[#allocation2 + $0x98] sm:$0xff] %vm255_vm13, %v2636_v15  ;;  %v2596_v21 = vmax.f32 %v2457_v11, 0.0  ;;  %3067 = vrot.lane.b32.xlu1 %v2759_v19, %s5747_s20  ;;  %v290_v19 = vld [vmem:[%s9816_s1 + $0xc8] sm:$0xff] }
 0x3dc   : > { %v2461_v25 = vpop.f32.mrb[34].mxu0 }
 0x3dd   : > { %v2637_v60 = vmul.f32 %v2596_v21, %v281_v31  ;;  %v2462_v52 = vadd.f32 %v8078_v50, %v2461_v25  ;;  %v5407_v35 = vpop.f32.mrb[35].mxu0 }
 0x3de   : > { %v2760_v32 = vld [vmem:[#allocation2 + $0x8e] sm:$0xff] }
 0x3df   : > { %2678 = vst.msk [vmem:[#allocation2 + $0xa0] sm:$0xff] %vm255_vm13, %v2637_v60  ;;  %v2597_v16 = vmax.f32 %v2462_v52, 0.0  ;;  %3069 = vrot.lane.b32.xlu0 %v2760_v32, %s5747_s20  ;;  %v291_v32 = vld [vmem:[%s9816_s1 + $0xd0] sm:$0xff] }
 0x3e0   : > { %v2466_v51 = vpop.f32.mrb[36].mxu0 }
 0x3e1   : > { %v2638_v38 = vmul.f32 %v2597_v16, %v282_v13  ;;  %v2467_v54 = vadd.f32 %v8078_v50, %v2466_v51  ;;  %v5410_v58 = vpop.f32.mrb[37].mxu0 }
 0x3e2   : > { %v2761_v49 = vld [vmem:[#allocation2 + $0x96] sm:$0xff] }
 0x3e3   : > { %2679 = vst.msk [vmem:[#allocation2 + $0xa8] sm:$0xff] %vm255_vm13, %v2638_v38  ;;  %v2598_v62 = vmax.f32 %v2467_v54, 0.0  ;;  %3071 = vrot.lane.b32.xlu1 %v2761_v49, %s5747_s20  ;;  %v292_v49 = vld [vmem:[%s9816_s1 + $0xd8] sm:$0xff] }
 0x3e4   : > { %v2471_v34 = vpop.f32.mrb[38].mxu0 }
 0x3e5   : > { %v2639_v47 = vmul.f32 %v2598_v62, %v283_v42  ;;  %v2472_v9 = vadd.f32 %v8078_v50, %v2471_v34  ;;  %v5413_v33 = vpop.f32.mrb[39].mxu0 }
 0x3e6   : > { %v2762_v14 = vld [vmem:[#allocation2 + $0x9e] sm:$0xff] }
 0x3e7   : > { %2680 = vst.msk [vmem:[#allocation2 + $0xb0] sm:$0xff] %vm255_vm13, %v2639_v47  ;;  %v2599_v0 = vmax.f32 %v2472_v9, 0.0  ;;  %3073 = vrot.lane.b32.xlu0 %v2762_v14, %s5747_s20  ;;  %v293_v14 = vld [vmem:[%s9816_s1 + $0xe0] sm:$0xff] }
 0x3e8   : > { %v2476_v7 = vpop.f32.mrb[40].mxu0 }
 0x3e9   : > { %v2640_v53 = vmul.f32 %v2599_v0, %v284_v27  ;;  %v2477_v6 = vadd.f32 %v8078_v50, %v2476_v7  ;;  %v5416_v10 = vpop.f32.mrb[41].mxu0 }
 0x3ea   : > { %v2763_v24 = vld [vmem:[#allocation2 + $0xa6] sm:$0xff] }
 0x3eb   : > { %2681 = vst.msk [vmem:[#allocation2 + $0xb8] sm:$0xff] %vm255_vm13, %v2640_v53  ;;  %v2600_v40 = vmax.f32 %v2477_v6, 0.0  ;;  %3075 = vrot.lane.b32.xlu1 %v2763_v24, %s5747_s20  ;;  %v294_v24 = vld [vmem:[%s9816_s1 + $0xe8] sm:$0xff] }
 0x3ec   : > { %v2481_v59 = vpop.f32.mrb[42].mxu0 }
 0x3ed   : > { %v2641_v18 = vmul.f32 %v2600_v40, %v285_v29  ;;  %v2482_v63 = vadd.f32 %v8078_v50, %v2481_v59  ;;  %v5419_v1 = vpop.f32.mrb[43].mxu0 }
 0x3ee   : > { %v2764_v44 = vld [vmem:[#allocation2 + $0xae] sm:$0xff] }
 0x3ef   : > { %2682 = vst.msk [vmem:[#allocation2 + $0xc0] sm:$0xff] %vm255_vm13, %v2641_v18  ;;  %v2601_v30 = vmax.f32 %v2482_v63, 0.0  ;;  %3077 = vrot.lane.b32.xlu0 %v2764_v44, %s5747_s20  ;;  %v295_v44 = vld [vmem:[%s9816_s1 + $0xf0] sm:$0xff] }
 0x3f0   : > { %v2486_v37 = vpop.f32.mrb[44].mxu0 }
 0x3f1   : > { %v2642_v5 = vmul.f32 %v2601_v30, %v286_v23  ;;  %v2487_v55 = vadd.f32 %v8078_v50, %v2486_v37  ;;  %v5422_v20 = vpop.f32.mrb[45].mxu0 }
 0x3f2   : > { %v2765_v28 = vld [vmem:[#allocation2 + $0xb6] sm:$0xff] }
 0x3f3   : > { %2683 = vst.msk [vmem:[#allocation2 + $0xc8] sm:$0xff] %vm255_vm13, %v2642_v5  ;;  %v2602_v43 = vmax.f32 %v2487_v55, 0.0  ;;  %3079 = vrot.lane.b32.xlu1 %v2765_v28, %s5747_s20  ;;  %v296_v28 = vld [vmem:[%s9816_s1 + $0xf8] sm:$0xff] }
 0x3f4   : > { %v2491_v8 = vpop.f32.mrb[46].mxu0 }
 0x3f5   : > { %v2643_v17 = vmul.f32 %v2602_v43, %v287_v48  ;;  %v2492_v4 = vadd.f32 %v8078_v50, %v2491_v8  ;;  %v5425_v56 = vpop.f32.mrb[47].mxu0 }
 0x3f6   : > { %v2766_v22 = vld [vmem:[#allocation2 + $0xbe] sm:$0xff] }
 0x3f7   : > { %2684 = vst.msk [vmem:[#allocation2 + $0xd0] sm:$0xff] %vm255_vm13, %v2643_v17  ;;  %v2603_v57 = vmax.f32 %v2492_v4, 0.0  ;;  %3081 = vrot.lane.b32.xlu0 %v2766_v22, %s5747_s20  ;;  %v297_v22 = vld [vmem:[%s9816_s1 + $0x100] sm:$0xff] }
 0x3f8   : > { %v2496_v39 = vpop.f32.mrb[48].mxu0 }
 0x3f9   : > { %v2644_v2 = vmul.f32 %v2603_v57, %v288_v26  ;;  %v2497_v41 = vadd.f32 %v8078_v50, %v2496_v39  ;;  %v5428_v45 = vpop.f32.mrb[49].mxu0 }
 0x3fa   : > { %v2767_v12 = vld [vmem:[#allocation2 + $0xc6] sm:$0xff] }
 0x3fb   : > { %2685 = vst.msk [vmem:[#allocation2 + $0xd8] sm:$0xff] %vm255_vm13, %v2644_v2  ;;  %v2604_v36 = vmax.f32 %v2497_v41, 0.0  ;;  %3083 = vrot.lane.b32.xlu1 %v2767_v12, %s5747_s20  ;;  %v298_v12 = vld [vmem:[%s9816_s1 + $0x108] sm:$0xff] }
 0x3fc   : > { %v2501_v15 = vpop.f32.mrb[50].mxu0 }
 0x3fd   : > { %v2645_v11 = vmul.f32 %v2604_v36, %v289_v46  ;;  %v2502_v3 = vadd.f32 %v8078_v50, %v2501_v15  ;;  %v5431_v31 = vpop.f32.mrb[51].mxu0 }
 0x3fe   : > { %v2768_v21 = vld [vmem:[#allocation2 + $0xce] sm:$0xff] }
 0x3ff   : > { %2686 = vst.msk [vmem:[#allocation2 + $0xe0] sm:$0xff] %vm255_vm13, %v2645_v11  ;;  %v2605_v25 = vmax.f32 %v2502_v3, 0.0  ;;  %3085 = vrot.lane.b32.xlu0 %v2768_v21, %s5747_s20  ;;  %v299_v21 = vld [vmem:[%s9816_s1 + $0x110] sm:$0xff] }
 0x400   : > { %v2506_v60 = vpop.f32.mrb[52].mxu0 }
 0x401   : > { %v2646_v52 = vmul.f32 %v2605_v25, %v290_v19  ;;  %v2507_v35 = vadd.f32 %v8078_v50, %v2506_v60  ;;  %v5434_v13 = vpop.f32.mrb[53].mxu0 }
 0x402   : > { %v2769_v16 = vld [vmem:[#allocation2 + $0xd6] sm:$0xff] }
 0x403   : > { %2687 = vst.msk [vmem:[#allocation2 + $0xe8] sm:$0xff] %vm255_vm13, %v2646_v52  ;;  %v2606_v51 = vmax.f32 %v2507_v35, 0.0  ;;  %3087 = vrot.lane.b32.xlu1 %v2769_v16, %s5747_s20  ;;  %v300_v16 = vld [vmem:[%s9816_s1 + $0x118] sm:$0xff] }
 0x404   : > { %v2511_v38 = vpop.f32.mrb[54].mxu0 }
 0x405   : > { %v2647_v54 = vmul.f32 %v2606_v51, %v291_v32  ;;  %v2512_v58 = vadd.f32 %v8078_v50, %v2511_v38  ;;  %v5437_v42 = vpop.f32.mrb[55].mxu0 }
 0x406   : > { %v2770_v62 = vld [vmem:[#allocation2 + $0xde] sm:$0xff] }
 0x407   : > { %2688 = vst.msk [vmem:[#allocation2 + $0xf0] sm:$0xff] %vm255_vm13, %v2647_v54  ;;  %v2607_v34 = vmax.f32 %v2512_v58, 0.0  ;;  %3089 = vrot.lane.b32.xlu0 %v2770_v62, %s5747_s20  ;;  %v301_v62 = vld [vmem:[%s9816_s1 + $0x120] sm:$0xff] }
 0x408   : > { %v2516_v47 = vpop.f32.mrb[56].mxu0 }
 0x409   : > { %v2648_v9 = vmul.f32 %v2607_v34, %v292_v49  ;;  %v2517_v33 = vadd.f32 %v8078_v50, %v2516_v47  ;;  %v5440_v27 = vpop.f32.mrb[57].mxu0 }
 0x40a   : > { %v2771_v0 = vld [vmem:[#allocation2 + $0xe6] sm:$0xff] }
 0x40b   : > { %2689 = vst.msk [vmem:[#allocation2 + $0xf8] sm:$0xff] %vm255_vm13, %v2648_v9  ;;  %v2608_v7 = vmax.f32 %v2517_v33, 0.0  ;;  %3091 = vrot.lane.b32.xlu1 %v2771_v0, %s5747_s20  ;;  %v302_v0 = vld [vmem:[%s9816_s1 + $0x128] sm:$0xff] }
 0x40c   : > { %v2521_v53 = vpop.f32.mrb[58].mxu0 }
 0x40d   : > { %v2649_v6 = vmul.f32 %v2608_v7, %v293_v14  ;;  %v2522_v10 = vadd.f32 %v8078_v50, %v2521_v53  ;;  %v5443_v29 = vpop.f32.mrb[59].mxu0 }
 0x40e   : > { %v2772_v40 = vld [vmem:[#allocation2 + $0xee] sm:$0xff] }
 0x40f   : > { %2690 = vst.msk [vmem:[#allocation2 + $0x100] sm:$0xff] %vm255_vm13, %v2649_v6  ;;  %v2609_v59 = vmax.f32 %v2522_v10, 0.0  ;;  %3093 = vrot.lane.b32.xlu0 %v2772_v40, %s5747_s20  ;;  %v303_v40 = vld [vmem:[%s9816_s1 + $0x130] sm:$0xff] }
 0x410   : > { %v2526_v18 = vpop.f32.mrb[60].mxu0 }
 0x411   : > { %v2650_v63 = vmul.f32 %v2609_v59, %v294_v24  ;;  %v2527_v1 = vadd.f32 %v8078_v50, %v2526_v18  ;;  %v5446_v23 = vpop.f32.mrb[61].mxu0 }
 0x412   : > { %v2773_v30 = vld [vmem:[#allocation2 + $0xf6] sm:$0xff] }
 0x413   : > { %2691 = vst.msk [vmem:[#allocation2 + $0x108] sm:$0xff] %vm255_vm13, %v2650_v63  ;;  %v2610_v37 = vmax.f32 %v2527_v1, 0.0  ;;  %3095 = vrot.lane.b32.xlu1 %v2773_v30, %s5747_s20  ;;  %v304_v30 = vld [vmem:[%s9816_s1 + $0x138] sm:$0xff] }
 0x414   : > { %v2531_v5 = vpop.f32.mrb[62].mxu0 }
 0x415   : > { %v2651_v55 = vmul.f32 %v2610_v37, %v295_v44  ;;  %v2532_v20 = vadd.f32 %v8078_v50, %v2531_v5  ;;  %v5449_v48 = vpop.f32.mrb[63].mxu0 }
 0x416   : > { %v2774_v43 = vld [vmem:[#allocation2 + $0xfe] sm:$0xff] }
 0x417   : > { %2692 = vst.msk [vmem:[#allocation2 + $0x110] sm:$0xff] %vm255_vm13, %v2651_v55  ;;  %v2611_v8 = vmax.f32 %v2532_v20, 0.0  ;;  %3097 = vrot.lane.b32.xlu0 %v2774_v43, %s5747_s20  ;;  %v305_v43 = vld [vmem:[%s9816_s1 + $0x140] sm:$0xf] }
 0x418   : > { %v2536_v17 = vpop.f32.mrb[64].mxu0 }
 0x419   : > { %v2652_v4 = vmul.f32 %v2611_v8, %v296_v28  ;;  %v2537_v56 = vadd.f32 %v8078_v50, %v2536_v17  ;;  %v5452_v26 = vpop.f32.mrb[65].mxu0 }
 0x41a   : > { %v2775_v57 = vld [vmem:[#allocation2 + $0x106] sm:$0xff] }
 0x41b   : > { %2693 = vst.msk [vmem:[#allocation2 + $0x118] sm:$0xff] %vm255_vm13, %v2652_v4  ;;  %v2612_v39 = vmax.f32 %v2537_v56, 0.0  ;;  %3099 = vrot.lane.b32.xlu1 %v2775_v57, %s5747_s20  ;;  %v2785_v4 = vld [vmem:[#allocation2 + $0xf] sm:$0xff] }
 0x41c   : > { %v2541_v2 = vpop.f32.mrb[66].mxu0  ;;  %v8343_v57 = vld [vmem:[#allocation2 + $0x2f] sm:$0xff] }
 0x41d   : > { %v2653_v41 = vmul.f32 %v2612_v39, %v297_v22  ;;  %v2542_v45 = vadd.f32 %v8078_v50, %v2541_v2  ;;  %v5455_v46 = vpop.f32.mrb[67].mxu0  ;;  %v8338_v22 = vld [vmem:[#allocation2 + $0x1f] sm:$0xff]  ;;  %v8345_v39 = vld [vmem:[#allocation2 + $0x27] sm:$0xff] }
 0x41e   : > { %v2776_v36 = vld [vmem:[#allocation2 + $0x10e] sm:$0xff]  ;;  %v8351_v2 = vld [vmem:[#allocation2 + $0x3f] sm:$0xff] }
 0x41f   : > { %2694 = vst.msk [vmem:[#allocation2 + $0x120] sm:$0xff] %vm255_vm13, %v2653_v41  ;;  %v2613_v15 = vmax.f32 %v2542_v45, 0.0  ;;  %3101 = vrot.lane.b32.xlu0 %v2776_v36, %s5747_s20  ;;  %v8353_v41 = vld [vmem:[#allocation2 + $0x37] sm:$0xff]  ;;  %v8359_v45 = vld [vmem:[#allocation2 + $0x4f] sm:$0xff]  ;;  %v8361_v46 = vld [vmem:[#allocation2 + $0x47] sm:$0xff] }
 0x420   : > { %v2546_v11 = vpop.f32.mrb[68].mxu0  ;;  %v8369_v36 = vld [vmem:[#allocation2 + $0x57] sm:$0xff] }
 0x421   : > { %v2654_v3 = vmul.f32 %v2613_v15, %v298_v12  ;;  %v2547_v31 = vadd.f32 %v8078_v50, %v2546_v11  ;;  %v5458_v19 = vpop.f32.mrb[69].mxu0  ;;  %v8367_v12 = vld [vmem:[#allocation2 + $0x5f] sm:$0xff]  ;;  %v8375_v15 = vld [vmem:[#allocation2 + $0x6f] sm:$0xff]  ;;  %v8377_v11 = vld [vmem:[#allocation2 + $0x67] sm:$0xff] }
 0x422   : > { %v2777_v25 = vld [vmem:[#allocation2 + $0x116] sm:$0xff] }
 0x423   : > { %2695 = vst.msk [vmem:[#allocation2 + $0x128] sm:$0xff] %vm255_vm13, %v2654_v3  ;;  %v2614_v60 = vmax.f32 %v2547_v31, 0.0  ;;  %3103 = vrot.lane.b32.xlu1 %v2777_v25, %s5747_s20  ;;  %v8383_v3 = vld [vmem:[#allocation2 + $0x7f] sm:$0xff]  ;;  %v8385_v31 = vld [vmem:[#allocation2 + $0x77] sm:$0xff]  ;;  %v8391_v19 = vld [vmem:[#allocation2 + $0x8f] sm:$0xff]  ;;  %v8395_v25 = vpop.permute.xlu0 %3037 }
 0x424   : > { %v2551_v52 = vpop.f32.mrb[70].mxu0  ;;  %10284 = vst [vmem:[#allocation3_spill] sm:$0xff] %v8395_v25  ;;  %v2874_v25 = vld [vmem:[#allocation2 + $0x41] sm:$0xff] }
 0x425   : > { %v2655_v35 = vmul.f32 %v2614_v60, %v299_v21  ;;  %v2552_v13 = vadd.f32 %v8078_v50, %v2551_v52  ;;  %v5461_v32 = vpop.f32.mrb[71].mxu0  ;;  %v8393_v21 = vld [vmem:[#allocation2 + $0x87] sm:$0xff]  ;;  %v8397_v60 = vpop.permute.xlu1 %3039  ;;  %v8403_v52 = vld [vmem:[#allocation2 + $0x9f] sm:$0xff] }
 0x426   : > { %v2778_v51 = vld [vmem:[#allocation2 + $0x11e] sm:$0xff] }
 0x427   : > { %2696 = vst.msk [vmem:[#allocation2 + $0x130] sm:$0xff] %vm255_vm13, %v2655_v35  ;;  %v2615_v38 = vmax.f32 %v2552_v13, 0.0  ;;  %3105 = vrot.lane.b32.xlu0 %v2778_v51, %s5747_s20  ;;  %v8405_v35 = vld [vmem:[#allocation2 + $0x97] sm:$0xff]  ;;  %v8411_v13 = vpop.permute.xlu0 %3041  ;;  %v8417_v51 = vld [vmem:[#allocation2 + $0xa7] sm:$0xff] }
 0x428   : > { %v2556_v54 = vpop.f32.mrb[72].mxu0 }
 0x429   : > { %v2656_v58 = vmul.f32 %v2615_v38, %v300_v16  ;;  %v2557_v42 = vadd.f32 %v8078_v50, %v2556_v54  ;;  %v5464_v49 = vpop.f32.mrb[73].mxu0  ;;  %v8413_v32 = vpop.permute.xlu1 %3043  ;;  %v8415_v16 = vld [vmem:[#allocation2 + $0xaf] sm:$0xff] }
 0x42a   : > { %v2779_v34 = vld [vmem:[#allocation2 + $0x126] sm:$0xff] }
 0x42b   : > { %2697 = vst.msk [vmem:[#allocation2 + $0x138] sm:$0xff] %vm255_vm13, %v2656_v58  ;;  %v2616_v47 = vmax.f32 %v2557_v42, 0.0  ;;  %3107 = vrot.lane.b32.xlu1 %v2779_v34, %s5747_s20  ;;  %v8423_v38 = vpop.permute.xlu0 %3045  ;;  %v8427_v58 = vld [vmem:[#allocation2 + $0xbf] sm:$0xff]  ;;  %v8429_v42 = vld [vmem:[#allocation2 + $0xb7] sm:$0xff]  ;;  %v8439_v34 = vld [vmem:[#allocation2 + $0xcf] sm:$0xff] }
 0x42c   : > { %v2561_v9 = vpop.f32.mrb[74].mxu0 }
 0x42d   : > { %v2657_v33 = vmul.f32 %v2616_v47, %v301_v62  ;;  %v2562_v27 = vadd.f32 %v8078_v50, %v2561_v9  ;;  %v5467_v14 = vpop.f32.mrb[75].mxu0  ;;  %v8425_v54 = vpop.permute.xlu1 %3047  ;;  %v8441_v47 = vld [vmem:[#allocation2 + $0xc7] sm:$0xff] }
 0x42e   : > { %v2780_v7 = vld [vmem:[#allocation2 + $0x12e] sm:$0xff]  ;;  %v8453_v14 = vld [vmem:[#allocation2 + $0xd7] sm:$0xff] }
 0x42f   : > { %2698 = vst.msk [vmem:[#allocation2 + $0x140] sm:$0xff] %vm255_vm13, %v2657_v33  ;;  %v2617_v53 = vmax.f32 %v2562_v27, 0.0  ;;  %3109 = vrot.lane.b32.xlu0 %v2780_v7, %s5747_s20  ;;  %v8435_v49 = vpop.permute.xlu0 %3049  ;;  %v8451_v27 = vld [vmem:[#allocation2 + $0xdf] sm:$0xff] }
 0x430   : > { %v2566_v6 = vpop.f32.mrb[76].mxu0 }
 0x431   : > { %v2658_v10 = vmul.f32 %v2617_v53, %v302_v0  ;;  %v2567_v29 = vadd.f32 %v8078_v50, %v2566_v6  ;;  %v5470_v24 = vpop.f32.mrb[77].mxu0  ;;  %v8437_v62 = vpop.permute.xlu1 %3051  ;;  %v8463_v53 = vld [vmem:[#allocation2 + $0xef] sm:$0xff]  ;;  %v8465_v6 = vld [vmem:[#allocation2 + $0xe7] sm:$0xff] }
 0x432   : > { %v2781_v59 = vld [vmem:[#allocation2 + $0x136] sm:$0xff]  ;;  %v2815_v24 = vld [vmem:[#allocation2 + $0xff] sm:$0xff] }
 0x433   : > { %2699 = vst.msk [vmem:[#allocation2 + $0x148] sm:$0xff] %vm255_vm13, %v2658_v10  ;;  %v2618_v18 = vmax.f32 %v2567_v29, 0.0  ;;  %3111 = vrot.lane.b32.xlu1 %v2781_v59, %s5747_s20  ;;  %v8447_v9 = vpop.permute.xlu0 %3053 }
 0x434   : > { %v2571_v63 = vpop.f32.mrb[78].mxu0 }
 0x435   : > { %v2659_v1 = vmul.f32 %v2618_v18, %v303_v40  ;;  %v2572_v23 = vadd.f32 %v8078_v50, %v2571_v63  ;;  %v5473_v44 = vpop.f32.mrb[79].mxu0  ;;  %v8449_v33 = vpop.permute.xlu1 %3055  ;;  %v8475_v40 = vld [vmem:[#allocation2 + $0xf7] sm:$0xff]  ;;  %v2817_v63 = vld [vmem:[#allocation2 + $0x10f] sm:$0xff] }
 0x436   : > { %v2782_v37 = vld [vmem:[#allocation2 + $0x13e] sm:$0xff] }
 0x437   : > { %2700 = vst.msk [vmem:[#allocation2 + $0x150] sm:$0xff] %vm255_vm13, %v2659_v1  ;;  %v2619_v5 = vmax.f32 %v2572_v23, 0.0  ;;  %3113 = vrot.lane.b32.xlu0 %v2782_v37, %s5747_s20  ;;  %v2816_v1 = vld [vmem:[#allocation2 + $0x107] sm:$0xff]  ;;  %v2818_v37 = vld [vmem:[#allocation2 + $0x117] sm:$0xff] }
 0x438   : > { %v2576_v55 = vpop.f32.mrb[80].mxu0 }
 0x439   : > { %v2660_v20 = vmul.f32 %v2619_v5, %v304_v30  ;;  %v2577_v48 = vadd.f32 %v8078_v50, %v2576_v55  ;;  %v5476_v28 = vpop.f32.mrb[81].mxu0  ;;  %v2786_v50 = vld [vmem:[#allocation2 + $0x17] sm:$0xff]  ;;  %v8459_v0 = vpop.permute.xlu0 %3057  ;;  %v2819_v30 = vld [vmem:[#allocation2 + $0x11f] sm:$0xff] }
 0x43a   : > { %v2783_v8 = vld [vmem:[#allocation2 + $0x146] sm:$0xff] }
 0x43b   : > { %2701 = vst.msk [vmem:[#allocation2 + $0x158] sm:$0xff] %vm255_vm13, %v2660_v20  ;;  %v2620_v17 = vmax.f32 %v2577_v48, 0.0  ;;  %3115 = vrot.lane.b32.xlu1 %v2783_v8, %s5747_s20  ;;  %v2821_v20 = vld [vmem:[#allocation2 + $0x12f] sm:$0xff]  ;;  %v2820_v48 = vld [vmem:[#allocation2 + $0x127] sm:$0xff]  ;;  %v2823_v8 = vld [vmem:[#allocation2 + $0x13f] sm:$0xff] }
 0x43d   : > { %v2661_v56 = vmul.f32 %v2620_v17, %v305_v43  ;;  %v8461_v7 = vpop.permute.xlu1 %3059  ;;  %v2822_v17 = vld [vmem:[#allocation2 + $0x137] sm:$0xff] }
 0x43e   : > { %v2784_v26 = vld [vmem:[#allocation2 + $0x14e] sm:$0xf] }
 0x43f   : > { %2702 = vst.msk [vmem:[#allocation2 + $0x160] sm:$0xf] %vm263_vm14, %v2661_v56  ;;  %3201 = vrot.lane.b32.xlu1 %v2785_v4, %s5748_s7  ;;  %3117 = vrot.lane.b32.xlu0 %v2784_v26, %s5747_s20  ;;  %v2825_v26 = vld [vmem:[#allocation2 + $0x14f] sm:$0xf]  ;;  %s5752_s20 = smov 48  }
 0x441   : > { %v8471_v10 = vpop.permute.xlu0 %3061 }
 0x443   : > { %3205 = vrot.lane.b32.xlu1 %v8338_v22, %s5748_s7  ;;  %3203 = vrot.lane.b32.xlu0 %v2786_v50, %s5748_s7  ;;  %v2824_v50 = vld [vmem:[#allocation2 + $0x147] sm:$0xff] }
 0x445   : > { %v8473_v29 = vpop.permute.xlu1 %3063 }
 0x447   : > { %3209 = vrot.lane.b32.xlu1 %v8343_v57, %s5748_s7  ;;  %3207 = vrot.lane.b32.xlu0 %v8345_v39, %s5748_s7 }
 0x449   : > { %v8480_v59 = vpop.permute.xlu0 %3065 }
 0x44b   : > { %3213 = vrot.lane.b32.xlu1 %v8351_v2, %s5748_s7  ;;  %3211 = vrot.lane.b32.xlu0 %v8353_v41, %s5748_s7 }
 0x44d   : > { %v8482_v18 = vpop.permute.xlu1 %3067 }
 0x44f   : > { %3217 = vrot.lane.b32.xlu1 %v8359_v45, %s5748_s7  ;;  %3215 = vrot.lane.b32.xlu0 %v8361_v46, %s5748_s7 }
 0x451   : > { %v8486_v23 = vpop.permute.xlu0 %3069 }
 0x453   : > { %3221 = vrot.lane.b32.xlu1 %v8367_v12, %s5748_s7  ;;  %3219 = vrot.lane.b32.xlu0 %v8369_v36, %s5748_s7 }
 0x455   : > { %v8488_v44 = vpop.permute.xlu1 %3071 }
 0x457   : > { %3225 = vrot.lane.b32.xlu1 %v8375_v15, %s5748_s7  ;;  %3223 = vrot.lane.b32.xlu0 %v8377_v11, %s5748_s7 }
 0x459   : > { %v8492_v5 = vpop.permute.xlu0 %3073 }
 0x45a   : > { %10285 = vst [vmem:[#allocation40_spill] sm:$0xff] %v8492_v5  ;;  %v2926_v5 = vld [vmem:[#allocation2 + $0x92] sm:$0xff] }
 0x45b   : > { %3229 = vrot.lane.b32.xlu1 %v8383_v3, %s5748_s7  ;;  %3227 = vrot.lane.b32.xlu0 %v8385_v31, %s5748_s7 }
 0x45d   : > { %v8494_v55 = vpop.permute.xlu1 %3075 }
 0x45e   : > { %10286 = vst [vmem:[#allocation75_spill] sm:$0xff] %v8494_v55  ;;  %v2965_v55 = vld [vmem:[#allocation2 + $0x83] sm:$0xff] }
 0x45f   : > { %3233 = vrot.lane.b32.xlu1 %v8391_v19, %s5748_s7  ;;  %3231 = vrot.lane.b32.xlu0 %v8393_v21, %s5748_s7 }
 0x461   : > { %v8498_v28 = vpop.permute.xlu0 %3077 }
 0x462   : > { %10287 = vst [vmem:[#allocation112_spill] sm:$0xff] %v8498_v28  ;;  %v2840_v28 = vld [vmem:[#allocation2 + $0x78] sm:$0xff] }
 0x463   : > { %3237 = vrot.lane.b32.xlu1 %v8403_v52, %s5748_s7  ;;  %3235 = vrot.lane.b32.xlu0 %v8405_v35, %s5748_s7 }
 0x465   : > { %v8500_v43 = vpop.permute.xlu1 %3079 }
 0x466   : > { %10288 = vst [vmem:[#allocation5_spill] sm:$0xff] %v8500_v43  ;;  %v2882_v43 = vld [vmem:[#allocation2 + $0x81] sm:$0xff] }
 0x467   : > { %3241 = vrot.lane.b32.xlu1 %v8415_v16, %s5748_s7  ;;  %3239 = vrot.lane.b32.xlu0 %v8417_v51, %s5748_s7 }
 0x469   : > { %v8504_v4 = vpop.permute.xlu0 %3081 }
 0x46a   : > { %10289 = vst [vmem:[#allocation39_spill] sm:$0xff] %v8504_v4  ;;  %v2964_v4 = vld [vmem:[#allocation2 + $0x7b] sm:$0xff] }
 0x46b   : > { %3245 = vrot.lane.b32.xlu1 %v8427_v58, %s5748_s7  ;;  %3243 = vrot.lane.b32.xlu0 %v8429_v42, %s5748_s7 }
 0x46d   : > { %v8506_v56 = vpop.permute.xlu1 %3083 }
 0x46e   : > { %10290 = vst [vmem:[#allocation77_spill] sm:$0xff] %v8506_v56  ;;  %v2923_v56 = vld [vmem:[#allocation2 + $0x7a] sm:$0xff] }
 0x46f   : > { %3249 = vrot.lane.b32.xlu1 %v8439_v34, %s5748_s7  ;;  %3247 = vrot.lane.b32.xlu0 %v8441_v47, %s5748_s7 }
 0x473   : > { %3253 = vrot.lane.b32.xlu1 %v8451_v27, %s5748_s7  ;;  %3251 = vrot.lane.b32.xlu0 %v8453_v14, %s5748_s7 }
 0x477   : > { %3257 = vrot.lane.b32.xlu1 %v8463_v53, %s5748_s7  ;;  %3255 = vrot.lane.b32.xlu0 %v8465_v6, %s5748_s7 }
 0x47b   : > { %3261 = vrot.lane.b32.xlu1 %v2815_v24, %s5748_s7  ;;  %3259 = vrot.lane.b32.xlu0 %v8475_v40, %s5748_s7  ;;  %v8510_v24 = vpop.permute.xlu0 %3085 }
 0x47c   : > { %10291 = vst [vmem:[#allocation111_spill] sm:$0xff] %v8510_v24  ;;  %v2963_v24 = vld [vmem:[#allocation2 + $0x73] sm:$0xff] }
 0x47f   : > { %3265 = vrot.lane.b32.xlu1 %v2817_v63, %s5748_s7  ;;  %3263 = vrot.lane.b32.xlu0 %v2816_v1, %s5748_s7  ;;  %v8512_v63 = vpop.permute.xlu1 %3087  ;;  %v8518_v1 = vpop.permute.xlu0 %3089 }
 0x480   : > { %10292 = vst [vmem:[#allocation4_spill] sm:$0xff] %v8512_v63  ;;  %10293 = vst [vmem:[#allocation42_spill] sm:$0xff] %v8518_v1  ;;  %v2880_v1 = vld [vmem:[#allocation2 + $0x71] sm:$0xff]  ;;  %v2838_v63 = vld [vmem:[#allocation2 + $0x68] sm:$0xff] }
 0x483   : > { %3269 = vrot.lane.b32.xlu1 %v2819_v30, %s5748_s7  ;;  %3267 = vrot.lane.b32.xlu0 %v2818_v37, %s5748_s7  ;;  %v8520_v30 = vpop.permute.xlu1 %3091  ;;  %v8526_v37 = vpop.permute.xlu0 %3093 }
 0x484   : > { %10294 = vst [vmem:[#allocation76_spill] sm:$0xff] %v8520_v30  ;;  %10295 = vst [vmem:[#allocation114_spill] sm:$0xff] %v8526_v37  ;;  %v2834_v37 = vld [vmem:[#allocation2 + $0x48] sm:$0xff]  ;;  %v2918_v30 = vld [vmem:[#allocation2 + $0x52] sm:$0xff] }
 0x487   : > { %3273 = vrot.lane.b32.xlu1 %v2821_v20, %s5748_s7  ;;  %3271 = vrot.lane.b32.xlu0 %v2820_v48, %s5748_s7  ;;  %v8528_v20 = vpop.permute.xlu1 %3095 }
 0x488   : > { %10296 = vst [vmem:[#allocation7_spill] sm:$0xff] %v8528_v20 }
 0x48b   : > { %3277 = vrot.lane.b32.xlu1 %v2823_v8, %s5748_s7  ;;  %3275 = vrot.lane.b32.xlu0 %v2822_v17, %s5748_s7  ;;  %v10309_v8 = vmov 0.0|0.0   ;;  %v4568_v17 = vld [vmem:[%s9819_s4 + $0x10] sm:$0xff] }
 0x48f   : > { %3281 = vrot.lane.b32.xlu1 %v2825_v26, %s5748_s7  ;;  %3279 = vrot.lane.b32.xlu0 %v2824_v50, %s5748_s7  ;;  %v4569_v26 = vld [vmem:[%s9819_s4 + $0x18] sm:$0xff]  ;;  %s5751_s7 = smov 56  }
 0x493   : > { %3329 = vrot.lane.b32.xlu1 %v8345_v39, %s5746_s19  ;;  %3327 = vrot.lane.b32.xlu0 %v8338_v22, %s5746_s19  ;;  %v8534_v22 = vpop.permute.xlu0 %3097  ;;  %v8536_v39 = vpop.permute.xlu1 %3099 }
 0x494   : > { %10297 = vst [vmem:[#allocation41_spill] sm:$0xff] %v8534_v22  ;;  %10298 = vst [vmem:[#allocation79_spill] sm:$0xff] %v8536_v39  ;;  %v2833_v39 = vld [vmem:[#allocation2 + $0x40] sm:$0xff]  ;;  %v2876_v22 = vld [vmem:[#allocation2 + $0x51] sm:$0xff] }
 0x497   : > { %3333 = vrot.lane.b32.xlu1 %v8353_v41, %s5746_s19  ;;  %3331 = vrot.lane.b32.xlu0 %v8343_v57, %s5746_s19  ;;  %v8542_v57 = vpop.permute.xlu0 %3101  ;;  %v8544_v41 = vpop.permute.xlu1 %3103 }
 0x498   : > { %10299 = vst [vmem:[#allocation113_spill] sm:$0xff] %v8542_v57  ;;  %10300 = vst [vmem:[#allocation6_spill] sm:$0xff] %v8544_v41  ;;  %v2875_v41 = vld [vmem:[#allocation2 + $0x49] sm:$0xff] }
 0x499   : > { %v2958_v57 = vld [vmem:[#allocation2 + $0x4b] sm:$0xff] }
 0x49b   : > { %3337 = vrot.lane.b32.xlu1 %v8361_v46, %s5746_s19  ;;  %3335 = vrot.lane.b32.xlu0 %v8351_v2, %s5746_s19  ;;  %v8550_v2 = vpop.permute.xlu0 %3105 }
 0x49c   : > { %10301 = vst [vmem:[#allocation44_spill] sm:$0xff] %v8550_v2  ;;  %v2917_v2 = vld [vmem:[#allocation2 + $0x4a] sm:$0xff] }
 0x49d   : > { %v8552_v46 = vpop.permute.xlu1 %3107 }
 0x49e   : > { %10302 = vst [vmem:[#allocation78_spill] sm:$0xff] %v8552_v46 }
 0x49f   : > { %3341 = vrot.lane.b32.xlu1 %v8369_v36, %s5746_s19  ;;  %3339 = vrot.lane.b32.xlu0 %v8359_v45, %s5746_s19 }
 0x4a1   : > { %v8558_v45 = vpop.permute.xlu0 %3109 }
 0x4a2   : > { %10303 = vst [vmem:[#allocation116_spill] sm:$0xff] %v8558_v45  ;;  %v2957_v45 = vld [vmem:[#allocation2 + $0x43] sm:$0xff] }
 0x4a3   : > { %3345 = vrot.lane.b32.xlu1 %v8377_v11, %s5746_s19  ;;  %3343 = vrot.lane.b32.xlu0 %v8367_v12, %s5746_s19 }
 0x4a5   : > { %v8560_v36 = vpop.permute.xlu1 %3111 }
 0x4a6   : > { %10304 = vst [vmem:[#allocation9_spill] sm:$0xff] %v8560_v36  ;;  %v2916_v36 = vld [vmem:[#allocation2 + $0x42] sm:$0xff] }
 0x4a7   : > { %3349 = vrot.lane.b32.xlu1 %v8385_v31, %s5746_s19  ;;  %3347 = vrot.lane.b32.xlu0 %v8375_v15, %s5746_s19 }
 0x4a9   : > { %v8566_v12 = vpop.permute.xlu0 %3113 }
 0x4aa   : > { %10305 = vst [vmem:[#allocation43_spill] sm:$0xff] %v8566_v12  ;;  %v2832_v12 = vld [vmem:[#allocation2 + $0x38] sm:$0xff] }
 0x4ab   : > { %3353 = vrot.lane.b32.xlu1 %v8393_v21, %s5746_s19  ;;  %3351 = vrot.lane.b32.xlu0 %v8383_v3, %s5746_s19 }
 0x4ad   : > { %v8568_v11 = vpop.permute.xlu1 %3115 }
 0x4ae   : > { %10306 = vst [vmem:[#allocation81_spill] sm:$0xff] %v8568_v11 }
 0x4af   : > { %3357 = vrot.lane.b32.xlu1 %v8405_v35, %s5746_s19  ;;  %3355 = vrot.lane.b32.xlu0 %v8391_v19, %s5746_s19  ;;  %v4566_v35 = vld [vmem:[%s9819_s4] sm:$0xff]  ;;  %v4567_v19 = vld [vmem:[%s9819_s4 + $0x8] sm:$0xff] }
 0x4b0   : > { %v5626_v48 = vpack.c.bf16 %v4567_v19, %v4566_v35  ;;  %v4570_v35 = vld [vmem:[%s9819_s4 + $0x20] sm:$0xff]  ;;  %v4571_v19 = vld [vmem:[%s9819_s4 + $0x28] sm:$0xff] }
 0x4b1   : > { %v8574_v15 = vpop.permute.xlu1 %3201  ;;  %v8576_v31 = vpop.permute.xlu0 %3117 }
 0x4b2   : > { %10307 = vst [vmem:[#allocation115_spill] sm:$0xff] %v8574_v15  ;;  %10308 = vst [vmem:[#allocation8_spill] sm:$0xff] %v8576_v31  ;;  %5642 = vmatpush3.bf16.msra.mxu1 %v5626_v48  ;;  %5627 = vmatpush3.bf16.msra.mxu0 %v5626_v48 }
 0x4b3   : > { %3361 = vrot.lane.b32.xlu1 %v8417_v51, %s5746_s19  ;;  %3359 = vrot.lane.b32.xlu0 %v8403_v52, %s5746_s19 }
 0x4b4   : > { %5638 = vmatprep.subr.bf16.mxu1 %v10309_v8  ;;  %5628 = vmatprep.subr.bf16.mxu0 %v10309_v8 }
 0x4b5   : > { %v8582_v3 = vpop.permute.xlu1 %3205  ;;  %v8584_v21 = vpop.permute.xlu0 %3203 }
 0x4b7   : > { %3365 = vrot.lane.b32.xlu1 %v8429_v42, %s5746_s19  ;;  %3363 = vrot.lane.b32.xlu0 %v8415_v16, %s5746_s19  ;;  %v5629_v42 = vpack.c.bf16 %v4569_v26, %v4568_v17  ;;  %v4572_v17 = vld [vmem:[%s9819_s4 + $0x30] sm:$0xff]  ;;  %v4573_v26 = vld [vmem:[%s9819_s4 + $0x38] sm:$0xff] }
 0x4b9   : > { %v8596_v52 = vpop.permute.xlu1 %3209  ;;  %v8598_v51 = vpop.permute.xlu0 %3207  ;;  %5643 = vmatpush3.bf16.msra.mxu1 %v5629_v42  ;;  %5630 = vmatpush3.bf16.msra.mxu0 %v5629_v42 }
 0x4ba   : > { %5639 = vmatprep.subr.bf16.mxu1 %v10309_v8  ;;  %5631 = vmatprep.subr.bf16.mxu0 %v10309_v8 }
 0x4bb   : > { %3369 = vrot.lane.b32.xlu1 %v8441_v47, %s5746_s19  ;;  %3367 = vrot.lane.b32.xlu0 %v8427_v58, %s5746_s19  ;;  %v5632_v47 = vpack.c.bf16 %v4571_v19, %v4570_v35  ;;  %v2871_v35 = vld [vmem:[#allocation2 + $0x29] sm:$0xff] }
 0x4bc   : > { %v2830_v19 = vld [vmem:[#allocation2 + $0x28] sm:$0xff] }
 0x4bd   : > { %v8612_v16 = vpop.permute.xlu1 %3213  ;;  %v8614_v50 = vpop.permute.xlu0 %3211  ;;  %5644 = vmatpush3.bf16.msra.mxu1 %v5632_v47  ;;  %5633 = vmatpush3.bf16.msra.mxu0 %v5632_v47 }
 0x4be   : > { %5640 = vmatprep.subr.bf16.mxu1 %v10309_v8  ;;  %5634 = vmatprep.subr.bf16.mxu0 %v10309_v8  ;;  %v4574_v8 = vld [vmem:[%s9819_s4 + $0x40] sm:$0xff] }
 0x4bf   : > { %3373 = vrot.lane.b32.xlu1 %v8453_v14, %s5746_s19  ;;  %3371 = vrot.lane.b32.xlu0 %v8439_v34, %s5746_s19  ;;  %v5635_v14 = vpack.c.bf16 %v4573_v26, %v4572_v17  ;;  %v2915_v17 = vld [vmem:[#allocation2 + $0x3a] sm:$0xff] }
 0x4c1   : > { %v8628_v58 = vpop.permute.xlu1 %3217  ;;  %v8630_v48 = vpop.permute.xlu0 %3215  ;;  %5645 = vmatpush3.bf16.msra.mxu1 %v5635_v14  ;;  %5636 = vmatpush3.bf16.msra.mxu0 %v5635_v14 }
 0x4c2   : > { %5641 = vmatprep.subr.mxu1 %v10055_v61  ;;  %5493 = vmatprep.subr.mxu0 %v10055_v61 }
 0x4c3   : > { %3377 = vrot.lane.b32.xlu1 %v8465_v6, %s5746_s19  ;;  %3375 = vrot.lane.b32.xlu0 %v8451_v27, %s5746_s19 }
 0x4c5   : > { %v8644_v34 = vpop.permute.xlu1 %3221  ;;  %v8646_v42 = vpop.permute.xlu0 %3219  ;;  %5646 = vmatpush3.msra.mxu1 %v4574_v8  ;;  %5494 = vmatpush3.msra.mxu0 %v4574_v8  ;;  %v2956_v8 = vld [vmem:[#allocation2 + $0x3b] sm:$0xff] }
 0x4c7   : > { %3381 = vrot.lane.b32.xlu1 %v8475_v40, %s5746_s19  ;;  %3379 = vrot.lane.b32.xlu0 %v8463_v53, %s5746_s19  ;;  %v2873_v53 = vld [vmem:[#allocation2 + $0x39] sm:$0xff] }
 0x4c9   : > { %v8657_v27 = vpop.permute.xlu1 %3225  ;;  %v8659_v6 = vpop.permute.xlu0 %3223 }
 0x4cb   : > { %3657 = vrot.lane.b32.xlu1 %v2871_v35, %s5749_s28  ;;  %3493 = vrot.lane.b32.xlu0 %v2830_v19, %s5750_s29  ;;  %v2831_v35 = vld [vmem:[#allocation2 + $0x30] sm:$0xff] }
 0x4cd   : > { %v8663_v47 = vpop.permute.xlu1 %3229  ;;  %v8665_v40 = vpop.permute.xlu0 %3227 }
 0x4cf   : > { %3947 = vrot.lane.b32.xlu1 %v2915_v17, %s5751_s7  ;;  %3783 = vrot.lane.b32.xlu0 %v2873_v53, %s5752_s20  ;;  %v2872_v17 = vld [vmem:[#allocation2 + $0x31] sm:$0xff] }
 0x4d1   : > { %v8669_v26 = vpop.permute.xlu1 %3233  ;;  %v8671_v14 = vpop.permute.xlu0 %3231 }
 0x4d3   : > { %4111 = vrot.lane.b32.xlu1 %v2956_v8, %s5753_s8  ;;  %3495 = vrot.lane.b32.xlu0 %v2831_v35, %s5750_s29 }
 0x4d5   : > { %v8675_v19 = vpop.permute.xlu1 %3237  ;;  %v8677_v15 = vpop.permute.xlu0 %3235 }
 0x4d6   : > { %10310 = vst [vmem:[#allocation46_spill] sm:$0xff] %v8675_v19  ;;  %v2883_v19 = vld [vmem:[#allocation2 + $0x89] sm:$0xff] }
 0x4d7   : > { %3785 = vrot.lane.b32.xlu1 %v2874_v25, %s5752_s20  ;;  %3659 = vrot.lane.b32.xlu0 %v2872_v17, %s5749_s28 }
 0x4d9   : > { %v8681_v31 = vpop.permute.xlu1 %3241  ;;  %v8683_v11 = vpop.permute.xlu0 %3239 }
 0x4da   : > { %10311 = vst [vmem:[#allocation80_spill] sm:$0xff] %v8681_v31  ;;  %10312 = vst [vmem:[#allocation118_spill] sm:$0xff] %v8683_v11  ;;  %v2924_v11 = vld [vmem:[#allocation2 + $0x82] sm:$0xff] }
 0x4db   : > { %3497 = vrot.lane.b32.xlu1 %v2832_v12, %s5750_s29  ;;  %3949 = vrot.lane.b32.xlu0 %v2916_v36, %s5751_s7 }
 0x4dd   : > { %v8687_v8 = vpop.permute.xlu1 %3245  ;;  %v8689_v35 = vpop.permute.xlu0 %3243 }
 0x4de   : > { %10313 = vst [vmem:[#allocation11_spill] sm:$0xff] %v8687_v8  ;;  %10314 = vst [vmem:[#allocation147_spill] sm:$0xff] %v8689_v35  ;;  %v2881_v8 = vld [vmem:[#allocation2 + $0x79] sm:$0xff]  ;;  %v2839_v35 = vld [vmem:[#allocation2 + $0x70] sm:$0xff] }
 0x4df   : > { %3661 = vrot.lane.b32.xlu1 %v2873_v53, %s5749_s28  ;;  %4113 = vrot.lane.b32.xlu0 %v2957_v45, %s5753_s8 }
 0x4e1   : > { %v8693_v17 = vpop.permute.xlu1 %3249  ;;  %v8695_v46 = vpop.permute.xlu0 %3247 }
 0x4e2   : > { %10315 = vst [vmem:[#allocation45_spill] sm:$0xff] %v8693_v17  ;;  %10316 = vst [vmem:[#allocation178_spill] sm:$0xff] %v8695_v46  ;;  %v2922_v17 = vld [vmem:[#allocation2 + $0x72] sm:$0xff] }
 0x4e3   : > { %3951 = vrot.lane.b32.xlu1 %v2917_v2, %s5751_s7  ;;  %3787 = vrot.lane.b32.xlu0 %v2875_v41, %s5752_s20 }
 0x4e5   : > { %v8699_v36 = vpop.permute.xlu1 %3253  ;;  %v8701_v12 = vpop.permute.xlu0 %3251 }
 0x4e6   : > { %10317 = vst [vmem:[#allocation83_spill] sm:$0xff] %v8699_v36  ;;  %10318 = vst [vmem:[#allocation207_spill] sm:$0xff] %v8701_v12  ;;  %v2837_v36 = vld [vmem:[#allocation2 + $0x60] sm:$0xff] }
 0x4e7   : > { %4115 = vrot.lane.b32.xlu1 %v2958_v57, %s5753_s8  ;;  %3499 = vrot.lane.b32.xlu0 %v2833_v39, %s5750_s29 }
 0x4e9   : > { %v8705_v45 = vpop.permute.xlu1 %3257  ;;  %v8707_v53 = vpop.permute.xlu0 %3255 }
 0x4ea   : > { %10319 = vst [vmem:[#allocation117_spill] sm:$0xff] %v8705_v45  ;;  %10320 = vst [vmem:[#allocation10_spill] sm:$0xff] %v8707_v53  ;;  %v2959_v45 = vld [vmem:[#allocation2 + $0x53] sm:$0xff] }
 0x4eb   : > { %3789 = vrot.lane.b32.xlu1 %v2876_v22, %s5752_s20  ;;  %3663 = vrot.lane.b32.xlu0 %v2874_v25, %s5749_s28  ;;  %v2877_v53 = vld [vmem:[#allocation2 + $0x59] sm:$0xff] }
 0x4ed   : > { %v8711_v2 = vpop.permute.xlu1 %3261  ;;  %v8713_v20 = vpop.permute.xlu0 %3259 }
 0x4ee   : > { %10321 = vst [vmem:[#allocation149_spill] sm:$0xff] %v8711_v2  ;;  %10322 = vst [vmem:[#allocation48_spill] sm:$0xff] %v8713_v20  ;;  %v2919_v20 = vld [vmem:[#allocation2 + $0x5a] sm:$0xff] }
 0x4ef   : > { %3501 = vrot.lane.b32.xlu1 %v2834_v37, %s5750_s29  ;;  %3953 = vrot.lane.b32.xlu0 %v2918_v30, %s5751_s7 }
 0x4f1   : > { %v8717_v39 = vpop.permute.xlu1 %3265  ;;  %v8719_v57 = vpop.permute.xlu0 %3263 }
 0x4f2   : > { %10323 = vst [vmem:[#allocation177_spill] sm:$0xff] %v8717_v39  ;;  %10324 = vst [vmem:[#allocation82_spill] sm:$0xff] %v8719_v57  ;;  %v2960_v39 = vld [vmem:[#allocation2 + $0x5b] sm:$0xff]  ;;  %v2835_v57 = vld [vmem:[#allocation2 + $0x50] sm:$0xff] }
 0x4f3   : > { %3665 = vrot.lane.b32.xlu1 %v2875_v41, %s5749_s28  ;;  %4117 = vrot.lane.b32.xlu0 %v2959_v45, %s5753_s8 }
 0x4f5   : > { %v8723_v25 = vpop.permute.xlu1 %3269  ;;  %v8725_v2 = vpop.permute.xlu0 %3267 }
 0x4f6   : > { %10325 = vst [vmem:[#allocation209_spill] sm:$0xff] %v8723_v25  ;;  %10326 = vst [vmem:[#allocation120_spill] sm:$0xff] %v8725_v2  ;;  %v2878_v25 = vld [vmem:[#allocation2 + $0x61] sm:$0xff] }
 0x4f7   : > { %3955 = vrot.lane.b32.xlu1 %v2919_v20, %s5751_s7  ;;  %3791 = vrot.lane.b32.xlu0 %v2877_v53, %s5752_s20  ;;  %v2920_v2 = vld [vmem:[#allocation2 + $0x62] sm:$0xff] }
 0x4f9   : > { %v8729_v30 = vpop.permute.xlu1 %3273  ;;  %v8731_v37 = vpop.permute.xlu0 %3271 }
 0x4fa   : > { %10327 = vst [vmem:[#allocation13_spill] sm:$0xff] %v8729_v30  ;;  %10328 = vst [vmem:[#allocation148_spill] sm:$0xff] %v8731_v37  ;;  %v2836_v37 = vld [vmem:[#allocation2 + $0x58] sm:$0xff] }
 0x4fb   : > { %4119 = vrot.lane.b32.xlu1 %v2960_v39, %s5753_s8  ;;  %3503 = vrot.lane.b32.xlu0 %v2835_v57, %s5750_s29 }
 0x4fd   : > { %v8735_v41 = vpop.permute.xlu1 %3277  ;;  %v8737_v45 = vpop.permute.xlu0 %3275 }
 0x4fe   : > { %10329 = vst [vmem:[#allocation47_spill] sm:$0xff] %v8735_v41  ;;  %10330 = vst [vmem:[#allocation180_spill] sm:$0xff] %v8737_v45  ;;  %v2961_v41 = vld [vmem:[#allocation2 + $0x63] sm:$0xff] }
 0x4ff   : > { %3793 = vrot.lane.b32.xlu1 %v2878_v25, %s5752_s20  ;;  %3667 = vrot.lane.b32.xlu0 %v2876_v22, %s5749_s28  ;;  %v2879_v45 = vld [vmem:[#allocation2 + $0x69] sm:$0xff] }
 0x501   : > { %v8741_v20 = vpop.permute.xlu1 %3281  ;;  %v8743_v30 = vpop.permute.xlu0 %3279 }
 0x502   : > { %10331 = vst [vmem:[#allocation85_spill] sm:$0xff] %v8741_v20  ;;  %10332 = vst [vmem:[#allocation208_spill] sm:$0xff] %v8743_v30  ;;  %v2921_v30 = vld [vmem:[#allocation2 + $0x6a] sm:$0xff] }
 0x503   : > { %3505 = vrot.lane.b32.xlu1 %v2836_v37, %s5750_s29  ;;  %3957 = vrot.lane.b32.xlu0 %v2920_v2, %s5751_s7 }
 0x505   : > { %v8747_v39 = vpop.permute.xlu1 %3329  ;;  %v8749_v57 = vpop.permute.xlu0 %3327 }
 0x506   : > { %10333 = vst [vmem:[#allocation119_spill] sm:$0xff] %v8749_v57  ;;  %v2962_v57 = vld [vmem:[#allocation2 + $0x6b] sm:$0xff] }
 0x507   : > { %3669 = vrot.lane.b32.xlu1 %v2877_v53, %s5749_s28  ;;  %4121 = vrot.lane.b32.xlu0 %v2961_v41, %s5753_s8 }
 0x509   : > { %v8753_v22 = vpop.permute.xlu1 %3333  ;;  %v8755_v20 = vpop.permute.xlu0 %3331 }
 0x50b   : > { %3959 = vrot.lane.b32.xlu1 %v2921_v30, %s5751_s7  ;;  %3795 = vrot.lane.b32.xlu0 %v2879_v45, %s5752_s20 }
 0x50d   : > { %v8759_v2 = vpop.permute.xlu1 %3337  ;;  %v8761_v37 = vpop.permute.xlu0 %3335 }
 0x50f   : > { %4123 = vrot.lane.b32.xlu1 %v2962_v57, %s5753_s8  ;;  %3507 = vrot.lane.b32.xlu0 %v2837_v36, %s5750_s29 }
 0x511   : > { %v8765_v53 = vpop.permute.xlu1 %3341  ;;  %v8767_v41 = vpop.permute.xlu0 %3339 }
 0x513   : > { %3797 = vrot.lane.b32.xlu1 %v2880_v1, %s5752_s20  ;;  %3671 = vrot.lane.b32.xlu0 %v2878_v25, %s5749_s28 }
 0x515   : > { %v8771_v30 = vpop.permute.xlu1 %3345  ;;  %v8773_v12 = vpop.permute.xlu0 %3343 }
 0x517   : > { %3509 = vrot.lane.b32.xlu1 %v2838_v63, %s5750_s29  ;;  %3961 = vrot.lane.b32.xlu0 %v2922_v17, %s5751_s7 }
 0x519   : > { %v8777_v36 = vpop.permute.xlu1 %3349  ;;  %v8779_v57 = vpop.permute.xlu0 %3347 }
 0x51b   : > { %3673 = vrot.lane.b32.xlu1 %v2879_v45, %s5749_s28  ;;  %4125 = vrot.lane.b32.xlu0 %v2963_v24, %s5753_s8 }
 0x51d   : > { %v8783_v25 = vpop.permute.xlu1 %3353  ;;  %v8785_v46 = vpop.permute.xlu0 %3351 }
 0x51f   : > { %3963 = vrot.lane.b32.xlu1 %v2923_v56, %s5751_s7  ;;  %3799 = vrot.lane.b32.xlu0 %v2881_v8, %s5752_s20 }
 0x521   : > { %v8789_v63 = vpop.permute.xlu1 %3357  ;;  %v8791_v17 = vpop.permute.xlu0 %3355 }
 0x523   : > { %4127 = vrot.lane.b32.xlu1 %v2964_v4, %s5753_s8  ;;  %3511 = vrot.lane.b32.xlu0 %v2839_v35, %s5750_s29 }
 0x525   : > { %v8795_v24 = vpop.permute.xlu1 %3361  ;;  %v8797_v45 = vpop.permute.xlu0 %3359 }
 0x527   : > { %3801 = vrot.lane.b32.xlu1 %v2882_v43, %s5752_s20  ;;  %3675 = vrot.lane.b32.xlu0 %v2880_v1, %s5749_s28 }
 0x529   : > { %v8801_v56 = vpop.permute.xlu1 %3365  ;;  %v8803_v31 = vpop.permute.xlu0 %3363 }
 0x52a   : > { %10334 = vst [vmem:[#allocation12_spill] sm:$0xff] %v8801_v56  ;;  %10335 = vst [vmem:[#allocation151_spill] sm:$0xff] %v8803_v31  ;;  %v2925_v31 = vld [vmem:[#allocation2 + $0x8a] sm:$0xff] }
 0x52b   : > { %3513 = vrot.lane.b32.xlu1 %v2840_v28, %s5750_s29  ;;  %3965 = vrot.lane.b32.xlu0 %v2924_v11, %s5751_s7 }
 0x52d   : > { %v8807_v4 = vpop.permute.xlu1 %3369  ;;  %v8809_v35 = vpop.permute.xlu0 %3367 }
 0x52e   : > { %10336 = vst [vmem:[#allocation50_spill] sm:$0xff] %v8807_v4  ;;  %10337 = vst [vmem:[#allocation179_spill] sm:$0xff] %v8809_v35  ;;  %v2966_v4 = vld [vmem:[#allocation2 + $0x8b] sm:$0xff]  ;;  %v2841_v35 = vld [vmem:[#allocation2 + $0x80] sm:$0xff] }
 0x52f   : > { %3677 = vrot.lane.b32.xlu1 %v2881_v8, %s5749_s28  ;;  %4129 = vrot.lane.b32.xlu0 %v2965_v55, %s5753_s8  ;;  %v2704_v55 = vld [vmem:[#allocation2 + $0x15] sm:$0xff] }
 0x531   : > { %v8813_v1 = vpop.permute.xlu1 %3373  ;;  %v8815_v56 = vpop.permute.xlu0 %3371 }
 0x532   : > { %10338 = vst [vmem:[#allocation84_spill] sm:$0xff] %v8813_v1  ;;  %10339 = vst [vmem:[#allocation211_spill] sm:$0xff] %v8815_v56  ;;  %v2884_v56 = vld [vmem:[#allocation2 + $0x91] sm:$0xff] }
 0x533   : > { %3967 = vrot.lane.b32.xlu1 %v2925_v31, %s5751_s7  ;;  %3803 = vrot.lane.b32.xlu0 %v2883_v19, %s5752_s20  ;;  %v4233_v31 = vsel %vm255_vm13, %v2704_v55, %v8397_v60 }
 0x535   : > { %v8819_v28 = vpop.permute.xlu1 %3377  ;;  %v8821_v11 = vpop.permute.xlu0 %3375 }
 0x536   : > { %10340 = vst [vmem:[#allocation122_spill] sm:$0xff] %v8819_v28  ;;  %10341 = vst [vmem:[#allocation15_spill] sm:$0xff] %v8821_v11  ;;  %v2842_v11 = vld [vmem:[#allocation2 + $0x88] sm:$0xff] }
 0x537   : > { %4131 = vrot.lane.b32.xlu1 %v2966_v4, %s5753_s8  ;;  %3515 = vrot.lane.b32.xlu0 %v2841_v35, %s5750_s29  ;;  %v4275_v4 = vsel %vm4273_vm15, %v4233_v31, %v8584_v21  ;;  %v2967_v31 = vld [vmem:[#allocation2 + $0x93] sm:$0xff] }
 0x538   : > { %v4316_v35 = vsel %vm2129_vm11, %v4275_v4, %v8747_v39  ;;  %v2927_v4 = vld [vmem:[#allocation2 + $0x9a] sm:$0xff] }
 0x539   : > { %v8825_v8 = vpop.permute.xlu1 %3381  ;;  %v8827_v1 = vpop.permute.xlu0 %3379 }
 0x53a   : > { %10342 = vst [vmem:[#allocation150_spill] sm:$0xff] %v8825_v8  ;;  %10343 = vst [vmem:[#allocation49_spill] sm:$0xff] %v8827_v1 }
 0x53b   : > { %3805 = vrot.lane.b32.xlu1 %v2884_v56, %s5752_s20  ;;  %3679 = vrot.lane.b32.xlu0 %v2882_v43, %s5749_s28 }
 0x53d   : > { %v3658_v28 = vpop.permute.xlu1 %3657  ;;  %v3494_v8 = vpop.permute.xlu0 %3493 }
 0x53e   : > { %v4358_v1 = vsel %vm4356_vm0, %v4316_v35, %v3494_v8  ;;  %v2885_v35 = vld [vmem:[#allocation2 + $0x99] sm:$0xff] }
 0x53f   : > { %3517 = vrot.lane.b32.xlu1 %v2842_v11, %s5750_s29  ;;  %3969 = vrot.lane.b32.xlu0 %v2926_v5, %s5751_s7  ;;  %v4400_v43 = vsel %vm4398_vm1, %v4358_v1, %v3658_v28  ;;  %v2705_v1 = vld [vmem:[#allocation2 + $0x1d] sm:$0xff] }
 0x541   : > { %v3948_v60 = vpop.permute.xlu1 %3947  ;;  %v3784_v55 = vpop.permute.xlu0 %3783 }
 0x542   : > { %v4442_v21 = vsel %vm4440_vm2, %v4400_v43, %v3784_v55  ;;  %v2968_v55 = vld [vmem:[#allocation2 + $0x9b] sm:$0xff] }
 0x543   : > { %3681 = vrot.lane.b32.xlu1 %v2883_v19, %s5749_s28  ;;  %4133 = vrot.lane.b32.xlu0 %v2967_v31, %s5753_s8  ;;  %v4484_v8 = vsel %vm4482_vm4, %v4442_v21, %v3948_v60  ;;  %v4234_v19 = vsel %vm255_vm13, %v2705_v1, %v8411_v13  ;;  %v2843_v21 = vld [vmem:[#allocation2 + $0x90] sm:$0xff] }
 0x544   : > { %v4276_v60 = vsel %vm4273_vm15, %v4234_v19, %v8582_v3  ;;  %v2706_v3 = vld [vmem:[#allocation2 + $0x25] sm:$0xff] }
 0x545   : > { %v4112_v39 = vpop.permute.xlu1 %4111  ;;  %v3496_v11 = vpop.permute.xlu0 %3495  ;;  %v4317_v31 = vsel %vm2129_vm11, %v4276_v60, %v8755_v20  ;;  %v4235_v20 = vsel %vm255_vm13, %v2706_v3, %v8413_v32 }
 0x546   : > { %v4526_v5 = vsel %vm4524_vm5, %v4484_v8, %v4112_v39  ;;  %v4359_v39 = vsel %vm4356_vm0, %v4317_v31, %v3496_v11  ;;  %v4277_v11 = vsel %vm4273_vm15, %v4235_v20, %v8598_v51  ;;  %v2928_v31 = vld [vmem:[#allocation2 + $0xa2] sm:$0xff]  ;;  %v2929_v20 = vld [vmem:[#allocation2 + $0xaa] sm:$0xff] }
 0x547   : > { %3971 = vrot.lane.b32.xlu1 %v2927_v4, %s5751_s7  ;;  %3807 = vrot.lane.b32.xlu0 %v2885_v35, %s5752_s20  ;;  %v2886_v4 = vld [vmem:[#allocation2 + $0xa1] sm:$0xff] }
 0x548   : > { %5499 = vmatmul.mubr.msk.f32.vlgmr.msra.gmra.mrb[0].mxu1 %vm4582_vm6, %v4526_v5 }
 0x549   : > { %v3786_v28 = vpop.permute.xlu1 %3785  ;;  %v3660_v43 = vpop.permute.xlu0 %3659  ;;  %5501 = vmatprep.mubr.msk.f32.mxu1 %vm5744_vm3, %v10055_v61 }
 0x54a   : > { %v4401_v13 = vsel %vm4398_vm1, %v4359_v39, %v3660_v43 }
 0x54b   : > { %4135 = vrot.lane.b32.xlu1 %v2968_v55, %s5753_s8  ;;  %3519 = vrot.lane.b32.xlu0 %v2843_v21, %s5750_s29  ;;  %v4443_v1 = vsel %vm4440_vm2, %v4401_v13, %v3786_v28  ;;  %v2844_v21 = vld [vmem:[#allocation2 + $0x98] sm:$0xff] }
 0x54d   : > { %v3498_v8 = vpop.permute.xlu1 %3497  ;;  %v3950_v5 = vpop.permute.xlu0 %3949 }
 0x54e   : > { %v4485_v19 = vsel %vm4482_vm4, %v4443_v1, %v3950_v5  ;;  %v2969_v5 = vld [vmem:[#allocation2 + $0xa3] sm:$0xff] }
 0x54f   : > { %3809 = vrot.lane.b32.xlu1 %v2886_v4, %s5752_s20  ;;  %3683 = vrot.lane.b32.xlu0 %v2884_v56, %s5749_s28  ;;  %v4318_v56 = vsel %vm2129_vm11, %v4277_v11, %v8753_v22 }
 0x550   : > { %v4360_v32 = vsel %vm4356_vm0, %v4318_v56, %v3498_v8 }
 0x551   : > { %v3662_v60 = vpop.permute.xlu1 %3661  ;;  %v4114_v55 = vpop.permute.xlu0 %4113 }
 0x552   : > { %v4527_v43 = vsel %vm4524_vm5, %v4485_v19, %v4114_v55  ;;  %v4402_v28 = vsel %vm4398_vm1, %v4360_v32, %v3662_v60  ;;  %v2887_v19 = vld [vmem:[#allocation2 + $0xa9] sm:$0xff] }
 0x553   : > { %3521 = vrot.lane.b32.xlu1 %v2844_v21, %s5750_s29  ;;  %3973 = vrot.lane.b32.xlu0 %v2928_v31, %s5751_s7  ;;  %v2707_v60 = vld [vmem:[#allocation2 + $0x2d] sm:$0xff]  ;;  %v2845_v31 = vld [vmem:[#allocation2 + $0xa0] sm:$0xff] }
 0x554   : > { %5502 = vmatmul.mubr.msk.f32.gmra.mrb[2].mxu1 %vm4582_vm6, %v4527_v43  ;;  %v2970_v21 = vld [vmem:[#allocation2 + $0xab] sm:$0xff] }
 0x555   : > { %v3952_v39 = vpop.permute.xlu1 %3951  ;;  %v3788_v13 = vpop.permute.xlu0 %3787  ;;  %5504 = vmatprep.mubr.msk.f32.mxu1 %vm5744_vm3, %v10055_v61 }
 0x556   : > { %v4444_v51 = vsel %vm4440_vm2, %v4402_v28, %v3788_v13  ;;  %v2888_v13 = vld [vmem:[#allocation2 + $0xb1] sm:$0xff] }
 0x557   : > { %3685 = vrot.lane.b32.xlu1 %v2885_v35, %s5749_s28  ;;  %4137 = vrot.lane.b32.xlu0 %v2969_v5, %s5753_s8  ;;  %v4486_v3 = vsel %vm4482_vm4, %v4444_v51, %v3952_v39  ;;  %v4236_v35 = vsel %vm255_vm13, %v2707_v60, %v8423_v38  ;;  %v2930_v60 = vld [vmem:[#allocation2 + $0xb2] sm:$0xff] }
 0x558   : > { %v4278_v43 = vsel %vm4273_vm15, %v4236_v35, %v8596_v52  ;;  %v2708_v52 = vld [vmem:[#allocation2 + $0x35] sm:$0xff] }
 0x559   : > { %v4116_v22 = vpop.permute.xlu1 %4115  ;;  %v3500_v8 = vpop.permute.xlu0 %3499  ;;  %v4319_v56 = vsel %vm2129_vm11, %v4278_v43, %v8761_v37  ;;  %v4237_v37 = vsel %vm255_vm13, %v2708_v52, %v8425_v54  ;;  %v2971_v43 = vld [vmem:[#allocation2 + $0xb3] sm:$0xff] }
 0x55a   : > { %v4528_v1 = vsel %vm4524_vm5, %v4486_v3, %v4116_v22  ;;  %v4361_v32 = vsel %vm4356_vm0, %v4319_v56, %v3500_v8  ;;  %v4279_v8 = vsel %vm4273_vm15, %v4237_v37, %v8614_v50  ;;  %v2972_v37 = vld [vmem:[#allocation2 + $0xbb] sm:$0xff] }
 0x55b   : > { %3975 = vrot.lane.b32.xlu1 %v2929_v20, %s5751_s7  ;;  %3811 = vrot.lane.b32.xlu0 %v2887_v19, %s5752_s20  ;;  %v2846_v20 = vld [vmem:[#allocation2 + $0xa8] sm:$0xff] }
 0x55c   : > { %5505 = vmatmul.mubr.msk.f32.gmra.mrb[4].mxu1 %vm4582_vm6, %v4528_v1 }
 0x55d   : > { %v3790_v55 = vpop.permute.xlu1 %3789  ;;  %v3664_v11 = vpop.permute.xlu0 %3663  ;;  %5507 = vmatprep.mubr.msk.f32.mxu1 %vm5744_vm3, %v10055_v61 }
 0x55e   : > { %v4403_v38 = vsel %vm4398_vm1, %v4361_v32, %v3664_v11  ;;  %v2931_v32 = vld [vmem:[#allocation2 + $0xba] sm:$0xff] }
 0x55f   : > { %4139 = vrot.lane.b32.xlu1 %v2970_v21, %s5753_s8  ;;  %3523 = vrot.lane.b32.xlu0 %v2845_v31, %s5750_s29  ;;  %v4445_v51 = vsel %vm4440_vm2, %v4403_v38, %v3790_v55  ;;  %v2889_v38 = vld [vmem:[#allocation2 + $0xb9] sm:$0xff] }
 0x561   : > { %v3502_v28 = vpop.permute.xlu1 %3501  ;;  %v3954_v39 = vpop.permute.xlu0 %3953 }
 0x562   : > { %v4487_v5 = vsel %vm4482_vm4, %v4445_v51, %v3954_v39 }
 0x563   : > { %3813 = vrot.lane.b32.xlu1 %v2888_v13, %s5752_s20  ;;  %3687 = vrot.lane.b32.xlu0 %v2886_v4, %s5749_s28  ;;  %v4320_v4 = vsel %vm2129_vm11, %v4279_v8, %v8759_v2 }
 0x564   : > { %v4362_v54 = vsel %vm4356_vm0, %v4320_v4, %v3502_v28  ;;  %v2709_v28 = vld [vmem:[#allocation2 + $0x3d] sm:$0xff] }
 0x565   : > { %v3666_v22 = vpop.permute.xlu1 %3665  ;;  %v4118_v3 = vpop.permute.xlu0 %4117 }
 0x566   : > { %v4529_v1 = vsel %vm4524_vm5, %v4487_v5, %v4118_v3  ;;  %v4404_v35 = vsel %vm4398_vm1, %v4362_v54, %v3666_v22  ;;  %v2847_v5 = vld [vmem:[#allocation2 + $0xb0] sm:$0xff] }
 0x567   : > { %3525 = vrot.lane.b32.xlu1 %v2846_v20, %s5750_s29  ;;  %3977 = vrot.lane.b32.xlu0 %v2930_v60, %s5751_s7  ;;  %v2890_v20 = vld [vmem:[#allocation2 + $0xc1] sm:$0xff] }
 0x568   : > { %5508 = vmatmul.mubr.msk.f32.gmra.mrb[6].mxu1 %vm4582_vm6, %v4529_v1 }
 0x569   : > { %v3956_v55 = vpop.permute.xlu1 %3955  ;;  %v3792_v11 = vpop.permute.xlu0 %3791  ;;  %5510 = vmatprep.mubr.msk.f32.mxu1 %vm5744_vm3, %v10055_v61 }
 0x56a   : > { %v4446_v50 = vsel %vm4440_vm2, %v4404_v35, %v3792_v11 }
 0x56b   : > { %3689 = vrot.lane.b32.xlu1 %v2887_v19, %s5749_s28  ;;  %4141 = vrot.lane.b32.xlu0 %v2971_v43, %s5753_s8  ;;  %v4488_v21 = vsel %vm4482_vm4, %v4446_v50, %v3956_v55  ;;  %v4238_v19 = vsel %vm255_vm13, %v2709_v28, %v8435_v49  ;;  %v2848_v50 = vld [vmem:[#allocation2 + $0xb8] sm:$0xff]  ;;  %v2932_v43 = vld [vmem:[#allocation2 + $0xc2] sm:$0xff] }
 0x56c   : > { %v4280_v51 = vsel %vm4273_vm15, %v4238_v19, %v8612_v16  ;;  %v2710_v16 = vld [vmem:[#allocation2 + $0x45] sm:$0xff] }
 0x56d   : > { %v4120_v2 = vpop.permute.xlu1 %4119  ;;  %v3504_v31 = vpop.permute.xlu0 %3503  ;;  %v4321_v22 = vsel %vm2129_vm11, %v4280_v51, %v8767_v41  ;;  %v4239_v41 = vsel %vm255_vm13, %v2710_v16, %v8437_v62  ;;  %v2711_v51 = vld [vmem:[#allocation2 + $0x4d] sm:$0xff] }
 0x56e   : > { %v4530_v56 = vsel %vm4524_vm5, %v4488_v21, %v4120_v2  ;;  %v4363_v3 = vsel %vm4356_vm0, %v4321_v22, %v3504_v31  ;;  %v4281_v55 = vsel %vm4273_vm15, %v4239_v41, %v8630_v48  ;;  %v2892_v41 = vld [vmem:[#allocation2 + $0xd1] sm:$0xff] }
 0x56f   : > { %3979 = vrot.lane.b32.xlu1 %v2931_v32, %s5751_s7  ;;  %3815 = vrot.lane.b32.xlu0 %v2889_v38, %s5752_s20 }
 0x570   : > { %5511 = vmatmul.mubr.msk.f32.gmra.mrb[8].mxu1 %vm4582_vm6, %v4530_v56  ;;  %v2973_v56 = vld [vmem:[#allocation2 + $0xc3] sm:$0xff] }
 0x571   : > { %v3794_v39 = vpop.permute.xlu1 %3793  ;;  %v3668_v52 = vpop.permute.xlu0 %3667  ;;  %5513 = vmatprep.mubr.msk.f32.mxu1 %vm5744_vm3, %v10055_v61 }
 0x572   : > { %v4405_v49 = vsel %vm4398_vm1, %v4363_v3, %v3668_v52  ;;  %v2891_v52 = vld [vmem:[#allocation2 + $0xc9] sm:$0xff] }
 0x573   : > { %4143 = vrot.lane.b32.xlu1 %v2972_v37, %s5753_s8  ;;  %3527 = vrot.lane.b32.xlu0 %v2847_v5, %s5750_s29  ;;  %v4447_v60 = vsel %vm4440_vm2, %v4405_v49, %v3794_v39  ;;  %v2933_v39 = vld [vmem:[#allocation2 + $0xca] sm:$0xff]  ;;  %v2849_v49 = vld [vmem:[#allocation2 + $0xc0] sm:$0xff] }
 0x574   : > { %v2974_v3 = vld [vmem:[#allocation2 + $0xcb] sm:$0xff] }
 0x575   : > { %v3506_v8 = vpop.permute.xlu1 %3505  ;;  %v3958_v1 = vpop.permute.xlu0 %3957 }
 0x576   : > { %v4489_v4 = vsel %vm4482_vm4, %v4447_v60, %v3958_v1 }
 0x577   : > { %3817 = vrot.lane.b32.xlu1 %v2890_v20, %s5752_s20  ;;  %3691 = vrot.lane.b32.xlu0 %v2888_v13, %s5749_s28  ;;  %v4322_v13 = vsel %vm2129_vm11, %v4281_v55, %v8765_v53 }
 0x578   : > { %v4364_v62 = vsel %vm4356_vm0, %v4322_v13, %v3506_v8  ;;  %v2934_v13 = vld [vmem:[#allocation2 + $0xd2] sm:$0xff] }
 0x579   : > { %v3670_v54 = vpop.permute.xlu1 %3669  ;;  %v4122_v35 = vpop.permute.xlu0 %4121 }
 0x57a   : > { %v4531_v11 = vsel %vm4524_vm5, %v4489_v4, %v4122_v35  ;;  %v4406_v2 = vsel %vm4398_vm1, %v4364_v62, %v3670_v54 }
 0x57b   : > { %3529 = vrot.lane.b32.xlu1 %v2848_v50, %s5750_s29  ;;  %3981 = vrot.lane.b32.xlu0 %v2932_v43, %s5751_s7  ;;  %v2850_v43 = vld [vmem:[#allocation2 + $0xc8] sm:$0xff] }
 0x57c   : > { %5514 = vmatmul.mubr.msk.f32.gmra.mrb[10].mxu1 %vm4582_vm6, %v4531_v11 }
 0x57d   : > { %v3960_v21 = vpop.permute.xlu1 %3959  ;;  %v3796_v31 = vpop.permute.xlu0 %3795  ;;  %5516 = vmatprep.mubr.msk.f32.mxu1 %vm5744_vm3, %v10055_v61 }
 0x57e   : > { %v4448_v48 = vsel %vm4440_vm2, %v4406_v2, %v3796_v31  ;;  %v2975_v31 = vld [vmem:[#allocation2 + $0xd3] sm:$0xff] }
 0x57f   : > { %3693 = vrot.lane.b32.xlu1 %v2889_v38, %s5749_s28  ;;  %4145 = vrot.lane.b32.xlu0 %v2973_v56, %s5753_s8  ;;  %v4490_v32 = vsel %vm4482_vm4, %v4448_v48, %v3960_v21  ;;  %v4240_v38 = vsel %vm255_vm13, %v2711_v51, %v8447_v9 }
 0x580   : > { %v4282_v22 = vsel %vm4273_vm15, %v4240_v38, %v8628_v58  ;;  %v2712_v58 = vld [vmem:[#allocation2 + $0x55] sm:$0xff] }
 0x581   : > { %v4124_v53 = vpop.permute.xlu1 %4123  ;;  %v3508_v28 = vpop.permute.xlu0 %3507  ;;  %v4323_v8 = vsel %vm2129_vm11, %v4282_v22, %v8773_v12  ;;  %v4241_v12 = vsel %vm255_vm13, %v2712_v58, %v8449_v33 }
 0x582   : > { %v4532_v19 = vsel %vm4524_vm5, %v4490_v32, %v4124_v53  ;;  %v4365_v1 = vsel %vm4356_vm0, %v4323_v8, %v3508_v28  ;;  %v4283_v11 = vsel %vm4273_vm15, %v4241_v12, %v8646_v42  ;;  %v2935_v32 = vld [vmem:[#allocation2 + $0xda] sm:$0xff] }
 0x583   : > { %3983 = vrot.lane.b32.xlu1 %v2933_v39, %s5751_s7  ;;  %3819 = vrot.lane.b32.xlu0 %v2891_v52, %s5752_s20  ;;  %v2893_v28 = vld [vmem:[#allocation2 + $0xd9] sm:$0xff] }
 0x584   : > { %5517 = vmatmul.mubr.msk.f32.gmra.mrb[12].mxu1 %vm4582_vm6, %v4532_v19  ;;  %v2713_v19 = vld [vmem:[#allocation2 + $0x5d] sm:$0xff] }
 0x585   : > { %v3798_v37 = vpop.permute.xlu1 %3797  ;;  %v3672_v5 = vpop.permute.xlu0 %3671  ;;  %5519 = vmatprep.mubr.msk.f32.mxu1 %vm5744_vm3, %v10055_v61  ;;  %v4242_v39 = vsel %vm255_vm13, %v2713_v19, %v8459_v0 }
 0x586   : > { %v4407_v9 = vsel %vm4398_vm1, %v4365_v1, %v3672_v5  ;;  %v4284_v38 = vsel %vm4273_vm15, %v4242_v39, %v8644_v34  ;;  %v2851_v5 = vld [vmem:[#allocation2 + $0xd0] sm:$0xff]  ;;  %v2894_v1 = vld [vmem:[#allocation2 + $0xe1] sm:$0xff] }
 0x587   : > { %4147 = vrot.lane.b32.xlu1 %v2974_v3, %s5753_s8  ;;  %3531 = vrot.lane.b32.xlu0 %v2849_v49, %s5750_s29  ;;  %v4449_v4 = vsel %vm4440_vm2, %v4407_v9, %v3798_v37  ;;  %v2976_v37 = vld [vmem:[#allocation2 + $0xdb] sm:$0xff]  ;;  %v4325_v22 = vsel %vm2129_vm11, %v4284_v38, %v8779_v57  ;;  %v2714_v34 = vld [vmem:[#allocation2 + $0x65] sm:$0xff] }
 0x588   : > { %v4243_v57 = vsel %vm255_vm13, %v2714_v34, %v8461_v7 }
 0x589   : > { %v3510_v16 = vpop.permute.xlu1 %3509  ;;  %v3962_v60 = vpop.permute.xlu0 %3961 }
 0x58a   : > { %v4491_v54 = vsel %vm4482_vm4, %v4449_v4, %v3962_v60  ;;  %v4285_v4 = vsel %vm4273_vm15, %v4243_v57, %v8659_v6  ;;  %v2979_v57 = vld [vmem:[#allocation2 + $0xf3] sm:$0xff] }
 0x58b   : > { %3821 = vrot.lane.b32.xlu1 %v2892_v41, %s5752_s20  ;;  %3695 = vrot.lane.b32.xlu0 %v2890_v20, %s5749_s28  ;;  %v4324_v20 = vsel %vm2129_vm11, %v4283_v11, %v8771_v30 }
 0x58c   : > { %v4366_v33 = vsel %vm4356_vm0, %v4324_v20, %v3510_v16 }
 0x58d   : > { %v3674_v35 = vpop.permute.xlu1 %3673  ;;  %v4126_v55 = vpop.permute.xlu0 %4125 }
 0x58e   : > { %v4533_v50 = vsel %vm4524_vm5, %v4491_v54, %v4126_v55  ;;  %v4408_v62 = vsel %vm4398_vm1, %v4366_v33, %v3674_v35  ;;  %v2852_v54 = vld [vmem:[#allocation2 + $0xd8] sm:$0xff]  ;;  %v2936_v35 = vld [vmem:[#allocation2 + $0xe2] sm:$0xff] }
 0x58f   : > { %3533 = vrot.lane.b32.xlu1 %v2850_v43, %s5750_s29  ;;  %3985 = vrot.lane.b32.xlu0 %v2934_v13, %s5751_s7  ;;  %v2977_v43 = vld [vmem:[#allocation2 + $0xe3] sm:$0xff] }
 0x590   : > { %5520 = vmatmul.mubr.msk.f32.gmra.mrb[14].mxu1 %vm4582_vm6, %v4533_v50 }
 0x591   : > { %v3964_v2 = vpop.permute.xlu1 %3963  ;;  %v3800_v21 = vpop.permute.xlu0 %3799  ;;  %5522 = vmatprep.mubr.msk.f32.mxu1 %vm5744_vm3, %v10055_v61 }
 0x592   : > { %v4450_v42 = vsel %vm4440_vm2, %v4408_v62, %v3800_v21  ;;  %v2937_v62 = vld [vmem:[#allocation2 + $0xea] sm:$0xff] }
 0x593   : > { %3697 = vrot.lane.b32.xlu1 %v2891_v52, %s5749_s28  ;;  %4149 = vrot.lane.b32.xlu0 %v2975_v31, %s5753_s8  ;;  %v4492_v48 = vsel %vm4482_vm4, %v4450_v42, %v3964_v2  ;;  %v2895_v2 = vld [vmem:[#allocation2 + $0xe9] sm:$0xff] }
 0x594   : > { %v2715_v21 = vld [vmem:[#allocation2 + $0x6d] sm:$0xff] }
 0x595   : > { %v4128_v30 = vpop.permute.xlu1 %4127  ;;  %v3512_v56 = vpop.permute.xlu0 %3511  ;;  %v4244_v42 = vsel %vm255_vm13, %v2715_v21, %v8471_v10 }
 0x596   : > { %v4534_v53 = vsel %vm4524_vm5, %v4492_v48, %v4128_v30  ;;  %v4367_v3 = vsel %vm4356_vm0, %v4325_v22, %v3512_v56  ;;  %v4286_v48 = vsel %vm4273_vm15, %v4244_v42, %v8657_v27  ;;  %v2978_v56 = vld [vmem:[#allocation2 + $0xeb] sm:$0xff]  ;;  %v2716_v27 = vld [vmem:[#allocation2 + $0x75] sm:$0xff] }
 0x597   : > { %3987 = vrot.lane.b32.xlu1 %v2935_v32, %s5751_s7  ;;  %3823 = vrot.lane.b32.xlu0 %v2893_v28, %s5752_s20  ;;  %v4327_v32 = vsel %vm2129_vm11, %v4286_v48, %v8785_v46  ;;  %v4245_v46 = vsel %vm255_vm13, %v2716_v27, %v8473_v29  ;;  %v2940_v48 = vld [vmem:[#allocation2 + $0x102] sm:$0xff] }
 0x598   : > { %5523 = vmatmul.mubr.msk.f32.gmra.mrb[16].mxu1 %vm4582_vm6, %v4534_v53  ;;  %v2853_v53 = vld [vmem:[#allocation2 + $0xe0] sm:$0xff]  ;;  %v4287_v22 = vsel %vm4273_vm15, %v4245_v46, %v8665_v40  ;;  %v2899_v27 = vld [vmem:[#allocation2 + $0x109] sm:$0xff] }
 0x599   : > { %v3802_v52 = vpop.permute.xlu1 %3801  ;;  %v3676_v51 = vpop.permute.xlu0 %3675  ;;  %5525 = vmatprep.mubr.msk.f32.mxu1 %vm5744_vm3, %v10055_v61  ;;  %v2719_v46 = vld [vmem:[#allocation2 + $0x8d] sm:$0xff] }
 0x59a   : > { %v4409_v0 = vsel %vm4398_vm1, %v4367_v3, %v3676_v51 }
 0x59b   : > { %4151 = vrot.lane.b32.xlu1 %v2976_v37, %s5753_s8  ;;  %3535 = vrot.lane.b32.xlu0 %v2851_v5, %s5750_s29  ;;  %v4451_v9 = vsel %vm4440_vm2, %v4409_v0, %v3802_v52  ;;  %v2896_v52 = vld [vmem:[#allocation2 + $0xf1] sm:$0xff]  ;;  %v2854_v0 = vld [vmem:[#allocation2 + $0xe8] sm:$0xff] }
 0x59d   : > { %v3514_v49 = vpop.permute.xlu1 %3513  ;;  %v3966_v8 = vpop.permute.xlu0 %3965 }
 0x59e   : > { %v4493_v16 = vsel %vm4482_vm4, %v4451_v9, %v3966_v8  ;;  %v4328_v8 = vsel %vm2129_vm11, %v4287_v22, %v8783_v25 }
 0x59f   : > { %3825 = vrot.lane.b32.xlu1 %v2894_v1, %s5752_s20  ;;  %3699 = vrot.lane.b32.xlu0 %v2892_v41, %s5749_s28  ;;  %v4326_v41 = vsel %vm2129_vm11, %v4285_v4, %v8777_v36  ;;  %v2939_v4 = vld [vmem:[#allocation2 + $0xfa] sm:$0xff] }
 0x5a0   : > { %v4368_v7 = vsel %vm4356_vm0, %v4326_v41, %v3514_v49  ;;  %v2938_v49 = vld [vmem:[#allocation2 + $0xf2] sm:$0xff] }
 0x5a1   : > { %v3678_v60 = vpop.permute.xlu1 %3677  ;;  %v4130_v58 = vpop.permute.xlu0 %4129 }
 0x5a2   : > { %v4535_v12 = vsel %vm4524_vm5, %v4493_v16, %v4130_v58  ;;  %v4410_v55 = vsel %vm4398_vm1, %v4368_v7, %v3678_v60 }
 0x5a3   : > { %3537 = vrot.lane.b32.xlu1 %v2852_v54, %s5750_s29  ;;  %3989 = vrot.lane.b32.xlu0 %v2936_v35, %s5751_s7  ;;  %v2717_v54 = vld [vmem:[#allocation2 + $0x7d] sm:$0xff] }
 0x5a4   : > { %5526 = vmatmul.mubr.msk.f32.gmra.mrb[18].mxu1 %vm4582_vm6, %v4535_v12  ;;  %v2897_v12 = vld [vmem:[#allocation2 + $0xf9] sm:$0xff]  ;;  %v4246_v35 = vsel %vm255_vm13, %v2717_v54, %v8480_v59 }
 0x5a5   : > { %v3968_v11 = vpop.permute.xlu1 %3967  ;;  %v3804_v50 = vpop.permute.xlu0 %3803  ;;  %5528 = vmatprep.mubr.msk.f32.mxu1 %vm5744_vm3, %v10055_v61 }
 0x5a6   : > { %v4452_v6 = vsel %vm4440_vm2, %v4410_v55, %v3804_v50  ;;  %v4288_v55 = vsel %vm4273_vm15, %v4246_v35, %v8663_v47  ;;  %v2855_v50 = vld [vmem:[#allocation2 + $0xf0] sm:$0xff]  ;;  %v2718_v47 = vld [vmem:[#allocation2 + $0x85] sm:$0xff] }
 0x5a7   : > { %3701 = vrot.lane.b32.xlu1 %v2893_v28, %s5749_s28  ;;  %4153 = vrot.lane.b32.xlu0 %v2977_v43, %s5753_s8  ;;  %v4494_v13 = vsel %vm4482_vm4, %v4452_v6, %v3968_v11  ;;  %v2980_v11 = vld [vmem:[#allocation2 + $0xfb] sm:$0xff]  ;;  %v4329_v6 = vsel %vm2129_vm11, %v4288_v55, %v8791_v17  ;;  %v4247_v17 = vsel %vm255_vm13, %v2718_v47, %v8482_v18 }
 0x5a8   : > { %v4289_v42 = vsel %vm4273_vm15, %v4247_v17, %v8671_v14 }
 0x5a9   : > { %v4132_v36 = vpop.permute.xlu1 %4131  ;;  %v3516_v20 = vpop.permute.xlu0 %3515 }
 0x5aa   : > { %v4536_v33 = vsel %vm4524_vm5, %v4494_v13, %v4132_v36  ;;  %v4369_v28 = vsel %vm4356_vm0, %v4327_v32, %v3516_v20  ;;  %v2898_v20 = vld [vmem:[#allocation2 + $0x101] sm:$0xff] }
 0x5ab   : > { %3991 = vrot.lane.b32.xlu1 %v2937_v62, %s5751_s7  ;;  %3827 = vrot.lane.b32.xlu0 %v2895_v2, %s5752_s20 }
 0x5ac   : > { %5529 = vmatmul.mubr.msk.f32.gmra.mrb[20].mxu1 %vm4582_vm6, %v4536_v33 }
 0x5ad   : > { %v3806_v31 = vpop.permute.xlu1 %3805  ;;  %v3680_v30 = vpop.permute.xlu0 %3679  ;;  %5531 = vmatprep.mubr.msk.f32.mxu1 %vm5744_vm3, %v10055_v61 }
 0x5ae   : > { %v4411_v10 = vsel %vm4398_vm1, %v4369_v28, %v3680_v30  ;;  %v2856_v30 = vld [vmem:[#allocation2 + $0xf8] sm:$0xff] }
 0x5af   : > { %4155 = vrot.lane.b32.xlu1 %v2978_v56, %s5753_s8  ;;  %3539 = vrot.lane.b32.xlu0 %v2853_v53, %s5750_s29  ;;  %v4453_v51 = vsel %vm4440_vm2, %v4411_v10, %v3806_v31  ;;  %v4330_v56 = vsel %vm2129_vm11, %v4289_v42, %v8789_v63  ;;  %v2981_v10 = vld [vmem:[#allocation2 + $0x103] sm:$0xff]  ;;  %v5676_v42 = vld [vmem:[#allocation2 + $0x10f] sm:$0xff] }
 0x5b1   : > { %v3518_v19 = vpop.permute.xlu1 %3517  ;;  %v3970_v39 = vpop.permute.xlu0 %3969 }
 0x5b2   : > { %v4495_v38 = vsel %vm4482_vm4, %v4453_v51, %v3970_v39  ;;  %v4370_v29 = vsel %vm4356_vm0, %v4328_v8, %v3518_v19  ;;  %v5674_v51 = vld [vmem:[#allocation2 + $0xff] sm:$0xff] }
 0x5b3   : > { %3829 = vrot.lane.b32.xlu1 %v2896_v52, %s5752_s20  ;;  %3703 = vrot.lane.b32.xlu0 %v2894_v1, %s5749_s28 }
 0x5b5   : > { %v3682_v37 = vpop.permute.xlu1 %3681  ;;  %v4134_v5 = vpop.permute.xlu0 %4133 }
 0x5b6   : > { %v4537_v3 = vsel %vm4524_vm5, %v4495_v38, %v4134_v5  ;;  %v4412_v1 = vsel %vm4398_vm1, %v4370_v29, %v3682_v37  ;;  %v4248_v38 = vsel %vm255_vm13, %v2719_v46, %v8486_v23  ;;  %v2984_v46 = vld [vmem:[#allocation2 + $0x11b] sm:$0xff] }
 0x5b7   : > { %3541 = vrot.lane.b32.xlu1 %v2854_v0, %s5750_s29  ;;  %3993 = vrot.lane.b32.xlu0 %v2938_v49, %s5751_s7  ;;  %v4290_v22 = vsel %vm4273_vm15, %v4248_v38, %v8669_v26  ;;  %v2941_v0 = vld [vmem:[#allocation2 + $0x10a] sm:$0xff]  ;;  %v2720_v26 = vld [vmem:[#allocation2 + $0x95] sm:$0xff] }
 0x5b8   : > { %5532 = vmatmul.mubr.msk.f32.gmra.mrb[22].mxu1 %vm4582_vm6, %v4537_v3  ;;  %v2857_v3 = vld [vmem:[#allocation2 + $0x100] sm:$0xff]  ;;  %v4331_v49 = vsel %vm2129_vm11, %v4290_v22, %v8797_v45  ;;  %v4249_v45 = vsel %vm255_vm13, %v2720_v26, %v8488_v44  ;;  %v10349_v38 = vld [vmem:[#allocation12_spill] sm:$0xff] }
 0x5b9   : > { %v3972_v34 = vpop.permute.xlu1 %3971  ;;  %v3808_v9 = vpop.permute.xlu0 %3807  ;;  %5534 = vmatprep.mubr.msk.f32.mxu1 %vm5744_vm3, %v10055_v61 }
 0x5ba   : > { %v4454_v40 = vsel %vm4440_vm2, %v4412_v1, %v3808_v9 }
 0x5bb   : > { %3705 = vrot.lane.b32.xlu1 %v2895_v2, %s5749_s28  ;;  %4157 = vrot.lane.b32.xlu0 %v2979_v57, %s5753_s8  ;;  %v4496_v16 = vsel %vm4482_vm4, %v4454_v40, %v3972_v34  ;;  %v2982_v34 = vld [vmem:[#allocation2 + $0x10b] sm:$0xff] }
 0x5bd   : > { %v4136_v25 = vpop.permute.xlu1 %4135  ;;  %v3520_v60 = vpop.permute.xlu0 %3519 }
 0x5be   : > { %v4538_v58 = vsel %vm4524_vm5, %v4496_v16, %v4136_v25  ;;  %v4371_v43 = vsel %vm4356_vm0, %v4329_v6, %v3520_v60  ;;  %v4291_v16 = vsel %vm4273_vm15, %v4249_v45, %v8677_v15  ;;  %v2944_v45 = vld [vmem:[#allocation2 + $0x122] sm:$0xff] }
 0x5bf   : > { %3995 = vrot.lane.b32.xlu1 %v2939_v4, %s5751_s7  ;;  %3831 = vrot.lane.b32.xlu0 %v2897_v12, %s5752_s20  ;;  %v4332_v4 = vsel %vm2129_vm11, %v4291_v16, %v8795_v24  ;;  %v2942_v24 = vld [vmem:[#allocation2 + $0x112] sm:$0xff] }
 0x5c0   : > { %5535 = vmatmul.mubr.msk.f32.gmra.mrb[24].mxu1 %vm4582_vm6, %v4538_v58  ;;  %v2900_v58 = vld [vmem:[#allocation2 + $0x111] sm:$0xff] }
 0x5c1   : > { %v3810_v41 = vpop.permute.xlu1 %3809  ;;  %v3684_v7 = vpop.permute.xlu0 %3683  ;;  %5537 = vmatprep.mubr.msk.f32.mxu1 %vm5744_vm3, %v10055_v61 }
 0x5c2   : > { %v4413_v59 = vsel %vm4398_vm1, %v4371_v43, %v3684_v7  ;;  %v2858_v7 = vld [vmem:[#allocation2 + $0x108] sm:$0xff]  ;;  %v2983_v43 = vld [vmem:[#allocation2 + $0x113] sm:$0xff] }
 0x5c3   : > { %4159 = vrot.lane.b32.xlu1 %v2980_v11, %s5753_s8  ;;  %3543 = vrot.lane.b32.xlu0 %v2855_v50, %s5750_s29  ;;  %v4455_v33 = vsel %vm4440_vm2, %v4413_v59, %v3810_v41  ;;  %v2721_v59 = vld [vmem:[#allocation2 + $0x9d] sm:$0xff] }
 0x5c5   : > { %v3522_v36 = vpop.permute.xlu1 %3521  ;;  %v3974_v13 = vpop.permute.xlu0 %3973 }
 0x5c6   : > { %v4497_v62 = vsel %vm4482_vm4, %v4455_v33, %v3974_v13  ;;  %v4372_v18 = vsel %vm4356_vm0, %v4330_v56, %v3522_v36  ;;  %v10344_v36 = vld [vmem:[#allocation40_spill] sm:$0xff]  ;;  %v10345_v33 = vld [vmem:[#allocation46_spill] sm:$0xff] }
 0x5c7   : > { %3833 = vrot.lane.b32.xlu1 %v2898_v20, %s5752_s20  ;;  %3707 = vrot.lane.b32.xlu0 %v2896_v52, %s5749_s28  ;;  %v4250_v13 = vsel %vm255_vm13, %v2721_v59, %v10344_v36 }
 0x5c8   : > { %v4292_v17 = vsel %vm4273_vm15, %v4250_v13, %v10345_v33 }
 0x5c9   : > { %v3686_v2 = vpop.permute.xlu1 %3685  ;;  %v4138_v21 = vpop.permute.xlu0 %4137 }
 0x5ca   : > { %v4539_v31 = vsel %vm4524_vm5, %v4497_v62, %v4138_v21  ;;  %v4414_v53 = vsel %vm4398_vm1, %v4372_v18, %v3686_v2  ;;  %v2901_v62 = vld [vmem:[#allocation2 + $0x119] sm:$0xff]  ;;  %v2859_v18 = vld [vmem:[#allocation2 + $0x110] sm:$0xff] }
 0x5cb   : > { %3545 = vrot.lane.b32.xlu1 %v2856_v30, %s5750_s29  ;;  %3997 = vrot.lane.b32.xlu0 %v2940_v48, %s5751_s7  ;;  %v10346_v2 = vld [vmem:[#allocation151_spill] sm:$0xff] }
 0x5cc   : > { %5538 = vmatmul.mubr.msk.f32.gmra.mrb[26].mxu1 %vm4582_vm6, %v4539_v31  ;;  %v4333_v21 = vsel %vm2129_vm11, %v4292_v17, %v10346_v2  ;;  %v2861_v17 = vld [vmem:[#allocation2 + $0x120] sm:$0xff]  ;;  %v10355_v2 = vld [vmem:[#allocation50_spill] sm:$0xff] }
 0x5cd   : > { %v3976_v32 = vpop.permute.xlu1 %3975  ;;  %v3812_v28 = vpop.permute.xlu0 %3811  ;;  %5540 = vmatprep.mubr.msk.f32.mxu1 %vm5744_vm3, %v10055_v61 }
 0x5ce   : > { %v4456_v14 = vsel %vm4440_vm2, %v4414_v53, %v3812_v28  ;;  %v2943_v53 = vld [vmem:[#allocation2 + $0x11a] sm:$0xff] }
 0x5cf   : > { %3709 = vrot.lane.b32.xlu1 %v2897_v12, %s5749_s28  ;;  %4161 = vrot.lane.b32.xlu0 %v2981_v10, %s5753_s8  ;;  %v4498_v19 = vsel %vm4482_vm4, %v4456_v14, %v3976_v32  ;;  %v5675_v12 = vld [vmem:[#allocation2 + $0x107] sm:$0xff] }
 0x5d0   : > { %v2722_v32 = vld [vmem:[#allocation2 + $0xa5] sm:$0xff] }
 0x5d1   : > { %v4140_v63 = vpop.permute.xlu1 %4139  ;;  %v3524_v39 = vpop.permute.xlu0 %3523  ;;  %v10347_v14 = vld [vmem:[#allocation75_spill] sm:$0xff] }
 0x5d2   : > { %v4540_v52 = vsel %vm4524_vm5, %v4498_v19, %v4140_v63  ;;  %v4373_v8 = vsel %vm4356_vm0, %v4331_v49, %v3524_v39  ;;  %v4251_v10 = vsel %vm255_vm13, %v2722_v32, %v10347_v14 }
 0x5d3   : > { %3383 = vrot.lane.b32.xlu1 %v5674_v51, %s5746_s19  ;;  %3835 = vrot.lane.b32.xlu0 %v2899_v27, %s5752_s20 }
 0x5d4   : > { %5541 = vmatmul.mubr.msk.f32.gmra.mrb[28].mxu1 %vm4582_vm6, %v4540_v52  ;;  %v10348_v52 = vld [vmem:[#allocation118_spill] sm:$0xff] }
 0x5d5   : > { %v3814_v37 = vpop.permute.xlu1 %3813  ;;  %v3688_v5 = vpop.permute.xlu0 %3687  ;;  %5543 = vmatprep.mubr.msk.f32.mxu1 %vm5744_vm3, %v10055_v61 }
 0x5d6   : > { %v4415_v23 = vsel %vm4398_vm1, %v4373_v8, %v3688_v5  ;;  %v2902_v8 = vld [vmem:[#allocation2 + $0x121] sm:$0xff] }
 0x5d7   : > { %3547 = vrot.lane.b32.xlu1 %v2857_v3, %s5750_s29  ;;  %3999 = vrot.lane.b32.xlu0 %v2941_v0, %s5751_s7  ;;  %v4457_v9 = vsel %vm4440_vm2, %v4415_v23, %v3814_v37  ;;  %v5677_v23 = vld [vmem:[#allocation2 + $0x117] sm:$0xff] }
 0x5d9   : > { %v3526_v29 = vpop.permute.xlu1 %3525  ;;  %v3978_v1 = vpop.permute.xlu0 %3977 }
 0x5da   : > { %v4499_v40 = vsel %vm4482_vm4, %v4457_v9, %v3978_v1  ;;  %v4374_v44 = vsel %vm4356_vm0, %v4332_v4, %v3526_v29  ;;  %v2860_v9 = vld [vmem:[#allocation2 + $0x118] sm:$0xff] }
 0x5db   : > { %3711 = vrot.lane.b32.xlu1 %v2898_v20, %s5749_s28  ;;  %4163 = vrot.lane.b32.xlu0 %v2982_v34, %s5753_s8 }
 0x5dd   : > { %v3690_v57 = vpop.permute.xlu1 %3689  ;;  %v4142_v25 = vpop.permute.xlu0 %4141 }
 0x5de   : > { %v4541_v60 = vsel %vm4524_vm5, %v4499_v40, %v4142_v25  ;;  %v4416_v54 = vsel %vm4398_vm1, %v4374_v44, %v3690_v57  ;;  %v2723_v40 = vld [vmem:[#allocation2 + $0xad] sm:$0xff]  ;;  %v10352_v44 = vld [vmem:[#allocation179_spill] sm:$0xff] }
 0x5df   : > { %3385 = vrot.lane.b32.xlu1 %v5675_v12, %s5746_s19  ;;  %3837 = vrot.lane.b32.xlu0 %v2900_v58, %s5752_s20  ;;  %v10350_v57 = vld [vmem:[#allocation112_spill] sm:$0xff] }
 0x5e0   : > { %5544 = vmatmul.mubr.msk.f32.gmra.mrb[30].mxu1 %vm4582_vm6, %v4541_v60  ;;  %v4252_v25 = vsel %vm255_vm13, %v2723_v40, %v10350_v57  ;;  %v2985_v12 = vld [vmem:[#allocation2 + $0x123] sm:$0xff] }
 0x5e1   : > { %v3980_v35 = vpop.permute.xlu1 %3979  ;;  %v3816_v41 = vpop.permute.xlu0 %3815  ;;  %5546 = vmatprep.mubr.msk.f32.mxu1 %vm5744_vm3, %v10055_v61 }
 0x5e2   : > { %v4458_v15 = vsel %vm4440_vm2, %v4416_v54, %v3816_v41 }
 0x5e3   : > { %3549 = vrot.lane.b32.xlu1 %v2858_v7, %s5750_s29  ;;  %4001 = vrot.lane.b32.xlu0 %v2942_v24, %s5751_s7  ;;  %v4500_v11 = vsel %vm4482_vm4, %v4458_v15, %v3980_v35  ;;  %v2903_v24 = vld [vmem:[#allocation2 + $0x129] sm:$0xff] }
 0x5e5   : > { %v4144_v55 = vpop.permute.xlu1 %4143  ;;  %v3528_v50 = vpop.permute.xlu0 %3527 }
 0x5e6   : > { %v4542_v6 = vsel %vm4524_vm5, %v4500_v11, %v4144_v55  ;;  %v4375_v31 = vsel %vm4356_vm0, %v4333_v21, %v3528_v50  ;;  %v5678_v55 = vld [vmem:[#allocation2 + $0x11f] sm:$0xff]  ;;  %v2724_v11 = vld [vmem:[#allocation2 + $0xb5] sm:$0xff] }
 0x5e7   : > { %3713 = vrot.lane.b32.xlu1 %v2899_v27, %s5749_s28  ;;  %4165 = vrot.lane.b32.xlu0 %v2983_v43, %s5753_s8  ;;  %v4293_v27 = vsel %vm4273_vm15, %v4251_v10, %v10348_v52  ;;  %v2904_v10 = vld [vmem:[#allocation2 + $0x131] sm:$0xff] }
 0x5e8   : > { %5547 = vmatmul.mubr.msk.f32.gmra.mrb[32].mxu1 %vm4582_vm6, %v4542_v6  ;;  %v4334_v37 = vsel %vm2129_vm11, %v4293_v27, %v10349_v38  ;;  %v10353_v6 = vld [vmem:[#allocation5_spill] sm:$0xff] }
 0x5e9   : > { %v3818_v20 = vpop.permute.xlu1 %3817  ;;  %v3692_v47 = vpop.permute.xlu0 %3691  ;;  %5549 = vmatprep.mubr.msk.f32.mxu1 %vm5744_vm3, %v10055_v61  ;;  %v4253_v43 = vsel %vm255_vm13, %v2724_v11, %v10353_v6 }
 0x5ea   : > { %v4417_v30 = vsel %vm4398_vm1, %v4375_v31, %v3692_v47 }
 0x5eb   : > { %3387 = vrot.lane.b32.xlu1 %v5676_v42, %s5746_s19  ;;  %3839 = vrot.lane.b32.xlu0 %v2901_v62, %s5752_s20  ;;  %v4459_v28 = vsel %vm4440_vm2, %v4417_v30, %v3818_v20  ;;  %v10354_v20 = vld [vmem:[#allocation147_spill] sm:$0xff] }
 0x5ec   : > { %v4295_v47 = vsel %vm4273_vm15, %v4253_v43, %v10354_v20  ;;  %v2863_v43 = vld [vmem:[#allocation2 + $0x130] sm:$0xff] }
 0x5ed   : > { %v3530_v48 = vpop.permute.xlu1 %3529  ;;  %v3982_v56 = vpop.permute.xlu0 %3981  ;;  %v4336_v21 = vsel %vm2129_vm11, %v4295_v47, %v10355_v2  ;;  %v2727_v2 = vld [vmem:[#allocation2 + $0xcd] sm:$0xff] }
 0x5ee   : > { %v4501_v63 = vsel %vm4482_vm4, %v4459_v28, %v3982_v56  ;;  %v4376_v5 = vsel %vm4356_vm0, %v4334_v37, %v3530_v48  ;;  %v2862_v37 = vld [vmem:[#allocation2 + $0x128] sm:$0xff] }
 0x5ef   : > { %3551 = vrot.lane.b32.xlu1 %v2859_v18, %s5750_s29  ;;  %4003 = vrot.lane.b32.xlu0 %v2943_v53, %s5751_s7  ;;  %v2986_v18 = vld [vmem:[#allocation2 + $0x12b] sm:$0xff] }
 0x5f1   : > { %v3694_v19 = vpop.permute.xlu1 %3693  ;;  %v4146_v39 = vpop.permute.xlu0 %4145 }
 0x5f2   : > { %v4543_v51 = vsel %vm4524_vm5, %v4501_v63, %v4146_v39  ;;  %v4418_v22 = vsel %vm4398_vm1, %v4376_v5, %v3694_v19  ;;  %v5679_v63 = vld [vmem:[#allocation2 + $0x127] sm:$0xff]  ;;  %v2725_v19 = vld [vmem:[#allocation2 + $0xbd] sm:$0xff]  ;;  %v2946_v5 = vld [vmem:[#allocation2 + $0x132] sm:$0xff] }
 0x5f3   : > { %3715 = vrot.lane.b32.xlu1 %v2900_v58, %s5749_s28  ;;  %4167 = vrot.lane.b32.xlu0 %v2984_v46, %s5753_s8  ;;  %v10351_v58 = vld [vmem:[#allocation80_spill] sm:$0xff]  ;;  %v10356_v39 = vld [vmem:[#allocation39_spill] sm:$0xff] }
 0x5f4   : > { %5550 = vmatmul.mubr.msk.f32.gmra.mrb[34].mxu1 %vm4582_vm6, %v4543_v51  ;;  %v4294_v4 = vsel %vm4273_vm15, %v4252_v25, %v10351_v58  ;;  %v4254_v52 = vsel %vm255_vm13, %v2725_v19, %v10356_v39  ;;  %v10357_v46 = vld [vmem:[#allocation11_spill] sm:$0xff] }
 0x5f5   : > { %v3984_v3 = vpop.permute.xlu1 %3983  ;;  %v3820_v0 = vpop.permute.xlu0 %3819  ;;  %5552 = vmatprep.mubr.msk.f32.mxu1 %vm5744_vm3, %v10055_v61  ;;  %v4335_v54 = vsel %vm2129_vm11, %v4294_v4, %v10352_v44  ;;  %v4296_v38 = vsel %vm4273_vm15, %v4254_v52, %v10357_v46  ;;  %v9250_v25 = vld [vmem:[%s9820_s5] ss:$0 sm:$0xff]  ;;  %v2864_v46 = vld [vmem:[#allocation2 + $0x138] sm:$0xff] }
 0x5f6   : > { %v4460_v49 = vsel %vm4440_vm2, %v4418_v22, %v3820_v0  ;;  %v10358_v22 = vld [vmem:[#allocation211_spill] sm:$0xff] }
 0x5f7   : > { %3389 = vrot.lane.b32.xlu1 %v5677_v23, %s5746_s19  ;;  %3841 = vrot.lane.b32.xlu0 %v2902_v8, %s5752_s20  ;;  %v4502_v1 = vsel %vm4482_vm4, %v4460_v49, %v3984_v3  ;;  %v4337_v3 = vsel %vm2129_vm11, %v4296_v38, %v10358_v22  ;;  %v9255_v4 = vld [vmem:[#allocation2 + $0x139] sm:$0xff]  ;;  %v2948_v38 = vld [vmem:[#allocation2 + $0x142] sm:$0xff] }
 0x5f9   : > { %v4148_v29 = vpop.permute.xlu1 %4147  ;;  %v3532_v34 = vpop.permute.xlu0 %3531 }
 0x5fa   : > { %v4544_v26 = vsel %vm4524_vm5, %v4502_v1, %v4148_v29  ;;  %v4377_v35 = vsel %vm4356_vm0, %v4335_v54, %v3532_v34  ;;  %v2987_v29 = vld [vmem:[#allocation2 + $0x133] sm:$0xff]  ;;  %v2726_v1 = vld [vmem:[#allocation2 + $0xc5] sm:$0xff] }
 0x5fb   : > { %3553 = vrot.lane.b32.xlu1 %v2860_v9, %s5750_s29  ;;  %4005 = vrot.lane.b32.xlu0 %v2944_v45, %s5751_s7 }
 0x5fc   : > { %5553 = vmatmul.mubr.msk.f32.gmra.mrb[36].mxu1 %vm4582_vm6, %v4544_v26  ;;  %v10359_v26 = vld [vmem:[#allocation77_spill] sm:$0xff] }
 0x5fd   : > { %v3822_v16 = vpop.permute.xlu1 %3821  ;;  %v3696_v60 = vpop.permute.xlu0 %3695  ;;  %5555 = vmatprep.mubr.msk.f32.mxu1 %vm5744_vm3, %v10055_v61  ;;  %v4255_v9 = vsel %vm255_vm13, %v2726_v1, %v10359_v26  ;;  %v10366_v1 = vld [vmem:[#allocation207_spill] sm:$0xff] }
 0x5fe   : > { %v4419_v41 = vsel %vm4398_vm1, %v4377_v35, %v3696_v60  ;;  %v5680_v35 = vld [vmem:[#allocation2 + $0x12f] sm:$0xff] }
 0x5ff   : > { %3717 = vrot.lane.b32.xlu1 %v2901_v62, %s5749_s28  ;;  %4169 = vrot.lane.b32.xlu0 %v2985_v12, %s5753_s8  ;;  %v4461_v50 = vsel %vm4440_vm2, %v4419_v41, %v3822_v16  ;;  %v2945_v62 = vld [vmem:[#allocation2 + $0x12a] sm:$0xff]  ;;  %v10360_v16 = vld [vmem:[#allocation178_spill] sm:$0xff] }
 0x600   : > { %v4297_v60 = vsel %vm4273_vm15, %v4255_v9, %v10360_v16  ;;  %v10361_v12 = vld [vmem:[#allocation84_spill] sm:$0xff] }
 0x601   : > { %v3534_v15 = vpop.permute.xlu1 %3533  ;;  %v3986_v7 = vpop.permute.xlu0 %3985  ;;  %v4338_v44 = vsel %vm2129_vm11, %v4297_v60, %v10361_v12  ;;  %v2989_v9 = vld [vmem:[#allocation2 + $0x143] sm:$0xff] }
 0x602   : > { %v4503_v59 = vsel %vm4482_vm4, %v4461_v50, %v3986_v7  ;;  %v4378_v42 = vsel %vm4356_vm0, %v4336_v21, %v3534_v15  ;;  %v10362_v21 = vld [vmem:[#allocation111_spill] sm:$0xff] }
 0x603   : > { %3391 = vrot.lane.b32.xlu1 %v5678_v55, %s5746_s19  ;;  %3843 = vrot.lane.b32.xlu0 %v2903_v24, %s5752_s20 }
 0x605   : > { %v3698_v36 = vpop.permute.xlu1 %3697  ;;  %v4150_v13 = vpop.permute.xlu0 %4149 }
 0x606   : > { %v4545_v33 = vsel %vm4524_vm5, %v4503_v59, %v4150_v13  ;;  %v4420_v31 = vsel %vm4398_vm1, %v4378_v42, %v3698_v36  ;;  %v2947_v59 = vld [vmem:[#allocation2 + $0x13a] sm:$0xff]  ;;  %v5681_v36 = vld [vmem:[%s9816_s1 + $0x8] sm:$0xff]  ;;  %v4256_v42 = vsel %vm255_vm13, %v2727_v2, %v10362_v21  ;;  %v10370_v21 = vld [vmem:[#allocation49_spill] sm:$0xff] }
 0x607   : > { %3555 = vrot.lane.b32.xlu1 %v2861_v17, %s5750_s29  ;;  %4007 = vrot.lane.b32.xlu0 %v2945_v62, %s5751_s7  ;;  %v2988_v62 = vld [vmem:[#allocation2 + $0x13b] sm:$0xff]  ;;  %v2990_v2 = vld [vmem:[#allocation2 + $0x14b] sm:$0xff] }
 0x608   : > { %5556 = vmatmul.mubr.msk.f32.gmra.mrb[38].mxu1 %vm4582_vm6, %v4545_v33 }
 0x609   : > { %v3988_v30 = vpop.permute.xlu1 %3987  ;;  %v3824_v48 = vpop.permute.xlu0 %3823  ;;  %5558 = vmatprep.mubr.msk.f32.mxu1 %vm5744_vm3, %v10055_v61 }
 0x60a   : > { %v4462_v56 = vsel %vm4440_vm2, %v4420_v31, %v3824_v48  ;;  %v10363_v48 = vld [vmem:[#allocation45_spill] sm:$0xff] }
 0x60b   : > { %3719 = vrot.lane.b32.xlu1 %v2902_v8, %s5749_s28  ;;  %4171 = vrot.lane.b32.xlu0 %v2986_v18, %s5753_s8  ;;  %v4504_v32 = vsel %vm4482_vm4, %v4462_v56, %v3988_v30  ;;  %v4298_v56 = vsel %vm4273_vm15, %v4256_v42, %v10363_v48  ;;  %v9287_v18 = vld [vmem:[#allocation2 + $0x141] sm:$0xff] }
 0x60d   : > { %v4152_v53 = vpop.permute.xlu1 %4151  ;;  %v3536_v28 = vpop.permute.xlu0 %3535 }
 0x60e   : > { %v4546_v14 = vsel %vm4524_vm5, %v4504_v32, %v4152_v53  ;;  %v4379_v0 = vsel %vm4356_vm0, %v4337_v3, %v3536_v28  ;;  %v10364_v53 = vld [vmem:[#allocation15_spill] sm:$0xff] }
 0x60f   : > { %3393 = vrot.lane.b32.xlu1 %v5679_v63, %s5746_s19  ;;  %3845 = vrot.lane.b32.xlu0 %v2904_v10, %s5752_s20  ;;  %v4339_v32 = vsel %vm2129_vm11, %v4298_v56, %v10364_v53 }
 0x610   : > { %5559 = vmatmul.mubr.msk.f32.gmra.mrb[40].mxu1 %vm4582_vm6, %v4546_v14  ;;  %v5682_v14 = vld [vmem:[#allocation2 + $0x137] sm:$0xff] }
 0x611   : > { %v3826_v27 = vpop.permute.xlu1 %3825  ;;  %v3700_v51 = vpop.permute.xlu0 %3699  ;;  %5561 = vmatprep.mubr.msk.f32.mxu1 %vm5744_vm3, %v10055_v61 }
 0x612   : > { %v4421_v49 = vsel %vm4398_vm1, %v4379_v0, %v3700_v51  ;;  %v10365_v0 = vld [vmem:[#allocation4_spill] sm:$0xff] }
 0x613   : > { %3557 = vrot.lane.b32.xlu1 %v2862_v37, %s5750_s29  ;;  %4009 = vrot.lane.b32.xlu0 %v2946_v5, %s5751_s7  ;;  %v4463_v34 = vsel %vm4440_vm2, %v4421_v49, %v3826_v27  ;;  %v2728_v37 = vld [vmem:[#allocation2 + $0xd5] sm:$0xff] }
 0x614   : > { %v5683_v5 = vld [vmem:[%s9816_s1 + $0x10] sm:$0xff]  ;;  %v4257_v49 = vsel %vm255_vm13, %v2728_v37, %v10365_v0 }
 0x615   : > { %v3538_v8 = vpop.permute.xlu1 %3537  ;;  %v3990_v23 = vpop.permute.xlu0 %3989 }
 0x616   : > { %v4505_v45 = vsel %vm4482_vm4, %v4463_v34, %v3990_v23  ;;  %v4380_v41 = vsel %vm4356_vm0, %v4338_v44, %v3538_v8  ;;  %v4299_v34 = vsel %vm4273_vm15, %v4257_v49, %v10366_v1 }
 0x617   : > { %3721 = vrot.lane.b32.xlu1 %v2903_v24, %s5749_s28  ;;  %4173 = vrot.lane.b32.xlu0 %v2987_v29, %s5753_s8 }
 0x619   : > { %v3702_v40 = vpop.permute.xlu1 %3701  ;;  %v4154_v57 = vpop.permute.xlu0 %4153 }
 0x61a   : > { %v4547_v58 = vsel %vm4524_vm5, %v4505_v45, %v4154_v57  ;;  %v4422_v24 = vsel %vm4398_vm1, %v4380_v41, %v3702_v40  ;;  %v10367_v45 = vld [vmem:[#allocation122_spill] sm:$0xff]  ;;  %v2907_v41 = vld [vmem:[#allocation2 + $0x149] sm:$0xff] }
 0x61b   : > { %v4777_v54 = vpop.f32.mrb[0].mxu1  ;;  %3395 = vrot.lane.b32.xlu1 %v5680_v35, %s5746_s19  ;;  %3847 = vrot.lane.b32.xlu0 %v9255_v4, %s5752_s20  ;;  %v4340_v40 = vsel %vm2129_vm11, %v4299_v34, %v10367_v45  ;;  %v2991_v34 = vld [vmem:[#allocation2 + $0x153] sm:$0xff]  ;;  %v5688_v45 = vld [vmem:[%s9816_s1 + $0x28] sm:$0xff] }
 0x61c   : > { %v4778_v15 = vadd.f32 %v9250_v25, %v4777_v54  ;;  %v5500_v7 = vpop.f32.mrb[1].mxu1  ;;  %5562 = vmatmul.mubr.msk.f32.gmra.mrb[42].mxu1 %vm4582_vm6, %v4547_v58 }
 0x61d   : > { %v3992_v55 = vpop.permute.xlu1 %3991  ;;  %v3828_v11 = vpop.permute.xlu0 %3827  ;;  %5564 = vmatprep.mubr.msk.f32.mxu1 %vm5744_vm3, %v10055_v61  ;;  %v5685_v7 = vld [vmem:[%s9816_s1 + $0x18] sm:$0xff] }
 0x61e   : > { %v4977_v50 = vmax.f32 %v4778_v15, 0.0  ;;  %v4464_v6 = vsel %vm4440_vm2, %v4422_v24, %v3828_v11  ;;  %v5684_v15 = vld [vmem:[#allocation2 + $0x13f] sm:$0xff] }
 0x61f   : > { %3559 = vrot.lane.b32.xlu1 %v2863_v43, %s5750_s29  ;;  %4011 = vrot.lane.b32.xlu0 %v2947_v59, %s5751_s7  ;;  %v4506_v47 = vsel %vm4482_vm4, %v4464_v6, %v3992_v55  ;;  %v2865_v43 = vld [vmem:[#allocation2 + $0x140] sm:$0xff]  ;;  %v2949_v59 = vld [vmem:[#allocation2 + $0x14a] sm:$0xff] }
 0x620   : > { %v5018_v13 = vmul.f32 %v5681_v36, %v4977_v50  ;;  %v2729_v36 = vld [vmem:[#allocation2 + $0xdd] sm:$0xff] }
 0x621   : > { %v4156_v20 = vpop.permute.xlu1 %4155  ;;  %v3540_v33 = vpop.permute.xlu0 %3539 }
 0x622   : > { %5059 = vst.msk [vmem:[%s8145_s30 + $0x8] sm:$0xff] %vm255_vm13, %v5018_v13  ;;  %v4548_v17 = vsel %vm4524_vm5, %v4506_v47, %v4156_v20  ;;  %v10368_v13 = vld [vmem:[#allocation42_spill] sm:$0xff] }
 0x623   : > { %3723 = vrot.lane.b32.xlu1 %v2904_v10, %s5749_s28  ;;  %4175 = vrot.lane.b32.xlu0 %v2988_v62, %s5753_s8  ;;  %v4381_v10 = vsel %vm4356_vm0, %v4339_v32, %v3540_v33  ;;  %v4258_v20 = vsel %vm255_vm13, %v2729_v36, %v10368_v13  ;;  %v2731_v13 = vld [vmem:[#allocation2 + $0xed] sm:$0xff] }
 0x624   : > { %5565 = vmatmul.mubr.msk.f32.gmra.mrb[44].mxu1 %vm4582_vm6, %v4548_v17  ;;  %v10369_v17 = vld [vmem:[#allocation83_spill] sm:$0xff] }
 0x625   : > { %v3830_v31 = vpop.permute.xlu1 %3829  ;;  %v3704_v30 = vpop.permute.xlu0 %3703  ;;  %5567 = vmatprep.mubr.msk.f32.mxu1 %vm5744_vm3, %v10055_v61  ;;  %v4300_v62 = vsel %vm4273_vm15, %v4258_v20, %v10369_v17  ;;  %v2992_v17 = vld [vmem:[#allocation2 + $0x15b] sm:$0xff] }
 0x626   : > { %v4423_v39 = vsel %vm4398_vm1, %v4381_v10, %v3704_v30  ;;  %v4341_v42 = vsel %vm2129_vm11, %v4300_v62, %v10370_v21  ;;  %v2908_v10 = vld [vmem:[#allocation2 + $0x151] sm:$0xff] }
 0x627   : > { %v4782_v28 = vpop.f32.mrb[2].mxu1  ;;  %3397 = vrot.lane.b32.xlu1 %v5682_v14, %s5746_s19  ;;  %3849 = vrot.lane.b32.xlu0 %v9287_v18, %s5752_s20  ;;  %v4465_v3 = vsel %vm4440_vm2, %v4423_v39, %v3830_v31  ;;  %v10375_v62 = vld [vmem:[#allocation117_spill] sm:$0xff] }
 0x628   : > { %v4783_v63 = vadd.f32 %v9250_v25, %v4782_v28  ;;  %v5503_v19 = vpop.f32.mrb[3].mxu1  ;;  %v5689_v21 = vld [vmem:[%s9816_s1 + $0x30] sm:$0xff] }
 0x629   : > { %v3542_v52 = vpop.permute.xlu1 %3541  ;;  %v3994_v27 = vpop.permute.xlu0 %3993 }
 0x62a   : > { %v4978_v51 = vmax.f32 %v4783_v63, 0.0  ;;  %v4507_v8 = vsel %vm4482_vm4, %v4465_v3, %v3994_v27  ;;  %v4382_v16 = vsel %vm4356_vm0, %v4340_v40, %v3542_v52  ;;  %v5686_v63 = vld [vmem:[#allocation2 + $0x147] sm:$0xff] }
 0x62b   : > { %3561 = vrot.lane.b32.xlu1 %v2864_v46, %s5750_s29  ;;  %4013 = vrot.lane.b32.xlu0 %v2948_v38, %s5751_s7  ;;  %v2866_v38 = vld [vmem:[#allocation2 + $0x148] sm:$0xff] }
 0x62c   : > { %v5019_v22 = vmul.f32 %v5683_v5, %v4978_v51  ;;  %v2950_v5 = vld [vmem:[#allocation2 + $0x152] sm:$0xff] }
 0x62d   : > { %v3706_v23 = vpop.permute.xlu1 %3705  ;;  %v4158_v29 = vpop.permute.xlu0 %4157 }
 0x62e   : > { %5060 = vst.msk [vmem:[%s8145_s30 + $0x10] sm:$0xff] %vm255_vm13, %v5019_v22  ;;  %v4549_v26 = vsel %vm4524_vm5, %v4507_v8, %v4158_v29  ;;  %v4424_v12 = vsel %vm4398_vm1, %v4382_v16, %v3706_v23  ;;  %v2730_v8 = vld [vmem:[#allocation2 + $0xe5] sm:$0xff] }
 0x62f   : > { %v4787_v57 = vpop.f32.mrb[4].mxu1  ;;  %3725 = vrot.lane.b32.xlu1 %v9255_v4, %s5749_s28  ;;  %4177 = vrot.lane.b32.xlu0 %v2989_v9, %s5753_s8  ;;  %v10371_v29 = vld [vmem:[#allocation76_spill] sm:$0xff] }
 0x630   : > { %v4788_v60 = vadd.f32 %v9250_v25, %v4787_v57  ;;  %v5506_v58 = vpop.f32.mrb[5].mxu1  ;;  %5568 = vmatmul.mubr.msk.f32.gmra.mrb[46].mxu1 %vm4582_vm6, %v4549_v26  ;;  %v4259_v1 = vsel %vm255_vm13, %v2730_v8, %v10371_v29  ;;  %v10372_v26 = vld [vmem:[#allocation10_spill] sm:$0xff]  ;;  %v10377_v29 = vld [vmem:[#allocation48_spill] sm:$0xff] }
 0x631   : > { %v3996_v44 = vpop.permute.xlu1 %3995  ;;  %v3832_v54 = vpop.permute.xlu0 %3831  ;;  %5570 = vmatprep.mubr.msk.f32.mxu1 %vm5744_vm3, %v10055_v61  ;;  %v4301_v9 = vsel %vm4273_vm15, %v4259_v1, %v10372_v26  ;;  %v10373_v57 = vld [vmem:[#allocation150_spill] sm:$0xff] }
 0x632   : > { %v4979_v35 = vmax.f32 %v4788_v60, 0.0  ;;  %v4466_v4 = vsel %vm4440_vm2, %v4424_v12, %v3832_v54  ;;  %v4342_v16 = vsel %vm2129_vm11, %v4301_v9, %v10373_v57  ;;  %v2828_v57 = vld [vmem:[#allocation2 + $0x15f] sm:$0xf] }
 0x633   : > { %3399 = vrot.lane.b32.xlu1 %v5684_v15, %s5746_s19  ;;  %3851 = vrot.lane.b32.xlu0 %v2907_v41, %s5752_s20  ;;  %v4508_v11 = vsel %vm4482_vm4, %v4466_v4, %v3996_v44  ;;  %v2826_v44 = vld [vmem:[#allocation2 + $0x14f] sm:$0xff] }
 0x634   : > { %v5020_v24 = vmul.f32 %v5685_v7, %v4979_v35  ;;  %v2909_v35 = vld [vmem:[#allocation2 + $0x159] sm:$0xff] }
 0x635   : > { %v4160_v55 = vpop.permute.xlu1 %4159  ;;  %v3544_v50 = vpop.permute.xlu0 %3543 }
 0x636   : > { %5061 = vst.msk [vmem:[%s8145_s30 + $0x18] sm:$0xff] %vm255_vm13, %v5020_v24  ;;  %v4550_v6 = vsel %vm4524_vm5, %v4508_v11, %v4160_v55  ;;  %v4383_v30 = vsel %vm4356_vm0, %v4341_v42, %v3544_v50  ;;  %v2867_v55 = vld [vmem:[#allocation2 + $0x150] sm:$0xff]  ;;  %v2951_v50 = vld [vmem:[#allocation2 + $0x15a] sm:$0xff] }
 0x637   : > { %3563 = vrot.lane.b32.xlu1 %v2865_v43, %s5750_s29  ;;  %4015 = vrot.lane.b32.xlu0 %v2949_v59, %s5751_s7 }
 0x638   : > { %5571 = vmatmul.mubr.msk.f32.gmra.mrb[48].mxu1 %vm4582_vm6, %v4550_v6 }
 0x639   : > { %v3834_v47 = vpop.permute.xlu1 %3833  ;;  %v3708_v33 = vpop.permute.xlu0 %3707  ;;  %5573 = vmatprep.mubr.msk.f32.mxu1 %vm5744_vm3, %v10055_v61 }
 0x63a   : > { %v4425_v53 = vsel %vm4398_vm1, %v4383_v30, %v3708_v33 }
 0x63b   : > { %v4792_v31 = vpop.f32.mrb[6].mxu1  ;;  %3727 = vrot.lane.b32.xlu1 %v9287_v18, %s5749_s28  ;;  %4179 = vrot.lane.b32.xlu0 %v2990_v2, %s5753_s8  ;;  %v5687_v18 = vld [vmem:[%s9816_s1 + $0x20] sm:$0xff]  ;;  %v4467_v39 = vsel %vm4440_vm2, %v4425_v53, %v3834_v47  ;;  %v10374_v47 = vld [vmem:[#allocation114_spill] sm:$0xff] }
 0x63c   : > { %v4793_v48 = vadd.f32 %v9250_v25, %v4792_v31  ;;  %v5509_v56 = vpop.f32.mrb[7].mxu1  ;;  %v4260_v33 = vsel %vm255_vm13, %v2731_v13, %v10374_v47  ;;  %v2827_v53 = vld [vmem:[#allocation2 + $0x157] sm:$0xff]  ;;  %v2869_v47 = vld [vmem:[#allocation2 + $0x160] sm:$0xf] }
 0x63d   : > { %v3546_v32 = vpop.permute.xlu1 %3545  ;;  %v3998_v28 = vpop.permute.xlu0 %3997  ;;  %v4302_v2 = vsel %vm4273_vm15, %v4260_v33, %v10375_v62  ;;  %v10379_v33 = vld [vmem:[#allocation149_spill] sm:$0xff] }
 0x63e   : > { %v4980_v14 = vmax.f32 %v4793_v48, 0.0  ;;  %v4509_v52 = vsel %vm4482_vm4, %v4467_v39, %v3998_v28  ;;  %v4384_v12 = vsel %vm4356_vm0, %v4342_v16, %v3546_v32 }
 0x63f   : > { %3401 = vrot.lane.b32.xlu1 %v5686_v63, %s5746_s19  ;;  %3853 = vrot.lane.b32.xlu0 %v2908_v10, %s5752_s20 }
 0x640   : > { %v5021_v19 = vmul.f32 %v5687_v18, %v4980_v14  ;;  %v2911_v14 = vld [vmem:[#allocation2 + $0x161] sm:$0xff] }
 0x641   : > { %v3710_v27 = vpop.permute.xlu1 %3709  ;;  %v4162_v51 = vpop.permute.xlu0 %4161 }
 0x642   : > { %5062 = vst.msk [vmem:[%s8145_s30 + $0x20] sm:$0xff] %vm255_vm13, %v5021_v19  ;;  %v4551_v46 = vsel %vm4524_vm5, %v4509_v52, %v4162_v51  ;;  %v4426_v54 = vsel %vm4398_vm1, %v4384_v12, %v3710_v27 }
 0x643   : > { %v4797_v37 = vpop.f32.mrb[8].mxu1  ;;  %3565 = vrot.lane.b32.xlu1 %v2866_v38, %s5750_s29  ;;  %5574 = vmatmul.mubr.msk.f32.gmra.mrb[50].mxu1 %vm4582_vm6, %v4551_v46  ;;  %v2868_v46 = vld [vmem:[#allocation2 + $0x158] sm:$0xff]  ;;  %v2952_v38 = vld [vmem:[#allocation2 + $0x162] sm:$0xff] }
 0x644   : > { %v4798_v22 = vadd.f32 %v9250_v25, %v4797_v37  ;;  %v5512_v3 = vpop.f32.mrb[9].mxu1  ;;  %4017 = vrot.lane.b32.xlu0 %v2950_v5, %s5751_s7  ;;  %5576 = vmatprep.mubr.msk.f32.mxu1 %vm5744_vm3, %v10055_v61  ;;  %v5690_v37 = vld [vmem:[%s9816_s1 + $0x38] sm:$0xff] }
 0x645   : > { %v3384_v0 = vpop.permute.xlu1 %3383  ;;  %v3836_v49 = vpop.permute.xlu0 %3835 }
 0x646   : > { %v4981_v23 = vmax.f32 %v4798_v22, 0.0  ;;  %v4468_v4 = vsel %vm4440_vm2, %v4426_v54, %v3836_v49  ;;  %v4343_v31 = vsel %vm2129_vm11, %v4302_v2, %v3384_v0  ;;  %v2732_v0 = vld [vmem:[#allocation2 + $0xf5] sm:$0xff]  ;;  %v10376_v49 = vld [vmem:[#allocation7_spill] sm:$0xff] }
 0x647   : > { %3729 = vrot.lane.b32.xlu1 %v2907_v41, %s5749_s28  ;;  %v4261_v8 = vsel %vm255_vm13, %v2732_v0, %v10376_v49  ;;  %v2914_v0 = vld [vmem:[#allocation2 + $0x32] sm:$0xff] }
 0x648   : > { %v5022_v40 = vmul.f32 %v5688_v45, %v4981_v23  ;;  %4181 = vrot.lane.b32.xlu0 %v2991_v34, %s5753_s8  ;;  %v2993_v23 = vld [vmem:[#allocation2 + $0x163] sm:$0xff]  ;;  %v4303_v1 = vsel %vm4273_vm15, %v4261_v8, %v10377_v29  ;;  %v10381_v49 = vld [vmem:[#allocation82_spill] sm:$0xff] }
 0x649   : > { %v3548_v60 = vpop.permute.xlu1 %3547  ;;  %v4000_v58 = vpop.permute.xlu0 %3999  ;;  %v2912_v45 = vld [vmem:[#allocation2 + $0x169] sm:$0xff] }
 0x64a   : > { %5063 = vst.msk [vmem:[%s8145_s30 + $0x28] sm:$0xff] %vm255_vm13, %v5022_v40  ;;  %v4510_v41 = vsel %vm4482_vm4, %v4468_v4, %v4000_v58  ;;  %v4385_v56 = vsel %vm4356_vm0, %v4343_v31, %v3548_v60 }
 0x64b   : > { %3403 = vrot.lane.b32.xlu1 %v2826_v44, %s5746_s19 }
 0x64c   : > { %3855 = vrot.lane.b32.xlu0 %v2909_v35, %s5752_s20 }
 0x64d   : > { %v3712_v15 = vpop.permute.xlu1 %3711  ;;  %v4164_v7 = vpop.permute.xlu0 %4163 }
 0x64e   : > { %v4552_v24 = vsel %vm4524_vm5, %v4510_v41, %v4164_v7  ;;  %v4427_v32 = vsel %vm4398_vm1, %v4385_v56, %v3712_v15  ;;  %v2953_v41 = vld [vmem:[#allocation2 + $0x16a] sm:$0xff]  ;;  %v2910_v56 = vld [vmem:[#allocation2 + $0x161] sm:$0xf] }
 0x64f   : > { %v4802_v11 = vpop.f32.mrb[10].mxu1  ;;  %3567 = vrot.lane.b32.xlu1 %v2867_v55, %s5750_s29  ;;  %5577 = vmatmul.mubr.msk.f32.gmra.mrb[52].mxu1 %vm4582_vm6, %v4552_v24  ;;  %v2829_v24 = vld [vmem:[#allocation2 + $0x20] sm:$0xff] }
 0x650   : > { %v4803_v6 = vadd.f32 %v9250_v25, %v4802_v11  ;;  %v5515_v43 = vpop.f32.mrb[11].mxu1  ;;  %4019 = vrot.lane.b32.xlu0 %v2951_v50, %s5751_s7  ;;  %5579 = vmatprep.mubr.msk.f32.mxu1 %vm5744_vm3, %v10055_v61  ;;  %v5691_v55 = vld [vmem:[%s9816_s1 + $0x40] sm:$0xff]  ;;  %v2994_v50 = vld [vmem:[#allocation2 + $0x16b] sm:$0xff] }
 0x651   : > { %v3386_v59 = vpop.permute.xlu1 %3385  ;;  %v3838_v36 = vpop.permute.xlu0 %3837 }
 0x652   : > { %v4982_v20 = vmax.f32 %v4803_v6, 0.0  ;;  %v4344_v34 = vsel %vm2129_vm11, %v4303_v1, %v3386_v59  ;;  %v2733_v59 = vld [vmem:[#allocation2 + $0xfd] sm:$0xff]  ;;  %v2995_v1 = vld [vmem:[#allocation2 + $0x173] sm:$0xf] }
 0x653   : > { %3731 = vrot.lane.b32.xlu1 %v2908_v10, %s5749_s28  ;;  %v4469_v10 = vsel %vm4440_vm2, %v4427_v32, %v3838_v36  ;;  %v10378_v36 = vld [vmem:[#allocation41_spill] sm:$0xff]  ;;  %v2870_v32 = vld [vmem:[#allocation2 + $0x21] sm:$0xff] }
 0x654   : > { %v5023_v42 = vmul.f32 %v5689_v21, %v4982_v20  ;;  %4183 = vrot.lane.b32.xlu0 %v2992_v17, %s5753_s8  ;;  %v4262_v13 = vsel %vm255_vm13, %v2733_v59, %v10378_v36  ;;  %v10383_v59 = vld [vmem:[#allocation177_spill] sm:$0xff] }
 0x655   : > { %v3550_v30 = vpop.permute.xlu1 %3549  ;;  %v4002_v48 = vpop.permute.xlu0 %4001  ;;  %v4304_v17 = vsel %vm4273_vm15, %v4262_v13, %v10379_v33  ;;  %v5695_v13 = vld [vmem:[%s9816_s1 + $0x58] sm:$0xff] }
 0x656   : > { %5064 = vst.msk [vmem:[%s8145_s30 + $0x30] sm:$0xff] %vm255_vm13, %v5023_v42  ;;  %v4511_v19 = vsel %vm4482_vm4, %v4469_v10, %v4002_v48  ;;  %v4386_v40 = vsel %vm4356_vm0, %v4344_v34, %v3550_v30 }
 0x657   : > { %v4807_v28 = vpop.f32.mrb[12].mxu1  ;;  %3405 = vrot.lane.b32.xlu1 %v2827_v53, %s5746_s19 }
 0x658   : > { %v4808_v63 = vadd.f32 %v9250_v25, %v4807_v28  ;;  %v5518_v18 = vpop.f32.mrb[13].mxu1  ;;  %3857 = vrot.lane.b32.xlu0 %v2911_v14, %s5752_s20  ;;  %v5692_v14 = vld [vmem:[%s9816_s1 + $0x48] sm:$0xff] }
 0x659   : > { %v3714_v39 = vpop.permute.xlu1 %3713  ;;  %v4166_v52 = vpop.permute.xlu0 %4165 }
 0x65a   : > { %v4983_v27 = vmax.f32 %v4808_v63, 0.0  ;;  %v4553_v51 = vsel %vm4524_vm5, %v4511_v19, %v4166_v52  ;;  %v4428_v16 = vsel %vm4398_vm1, %v4386_v40, %v3714_v39  ;;  %v2913_v63 = vld [vmem:[#allocation2 + $0x171] sm:$0xf] }
 0x65b   : > { %5580 = vmatmul.mubr.msk.f32.gmra.mrb[54].mxu1 %vm4582_vm6, %v4553_v51  ;;  %3569 = vrot.lane.b32.xlu1 %v2868_v46, %s5750_s29  ;;  %v2954_v51 = vld [vmem:[#allocation2 + $0x172] sm:$0xf] }
 0x65c   : > { %v5024_v5 = vmul.f32 %v5690_v37, %v4983_v27  ;;  %4021 = vrot.lane.b32.xlu0 %v2952_v38, %s5751_s7  ;;  %5582 = vmatprep.mubr.msk.f32.mxu1 %vm5744_vm3, %v10055_v61  ;;  %v5693_v27 = vld [vmem:[#allocation2 + $0x31] sm:$0xff]  ;;  %v2734_v37 = vld [vmem:[#allocation2 + $0x105] sm:$0xff] }
 0x65d   : > { %v3388_v22 = vpop.permute.xlu1 %3387  ;;  %v3840_v3 = vpop.permute.xlu0 %3839 }
 0x65e   : > { %5065 = vst.msk [vmem:[%s8145_s30 + $0x38] sm:$0xff] %vm255_vm13, %v5024_v5  ;;  %v4470_v58 = vsel %vm4440_vm2, %v4428_v16, %v3840_v3  ;;  %v4345_v21 = vsel %vm2129_vm11, %v4304_v17, %v3388_v22  ;;  %v10380_v5 = vld [vmem:[#allocation79_spill] sm:$0xff]  ;;  %v2955_v16 = vld [vmem:[#allocation2 + $0x33] sm:$0xff] }
 0x65f   : > { %3733 = vrot.lane.b32.xlu1 %v2909_v35, %s5749_s28  ;;  %v4263_v22 = vsel %vm255_vm13, %v2734_v37, %v10380_v5 }
 0x660   : > { %4185 = vrot.lane.b32.xlu0 %v2993_v23, %s5753_s8  ;;  %v4305_v8 = vsel %vm4273_vm15, %v4263_v22, %v10381_v49 }
 0x661   : > { %v3552_v26 = vpop.permute.xlu1 %3551  ;;  %v4004_v9 = vpop.permute.xlu0 %4003 }
 0x662   : > { %v4512_v54 = vsel %vm4482_vm4, %v4470_v58, %v4004_v9  ;;  %v4387_v30 = vsel %vm4356_vm0, %v4345_v21, %v3552_v26  ;;  %v5694_v58 = vld [vmem:[%s9816_s1 + $0x50] sm:$0xff] }
 0x663   : > { %v4812_v60 = vpop.f32.mrb[14].mxu1  ;;  %3407 = vrot.lane.b32.xlu1 %v2828_v57, %s5746_s19 }
 0x664   : > { %v4813_v12 = vadd.f32 %v9250_v25, %v4812_v60  ;;  %v5521_v44 = vpop.f32.mrb[15].mxu1  ;;  %3859 = vrot.lane.b32.xlu0 %v2912_v45, %s5752_s20 }
 0x665   : > { %v3716_v35 = vpop.permute.xlu1 %3715  ;;  %v4168_v4 = vpop.permute.xlu0 %4167 }
 0x666   : > { %v4984_v15 = vmax.f32 %v4813_v12, 0.0  ;;  %v4554_v7 = vsel %vm4524_vm5, %v4512_v54, %v4168_v4  ;;  %v4429_v53 = vsel %vm4398_vm1, %v4387_v30, %v3716_v35 }
 0x667   : > { %5583 = vmatmul.mubr.msk.f32.gmra.mrb[56].mxu1 %vm4582_vm6, %v4554_v7  ;;  %3491 = vrot.lane.b32.xlu1 %v2829_v24, %s5750_s29 }
 0x668   : > { %v5025_v11 = vmul.f32 %v5691_v55, %v4984_v15  ;;  %4023 = vrot.lane.b32.xlu0 %v2953_v41, %s5751_s7  ;;  %5585 = vmatprep.mubr.msk.f32.mxu1 %vm5744_vm3, %v10055_v61 }
 0x669   : > { %v3390_v6 = vpop.permute.xlu1 %3389  ;;  %v3842_v43 = vpop.permute.xlu0 %3841 }
 0x66a   : > { %5066 = vst.msk [vmem:[%s8145_s30 + $0x40] sm:$0xff] %vm255_vm13, %v5025_v11  ;;  %v4471_v28 = vsel %vm4440_vm2, %v4429_v53, %v3842_v43  ;;  %v4346_v34 = vsel %vm2129_vm11, %v4305_v8, %v3390_v6  ;;  %v2735_v11 = vld [vmem:[#allocation2 + $0x10d] sm:$0xff] }
 0x66b   : > { %v4817_v20 = vpop.f32.mrb[16].mxu1  ;;  %4187 = vrot.lane.b32.xlu1 %v2994_v50, %s5753_s8  ;;  %v10382_v6 = vld [vmem:[#allocation113_spill] sm:$0xff] }
 0x66c   : > { %v4818_v62 = vadd.f32 %v9250_v25, %v4817_v20  ;;  %v5524_v2 = vpop.f32.mrb[17].mxu1  ;;  %3571 = vrot.lane.b32.xlu0 %v2869_v47, %s5750_s29  ;;  %v4264_v43 = vsel %vm255_vm13, %v2735_v11, %v10382_v6 }
 0x66d   : > { %v3554_v42 = vpop.permute.xlu1 %3553  ;;  %v4006_v31 = vpop.permute.xlu0 %4005  ;;  %v4306_v36 = vsel %vm4273_vm15, %v4264_v43, %v10383_v59 }
 0x66e   : > { %v4985_v48 = vmax.f32 %v4818_v62, 0.0  ;;  %v4513_v18 = vsel %vm4482_vm4, %v4471_v28, %v4006_v31  ;;  %v4388_v45 = vsel %vm4356_vm0, %v4346_v34, %v3554_v42 }
 0x66f   : > { %3735 = vrot.lane.b32.xlu1 %v2910_v56, %s5749_s28 }
 0x670   : > { %v5026_v10 = vmul.f32 %v5692_v14, %v4985_v48  ;;  %3655 = vrot.lane.b32.xlu0 %v2870_v32, %s5749_s28 }
 0x671   : > { %v3718_v19 = vpop.permute.xlu1 %3717  ;;  %v4170_v39 = vpop.permute.xlu0 %4169 }
 0x672   : > { %5067 = vst.msk [vmem:[%s8145_s30 + $0x48] sm:$0xff] %vm255_vm13, %v5026_v10  ;;  %v4555_v52 = vsel %vm4524_vm5, %v4513_v18, %v4170_v39  ;;  %v4430_v57 = vsel %vm4398_vm1, %v4388_v45, %v3718_v19  ;;  %v2736_v10 = vld [vmem:[#allocation2 + $0x115] sm:$0xff]  ;;  %v10385_v39 = vld [vmem:[#allocation120_spill] sm:$0xff] }
 0x673   : > { %5586 = vmatmul.mubr.msk.f32.gmra.mrb[58].mxu1 %vm4582_vm6, %v4555_v52  ;;  %3861 = vrot.lane.b32.xlu1 %v2913_v63, %s5752_s20  ;;  %v10384_v18 = vld [vmem:[#allocation6_spill] sm:$0xff] }
 0x674   : > { %3781 = vrot.lane.b32.xlu0 %v5693_v27, %s5752_s20  ;;  %5588 = vmatprep.mubr.msk.f32.mxu1 %vm5744_vm3, %v10055_v61  ;;  %v4265_v19 = vsel %vm255_vm13, %v2736_v10, %v10384_v18  ;;  %v5696_v27 = vld [vmem:[%s9816_s1 + $0x60] sm:$0xff]  ;;  %v5699_v18 = vld [vmem:[%s9816_s1 + $0x78] sm:$0xff] }
 0x675   : > { %v3392_v46 = vpop.permute.xlu1 %3391  ;;  %v3844_v38 = vpop.permute.xlu0 %3843  ;;  %v4307_v52 = vsel %vm4273_vm15, %v4265_v19, %v10385_v39 }
 0x676   : > { %v4472_v60 = vsel %vm4440_vm2, %v4430_v57, %v3844_v38  ;;  %v4347_v47 = vsel %vm2129_vm11, %v4306_v36, %v3392_v46 }
 0x677   : > { %v4822_v3 = vpop.f32.mrb[18].mxu1  ;;  %4025 = vrot.lane.b32.xlu1 %v2954_v51, %s5751_s7 }
 0x678   : > { %v4823_v23 = vadd.f32 %v9250_v25, %v4822_v3  ;;  %v5527_v29 = vpop.f32.mrb[19].mxu1  ;;  %3945 = vrot.lane.b32.xlu0 %v2914_v0, %s5751_s7 }
 0x679   : > { %v3556_v26 = vpop.permute.xlu1 %3555  ;;  %v4008_v9 = vpop.permute.xlu0 %4007 }
 0x67a   : > { %v4986_v40 = vmax.f32 %v4823_v23, 0.0  ;;  %v4514_v44 = vsel %vm4482_vm4, %v4472_v60, %v4008_v9  ;;  %v4389_v62 = vsel %vm4356_vm0, %v4347_v47, %v3556_v26  ;;  %v5697_v9 = vld [vmem:[%s9816_s1 + $0x68] sm:$0xff] }
 0x67b   : > { %4189 = vrot.lane.b32.xlu1 %v2995_v1, %s5753_s8  ;;  %v10386_v60 = vld [vmem:[#allocation44_spill] sm:$0xff] }
 0x67c   : > { %v5027_v12 = vmul.f32 %v5694_v58, %v4986_v40  ;;  %4109 = vrot.lane.b32.xlu0 %v2955_v16, %s5753_s8  ;;  %v2737_v16 = vld [vmem:[#allocation2 + $0x11d] sm:$0xff] }
 0x67d   : > { %v3720_v54 = vpop.permute.xlu1 %3719  ;;  %v4172_v35 = vpop.permute.xlu0 %4171  ;;  %v4266_v58 = vsel %vm255_vm13, %v2737_v16, %v10386_v60 }
 0x67e   : > { %5068 = vst.msk [vmem:[%s8145_s30 + $0x50] sm:$0xff] %vm255_vm13, %v5027_v12  ;;  %v4556_v4 = vsel %vm4524_vm5, %v4514_v44, %v4172_v35  ;;  %v4431_v2 = vsel %vm4398_vm1, %v4389_v62, %v3720_v54  ;;  %v10387_v12 = vld [vmem:[#allocation209_spill] sm:$0xff]  ;;  %v10388_v62 = vld [vmem:[#allocation78_spill] sm:$0xff] }
 0x67f   : > { %v4827_v41 = vpop.f32.mrb[20].mxu1  ;;  %5589 = vmatmul.mubr.msk.f32.gmra.mrb[60].mxu1 %vm4582_vm6, %v4556_v4  ;;  %v4308_v44 = vsel %vm4273_vm15, %v4266_v58, %v10387_v12 }
 0x680   : > { %v4828_v15 = vadd.f32 %v9250_v25, %v4827_v41  ;;  %v5530_v7 = vpop.f32.mrb[21].mxu1  ;;  %5591 = vmatprep.mubr.msk.f32.mxu1 %vm5744_vm3, %v10055_v61 }
 0x681   : > { %v3394_v24 = vpop.permute.xlu1 %3393  ;;  %v3846_v55 = vpop.permute.xlu0 %3845 }
 0x682   : > { %v4987_v50 = vmax.f32 %v4828_v15, 0.0  ;;  %v4473_v21 = vsel %vm4440_vm2, %v4431_v2, %v3846_v55  ;;  %v4348_v46 = vsel %vm2129_vm11, %v4307_v52, %v3394_v24 }
 0x684   : > { %v5028_v20 = vmul.f32 %v5695_v13, %v4987_v50  ;;  %v5698_v13 = vld [vmem:[%s9816_s1 + $0x70] sm:$0xff] }
 0x685   : > { %v3558_v33 = vpop.permute.xlu1 %3557  ;;  %v4010_v17 = vpop.permute.xlu0 %4009 }
 0x686   : > { %5069 = vst.msk [vmem:[%s8145_s30 + $0x58] sm:$0xff] %vm255_vm13, %v5028_v20  ;;  %v4515_v42 = vsel %vm4482_vm4, %v4473_v21, %v4010_v17  ;;  %v4390_v5 = vsel %vm4356_vm0, %v4348_v46, %v3558_v33  ;;  %v2738_v17 = vld [vmem:[#allocation2 + $0x125] sm:$0xff] }
 0x687   : > { %v4267_v2 = vsel %vm255_vm13, %v2738_v17, %v10388_v62 }
 0x689   : > { %v3722_v31 = vpop.permute.xlu1 %3721  ;;  %v4174_v30 = vpop.permute.xlu0 %4173 }
 0x68a   : > { %v4557_v48 = vsel %vm4524_vm5, %v4515_v42, %v4174_v30  ;;  %v4432_v22 = vsel %vm4398_vm1, %v4390_v5, %v3722_v31  ;;  %v10389_v42 = vld [vmem:[#allocation148_spill] sm:$0xff] }
 0x68b   : > { %v4832_v56 = vpop.f32.mrb[22].mxu1  ;;  %5592 = vmatmul.mubr.msk.f32.gmra.mrb[62].mxu1 %vm4582_vm6, %v4557_v48  ;;  %v4309_v31 = vsel %vm4273_vm15, %v4267_v2, %v10389_v42 }
 0x68c   : > { %v4833_v53 = vadd.f32 %v9250_v25, %v4832_v56  ;;  %v5533_v32 = vpop.f32.mrb[23].mxu1  ;;  %5594 = vmatprep.mubr.msk.f32.mxu1 %vm5744_vm3, %v10055_v61 }
 0x68d   : > { %v3396_v28 = vpop.permute.xlu1 %3395  ;;  %v3848_v14 = vpop.permute.xlu0 %3847 }
 0x68e   : > { %v4988_v63 = vmax.f32 %v4833_v53, 0.0  ;;  %v4474_v0 = vsel %vm4440_vm2, %v4432_v22, %v3848_v14  ;;  %v4349_v54 = vsel %vm2129_vm11, %v4308_v44, %v3396_v28  ;;  %v10390_v22 = vld [vmem:[#allocation116_spill] sm:$0xff] }
 0x690   : > { %v5029_v51 = vmul.f32 %v5696_v27, %v4988_v63 }
 0x691   : > { %v3560_v38 = vpop.permute.xlu1 %3559  ;;  %v4012_v37 = vpop.permute.xlu0 %4011 }
 0x692   : > { %5070 = vst.msk [vmem:[%s8145_s30 + $0x60] sm:$0xff] %vm255_vm13, %v5029_v51  ;;  %v4516_v23 = vsel %vm4482_vm4, %v4474_v0, %v4012_v37  ;;  %v4391_v41 = vsel %vm4356_vm0, %v4349_v54, %v3560_v38  ;;  %v2739_v37 = vld [vmem:[#allocation2 + $0x12d] sm:$0xff] }
 0x693   : > { %v4837_v3 = vpop.f32.mrb[24].mxu1 }
 0x694   : > { %v4838_v49 = vadd.f32 %v9250_v25, %v4837_v3  ;;  %v5536_v8 = vpop.f32.mrb[25].mxu1  ;;  %v4268_v3 = vsel %vm255_vm13, %v2739_v37, %v10390_v22 }
 0x695   : > { %v3724_v29 = vpop.permute.xlu1 %3723  ;;  %v4176_v1 = vpop.permute.xlu0 %4175  ;;  %v10391_v8 = vld [vmem:[#allocation13_spill] sm:$0xff] }
 0x696   : > { %v4989_v34 = vmax.f32 %v4838_v49, 0.0  ;;  %v4558_v26 = vsel %vm4524_vm5, %v4516_v23, %v4176_v1  ;;  %v4433_v15 = vsel %vm4398_vm1, %v4391_v41, %v3724_v29  ;;  %v4310_v23 = vsel %vm4273_vm15, %v4268_v3, %v10391_v8 }
 0x697   : > { %5595 = vmatmul.mubr.msk.f32.gmra.mrb[64].mxu1 %vm4582_vm6, %v4558_v26 }
 0x698   : > { %v5030_v45 = vmul.f32 %v5697_v9, %v4989_v34  ;;  %5597 = vmatprep.mubr.msk.f32.mxu1 %vm5744_vm3, %v10055_v61 }
 0x699   : > { %v3398_v40 = vpop.permute.xlu1 %3397  ;;  %v3850_v57 = vpop.permute.xlu0 %3849 }
 0x69a   : > { %5071 = vst.msk [vmem:[%s8145_s30 + $0x68] sm:$0xff] %vm255_vm13, %v5030_v45  ;;  %v4475_v24 = vsel %vm4440_vm2, %v4433_v15, %v3850_v57  ;;  %v4350_v56 = vsel %vm2129_vm11, %v4309_v31, %v3398_v40  ;;  %v5700_v40 = vld [vmem:[%s9816_s1 + $0x80] sm:$0xff] }
 0x69d   : > { %v3562_v35 = vpop.permute.xlu1 %3561  ;;  %v4014_v4 = vpop.permute.xlu0 %4013 }
 0x69e   : > { %v4517_v50 = vsel %vm4482_vm4, %v4475_v24, %v4014_v4  ;;  %v4392_v28 = vsel %vm4356_vm0, %v4350_v56, %v3562_v35  ;;  %v2740_v24 = vld [vmem:[#allocation2 + $0x135] sm:$0xff] }
 0x69f   : > { %v4842_v7 = vpop.f32.mrb[26].mxu1 }
 0x6a0   : > { %v4843_v55 = vadd.f32 %v9250_v25, %v4842_v7  ;;  %v5539_v11 = vpop.f32.mrb[27].mxu1 }
 0x6a1   : > { %v3726_v6 = vpop.permute.xlu1 %3725  ;;  %v4178_v43 = vpop.permute.xlu0 %4177 }
 0x6a2   : > { %v4990_v59 = vmax.f32 %v4843_v55, 0.0  ;;  %v4559_v36 = vsel %vm4524_vm5, %v4517_v50, %v4178_v43  ;;  %v4434_v10 = vsel %vm4398_vm1, %v4392_v28, %v3726_v6  ;;  %v10392_v55 = vld [vmem:[#allocation9_spill] sm:$0xff]  ;;  %v5701_v50 = vld [vmem:[%s9816_s1 + $0x88] sm:$0xff]  ;;  %v2741_v28 = vld [vmem:[#allocation2 + $0x13d] sm:$0xff] }
 0x6a3   : > { %5598 = vmatmul.mubr.msk.f32.gmra.mrb[66].mxu1 %vm4582_vm6, %v4559_v36  ;;  %v4269_v11 = vsel %vm255_vm13, %v2740_v24, %v10392_v55  ;;  %v10393_v43 = vld [vmem:[#allocation180_spill] sm:$0xff] }
 0x6a4   : > { %v5031_v20 = vmul.f32 %v5698_v13, %v4990_v59  ;;  %5600 = vmatprep.mubr.msk.f32.mxu1 %vm5744_vm3, %v10055_v61  ;;  %v4311_v59 = vsel %vm4273_vm15, %v4269_v11, %v10393_v43  ;;  %v5704_v43 = vld [vmem:[%s9816_s1 + $0xa0] sm:$0xff] }
 0x6a5   : > { %v3400_v47 = vpop.permute.xlu1 %3399  ;;  %v3852_v33 = vpop.permute.xlu0 %3851 }
 0x6a6   : > { %5072 = vst.msk [vmem:[%s8145_s30 + $0x70] sm:$0xff] %vm255_vm13, %v5031_v20  ;;  %v4476_v63 = vsel %vm4440_vm2, %v4434_v10, %v3852_v33  ;;  %v4351_v1 = vsel %vm2129_vm11, %v4310_v23, %v3400_v47 }
 0x6a7   : > { %v4847_v21 = vpop.f32.mrb[28].mxu1 }
 0x6a8   : > { %v4848_v30 = vadd.f32 %v9250_v25, %v4847_v21  ;;  %v5542_v48 = vpop.f32.mrb[29].mxu1 }
 0x6a9   : > { %v3564_v53 = vpop.permute.xlu1 %3563  ;;  %v4016_v32 = vpop.permute.xlu0 %4015 }
 0x6aa   : > { %v4991_v14 = vmax.f32 %v4848_v30, 0.0  ;;  %v4518_v39 = vsel %vm4482_vm4, %v4476_v63, %v4016_v32  ;;  %v4393_v9 = vsel %vm4356_vm0, %v4351_v1, %v3564_v53  ;;  %v5702_v63 = vld [vmem:[%s9816_s1 + $0x90] sm:$0xff]  ;;  %v5703_v1 = vld [vmem:[%s9816_s1 + $0x98] sm:$0xff] }
 0x6ac   : > { %v5032_v19 = vmul.f32 %v5699_v18, %v4991_v14  ;;  %v10394_v14 = vld [vmem:[#allocation43_spill] sm:$0xff] }
 0x6ad   : > { %v3728_v52 = vpop.permute.xlu1 %3727  ;;  %v4180_v27 = vpop.permute.xlu0 %4179  ;;  %v4270_v10 = vsel %vm255_vm13, %v2741_v28, %v10394_v14  ;;  %v10401_v28 = vld [vmem:[#allocation115_spill] sm:$0xff] }
 0x6ae   : > { %5073 = vst.msk [vmem:[%s8145_s30 + $0x78] sm:$0xff] %vm255_vm13, %v5032_v19  ;;  %v4560_v51 = vsel %vm4524_vm5, %v4518_v39, %v4180_v27  ;;  %v4435_v45 = vsel %vm4398_vm1, %v4393_v9, %v3728_v52  ;;  %v10395_v19 = vld [vmem:[#allocation47_spill] sm:$0xff] }
 0x6af   : > { %5601 = vmatmul.mubr.msk.f32.gmra.mrb[68].mxu1 %vm4582_vm6, %v4560_v51  ;;  %v4312_v39 = vsel %vm4273_vm15, %v4270_v10, %v10395_v19  ;;  %v2742_v9 = vld [vmem:[#allocation2 + $0x145] sm:$0xff] }
 0x6b0   : > { %5603 = vmatprep.mubr.msk.f32.mxu1 %vm5744_vm3, %v10055_v61 }
 0x6b1   : > { %v3402_v46 = vpop.permute.xlu1 %3401  ;;  %v3854_v38 = vpop.permute.xlu0 %3853 }
 0x6b2   : > { %v4477_v16 = vsel %vm4440_vm2, %v4435_v45, %v3854_v38  ;;  %v4352_v13 = vsel %vm2129_vm11, %v4311_v59, %v3402_v46 }
 0x6b3   : > { %v4852_v5 = vpop.f32.mrb[30].mxu1 }
 0x6b4   : > { %v4853_v0 = vadd.f32 %v9250_v25, %v4852_v5  ;;  %v5545_v49 = vpop.f32.mrb[31].mxu1 }
 0x6b5   : > { %v3566_v29 = vpop.permute.xlu1 %3565 }
 0x6b6   : > { %v4992_v34 = vmax.f32 %v4853_v0, 0.0  ;;  %v4018_v26 = vpop.permute.xlu0 %4017  ;;  %v4394_v47 = vsel %vm4356_vm0, %v4352_v13, %v3566_v29 }
 0x6b7   : > { %v4519_v58 = vsel %vm4482_vm4, %v4477_v16, %v4018_v26  ;;  %v10397_v16 = vld [vmem:[#allocation208_spill] sm:$0xff] }
 0x6b8   : > { %v5033_v57 = vmul.f32 %v5700_v40, %v4992_v34  ;;  %v10396_v40 = vld [vmem:[#allocation81_spill] sm:$0xff] }
 0x6b9   : > { %v3730_v60 = vpop.permute.xlu1 %3729 }
 0x6ba   : > { %5074 = vst.msk [vmem:[%s8145_s30 + $0x80] sm:$0xff] %vm255_vm13, %v5033_v57  ;;  %v4182_v12 = vpop.permute.xlu0 %4181  ;;  %v4436_v33 = vsel %vm4398_vm1, %v4394_v47, %v3730_v60  ;;  %v4271_v57 = vsel %vm255_vm13, %v2742_v9, %v10396_v40  ;;  %v5707_v9 = vld [vmem:[%s9816_s1 + $0xb0] sm:$0xff] }
 0x6bb   : > { %v4561_v44 = vsel %vm4524_vm5, %v4519_v58, %v4182_v12  ;;  %v4857_v54 = vpop.f32.mrb[32].mxu1  ;;  %v4313_v60 = vsel %vm4273_vm15, %v4271_v57, %v10397_v16 }
 0x6bc   : > { %v4858_v35 = vadd.f32 %v9250_v25, %v4857_v54  ;;  %v5548_v4 = vpop.f32.mrb[33].mxu1  ;;  %5604 = vmatmul.mubr.msk.f32.gmra.mrb[70].mxu1 %vm4582_vm6, %v4561_v44 }
 0x6bd   : > { %v3404_v41 = vpop.permute.xlu1 %3403  ;;  %5606 = vmatprep.mubr.msk.f32.mxu1 %vm5744_vm3, %v10055_v61 }
 0x6be   : > { %v4993_v15 = vmax.f32 %v4858_v35, 0.0  ;;  %v3856_v7 = vpop.permute.xlu0 %3855  ;;  %v4353_v27 = vsel %vm2129_vm11, %v4312_v39, %v3404_v41 }
 0x6bf   : > { %v4478_v17 = vsel %vm4440_vm2, %v4436_v33, %v3856_v7 }
 0x6c0   : > { %v5034_v6 = vmul.f32 %v5701_v50, %v4993_v15 }
 0x6c1   : > { %v3568_v36 = vpop.permute.xlu1 %3567 }
 0x6c2   : > { %5075 = vst.msk [vmem:[%s8145_s30 + $0x88] sm:$0xff] %vm255_vm13, %v5034_v6  ;;  %v4020_v20 = vpop.permute.xlu0 %4019  ;;  %v4395_v46 = vsel %vm4356_vm0, %v4353_v27, %v3568_v36 }
 0x6c3   : > { %v4520_v2 = vsel %vm4482_vm4, %v4478_v17, %v4020_v20  ;;  %v2703_v17 = vld [vmem:[#allocation2 + $0xd] sm:$0xff] }
 0x6c5   : > { %v3732_v62 = vpop.permute.xlu1 %3731 }
 0x6c6   : > { %v4184_v21 = vpop.permute.xlu0 %4183  ;;  %v4437_v37 = vsel %vm4398_vm1, %v4395_v46, %v3732_v62 }
 0x6c7   : > { %v4562_v42 = vsel %vm4524_vm5, %v4520_v2, %v4184_v21  ;;  %v4862_v31 = vpop.f32.mrb[34].mxu1  ;;  %v2743_v2 = vld [vmem:[#allocation2 + $0x14d] sm:$0xf] }
 0x6c8   : > { %v4863_v30 = vadd.f32 %v9250_v25, %v4862_v31  ;;  %v5551_v48 = vpop.f32.mrb[35].mxu1  ;;  %5607 = vmatmul.mubr.msk.f32.gmra.mrb[72].mxu1 %vm4582_vm6, %v4562_v42  ;;  %v10398_v31 = vld [vmem:[#allocation8_spill] sm:$0xff] }
 0x6c9   : > { %v3406_v56 = vpop.permute.xlu1 %3405  ;;  %5609 = vmatprep.mubr.msk.f32.mxu1 %vm5744_vm3, %v10055_v61  ;;  %v10399_v48 = vld [vmem:[#allocation3_spill] sm:$0xff] }
 0x6ca   : > { %v4994_v53 = vmax.f32 %v4863_v30, 0.0  ;;  %v3858_v32 = vpop.permute.xlu0 %3857  ;;  %v4354_v58 = vsel %vm2129_vm11, %v4313_v60, %v3406_v56  ;;  %v4272_v30 = vsel %vm255_vm13, %v2743_v2, %v10398_v31  ;;  %v10400_v56 = vld [vmem:[#allocation85_spill] sm:$0xff] }
 0x6cb   : > { %v4479_v3 = vsel %vm4440_vm2, %v4437_v37, %v3858_v32 }
 0x6cc   : > { %v5035_v18 = vmul.f32 %v5702_v63, %v4994_v53  ;;  %v4314_v53 = vsel %vm4273_vm15, %v4272_v30, %v10400_v56  ;;  %v5713_v56 = vld [vmem:[%s9816_s1 + $0xe0] sm:$0xff] }
 0x6cd   : > { %v3570_v52 = vpop.permute.xlu1 %3569 }
 0x6ce   : > { %5076 = vst.msk [vmem:[%s8145_s30 + $0x90] sm:$0xff] %vm255_vm13, %v5035_v18  ;;  %v4022_v51 = vpop.permute.xlu0 %4021  ;;  %v4396_v44 = vsel %vm4356_vm0, %v4354_v58, %v3570_v52  ;;  %v10402_v18 = vld [vmem:[#allocation119_spill] sm:$0xff]  ;;  %v5708_v58 = vld [vmem:[%s9816_s1 + $0xb8] sm:$0xff] }
 0x6cf   : > { %v4867_v38 = vpop.f32.mrb[36].mxu1  ;;  %v4521_v49 = vsel %vm4482_vm4, %v4479_v3, %v4022_v51 }
 0x6d0   : > { %v4868_v5 = vadd.f32 %v9250_v25, %v4867_v38  ;;  %v5554_v22 = vpop.f32.mrb[37].mxu1 }
 0x6d1   : > { %v3734_v0 = vpop.permute.xlu1 %3733 }
 0x6d2   : > { %v4995_v8 = vmax.f32 %v4868_v5, 0.0  ;;  %v4186_v23 = vpop.permute.xlu0 %4185  ;;  %v4438_v35 = vsel %vm4398_vm1, %v4396_v44, %v3734_v0 }
 0x6d3   : > { %v4563_v29 = vsel %vm4524_vm5, %v4521_v49, %v4186_v23 }
 0x6d4   : > { %v5036_v34 = vmul.f32 %v5703_v1, %v4995_v8  ;;  %5610 = vmatmul.mubr.msk.f32.gmra.mrb[74].mxu1 %vm4582_vm6, %v4563_v29  ;;  %v9689_v29 = vld [vmem:[%s9820_s5] ss:$0 sm:$0xff] }
 0x6d5   : > { %v3408_v26 = vpop.permute.xlu1 %3407  ;;  %5612 = vmatprep.mubr.msk.f32.mxu1 %vm5744_vm3, %v10055_v61 }
 0x6d6   : > { %5077 = vst.msk [vmem:[%s8145_s30 + $0x98] sm:$0xff] %vm255_vm13, %v5036_v34  ;;  %v3860_v45 = vpop.permute.xlu0 %3859  ;;  %v4355_v10 = vsel %vm2129_vm11, %v4314_v53, %v3408_v26 }
 0x6d7   : > { %v4480_v41 = vsel %vm4440_vm2, %v4438_v35, %v3860_v45 }
 0x6d9   : > { %v3492_v12 = vpop.permute.xlu1 %3491 }
 0x6da   : > { %v4024_v54 = vpop.permute.xlu0 %4023 }
 0x6db   : > { %v4872_v4 = vpop.f32.mrb[38].mxu1  ;;  %v4522_v24 = vsel %vm4482_vm4, %v4480_v41, %v4024_v54  ;;  %v5709_v41 = vld [vmem:[%s9816_s1 + $0xc0] sm:$0xff] }
 0x6dc   : > { %v4873_v15 = vadd.f32 %v9250_v25, %v4872_v4  ;;  %v5557_v7 = vpop.f32.mrb[39].mxu1 }
 0x6dd   : > { %v4188_v55 = vpop.permute.xlu1 %4187 }
 0x6de   : > { %v4996_v11 = vmax.f32 %v4873_v15, 0.0  ;;  %v3572_v50 = vpop.permute.xlu0 %3571  ;;  %v4564_v6 = vsel %vm4524_vm5, %v4522_v24, %v4188_v55 }
 0x6df   : > { %5613 = vmatmul.mubr.msk.f32.gmra.mrb[76].mxu1 %vm4582_vm6, %v4564_v6  ;;  %v4397_v39 = vsel %vm4356_vm0, %v4355_v10, %v3572_v50  ;;  %v5710_v50 = vld [vmem:[%s9816_s1 + $0xc8] sm:$0xff] }
 0x6e0   : > { %v5037_v59 = vmul.f32 %v5704_v43, %v4996_v11  ;;  %5615 = vmatprep.mubr.msk.f32.mxu1 %vm5744_vm3, %v10055_v61  ;;  %v4232_v61 = vsel %vm255_vm13, %v2703_v17, %v10399_v48  ;;  %v5714_v10 = vld [vmem:[%s9816_s1 + $0xe8] sm:$0xff] }
 0x6e1   : > { %v3736_v36 = vpop.permute.xlu1 %3735  ;;  %v4274_v14 = vsel %vm4273_vm15, %v4232_v61, %v10401_v28 }
 0x6e2   : > { %5078 = vst.msk [vmem:[%s8145_s30 + $0xa0] sm:$0xff] %vm255_vm13, %v5037_v59  ;;  %v3656_v13 = vpop.permute.xlu0 %3655  ;;  %v4315_v19 = vsel %vm2129_vm11, %v4274_v14, %v10402_v18  ;;  %v4439_v51 = vsel %vm4398_vm1, %v4397_v39, %v3736_v36 }
 0x6e3   : > { %v4877_v20 = vpop.f32.mrb[40].mxu1  ;;  %v4357_v27 = vsel %vm4356_vm0, %v4315_v19, %v3492_v12 }
 0x6e4   : > { %v4878_v47 = vadd.f32 %v9250_v25, %v4877_v20  ;;  %v5560_v33 = vpop.f32.mrb[41].mxu1  ;;  %v5705_v25 = vld [vmem:[%s9816_s1 + $0xa8] sm:$0xff]  ;;  %v4399_v46 = vsel %vm4398_vm1, %v4357_v27, %v3656_v13  ;;  %v5711_v20 = vld [vmem:[%s9816_s1 + $0xd0] sm:$0xff] }
 0x6e5   : > { %v3862_v62 = vpop.permute.xlu1 %3861  ;;  %v5715_v27 = vld [vmem:[%s9816_s1 + $0xf0] sm:$0xff] }
 0x6e6   : > { %v4997_v21 = vmax.f32 %v4878_v47, 0.0  ;;  %v3782_v42 = vpop.permute.xlu0 %3781  ;;  %v4481_v38 = vsel %vm4440_vm2, %v4439_v51, %v3862_v62 }
 0x6e7   : > { %v4441_v37 = vsel %vm4440_vm2, %v4399_v46, %v3782_v42 }
 0x6e8   : > { %v5038_v32 = vmul.f32 %v5705_v25, %v4997_v21  ;;  %v5712_v21 = vld [vmem:[%s9816_s1 + $0xd8] sm:$0xff] }
 0x6e9   : > { %v4026_v63 = vpop.permute.xlu1 %4025 }
 0x6ea   : > { %5079 = vst.msk [vmem:[%s8145_s30 + $0xa8] sm:$0xff] %vm255_vm13, %v5038_v32  ;;  %v3946_v52 = vpop.permute.xlu0 %3945  ;;  %v4523_v5 = vsel %vm4482_vm4, %v4481_v38, %v4026_v63 }
 0x6eb   : > { %v4483_v3 = vsel %vm4482_vm4, %v4441_v37, %v3946_v52 }
 0x6ed   : > { %v4190_v22 = vpop.permute.xlu1 %4189 }
 0x6ee   : > { %v4110_v0 = vpop.permute.xlu0 %4109  ;;  %v4565_v49 = vsel %vm4524_vm5, %v4523_v5, %v4190_v22  ;;  %v5716_v22 = vld [vmem:[%s9816_s1 + $0xf8] sm:$0xff] }
 0x6ef   : > { %v4525_v8 = vsel %vm4524_vm5, %v4483_v3, %v4110_v0  ;;  %v4882_v23 = vpop.f32.mrb[42].mxu1  ;;  %5616 = vmatmul.mubr.msk.f32.gmra.mrb[78].mxu1 %vm4582_vm6, %v4565_v49 }
 0x6f0   : > { %v4883_v1 = vadd.f32 %v9689_v29, %v4882_v23  ;;  %5496 = vmatmul.mubr.msk.f32.vlgmr.msra.gmra.mrb[82].mxu0 %vm4582_vm6, %v4525_v8  ;;  %v5563_v34 = vpop.f32.mrb[43].mxu1 }
 0x6f2   : > { %v4998_v26 = vmax.f32 %v4883_v1, 0.0  ;;  %v5717_v1 = vld [vmem:[%s9816_s1 + $0x100] sm:$0xff] }
 0x6f4   : > { %v5039_v45 = vmul.f32 %v5707_v9, %v4998_v26 }
 0x6f6   : > { %5080 = vst.msk [vmem:[%s8145_s30 + $0xb0] sm:$0xff] %vm255_vm13, %v5039_v45 }
 0x6f7   : > { %v4887_v40 = vpop.f32.mrb[44].mxu1 }
 0x6f8   : > { %v4888_v57 = vadd.f32 %v9689_v29, %v4887_v40  ;;  %v5566_v16 = vpop.f32.mrb[45].mxu1 }
 0x6fa   : > { %v4999_v60 = vmax.f32 %v4888_v57, 0.0  ;;  %v5718_v57 = vld [vmem:[%s9816_s1 + $0x108] sm:$0xff] }
 0x6fc   : > { %v5040_v12 = vmul.f32 %v5708_v58, %v4999_v60 }
 0x6fe   : > { %5081 = vst.msk [vmem:[%s8145_s30 + $0xb8] sm:$0xff] %vm255_vm13, %v5040_v12 }
 0x703   : > { %v4892_v44 = vpop.f32.mrb[46].mxu1 }
 0x704   : > { %v4893_v54 = vadd.f32 %v9689_v29, %v4892_v44  ;;  %v5569_v35 = vpop.f32.mrb[47].mxu1 }
 0x706   : > { %v5000_v4 = vmax.f32 %v4893_v54, 0.0  ;;  %v5719_v54 = vld [vmem:[%s9816_s1 + $0x110] sm:$0xff] }
 0x708   : > { %v5041_v15 = vmul.f32 %v5709_v41, %v5000_v4 }
 0x70a   : > { %5082 = vst.msk [vmem:[%s8145_s30 + $0xc0] sm:$0xff] %vm255_vm13, %v5041_v15 }
 0x70b   : > { %v4897_v7 = vpop.f32.mrb[48].mxu1 }
 0x70c   : > { %v4898_v24 = vadd.f32 %v9689_v29, %v4897_v7  ;;  %v5572_v55 = vpop.f32.mrb[49].mxu1 }
 0x70e   : > { %v5001_v11 = vmax.f32 %v4898_v24, 0.0  ;;  %v5720_v24 = vld [vmem:[%s9816_s1 + $0x118] sm:$0xff] }
 0x710   : > { %v5042_v6 = vmul.f32 %v5710_v50, %v5001_v11 }
 0x712   : > { %5083 = vst.msk [vmem:[%s8145_s30 + $0xc8] sm:$0xff] %vm255_vm13, %v5042_v6 }
 0x716   : > { %v4902_v43 = vpop.f32.mrb[50].mxu1 }
 0x717   : > { %v4903_v59 = vadd.f32 %v9689_v29, %v4902_v43  ;;  %v5575_v36 = vpop.f32.mrb[51].mxu1 }
 0x719   : > { %v5002_v13 = vmax.f32 %v4903_v59, 0.0  ;;  %v5721_v59 = vld [vmem:[%s9816_s1 + $0x120] sm:$0xff] }
 0x71b   : > { %v5043_v47 = vmul.f32 %v5711_v20, %v5002_v13 }
 0x71d   : > { %5084 = vst.msk [vmem:[%s8145_s30 + $0xd0] sm:$0xff] %vm255_vm13, %v5043_v47 }
 0x722   : > { %v4907_v33 = vpop.f32.mrb[52].mxu1 }
 0x723   : > { %v4908_v17 = vadd.f32 %v9689_v29, %v4907_v33  ;;  %v5578_v62 = vpop.f32.mrb[53].mxu1 }
 0x725   : > { %v5003_v2 = vmax.f32 %v4908_v17, 0.0  ;;  %v5722_v17 = vld [vmem:[%s9816_s1 + $0x128] sm:$0xff] }
 0x727   : > { %v5044_v42 = vmul.f32 %v5712_v21, %v5003_v2 }
 0x729   : > { %5085 = vst.msk [vmem:[%s8145_s30 + $0xd8] sm:$0xff] %vm255_vm13, %v5044_v42 }
 0x72e   : > { %v4912_v31 = vpop.f32.mrb[54].mxu1 }
 0x72f   : > { %v4913_v30 = vadd.f32 %v9689_v29, %v4912_v31  ;;  %v5581_v48 = vpop.f32.mrb[55].mxu1 }
 0x731   : > { %v5004_v61 = vmax.f32 %v4913_v30, 0.0  ;;  %v5723_v30 = vld [vmem:[%s9816_s1 + $0x130] sm:$0xff] }
 0x733   : > { %v5045_v53 = vmul.f32 %v5713_v56, %v5004_v61 }
 0x735   : > { %5086 = vst.msk [vmem:[%s8145_s30 + $0xe0] sm:$0xff] %vm255_vm13, %v5045_v53 }
 0x73a   : > { %v4917_v25 = vpop.f32.mrb[56].mxu1 }
 0x73b   : > { %v4918_v32 = vadd.f32 %v9689_v29, %v4917_v25  ;;  %v5584_v28 = vpop.f32.mrb[57].mxu1 }
 0x73d   : > { %v5005_v14 = vmax.f32 %v4918_v32, 0.0  ;;  %v5724_v32 = vld [vmem:[%s9816_s1 + $0x138] sm:$0xff] }
 0x73f   : > { %v5046_v63 = vmul.f32 %v5714_v10, %v5005_v14 }
 0x741   : > { %5087 = vst.msk [vmem:[%s8145_s30 + $0xe8] sm:$0xff] %vm255_vm13, %v5046_v63 }
 0x746   : > { %v4922_v18 = vpop.f32.mrb[58].mxu1 }
 0x747   : > { %v4923_v19 = vadd.f32 %v9689_v29, %v4922_v18  ;;  %v5587_v39 = vpop.f32.mrb[59].mxu1 }
 0x749   : > { %v5006_v52 = vmax.f32 %v4923_v19, 0.0 }
 0x74b   : > { %v5047_v51 = vmul.f32 %v5715_v27, %v5006_v52 }
 0x74d   : > { %5088 = vst.msk [vmem:[%s8145_s30 + $0xf0] sm:$0xff] %vm255_vm13, %v5047_v51  ;;  %v5725_v51 = vld [vmem:[%s9816_s1 + $0x140] sm:$0xf] }
 0x752   : > { %v4927_v46 = vpop.f32.mrb[60].mxu1 }
 0x753   : > { %v4928_v38 = vadd.f32 %v9689_v29, %v4927_v46  ;;  %v5590_v37 = vpop.f32.mrb[61].mxu1 }
 0x755   : > { %v5007_v5 = vmax.f32 %v4928_v38, 0.0  ;;  %v5726_v38 = vld [vmem:[%s9816_s1] sm:$0xff] }
 0x757   : > { %v5048_v3 = vmul.f32 %v5716_v22, %v5007_v5 }
 0x759   : > { %5089 = vst.msk [vmem:[%s8145_s30 + $0xf8] sm:$0xff] %vm255_vm13, %v5048_v3 }
 0x75e   : > { %v4932_v0 = vpop.f32.mrb[62].mxu1 }
 0x75f   : > { %v4933_v49 = vadd.f32 %v9689_v29, %v4932_v0  ;;  %v5593_v8 = vpop.f32.mrb[63].mxu1 }
 0x761   : > { %v5008_v23 = vmax.f32 %v4933_v49, 0.0 }
 0x763   : > { %v5049_v34 = vmul.f32 %v5717_v1, %v5008_v23 }
 0x765   : > { %5090 = vst.msk [vmem:[%s8145_s30 + $0x100] sm:$0xff] %vm255_vm13, %v5049_v34 }
 0x76a   : > { %v4937_v26 = vpop.f32.mrb[64].mxu1 }
 0x76b   : > { %v4938_v9 = vadd.f32 %v9689_v29, %v4937_v26  ;;  %v5596_v45 = vpop.f32.mrb[65].mxu1 }
 0x76d   : > { %v5009_v40 = vmax.f32 %v4938_v9, 0.0 }
 0x76f   : > { %v5050_v16 = vmul.f32 %v5718_v57, %v5009_v40 }
 0x771   : > { %5091 = vst.msk [vmem:[%s8145_s30 + $0x108] sm:$0xff] %vm255_vm13, %v5050_v16 }
 0x776   : > { %v4942_v60 = vpop.f32.mrb[66].mxu1 }
 0x777   : > { %v4943_v58 = vadd.f32 %v9689_v29, %v4942_v60  ;;  %v5599_v12 = vpop.f32.mrb[67].mxu1 }
 0x779   : > { %v5010_v44 = vmax.f32 %v4943_v58, 0.0 }
 0x77b   : > { %v5051_v35 = vmul.f32 %v5719_v54, %v5010_v44 }
 0x77d   : > { %5092 = vst.msk [vmem:[%s8145_s30 + $0x110] sm:$0xff] %vm255_vm13, %v5051_v35 }
 0x782   : > { %v4947_v4 = vpop.f32.mrb[68].mxu1 }
 0x783   : > { %v4948_v41 = vadd.f32 %v9689_v29, %v4947_v4  ;;  %v5602_v15 = vpop.f32.mrb[69].mxu1 }
 0x785   : > { %v5011_v7 = vmax.f32 %v4948_v41, 0.0 }
 0x787   : > { %v5052_v55 = vmul.f32 %v5720_v24, %v5011_v7 }
 0x789   : > { %5093 = vst.msk [vmem:[%s8145_s30 + $0x118] sm:$0xff] %vm255_vm13, %v5052_v55 }
 0x78f   : > { %v4952_v11 = vpop.f32.mrb[70].mxu1 }
 0x790   : > { %v4953_v50 = vadd.f32 %v9689_v29, %v4952_v11  ;;  %v5605_v6 = vpop.f32.mrb[71].mxu1 }
 0x792   : > { %v5012_v43 = vmax.f32 %v4953_v50, 0.0 }
 0x794   : > { %v5053_v36 = vmul.f32 %v5721_v59, %v5012_v43 }
 0x796   : > { %5094 = vst.msk [vmem:[%s8145_s30 + $0x120] sm:$0xff] %vm255_vm13, %v5053_v36 }
 0x79b   : > { %v4957_v13 = vpop.f32.mrb[72].mxu1 }
 0x79c   : > { %v4958_v20 = vadd.f32 %v9689_v29, %v4957_v13  ;;  %v5608_v47 = vpop.f32.mrb[73].mxu1 }
 0x79e   : > { %v5013_v33 = vmax.f32 %v4958_v20, 0.0 }
 0x7a0   : > { %v5054_v62 = vmul.f32 %v5722_v17, %v5013_v33 }
 0x7a2   : > { %5095 = vst.msk [vmem:[%s8145_s30 + $0x128] sm:$0xff] %vm255_vm13, %v5054_v62 }
 0x7a7   : > { %v4962_v2 = vpop.f32.mrb[74].mxu1 }
 0x7a8   : > { %v4963_v21 = vadd.f32 %v9689_v29, %v4962_v2  ;;  %v5611_v42 = vpop.f32.mrb[75].mxu1 }
 0x7aa   : > { %v5014_v31 = vmax.f32 %v4963_v21, 0.0 }
 0x7ac   : > { %v5055_v48 = vmul.f32 %v5723_v30, %v5014_v31 }
 0x7ae   : > { %5096 = vst.msk [vmem:[%s8145_s30 + $0x130] sm:$0xff] %vm255_vm13, %v5055_v48 }
 0x7b2   : > { %v4967_v61 = vpop.f32.mrb[76].mxu1 }
 0x7b3   : > { %v4968_v56 = vadd.f32 %v9689_v29, %v4967_v61  ;;  %v5614_v53 = vpop.f32.mrb[77].mxu1 }
 0x7b5   : > { %v5015_v25 = vmax.f32 %v4968_v56, 0.0 }
 0x7b7   : > { %v5056_v28 = vmul.f32 %v5724_v32, %v5015_v25 }
 0x7b9   : > { %5097 = vst.msk [vmem:[%s8145_s30 + $0x138] sm:$0xff] %vm255_vm13, %v5056_v28 }
 0x7c2   : > { %v4972_v14 = vpop.f32.mrb[78].mxu1 }
 0x7c3   : > { %v4772_v10 = vpop.f32.mrb[82].mxu0  ;;  %v4973_v63 = vadd.f32 %v9689_v29, %v4972_v14  ;;  %v5617_v18 = vpop.f32.mrb[79].mxu1 }
 0x7c4   : > { %v4773_v19 = vadd.f32 %v9689_v29, %v4772_v10  ;;  %v5497_v39 = vpop.f32.mrb[83].mxu0 }
 0x7c5   : > { %v5016_v52 = vmax.f32 %v4973_v63, 0.0 }
 0x7c6   : > { %v4976_v27 = vmax.f32 %v4773_v19, 0.0 }
 0x7c7   : > { %v5057_v46 = vmul.f32 %v5725_v51, %v5016_v52 }
 0x7c8   : > { %v5017_v37 = vmul.f32 %v5726_v38, %v4976_v27 }
 0x7c9   : > { %5098 = vst.msk [vmem:[%s8145_s30 + $0x140] sm:$0xf] %vm263_vm14, %v5057_v46 }
 0x7ca   : > { %5058 = vst.msk [vmem:[%s8145_s30] sm:$0xff] %vm255_vm13, %v5017_v37 }
 0x7cb PF: > { %s16_s21 = sadd.s32 1, %s5733_s21  }
 0x7cc   : > { %p13_p5 = scmp.ge.s32.totalorder %s16_s21, 4  }
 0x7ce   :  { %15 = sbr.rel (!%p13_p5) target bundleno = 1 (0x1), region = 74 }

</bundles_post_ra>
